<compile_context>
chip_gen: v7x
topology: tpu7x:2x2x1
jax: 0.10.0
libtpu: 0.0.40
codegen_flags: <defaults>
</compile_context>

<pallas_src>
import functools
import jax
import jax.numpy as jnp
from jax import lax
from jax.experimental import pallas as pl
from jax.experimental.pallas import tpu as pltpu

PAD = 4        # max vertical padding any first-stage primitive needs (dil_conv_5x5: pad=4)
ROW0 = 8       # interior row offset in the sep-conv stage-2 buffer (8-aligned stores)
BN_EPS = 1e-5
NACC = 4       # independent accumulator chains for the depthwise tap loops


def _mixed_op_kernel(N, H, W, C, LW,
                     w_ref,        # SMEM (8,) architecture weights
                     xpad_ref,     # (N, H+2*PAD, LW): interior lanes [0, W*C), zero band after
                     invcnt_ref,   # (N*H, W*C) reciprocal avg-pool counts
                     mbias_ref,    # (9, N*H, W*C) max-pool border bias planes (0 / -inf)
                     g_ref,        # (W*C, W*C) per-channel broadcast matrix for BN stats
                     s3dw1_ref, s3pw1_ref, s3dw2_ref, s3pw2_ref,
                     s5dw1_ref, s5pw1_ref, s5dw2_ref, s5pw2_ref,
                     d3dw_ref, d3pw_ref, d5dw_ref, d5pw_ref,
                     out_ref,      # (N, H, W*C)
                     rpad_ref,     # scratch: ReLU(xpad), same shape as xpad
                     pbuf_ref):    # scratch: (N, 2*ROW0 + H, LW) sep-conv stage-2 buffer
    WC = W * C
    NH = N * H
    inv_nhw = 1.0 / float(N * H * W)

    # Hoisted once: ReLU of the padded input, shared by every ReLU->conv stage.
    rpad_ref[...] = jnp.maximum(xpad_ref[...], 0.0)
    # Zero the sep-conv stage-2 buffer once (lane-dense, unmasked stores): the
    # border rows + the trailing zero lane band provide all the conv padding;
    # only the aligned interior is rewritten below.
    pbuf_ref[...] = jnp.zeros_like(pbuf_ref)

    def row_slab(src_ref, oh):
        # One lane-dense load per kernel row: (N, H, LW) -> (NH, LW).
        return src_ref[:, oh:oh + H, :].reshape(NH, LW)

    def lane_shift(slab, dxl):
        # Horizontal tap shift on the XLU; the trailing zero lane band acts as
        # circular left/right zero padding (|dxl| <= LW - WC by construction).
        if dxl == 0:
            return slab[:, :WC]
        return pltpu.roll(slab, (-dxl) % LW, axis=1)[:, :WC]

    def acc_add(accs, idx, v):
        if len(accs) < NACC:
            accs.append(v)
        else:
            accs[idx % NACC] = accs[idx % NACC] + v

    def reduce_sum(accs):
        tot = accs[0]
        for a in accs[1:]:
            tot = tot + a
        return tot

    def dw_conv(src_ref, wd, k, row0, pad, dil):
        # Depthwise k x k conv, stride 1.  wd: (k*k, WC) per-tap weights tiled over W.
        accs = []
        idx = 0
        for kh in range(k):
            slab = row_slab(src_ref, row0 - pad + kh * dil)      # 1 load per kernel row
            for kw in range(k):
                tap = lane_shift(slab, (kw * dil - pad) * C) * wd[idx:idx + 1, :]
                acc_add(accs, idx, tap)
                idx += 1
        return reduce_sum(accs)

    def pointwise(y, pw_ref):
        # 1x1 conv as a block-diagonal (WC, WC) = 128x128 MXU matmul.
        return jnp.dot(y, pw_ref[...], preferred_element_type=jnp.float32)

    def bn_train(y, w=None):
        # BatchNorm2d(affine=False), train mode, biased variance.  The architecture
        # weight (if given) is folded into the per-channel scale so no separate
        # full-tensor multiply is needed: out = y*scale - mean*scale.
        s1 = jnp.sum(y, axis=0, keepdims=True)
        s2 = jnp.sum(y * y, axis=0, keepdims=True)
        ss = jnp.concatenate([s1, s2], axis=0)                   # (2, WC): one MXU push
        tt = jnp.dot(ss, g_ref[...],
                     preferred_element_type=jnp.float32) * inv_nhw
        mean = tt[0:1, :]
        var = jnp.maximum(tt[1:2, :] - mean * mean, 0.0)
        # TODO(synk): single-pass variance can cancel for ill-conditioned
        #             activations; switch to a centered two-pass reduction if needed.
        scale = lax.rsqrt(var + BN_EPS)
        if w is not None:
            scale = scale * w
        return y * scale - mean * scale

    def sep_conv(k, pad, dw1, pw1_ref, dw2, pw2_ref, w):
        y = dw_conv(rpad_ref, dw1, k, PAD, pad, 1)               # ReLU already hoisted
        y = jnp.maximum(bn_train(pointwise(y, pw1_ref)), 0.0)
        pbuf_ref[:, ROW0:ROW0 + H, 0:WC] = y.reshape(N, H, WC)   # aligned, unmasked store
        y = dw_conv(pbuf_ref, dw2, k, ROW0, pad, 1)
        return bn_train(pointwise(y, pw2_ref), w)

    def dil_conv(k, pad, dwt, pw_ref, w):
        y = dw_conv(rpad_ref, dwt, k, PAD, pad, 2)
        return bn_train(pointwise(y, pw_ref), w)

    # ---- fused 3x3 pools: each of the 9 tap slabs is loaded once and feeds both
    #      the running max (with precomputed -inf border bias) and the running sum.
    center = None
    maxs, sums = [], []
    idx = 0
    for dy in (-1, 0, 1):
        slab = row_slab(xpad_ref, PAD + dy)
        for dx in (-1, 0, 1):
            tap = lane_shift(slab, dx * C)
            if dy == 0 and dx == 0:
                center = tap                                     # reused by skip_connect
                cand = tap
            else:
                cand = tap + mbias_ref[idx]                      # 0 inside, -inf at border
            if len(maxs) < 2:
                maxs.append(cand)
                sums.append(tap)
            else:
                maxs[idx % 2] = jnp.maximum(maxs[idx % 2], cand)
                sums[idx % 2] = sums[idx % 2] + tap
            idx += 1
    mx = jnp.maximum(maxs[0], maxs[1])
    av = (sums[0] + sums[1]) * invcnt_ref[...]                   # count_include_pad=False

    # primitive 0 'none' -> Zero(stride=1): w[0] * zeros == 0, skipped.
    out = bn_train(mx, w_ref[1])                                 # max_pool_3x3 + BN
    out = out + bn_train(av, w_ref[2])                           # avg_pool_3x3 + BN
    out = out + w_ref[3] * center                                # skip_connect (Identity)
    out = out + sep_conv(3, 1, s3dw1_ref[...], s3pw1_ref,
                         s3dw2_ref[...], s3pw2_ref, w_ref[4])
    out = out + sep_conv(5, 2, s5dw1_ref[...], s5pw1_ref,
                         s5dw2_ref[...], s5pw2_ref, w_ref[5])
    out = out + dil_conv(3, 2, d3dw_ref[...], d3pw_ref, w_ref[6])
    out = out + dil_conv(5, 4, d5dw_ref[...], d5pw_ref, w_ref[7])

    out_ref[...] = out.reshape(N, H, WC)


def mixed_op_forward(x_nchw, arch_w, params):
    """x_nchw: (N, C, H, W) like PyTorch; arch_w: (8,); returns (N, C, H, W)."""
    N, C, H, W = x_nchw.shape
    WC = W * C
    # Lane width: interior WC columns + a zero band wide enough for the largest
    # horizontal tap offset (PAD*C), rounded up to a multiple of 128 lanes.
    LW = ((WC + PAD * C + 127) // 128) * 128

    # NCHW -> NHWC -> fold (W, C) into the lane dimension: (N, H, W*C).
    x = jnp.transpose(x_nchw, (0, 2, 3, 1)).astype(jnp.float32)
    xf = x.reshape(N, H, WC)
    # Vertical zero-pad rows; horizontal padding is provided by the trailing
    # zero lane band (pltpu.roll wraps through it inside the kernel).
    xpad = jnp.pad(xf, ((0, 0), (PAD, PAD), (0, LW - WC)))

    # Reciprocal avg-pool counts (count_include_pad=False), tiled to (N*H, W*C).
    ones = jnp.ones((H, W), jnp.float32)
    onep = jnp.pad(ones, ((1, 1), (1, 1)))
    cnt = sum(onep[kh:kh + H, kw:kw + W] for kh in range(3) for kw in range(3))
    inv_cnt = jnp.tile(jnp.repeat(1.0 / cnt, C, axis=1), (N, 1))

    # Max-pool border bias planes: 0 where the (dy,dx) tap is in-bounds, -inf
    # where the -inf-padded maxpool would read padding (center plane is all 0).
    rows = jnp.arange(H)[:, None]
    cols = jnp.arange(W)[None, :]
    planes = []
    for dy in (-1, 0, 1):
        for dx in (-1, 0, 1):
            valid = ((rows + dy >= 0) & (rows + dy < H) &
                     (cols + dx >= 0) & (cols + dx < W))
            bias = jnp.where(valid, 0.0, -jnp.inf).astype(jnp.float32)
            planes.append(jnp.tile(jnp.repeat(bias, C, axis=1), (N, 1)))
    mbias = jnp.stack(planes, axis=0)                            # (9, N*H, WC)

    # Per-channel broadcast matrix for BN stats: G[(w,c),(w',c')] = (c == c').
    g = jnp.kron(jnp.ones((W, W), jnp.float32), jnp.eye(C, dtype=jnp.float32))

    def fold_dw(wd):   # (k,k,C) -> (k*k, W*C) per-tap weights tiled over W
        k = wd.shape[0]
        return jnp.tile(wd.reshape(k * k, C), (1, W))

    def fold_pw(pw):   # (Cin,Cout) -> block-diagonal (W*C, W*C); fills the MXU
        return jnp.kron(jnp.eye(W, dtype=jnp.float32), pw)

    tensors = [
        xpad, inv_cnt, mbias, g,
        fold_dw(params['s3dw1']), fold_pw(params['s3pw1']),
        fold_dw(params['s3dw2']), fold_pw(params['s3pw2']),
        fold_dw(params['s5dw1']), fold_pw(params['s5pw1']),
        fold_dw(params['s5dw2']), fold_pw(params['s5pw2']),
        fold_dw(params['d3dw']), fold_pw(params['d3pw']),
        fold_dw(params['d5dw']), fold_pw(params['d5pw']),
    ]

    vmem = pl.BlockSpec(memory_space=pltpu.MemorySpace.VMEM)
    smem = pl.BlockSpec(memory_space=pltpu.MemorySpace.SMEM)

    out = pl.pallas_call(
        functools.partial(_mixed_op_kernel, N, H, W, C, LW),
        out_shape=jax.ShapeDtypeStruct((N, H, WC), jnp.float32),
        in_specs=[smem] + [vmem] * len(tensors),
        out_specs=vmem,
        scratch_shapes=[
            pltpu.VMEM((N, H + 2 * PAD, LW), jnp.float32),       # ReLU(xpad)
            pltpu.VMEM((N, 2 * ROW0 + H, LW), jnp.float32),      # sep-conv stage-2 buffer
        ],
        compiler_params=pltpu.CompilerParams(vmem_limit_bytes=32 * 1024 * 1024),
    )(arch_w.astype(jnp.float32), *tensors)

    return jnp.transpose(out.reshape(N, H, W, C), (0, 3, 1, 2))   # -> NCHW


def init_params(key, C):
    """Deterministic synthetic parameters (shapes follow the DARTS OPS)."""
    ks = jax.random.split(key, 12)

    def dw(k_, ksz):                       # depthwise Conv2d(C, C, ksz, groups=C) weight
        return jax.random.normal(k_, (ksz, ksz, C), jnp.float32) * 0.2

    def pw(k_):                            # 1x1 Conv2d(C, C) weight, stored as (Cin, Cout)
        return jax.random.normal(k_, (C, C), jnp.float32) * (1.0 / jnp.sqrt(C))

    return {
        's3dw1': dw(ks[0], 3), 's3pw1': pw(ks[1]),
        's3dw2': dw(ks[2], 3), 's3pw2': pw(ks[3]),
        's5dw1': dw(ks[4], 5), 's5pw1': pw(ks[5]),
        's5dw2': dw(ks[6], 5), 's5pw2': pw(ks[7]),
        'd3dw': dw(ks[8], 3), 'd3pw': pw(ks[9]),
        'd5dw': dw(ks[10], 5), 'd5pw': pw(ks[11]),
    }


if __name__ == "__main__":
    key = jax.random.PRNGKey(0)
    kx, kw, kp = jax.random.split(key, 3)

    # W*C = 16*8 = 128 -> the interior is exactly one lane-dense vreg row.
    N, C, H, W = 2, 8, 16, 16
    x = jax.random.normal(kx, (N, C, H, W), jnp.float32)                 # PyTorch-style NCHW
    arch_w = jax.nn.softmax(jax.random.normal(kw, (8,), jnp.float32))    # one weight per primitive
    params = init_params(kp, C)

    out = mixed_op_forward(x, arch_w, params)
    out = jax.block_until_ready(out)
    assert out.shape == (N, C, H, W)
    assert bool(jnp.all(jnp.isfinite(out)))
    print("KERNEL_OK")
</pallas_src>

<mosaic_0001>
module attributes {stable_mosaic.version = 11 : i64} {
  func.func @_mixed_op_kernel(%arg0: memref<8xf32, #tpu.memory_space<smem>>, %arg1: memref<2x24x256xf32, #tpu.memory_space<vmem>>, %arg2: memref<32x128xf32, #tpu.memory_space<vmem>>, %arg3: memref<9x32x128xf32, #tpu.memory_space<vmem>>, %arg4: memref<128x128xf32, #tpu.memory_space<vmem>>, %arg5: memref<9x128xf32, #tpu.memory_space<vmem>>, %arg6: memref<128x128xf32, #tpu.memory_space<vmem>>, %arg7: memref<9x128xf32, #tpu.memory_space<vmem>>, %arg8: memref<128x128xf32, #tpu.memory_space<vmem>>, %arg9: memref<25x128xf32, #tpu.memory_space<vmem>>, %arg10: memref<128x128xf32, #tpu.memory_space<vmem>>, %arg11: memref<25x128xf32, #tpu.memory_space<vmem>>, %arg12: memref<128x128xf32, #tpu.memory_space<vmem>>, %arg13: memref<9x128xf32, #tpu.memory_space<vmem>>, %arg14: memref<128x128xf32, #tpu.memory_space<vmem>>, %arg15: memref<25x128xf32, #tpu.memory_space<vmem>>, %arg16: memref<128x128xf32, #tpu.memory_space<vmem>>, %arg17: memref<2x16x128xf32, #tpu.memory_space<vmem>>, %arg18: memref<2x24x256xf32, #tpu.memory_space<vmem>>, %arg19: memref<2x32x256xf32, #tpu.memory_space<vmem>>) attributes {dimension_semantics = [], scalar_prefetch = 0 : i64, scratch_operands = 2 : i64, tpu.core_type = #tpu.core_type<tc>} {
    %c0 = arith.constant 0 : index
    %c0_0 = arith.constant 0 : index
    %c0_1 = arith.constant 0 : index
    %0 = vector.load %arg1[%c0, %c0_0, %c0_1] : memref<2x24x256xf32, #tpu.memory_space<vmem>>, vector<2x24x256xf32>
    %cst = arith.constant 0.000000e+00 : f32
    %1 = vector.broadcast %cst : f32 to vector<2x24x256xf32>
    %2 = arith.maximumf %0, %1 : vector<2x24x256xf32>
    %c0_2 = arith.constant 0 : index
    %c0_3 = arith.constant 0 : index
    %c0_4 = arith.constant 0 : index
    %3 = vector.load %arg18[%c0_2, %c0_3, %c0_4] : memref<2x24x256xf32, #tpu.memory_space<vmem>>, vector<2x24x256xf32>
    tpu.vector_store %arg18[%c0_2, %c0_3, %c0_4], %2 {strides = array<i32>} : memref<2x24x256xf32, #tpu.memory_space<vmem>>, vector<2x24x256xf32>,
    %cst_5 = arith.constant 0.000000e+00 : f32
    %4 = vector.broadcast %cst_5 : f32 to vector<2x32x256xf32>
    %c0_6 = arith.constant 0 : index
    %c0_7 = arith.constant 0 : index
    %c0_8 = arith.constant 0 : index
    %5 = vector.load %arg19[%c0_6, %c0_7, %c0_8] : memref<2x32x256xf32, #tpu.memory_space<vmem>>, vector<2x32x256xf32>
    tpu.vector_store %arg19[%c0_6, %c0_7, %c0_8], %4 {strides = array<i32>} : memref<2x32x256xf32, #tpu.memory_space<vmem>>, vector<2x32x256xf32>,
    %c0_9 = arith.constant 0 : index
    %c3 = arith.constant 3 : index
    %c0_10 = arith.constant 0 : index
    %6 = vector.load %arg1[%c0_9, %c3, %c0_10] : memref<2x24x256xf32, #tpu.memory_space<vmem>>, vector<2x16x256xf32>
    %7 = vector.shape_cast %6 : vector<2x16x256xf32> to vector<32x256xf32>
    %c8_i32 = arith.constant 8 : i32
    %8 = tpu.dynamic_rotate %7 by %c8_i32 dim 1 : vector<32x256xf32>, i32 -> vector<32x256xf32>
    %9 = vector.extract_strided_slice %8 {offsets = [0, 0], sizes = [32, 128], strides = [1, 1]} : vector<32x256xf32> to vector<32x128xf32>
    %c0_11 = arith.constant 0 : index
    %c0_12 = arith.constant 0 : index
    %c0_13 = arith.constant 0 : index
    %10 = vector.load %arg3[%c0_11, %c0_12, %c0_13] : memref<9x32x128xf32, #tpu.memory_space<vmem>>, vector<1x32x128xf32>
    %11 = vector.shape_cast %10 : vector<1x32x128xf32> to vector<32x128xf32>
    %12 = arith.addf %9, %11 : vector<32x128xf32>
    %13 = vector.extract_strided_slice %7 {offsets = [0, 0], sizes = [32, 128], strides = [1, 1]} : vector<32x256xf32> to vector<32x128xf32>
    %c1 = arith.constant 1 : index
    %c0_14 = arith.constant 0 : index
    %c0_15 = arith.constant 0 : index
    %14 = vector.load %arg3[%c1, %c0_14, %c0_15] : memref<9x32x128xf32, #tpu.memory_space<vmem>>, vector<1x32x128xf32>
    %15 = vector.shape_cast %14 : vector<1x32x128xf32> to vector<32x128xf32>
    %16 = arith.addf %13, %15 : vector<32x128xf32>
    %c248_i32 = arith.constant 248 : i32
    %17 = tpu.dynamic_rotate %7 by %c248_i32 dim 1 : vector<32x256xf32>, i32 -> vector<32x256xf32>
    %18 = vector.extract_strided_slice %17 {offsets = [0, 0], sizes = [32, 128], strides = [1, 1]} : vector<32x256xf32> to vector<32x128xf32>
    %c2 = arith.constant 2 : index
    %c0_16 = arith.constant 0 : index
    %c0_17 = arith.constant 0 : index
    %19 = vector.load %arg3[%c2, %c0_16, %c0_17] : memref<9x32x128xf32, #tpu.memory_space<vmem>>, vector<1x32x128xf32>
    %20 = vector.shape_cast %19 : vector<1x32x128xf32> to vector<32x128xf32>
    %21 = arith.addf %18, %20 : vector<32x128xf32>
    %22 = arith.maximumf %12, %21 : vector<32x128xf32>
    %23 = arith.addf %9, %18 : vector<32x128xf32>
    %c0_18 = arith.constant 0 : index
    %c4 = arith.constant 4 : index
    %c0_19 = arith.constant 0 : index
    %24 = vector.load %arg1[%c0_18, %c4, %c0_19] : memref<2x24x256xf32, #tpu.memory_space<vmem>>, vector<2x16x256xf32>
    %25 = vector.shape_cast %24 : vector<2x16x256xf32> to vector<32x256xf32>
    %c8_i32_20 = arith.constant 8 : i32
    %26 = tpu.dynamic_rotate %25 by %c8_i32_20 dim 1 : vector<32x256xf32>, i32 -> vector<32x256xf32>
    %27 = vector.extract_strided_slice %26 {offsets = [0, 0], sizes = [32, 128], strides = [1, 1]} : vector<32x256xf32> to vector<32x128xf32>
    %c3_21 = arith.constant 3 : index
    %c0_22 = arith.constant 0 : index
    %c0_23 = arith.constant 0 : index
    %28 = vector.load %arg3[%c3_21, %c0_22, %c0_23] : memref<9x32x128xf32, #tpu.memory_space<vmem>>, vector<1x32x128xf32>
    %29 = vector.shape_cast %28 : vector<1x32x128xf32> to vector<32x128xf32>
    %30 = arith.addf %27, %29 : vector<32x128xf32>
    %31 = arith.maximumf %16, %30 : vector<32x128xf32>
    %32 = arith.addf %13, %27 : vector<32x128xf32>
    %33 = vector.extract_strided_slice %25 {offsets = [0, 0], sizes = [32, 128], strides = [1, 1]} : vector<32x256xf32> to vector<32x128xf32>
    %34 = arith.maximumf %22, %33 : vector<32x128xf32>
    %35 = arith.addf %23, %33 : vector<32x128xf32>
    %c248_i32_24 = arith.constant 248 : i32
    %36 = tpu.dynamic_rotate %25 by %c248_i32_24 dim 1 : vector<32x256xf32>, i32 -> vector<32x256xf32>
    %37 = vector.extract_strided_slice %36 {offsets = [0, 0], sizes = [32, 128], strides = [1, 1]} : vector<32x256xf32> to vector<32x128xf32>
    %c5 = arith.constant 5 : index
    %c0_25 = arith.constant 0 : index
    %c0_26 = arith.constant 0 : index
    %38 = vector.load %arg3[%c5, %c0_25, %c0_26] : memref<9x32x128xf32, #tpu.memory_space<vmem>>, vector<1x32x128xf32>
    %39 = vector.shape_cast %38 : vector<1x32x128xf32> to vector<32x128xf32>
    %40 = arith.addf %37, %39 : vector<32x128xf32>
    %41 = arith.maximumf %31, %40 : vector<32x128xf32>
    %42 = arith.addf %32, %37 : vector<32x128xf32>
    %c0_27 = arith.constant 0 : index
    %c5_28 = arith.constant 5 : index
    %c0_29 = arith.constant 0 : index
    %43 = vector.load %arg1[%c0_27, %c5_28, %c0_29] : memref<2x24x256xf32, #tpu.memory_space<vmem>>, vector<2x16x256xf32>
    %44 = vector.shape_cast %43 : vector<2x16x256xf32> to vector<32x256xf32>
    %c8_i32_30 = arith.constant 8 : i32
    %45 = tpu.dynamic_rotate %44 by %c8_i32_30 dim 1 : vector<32x256xf32>, i32 -> vector<32x256xf32>
    %46 = vector.extract_strided_slice %45 {offsets = [0, 0], sizes = [32, 128], strides = [1, 1]} : vector<32x256xf32> to vector<32x128xf32>
    %c6 = arith.constant 6 : index
    %c0_31 = arith.constant 0 : index
    %c0_32 = arith.constant 0 : index
    %47 = vector.load %arg3[%c6, %c0_31, %c0_32] : memref<9x32x128xf32, #tpu.memory_space<vmem>>, vector<1x32x128xf32>
    %48 = vector.shape_cast %47 : vector<1x32x128xf32> to vector<32x128xf32>
    %49 = arith.addf %46, %48 : vector<32x128xf32>
    %50 = arith.maximumf %34, %49 : vector<32x128xf32>
    %51 = arith.addf %35, %46 : vector<32x128xf32>
    %52 = vector.extract_strided_slice %44 {offsets = [0, 0], sizes = [32, 128], strides = [1, 1]} : vector<32x256xf32> to vector<32x128xf32>
    %c7 = arith.constant 7 : index
    %c0_33 = arith.constant 0 : index
    %c0_34 = arith.constant 0 : index
    %53 = vector.load %arg3[%c7, %c0_33, %c0_34] : memref<9x32x128xf32, #tpu.memory_space<vmem>>, vector<1x32x128xf32>
    %54 = vector.shape_cast %53 : vector<1x32x128xf32> to vector<32x128xf32>
    %55 = arith.addf %52, %54 : vector<32x128xf32>
    %56 = arith.maximumf %41, %55 : vector<32x128xf32>
    %57 = arith.addf %42, %52 : vector<32x128xf32>
    %c248_i32_35 = arith.constant 248 : i32
    %58 = tpu.dynamic_rotate %44 by %c248_i32_35 dim 1 : vector<32x256xf32>, i32 -> vector<32x256xf32>
    %59 = vector.extract_strided_slice %58 {offsets = [0, 0], sizes = [32, 128], strides = [1, 1]} : vector<32x256xf32> to vector<32x128xf32>
    %c8 = arith.constant 8 : index
    %c0_36 = arith.constant 0 : index
    %c0_37 = arith.constant 0 : index
    %60 = vector.load %arg3[%c8, %c0_36, %c0_37] : memref<9x32x128xf32, #tpu.memory_space<vmem>>, vector<1x32x128xf32>
    %61 = vector.shape_cast %60 : vector<1x32x128xf32> to vector<32x128xf32>
    %62 = arith.addf %59, %61 : vector<32x128xf32>
    %63 = arith.maximumf %50, %62 : vector<32x128xf32>
    %64 = arith.addf %51, %59 : vector<32x128xf32>
    %65 = arith.maximumf %63, %56 : vector<32x128xf32>
    %66 = arith.addf %64, %57 : vector<32x128xf32>
    %c0_38 = arith.constant 0 : index
    %c0_39 = arith.constant 0 : index
    %67 = vector.load %arg2[%c0_38, %c0_39] : memref<32x128xf32, #tpu.memory_space<vmem>>, vector<32x128xf32>
    %68 = arith.mulf %66, %67 : vector<32x128xf32>
    %c1_40 = arith.constant 1 : index
    %69 = memref.load %arg0[%c1_40] : memref<8xf32, #tpu.memory_space<smem>>
    %cst_41 = arith.constant dense<0.000000e+00> : vector<128xf32>
    %70 = vector.multi_reduction <add>, %65, %cst_41 [0] : vector<32x128xf32> to vector<128xf32>
    %71 = vector.shape_cast %70 : vector<128xf32> to vector<1x128xf32>
    %72 = arith.mulf %65, %65 : vector<32x128xf32>
    %cst_42 = arith.constant dense<0.000000e+00> : vector<128xf32>
    %73 = vector.multi_reduction <add>, %72, %cst_42 [0] : vector<32x128xf32> to vector<128xf32>
    %74 = vector.shape_cast %73 : vector<128xf32> to vector<1x128xf32>
    %75 = tpu.concatenate %71, %74 in 0 : vector<1x128xf32>, vector<1x128xf32> -> vector<2x128xf32>
    %c0_43 = arith.constant 0 : index
    %c0_44 = arith.constant 0 : index
    %76 = vector.load %arg4[%c0_43, %c0_44] : memref<128x128xf32, #tpu.memory_space<vmem>>, vector<128x128xf32>
    %cst_45 = arith.constant dense<0.000000e+00> : vector<2x128xf32>
    %77 = tpu.matmul %75, %76, %cst_45 {dimension_numbers = #tpu.dot_dimension_numbers<[1], [0], [0], [1], [0, 0, 1, 1], [], []>} : vector<2x128xf32>, vector<128x128xf32>, vector<2x128xf32> -> vector<2x128xf32>
    %cst_46 = arith.constant 0.001953125 : f32
    %78 = vector.broadcast %cst_46 : f32 to vector<2x128xf32>
    %79 = arith.mulf %77, %78 : vector<2x128xf32>
    %80 = vector.extract_strided_slice %79 {offsets = [0, 0], sizes = [1, 128], strides = [1, 1]} : vector<2x128xf32> to vector<1x128xf32>
    %81 = vector.extract_strided_slice %79 {offsets = [1, 0], sizes = [1, 128], strides = [1, 1]} : vector<2x128xf32> to vector<1x128xf32>
    %82 = arith.mulf %80, %80 : vector<1x128xf32>
    %83 = arith.subf %81, %82 : vector<1x128xf32>
    %cst_47 = arith.constant 0.000000e+00 : f32
    %84 = vector.broadcast %cst_47 : f32 to vector<1x128xf32>
    %85 = arith.maximumf %83, %84 : vector<1x128xf32>
    %cst_48 = arith.constant 9.99999974E-6 : f32
    %86 = vector.broadcast %cst_48 : f32 to vector<1x128xf32>
    %87 = arith.addf %85, %86 : vector<1x128xf32>
    %88 = math.rsqrt %87 : vector<1x128xf32>
    %89 = vector.broadcast %69 : f32 to vector<1x128xf32>
    %90 = arith.mulf %88, %89 : vector<1x128xf32>
    %91 = vector.broadcast %90 : vector<1x128xf32> to vector<32x128xf32>
    %92 = arith.mulf %65, %91 : vector<32x128xf32>
    %93 = arith.mulf %80, %90 : vector<1x128xf32>
    %94 = vector.broadcast %93 : vector<1x128xf32> to vector<32x128xf32>
    %95 = arith.subf %92, %94 : vector<32x128xf32>
    %c2_49 = arith.constant 2 : index
    %96 = memref.load %arg0[%c2_49] : memref<8xf32, #tpu.memory_space<smem>>
    %cst_50 = arith.constant dense<0.000000e+00> : vector<128xf32>
    %97 = vector.multi_reduction <add>, %68, %cst_50 [0] : vector<32x128xf32> to vector<128xf32>
    %98 = vector.shape_cast %97 : vector<128xf32> to vector<1x128xf32>
    %99 = arith.mulf %68, %68 : vector<32x128xf32>
    %cst_51 = arith.constant dense<0.000000e+00> : vector<128xf32>
    %100 = vector.multi_reduction <add>, %99, %cst_51 [0] : vector<32x128xf32> to vector<128xf32>
    %101 = vector.shape_cast %100 : vector<128xf32> to vector<1x128xf32>
    %102 = tpu.concatenate %98, %101 in 0 : vector<1x128xf32>, vector<1x128xf32> -> vector<2x128xf32>
    %c0_52 = arith.constant 0 : index
    %c0_53 = arith.constant 0 : index
    %103 = vector.load %arg4[%c0_52, %c0_53] : memref<128x128xf32, #tpu.memory_space<vmem>>, vector<128x128xf32>
    %cst_54 = arith.constant dense<0.000000e+00> : vector<2x128xf32>
    %104 = tpu.matmul %102, %103, %cst_54 {dimension_numbers = #tpu.dot_dimension_numbers<[1], [0], [0], [1], [0, 0, 1, 1], [], []>} : vector<2x128xf32>, vector<128x128xf32>, vector<2x128xf32> -> vector<2x128xf32>
    %cst_55 = arith.constant 0.001953125 : f32
    %105 = vector.broadcast %cst_55 : f32 to vector<2x128xf32>
    %106 = arith.mulf %104, %105 : vector<2x128xf32>
    %107 = vector.extract_strided_slice %106 {offsets = [0, 0], sizes = [1, 128], strides = [1, 1]} : vector<2x128xf32> to vector<1x128xf32>
    %108 = vector.extract_strided_slice %106 {offsets = [1, 0], sizes = [1, 128], strides = [1, 1]} : vector<2x128xf32> to vector<1x128xf32>
    %109 = arith.mulf %107, %107 : vector<1x128xf32>
    %110 = arith.subf %108, %109 : vector<1x128xf32>
    %cst_56 = arith.constant 0.000000e+00 : f32
    %111 = vector.broadcast %cst_56 : f32 to vector<1x128xf32>
    %112 = arith.maximumf %110, %111 : vector<1x128xf32>
    %cst_57 = arith.constant 9.99999974E-6 : f32
    %113 = vector.broadcast %cst_57 : f32 to vector<1x128xf32>
    %114 = arith.addf %112, %113 : vector<1x128xf32>
    %115 = math.rsqrt %114 : vector<1x128xf32>
    %116 = vector.broadcast %96 : f32 to vector<1x128xf32>
    %117 = arith.mulf %115, %116 : vector<1x128xf32>
    %118 = vector.broadcast %117 : vector<1x128xf32> to vector<32x128xf32>
    %119 = arith.mulf %68, %118 : vector<32x128xf32>
    %120 = arith.mulf %107, %117 : vector<1x128xf32>
    %121 = vector.broadcast %120 : vector<1x128xf32> to vector<32x128xf32>
    %122 = arith.subf %119, %121 : vector<32x128xf32>
    %123 = arith.addf %95, %122 : vector<32x128xf32>
    %c3_58 = arith.constant 3 : index
    %124 = memref.load %arg0[%c3_58] : memref<8xf32, #tpu.memory_space<smem>>
    %125 = vector.broadcast %124 : f32 to vector<32x128xf32>
    %126 = arith.mulf %125, %33 : vector<32x128xf32>
    %127 = arith.addf %123, %126 : vector<32x128xf32>
    %c0_59 = arith.constant 0 : index
    %c0_60 = arith.constant 0 : index
    %128 = vector.load %arg5[%c0_59, %c0_60] : memref<9x128xf32, #tpu.memory_space<vmem>>, vector<9x128xf32>
    %c0_61 = arith.constant 0 : index
    %c0_62 = arith.constant 0 : index
    %129 = vector.load %arg7[%c0_61, %c0_62] : memref<9x128xf32, #tpu.memory_space<vmem>>, vector<9x128xf32>
    %c4_63 = arith.constant 4 : index
    %130 = memref.load %arg0[%c4_63] : memref<8xf32, #tpu.memory_space<smem>>
    %c0_64 = arith.constant 0 : index
    %c3_65 = arith.constant 3 : index
    %c0_66 = arith.constant 0 : index
    %131 = vector.load %arg18[%c0_64, %c3_65, %c0_66] : memref<2x24x256xf32, #tpu.memory_space<vmem>>, vector<2x16x256xf32>
    %132 = vector.shape_cast %131 : vector<2x16x256xf32> to vector<32x256xf32>
    %c8_i32_67 = arith.constant 8 : i32
    %133 = tpu.dynamic_rotate %132 by %c8_i32_67 dim 1 : vector<32x256xf32>, i32 -> vector<32x256xf32>
    %134 = vector.extract_strided_slice %133 {offsets = [0, 0], sizes = [32, 128], strides = [1, 1]} : vector<32x256xf32> to vector<32x128xf32>
    %135 = vector.extract_strided_slice %128 {offsets = [0, 0], sizes = [1, 128], strides = [1, 1]} : vector<9x128xf32> to vector<1x128xf32>
    %136 = vector.broadcast %135 : vector<1x128xf32> to vector<32x128xf32>
    %137 = arith.mulf %134, %136 : vector<32x128xf32>
    %138 = vector.extract_strided_slice %132 {offsets = [0, 0], sizes = [32, 128], strides = [1, 1]} : vector<32x256xf32> to vector<32x128xf32>
    %139 = vector.extract_strided_slice %128 {offsets = [1, 0], sizes = [1, 128], strides = [1, 1]} : vector<9x128xf32> to vector<1x128xf32>
    %140 = vector.broadcast %139 : vector<1x128xf32> to vector<32x128xf32>
    %141 = arith.mulf %138, %140 : vector<32x128xf32>
    %c248_i32_68 = arith.constant 248 : i32
    %142 = tpu.dynamic_rotate %132 by %c248_i32_68 dim 1 : vector<32x256xf32>, i32 -> vector<32x256xf32>
    %143 = vector.extract_strided_slice %142 {offsets = [0, 0], sizes = [32, 128], strides = [1, 1]} : vector<32x256xf32> to vector<32x128xf32>
    %144 = vector.extract_strided_slice %128 {offsets = [2, 0], sizes = [1, 128], strides = [1, 1]} : vector<9x128xf32> to vector<1x128xf32>
    %145 = vector.broadcast %144 : vector<1x128xf32> to vector<32x128xf32>
    %146 = arith.mulf %143, %145 : vector<32x128xf32>
    %c0_69 = arith.constant 0 : index
    %c4_70 = arith.constant 4 : index
    %c0_71 = arith.constant 0 : index
    %147 = vector.load %arg18[%c0_69, %c4_70, %c0_71] : memref<2x24x256xf32, #tpu.memory_space<vmem>>, vector<2x16x256xf32>
    %148 = vector.shape_cast %147 : vector<2x16x256xf32> to vector<32x256xf32>
    %c8_i32_72 = arith.constant 8 : i32
    %149 = tpu.dynamic_rotate %148 by %c8_i32_72 dim 1 : vector<32x256xf32>, i32 -> vector<32x256xf32>
    %150 = vector.extract_strided_slice %149 {offsets = [0, 0], sizes = [32, 128], strides = [1, 1]} : vector<32x256xf32> to vector<32x128xf32>
    %151 = vector.extract_strided_slice %128 {offsets = [3, 0], sizes = [1, 128], strides = [1, 1]} : vector<9x128xf32> to vector<1x128xf32>
    %152 = vector.broadcast %151 : vector<1x128xf32> to vector<32x128xf32>
    %153 = arith.mulf %150, %152 : vector<32x128xf32>
    %154 = vector.extract_strided_slice %148 {offsets = [0, 0], sizes = [32, 128], strides = [1, 1]} : vector<32x256xf32> to vector<32x128xf32>
    %155 = vector.extract_strided_slice %128 {offsets = [4, 0], sizes = [1, 128], strides = [1, 1]} : vector<9x128xf32> to vector<1x128xf32>
    %156 = vector.broadcast %155 : vector<1x128xf32> to vector<32x128xf32>
    %157 = arith.mulf %154, %156 : vector<32x128xf32>
    %158 = arith.addf %137, %157 : vector<32x128xf32>
    %c248_i32_73 = arith.constant 248 : i32
    %159 = tpu.dynamic_rotate %148 by %c248_i32_73 dim 1 : vector<32x256xf32>, i32 -> vector<32x256xf32>
    %160 = vector.extract_strided_slice %159 {offsets = [0, 0], sizes = [32, 128], strides = [1, 1]} : vector<32x256xf32> to vector<32x128xf32>
    %161 = vector.extract_strided_slice %128 {offsets = [5, 0], sizes = [1, 128], strides = [1, 1]} : vector<9x128xf32> to vector<1x128xf32>
    %162 = vector.broadcast %161 : vector<1x128xf32> to vector<32x128xf32>
    %163 = arith.mulf %160, %162 : vector<32x128xf32>
    %164 = arith.addf %141, %163 : vector<32x128xf32>
    %c0_74 = arith.constant 0 : index
    %c5_75 = arith.constant 5 : index
    %c0_76 = arith.constant 0 : index
    %165 = vector.load %arg18[%c0_74, %c5_75, %c0_76] : memref<2x24x256xf32, #tpu.memory_space<vmem>>, vector<2x16x256xf32>
    %166 = vector.shape_cast %165 : vector<2x16x256xf32> to vector<32x256xf32>
    %c8_i32_77 = arith.constant 8 : i32
    %167 = tpu.dynamic_rotate %166 by %c8_i32_77 dim 1 : vector<32x256xf32>, i32 -> vector<32x256xf32>
    %168 = vector.extract_strided_slice %167 {offsets = [0, 0], sizes = [32, 128], strides = [1, 1]} : vector<32x256xf32> to vector<32x128xf32>
    %169 = vector.extract_strided_slice %128 {offsets = [6, 0], sizes = [1, 128], strides = [1, 1]} : vector<9x128xf32> to vector<1x128xf32>
    %170 = vector.broadcast %169 : vector<1x128xf32> to vector<32x128xf32>
    %171 = arith.mulf %168, %170 : vector<32x128xf32>
    %172 = arith.addf %146, %171 : vector<32x128xf32>
    %173 = vector.extract_strided_slice %166 {offsets = [0, 0], sizes = [32, 128], strides = [1, 1]} : vector<32x256xf32> to vector<32x128xf32>
    %174 = vector.extract_strided_slice %128 {offsets = [7, 0], sizes = [1, 128], strides = [1, 1]} : vector<9x128xf32> to vector<1x128xf32>
    %175 = vector.broadcast %174 : vector<1x128xf32> to vector<32x128xf32>
    %176 = arith.mulf %173, %175 : vector<32x128xf32>
    %177 = arith.addf %153, %176 : vector<32x128xf32>
    %c248_i32_78 = arith.constant 248 : i32
    %178 = tpu.dynamic_rotate %166 by %c248_i32_78 dim 1 : vector<32x256xf32>, i32 -> vector<32x256xf32>
    %179 = vector.extract_strided_slice %178 {offsets = [0, 0], sizes = [32, 128], strides = [1, 1]} : vector<32x256xf32> to vector<32x128xf32>
    %180 = vector.extract_strided_slice %128 {offsets = [8, 0], sizes = [1, 128], strides = [1, 1]} : vector<9x128xf32> to vector<1x128xf32>
    %181 = vector.broadcast %180 : vector<1x128xf32> to vector<32x128xf32>
    %182 = arith.mulf %179, %181 : vector<32x128xf32>
    %183 = arith.addf %158, %182 : vector<32x128xf32>
    %184 = arith.addf %183, %164 : vector<32x128xf32>
    %185 = arith.addf %184, %172 : vector<32x128xf32>
    %186 = arith.addf %185, %177 : vector<32x128xf32>
    %c0_79 = arith.constant 0 : index
    %c0_80 = arith.constant 0 : index
    %187 = vector.load %arg6[%c0_79, %c0_80] : memref<128x128xf32, #tpu.memory_space<vmem>>, vector<128x128xf32>
    %cst_81 = arith.constant dense<0.000000e+00> : vector<32x128xf32>
    %188 = tpu.matmul %186, %187, %cst_81 {dimension_numbers = #tpu.dot_dimension_numbers<[1], [0], [0], [1], [0, 0, 1, 1], [], []>} : vector<32x128xf32>, vector<128x128xf32>, vector<32x128xf32> -> vector<32x128xf32>
    %cst_82 = arith.constant dense<0.000000e+00> : vector<128xf32>
    %189 = vector.multi_reduction <add>, %188, %cst_82 [0] : vector<32x128xf32> to vector<128xf32>
    %190 = vector.shape_cast %189 : vector<128xf32> to vector<1x128xf32>
    %191 = arith.mulf %188, %188 : vector<32x128xf32>
    %cst_83 = arith.constant dense<0.000000e+00> : vector<128xf32>
    %192 = vector.multi_reduction <add>, %191, %cst_83 [0] : vector<32x128xf32> to vector<128xf32>
    %193 = vector.shape_cast %192 : vector<128xf32> to vector<1x128xf32>
    %194 = tpu.concatenate %190, %193 in 0 : vector<1x128xf32>, vector<1x128xf32> -> vector<2x128xf32>
    %c0_84 = arith.constant 0 : index
    %c0_85 = arith.constant 0 : index
    %195 = vector.load %arg4[%c0_84, %c0_85] : memref<128x128xf32, #tpu.memory_space<vmem>>, vector<128x128xf32>
    %cst_86 = arith.constant dense<0.000000e+00> : vector<2x128xf32>
    %196 = tpu.matmul %194, %195, %cst_86 {dimension_numbers = #tpu.dot_dimension_numbers<[1], [0], [0], [1], [0, 0, 1, 1], [], []>} : vector<2x128xf32>, vector<128x128xf32>, vector<2x128xf32> -> vector<2x128xf32>
    %cst_87 = arith.constant 0.001953125 : f32
    %197 = vector.broadcast %cst_87 : f32 to vector<2x128xf32>
    %198 = arith.mulf %196, %197 : vector<2x128xf32>
    %199 = vector.extract_strided_slice %198 {offsets = [0, 0], sizes = [1, 128], strides = [1, 1]} : vector<2x128xf32> to vector<1x128xf32>
    %200 = vector.extract_strided_slice %198 {offsets = [1, 0], sizes = [1, 128], strides = [1, 1]} : vector<2x128xf32> to vector<1x128xf32>
    %201 = arith.mulf %199, %199 : vector<1x128xf32>
    %202 = arith.subf %200, %201 : vector<1x128xf32>
    %cst_88 = arith.constant 0.000000e+00 : f32
    %203 = vector.broadcast %cst_88 : f32 to vector<1x128xf32>
    %204 = arith.maximumf %202, %203 : vector<1x128xf32>
    %cst_89 = arith.constant 9.99999974E-6 : f32
    %205 = vector.broadcast %cst_89 : f32 to vector<1x128xf32>
    %206 = arith.addf %204, %205 : vector<1x128xf32>
    %207 = math.rsqrt %206 : vector<1x128xf32>
    %208 = vector.broadcast %207 : vector<1x128xf32> to vector<32x128xf32>
    %209 = arith.mulf %188, %208 : vector<32x128xf32>
    %210 = arith.mulf %199, %207 : vector<1x128xf32>
    %211 = vector.broadcast %210 : vector<1x128xf32> to vector<32x128xf32>
    %212 = arith.subf %209, %211 : vector<32x128xf32>
    %cst_90 = arith.constant 0.000000e+00 : f32
    %213 = vector.broadcast %cst_90 : f32 to vector<32x128xf32>
    %214 = arith.maximumf %212, %213 : vector<32x128xf32>
    %215 = vector.shape_cast %214 : vector<32x128xf32> to vector<2x16x128xf32>
    %c0_91 = arith.constant 0 : index
    %c8_92 = arith.constant 8 : index
    %c0_93 = arith.constant 0 : index
    %216 = vector.load %arg19[%c0_91, %c8_92, %c0_93] : memref<2x32x256xf32, #tpu.memory_space<vmem>>, vector<2x16x128xf32>
    tpu.vector_store %arg19[%c0_91, %c8_92, %c0_93], %215 {strides = array<i32>} : memref<2x32x256xf32, #tpu.memory_space<vmem>>, vector<2x16x128xf32>,
    %c0_94 = arith.constant 0 : index
    %c7_95 = arith.constant 7 : index
    %c0_96 = arith.constant 0 : index
    %217 = vector.load %arg19[%c0_94, %c7_95, %c0_96] : memref<2x32x256xf32, #tpu.memory_space<vmem>>, vector<2x16x256xf32>
    %218 = vector.shape_cast %217 : vector<2x16x256xf32> to vector<32x256xf32>
    %c8_i32_97 = arith.constant 8 : i32
    %219 = tpu.dynamic_rotate %218 by %c8_i32_97 dim 1 : vector<32x256xf32>, i32 -> vector<32x256xf32>
    %220 = vector.extract_strided_slice %219 {offsets = [0, 0], sizes = [32, 128], strides = [1, 1]} : vector<32x256xf32> to vector<32x128xf32>
    %221 = vector.extract_strided_slice %129 {offsets = [0, 0], sizes = [1, 128], strides = [1, 1]} : vector<9x128xf32> to vector<1x128xf32>
    %222 = vector.broadcast %221 : vector<1x128xf32> to vector<32x128xf32>
    %223 = arith.mulf %220, %222 : vector<32x128xf32>
    %224 = vector.extract_strided_slice %218 {offsets = [0, 0], sizes = [32, 128], strides = [1, 1]} : vector<32x256xf32> to vector<32x128xf32>
    %225 = vector.extract_strided_slice %129 {offsets = [1, 0], sizes = [1, 128], strides = [1, 1]} : vector<9x128xf32> to vector<1x128xf32>
    %226 = vector.broadcast %225 : vector<1x128xf32> to vector<32x128xf32>
    %227 = arith.mulf %224, %226 : vector<32x128xf32>
    %c248_i32_98 = arith.constant 248 : i32
    %228 = tpu.dynamic_rotate %218 by %c248_i32_98 dim 1 : vector<32x256xf32>, i32 -> vector<32x256xf32>
    %229 = vector.extract_strided_slice %228 {offsets = [0, 0], sizes = [32, 128], strides = [1, 1]} : vector<32x256xf32> to vector<32x128xf32>
    %230 = vector.extract_strided_slice %129 {offsets = [2, 0], sizes = [1, 128], strides = [1, 1]} : vector<9x128xf32> to vector<1x128xf32>
    %231 = vector.broadcast %230 : vector<1x128xf32> to vector<32x128xf32>
    %232 = arith.mulf %229, %231 : vector<32x128xf32>
    %c0_99 = arith.constant 0 : index
    %c8_100 = arith.constant 8 : index
    %c0_101 = arith.constant 0 : index
    %233 = vector.load %arg19[%c0_99, %c8_100, %c0_101] : memref<2x32x256xf32, #tpu.memory_space<vmem>>, vector<2x16x256xf32>
    %234 = vector.shape_cast %233 : vector<2x16x256xf32> to vector<32x256xf32>
    %c8_i32_102 = arith.constant 8 : i32
    %235 = tpu.dynamic_rotate %234 by %c8_i32_102 dim 1 : vector<32x256xf32>, i32 -> vector<32x256xf32>
    %236 = vector.extract_strided_slice %235 {offsets = [0, 0], sizes = [32, 128], strides = [1, 1]} : vector<32x256xf32> to vector<32x128xf32>
    %237 = vector.extract_strided_slice %129 {offsets = [3, 0], sizes = [1, 128], strides = [1, 1]} : vector<9x128xf32> to vector<1x128xf32>
    %238 = vector.broadcast %237 : vector<1x128xf32> to vector<32x128xf32>
    %239 = arith.mulf %236, %238 : vector<32x128xf32>
    %240 = vector.extract_strided_slice %234 {offsets = [0, 0], sizes = [32, 128], strides = [1, 1]} : vector<32x256xf32> to vector<32x128xf32>
    %241 = vector.extract_strided_slice %129 {offsets = [4, 0], sizes = [1, 128], strides = [1, 1]} : vector<9x128xf32> to vector<1x128xf32>
    %242 = vector.broadcast %241 : vector<1x128xf32> to vector<32x128xf32>
    %243 = arith.mulf %240, %242 : vector<32x128xf32>
    %244 = arith.addf %223, %243 : vector<32x128xf32>
    %c248_i32_103 = arith.constant 248 : i32
    %245 = tpu.dynamic_rotate %234 by %c248_i32_103 dim 1 : vector<32x256xf32>, i32 -> vector<32x256xf32>
    %246 = vector.extract_strided_slice %245 {offsets = [0, 0], sizes = [32, 128], strides = [1, 1]} : vector<32x256xf32> to vector<32x128xf32>
    %247 = vector.extract_strided_slice %129 {offsets = [5, 0], sizes = [1, 128], strides = [1, 1]} : vector<9x128xf32> to vector<1x128xf32>
    %248 = vector.broadcast %247 : vector<1x128xf32> to vector<32x128xf32>
    %249 = arith.mulf %246, %248 : vector<32x128xf32>
    %250 = arith.addf %227, %249 : vector<32x128xf32>
    %c0_104 = arith.constant 0 : index
    %c9 = arith.constant 9 : index
    %c0_105 = arith.constant 0 : index
    %251 = vector.load %arg19[%c0_104, %c9, %c0_105] : memref<2x32x256xf32, #tpu.memory_space<vmem>>, vector<2x16x256xf32>
    %252 = vector.shape_cast %251 : vector<2x16x256xf32> to vector<32x256xf32>
    %c8_i32_106 = arith.constant 8 : i32
    %253 = tpu.dynamic_rotate %252 by %c8_i32_106 dim 1 : vector<32x256xf32>, i32 -> vector<32x256xf32>
    %254 = vector.extract_strided_slice %253 {offsets = [0, 0], sizes = [32, 128], strides = [1, 1]} : vector<32x256xf32> to vector<32x128xf32>
    %255 = vector.extract_strided_slice %129 {offsets = [6, 0], sizes = [1, 128], strides = [1, 1]} : vector<9x128xf32> to vector<1x128xf32>
    %256 = vector.broadcast %255 : vector<1x128xf32> to vector<32x128xf32>
    %257 = arith.mulf %254, %256 : vector<32x128xf32>
    %258 = arith.addf %232, %257 : vector<32x128xf32>
    %259 = vector.extract_strided_slice %252 {offsets = [0, 0], sizes = [32, 128], strides = [1, 1]} : vector<32x256xf32> to vector<32x128xf32>
    %260 = vector.extract_strided_slice %129 {offsets = [7, 0], sizes = [1, 128], strides = [1, 1]} : vector<9x128xf32> to vector<1x128xf32>
    %261 = vector.broadcast %260 : vector<1x128xf32> to vector<32x128xf32>
    %262 = arith.mulf %259, %261 : vector<32x128xf32>
    %263 = arith.addf %239, %262 : vector<32x128xf32>
    %c248_i32_107 = arith.constant 248 : i32
    %264 = tpu.dynamic_rotate %252 by %c248_i32_107 dim 1 : vector<32x256xf32>, i32 -> vector<32x256xf32>
    %265 = vector.extract_strided_slice %264 {offsets = [0, 0], sizes = [32, 128], strides = [1, 1]} : vector<32x256xf32> to vector<32x128xf32>
    %266 = vector.extract_strided_slice %129 {offsets = [8, 0], sizes = [1, 128], strides = [1, 1]} : vector<9x128xf32> to vector<1x128xf32>
    %267 = vector.broadcast %266 : vector<1x128xf32> to vector<32x128xf32>
    %268 = arith.mulf %265, %267 : vector<32x128xf32>
    %269 = arith.addf %244, %268 : vector<32x128xf32>
    %270 = arith.addf %269, %250 : vector<32x128xf32>
    %271 = arith.addf %270, %258 : vector<32x128xf32>
    %272 = arith.addf %271, %263 : vector<32x128xf32>
    %c0_108 = arith.constant 0 : index
    %c0_109 = arith.constant 0 : index
    %273 = vector.load %arg8[%c0_108, %c0_109] : memref<128x128xf32, #tpu.memory_space<vmem>>, vector<128x128xf32>
    %cst_110 = arith.constant dense<0.000000e+00> : vector<32x128xf32>
    %274 = tpu.matmul %272, %273, %cst_110 {dimension_numbers = #tpu.dot_dimension_numbers<[1], [0], [0], [1], [0, 0, 1, 1], [], []>} : vector<32x128xf32>, vector<128x128xf32>, vector<32x128xf32> -> vector<32x128xf32>
    %cst_111 = arith.constant dense<0.000000e+00> : vector<128xf32>
    %275 = vector.multi_reduction <add>, %274, %cst_111 [0] : vector<32x128xf32> to vector<128xf32>
    %276 = vector.shape_cast %275 : vector<128xf32> to vector<1x128xf32>
    %277 = arith.mulf %274, %274 : vector<32x128xf32>
    %cst_112 = arith.constant dense<0.000000e+00> : vector<128xf32>
    %278 = vector.multi_reduction <add>, %277, %cst_112 [0] : vector<32x128xf32> to vector<128xf32>
    %279 = vector.shape_cast %278 : vector<128xf32> to vector<1x128xf32>
    %280 = tpu.concatenate %276, %279 in 0 : vector<1x128xf32>, vector<1x128xf32> -> vector<2x128xf32>
    %c0_113 = arith.constant 0 : index
    %c0_114 = arith.constant 0 : index
    %281 = vector.load %arg4[%c0_113, %c0_114] : memref<128x128xf32, #tpu.memory_space<vmem>>, vector<128x128xf32>
    %cst_115 = arith.constant dense<0.000000e+00> : vector<2x128xf32>
    %282 = tpu.matmul %280, %281, %cst_115 {dimension_numbers = #tpu.dot_dimension_numbers<[1], [0], [0], [1], [0, 0, 1, 1], [], []>} : vector<2x128xf32>, vector<128x128xf32>, vector<2x128xf32> -> vector<2x128xf32>
    %cst_116 = arith.constant 0.001953125 : f32
    %283 = vector.broadcast %cst_116 : f32 to vector<2x128xf32>
    %284 = arith.mulf %282, %283 : vector<2x128xf32>
    %285 = vector.extract_strided_slice %284 {offsets = [0, 0], sizes = [1, 128], strides = [1, 1]} : vector<2x128xf32> to vector<1x128xf32>
    %286 = vector.extract_strided_slice %284 {offsets = [1, 0], sizes = [1, 128], strides = [1, 1]} : vector<2x128xf32> to vector<1x128xf32>
    %287 = arith.mulf %285, %285 : vector<1x128xf32>
    %288 = arith.subf %286, %287 : vector<1x128xf32>
    %cst_117 = arith.constant 0.000000e+00 : f32
    %289 = vector.broadcast %cst_117 : f32 to vector<1x128xf32>
    %290 = arith.maximumf %288, %289 : vector<1x128xf32>
    %cst_118 = arith.constant 9.99999974E-6 : f32
    %291 = vector.broadcast %cst_118 : f32 to vector<1x128xf32>
    %292 = arith.addf %290, %291 : vector<1x128xf32>
    %293 = math.rsqrt %292 : vector<1x128xf32>
    %294 = vector.broadcast %130 : f32 to vector<1x128xf32>
    %295 = arith.mulf %293, %294 : vector<1x128xf32>
    %296 = vector.broadcast %295 : vector<1x128xf32> to vector<32x128xf32>
    %297 = arith.mulf %274, %296 : vector<32x128xf32>
    %298 = arith.mulf %285, %295 : vector<1x128xf32>
    %299 = vector.broadcast %298 : vector<1x128xf32> to vector<32x128xf32>
    %300 = arith.subf %297, %299 : vector<32x128xf32>
    %301 = arith.addf %127, %300 : vector<32x128xf32>
    %c0_119 = arith.constant 0 : index
    %c0_120 = arith.constant 0 : index
    %302 = vector.load %arg9[%c0_119, %c0_120] : memref<25x128xf32, #tpu.memory_space<vmem>>, vector<25x128xf32>
    %c0_121 = arith.constant 0 : index
    %c0_122 = arith.constant 0 : index
    %303 = vector.load %arg11[%c0_121, %c0_122] : memref<25x128xf32, #tpu.memory_space<vmem>>, vector<25x128xf32>
    %c5_123 = arith.constant 5 : index
    %304 = memref.load %arg0[%c5_123] : memref<8xf32, #tpu.memory_space<smem>>
    %c0_124 = arith.constant 0 : index
    %c2_125 = arith.constant 2 : index
    %c0_126 = arith.constant 0 : index
    %305 = vector.load %arg18[%c0_124, %c2_125, %c0_126] : memref<2x24x256xf32, #tpu.memory_space<vmem>>, vector<2x16x256xf32>
    %306 = vector.shape_cast %305 : vector<2x16x256xf32> to vector<32x256xf32>
    %c16_i32 = arith.constant 16 : i32
    %307 = tpu.dynamic_rotate %306 by %c16_i32 dim 1 : vector<32x256xf32>, i32 -> vector<32x256xf32>
    %308 = vector.extract_strided_slice %307 {offsets = [0, 0], sizes = [32, 128], strides = [1, 1]} : vector<32x256xf32> to vector<32x128xf32>
    %309 = vector.extract_strided_slice %302 {offsets = [0, 0], sizes = [1, 128], strides = [1, 1]} : vector<25x128xf32> to vector<1x128xf32>
    %310 = vector.broadcast %309 : vector<1x128xf32> to vector<32x128xf32>
    %311 = arith.mulf %308, %310 : vector<32x128xf32>
    %c8_i32_127 = arith.constant 8 : i32
    %312 = tpu.dynamic_rotate %306 by %c8_i32_127 dim 1 : vector<32x256xf32>, i32 -> vector<32x256xf32>
    %313 = vector.extract_strided_slice %312 {offsets = [0, 0], sizes = [32, 128], strides = [1, 1]} : vector<32x256xf32> to vector<32x128xf32>
    %314 = vector.extract_strided_slice %302 {offsets = [1, 0], sizes = [1, 128], strides = [1, 1]} : vector<25x128xf32> to vector<1x128xf32>
    %315 = vector.broadcast %314 : vector<1x128xf32> to vector<32x128xf32>
    %316 = arith.mulf %313, %315 : vector<32x128xf32>
    %317 = vector.extract_strided_slice %306 {offsets = [0, 0], sizes = [32, 128], strides = [1, 1]} : vector<32x256xf32> to vector<32x128xf32>
    %318 = vector.extract_strided_slice %302 {offsets = [2, 0], sizes = [1, 128], strides = [1, 1]} : vector<25x128xf32> to vector<1x128xf32>
    %319 = vector.broadcast %318 : vector<1x128xf32> to vector<32x128xf32>
    %320 = arith.mulf %317, %319 : vector<32x128xf32>
    %c248_i32_128 = arith.constant 248 : i32
    %321 = tpu.dynamic_rotate %306 by %c248_i32_128 dim 1 : vector<32x256xf32>, i32 -> vector<32x256xf32>
    %322 = vector.extract_strided_slice %321 {offsets = [0, 0], sizes = [32, 128], strides = [1, 1]} : vector<32x256xf32> to vector<32x128xf32>
    %323 = vector.extract_strided_slice %302 {offsets = [3, 0], sizes = [1, 128], strides = [1, 1]} : vector<25x128xf32> to vector<1x128xf32>
    %324 = vector.broadcast %323 : vector<1x128xf32> to vector<32x128xf32>
    %325 = arith.mulf %322, %324 : vector<32x128xf32>
    %c240_i32 = arith.constant 240 : i32
    %326 = tpu.dynamic_rotate %306 by %c240_i32 dim 1 : vector<32x256xf32>, i32 -> vector<32x256xf32>
    %327 = vector.extract_strided_slice %326 {offsets = [0, 0], sizes = [32, 128], strides = [1, 1]} : vector<32x256xf32> to vector<32x128xf32>
    %328 = vector.extract_strided_slice %302 {offsets = [4, 0], sizes = [1, 128], strides = [1, 1]} : vector<25x128xf32> to vector<1x128xf32>
    %329 = vector.broadcast %328 : vector<1x128xf32> to vector<32x128xf32>
    %330 = arith.mulf %327, %329 : vector<32x128xf32>
    %331 = arith.addf %311, %330 : vector<32x128xf32>
    %c0_129 = arith.constant 0 : index
    %c3_130 = arith.constant 3 : index
    %c0_131 = arith.constant 0 : index
    %332 = vector.load %arg18[%c0_129, %c3_130, %c0_131] : memref<2x24x256xf32, #tpu.memory_space<vmem>>, vector<2x16x256xf32>
    %333 = vector.shape_cast %332 : vector<2x16x256xf32> to vector<32x256xf32>
    %c16_i32_132 = arith.constant 16 : i32
    %334 = tpu.dynamic_rotate %333 by %c16_i32_132 dim 1 : vector<32x256xf32>, i32 -> vector<32x256xf32>
    %335 = vector.extract_strided_slice %334 {offsets = [0, 0], sizes = [32, 128], strides = [1, 1]} : vector<32x256xf32> to vector<32x128xf32>
    %336 = vector.extract_strided_slice %302 {offsets = [5, 0], sizes = [1, 128], strides = [1, 1]} : vector<25x128xf32> to vector<1x128xf32>
    %337 = vector.broadcast %336 : vector<1x128xf32> to vector<32x128xf32>
    %338 = arith.mulf %335, %337 : vector<32x128xf32>
    %339 = arith.addf %316, %338 : vector<32x128xf32>
    %c8_i32_133 = arith.constant 8 : i32
    %340 = tpu.dynamic_rotate %333 by %c8_i32_133 dim 1 : vector<32x256xf32>, i32 -> vector<32x256xf32>
    %341 = vector.extract_strided_slice %340 {offsets = [0, 0], sizes = [32, 128], strides = [1, 1]} : vector<32x256xf32> to vector<32x128xf32>
    %342 = vector.extract_strided_slice %302 {offsets = [6, 0], sizes = [1, 128], strides = [1, 1]} : vector<25x128xf32> to vector<1x128xf32>
    %343 = vector.broadcast %342 : vector<1x128xf32> to vector<32x128xf32>
    %344 = arith.mulf %341, %343 : vector<32x128xf32>
    %345 = arith.addf %320, %344 : vector<32x128xf32>
    %346 = vector.extract_strided_slice %333 {offsets = [0, 0], sizes = [32, 128], strides = [1, 1]} : vector<32x256xf32> to vector<32x128xf32>
    %347 = vector.extract_strided_slice %302 {offsets = [7, 0], sizes = [1, 128], strides = [1, 1]} : vector<25x128xf32> to vector<1x128xf32>
    %348 = vector.broadcast %347 : vector<1x128xf32> to vector<32x128xf32>
    %349 = arith.mulf %346, %348 : vector<32x128xf32>
    %350 = arith.addf %325, %349 : vector<32x128xf32>
    %c248_i32_134 = arith.constant 248 : i32
    %351 = tpu.dynamic_rotate %333 by %c248_i32_134 dim 1 : vector<32x256xf32>, i32 -> vector<32x256xf32>
    %352 = vector.extract_strided_slice %351 {offsets = [0, 0], sizes = [32, 128], strides = [1, 1]} : vector<32x256xf32> to vector<32x128xf32>
    %353 = vector.extract_strided_slice %302 {offsets = [8, 0], sizes = [1, 128], strides = [1, 1]} : vector<25x128xf32> to vector<1x128xf32>
    %354 = vector.broadcast %353 : vector<1x128xf32> to vector<32x128xf32>
    %355 = arith.mulf %352, %354 : vector<32x128xf32>
    %356 = arith.addf %331, %355 : vector<32x128xf32>
    %c240_i32_135 = arith.constant 240 : i32
    %357 = tpu.dynamic_rotate %333 by %c240_i32_135 dim 1 : vector<32x256xf32>, i32 -> vector<32x256xf32>
    %358 = vector.extract_strided_slice %357 {offsets = [0, 0], sizes = [32, 128], strides = [1, 1]} : vector<32x256xf32> to vector<32x128xf32>
    %359 = vector.extract_strided_slice %302 {offsets = [9, 0], sizes = [1, 128], strides = [1, 1]} : vector<25x128xf32> to vector<1x128xf32>
    %360 = vector.broadcast %359 : vector<1x128xf32> to vector<32x128xf32>
    %361 = arith.mulf %358, %360 : vector<32x128xf32>
    %362 = arith.addf %339, %361 : vector<32x128xf32>
    %c0_136 = arith.constant 0 : index
    %c4_137 = arith.constant 4 : index
    %c0_138 = arith.constant 0 : index
    %363 = vector.load %arg18[%c0_136, %c4_137, %c0_138] : memref<2x24x256xf32, #tpu.memory_space<vmem>>, vector<2x16x256xf32>
    %364 = vector.shape_cast %363 : vector<2x16x256xf32> to vector<32x256xf32>
    %c16_i32_139 = arith.constant 16 : i32
    %365 = tpu.dynamic_rotate %364 by %c16_i32_139 dim 1 : vector<32x256xf32>, i32 -> vector<32x256xf32>
    %366 = vector.extract_strided_slice %365 {offsets = [0, 0], sizes = [32, 128], strides = [1, 1]} : vector<32x256xf32> to vector<32x128xf32>
    %367 = vector.extract_strided_slice %302 {offsets = [10, 0], sizes = [1, 128], strides = [1, 1]} : vector<25x128xf32> to vector<1x128xf32>
    %368 = vector.broadcast %367 : vector<1x128xf32> to vector<32x128xf32>
    %369 = arith.mulf %366, %368 : vector<32x128xf32>
    %370 = arith.addf %345, %369 : vector<32x128xf32>
    %c8_i32_140 = arith.constant 8 : i32
    %371 = tpu.dynamic_rotate %364 by %c8_i32_140 dim 1 : vector<32x256xf32>, i32 -> vector<32x256xf32>
    %372 = vector.extract_strided_slice %371 {offsets = [0, 0], sizes = [32, 128], strides = [1, 1]} : vector<32x256xf32> to vector<32x128xf32>
    %373 = vector.extract_strided_slice %302 {offsets = [11, 0], sizes = [1, 128], strides = [1, 1]} : vector<25x128xf32> to vector<1x128xf32>
    %374 = vector.broadcast %373 : vector<1x128xf32> to vector<32x128xf32>
    %375 = arith.mulf %372, %374 : vector<32x128xf32>
    %376 = arith.addf %350, %375 : vector<32x128xf32>
    %377 = vector.extract_strided_slice %364 {offsets = [0, 0], sizes = [32, 128], strides = [1, 1]} : vector<32x256xf32> to vector<32x128xf32>
    %378 = vector.extract_strided_slice %302 {offsets = [12, 0], sizes = [1, 128], strides = [1, 1]} : vector<25x128xf32> to vector<1x128xf32>
    %379 = vector.broadcast %378 : vector<1x128xf32> to vector<32x128xf32>
    %380 = arith.mulf %377, %379 : vector<32x128xf32>
    %381 = arith.addf %356, %380 : vector<32x128xf32>
    %c248_i32_141 = arith.constant 248 : i32
    %382 = tpu.dynamic_rotate %364 by %c248_i32_141 dim 1 : vector<32x256xf32>, i32 -> vector<32x256xf32>
    %383 = vector.extract_strided_slice %382 {offsets = [0, 0], sizes = [32, 128], strides = [1, 1]} : vector<32x256xf32> to vector<32x128xf32>
    %384 = vector.extract_strided_slice %302 {offsets = [13, 0], sizes = [1, 128], strides = [1, 1]} : vector<25x128xf32> to vector<1x128xf32>
    %385 = vector.broadcast %384 : vector<1x128xf32> to vector<32x128xf32>
    %386 = arith.mulf %383, %385 : vector<32x128xf32>
    %387 = arith.addf %362, %386 : vector<32x128xf32>
    %c240_i32_142 = arith.constant 240 : i32
    %388 = tpu.dynamic_rotate %364 by %c240_i32_142 dim 1 : vector<32x256xf32>, i32 -> vector<32x256xf32>
    %389 = vector.extract_strided_slice %388 {offsets = [0, 0], sizes = [32, 128], strides = [1, 1]} : vector<32x256xf32> to vector<32x128xf32>
    %390 = vector.extract_strided_slice %302 {offsets = [14, 0], sizes = [1, 128], strides = [1, 1]} : vector<25x128xf32> to vector<1x128xf32>
    %391 = vector.broadcast %390 : vector<1x128xf32> to vector<32x128xf32>
    %392 = arith.mulf %389, %391 : vector<32x128xf32>
    %393 = arith.addf %370, %392 : vector<32x128xf32>
    %c0_143 = arith.constant 0 : index
    %c5_144 = arith.constant 5 : index
    %c0_145 = arith.constant 0 : index
    %394 = vector.load %arg18[%c0_143, %c5_144, %c0_145] : memref<2x24x256xf32, #tpu.memory_space<vmem>>, vector<2x16x256xf32>
    %395 = vector.shape_cast %394 : vector<2x16x256xf32> to vector<32x256xf32>
    %c16_i32_146 = arith.constant 16 : i32
    %396 = tpu.dynamic_rotate %395 by %c16_i32_146 dim 1 : vector<32x256xf32>, i32 -> vector<32x256xf32>
    %397 = vector.extract_strided_slice %396 {offsets = [0, 0], sizes = [32, 128], strides = [1, 1]} : vector<32x256xf32> to vector<32x128xf32>
    %398 = vector.extract_strided_slice %302 {offsets = [15, 0], sizes = [1, 128], strides = [1, 1]} : vector<25x128xf32> to vector<1x128xf32>
    %399 = vector.broadcast %398 : vector<1x128xf32> to vector<32x128xf32>
    %400 = arith.mulf %397, %399 : vector<32x128xf32>
    %401 = arith.addf %376, %400 : vector<32x128xf32>
    %c8_i32_147 = arith.constant 8 : i32
    %402 = tpu.dynamic_rotate %395 by %c8_i32_147 dim 1 : vector<32x256xf32>, i32 -> vector<32x256xf32>
    %403 = vector.extract_strided_slice %402 {offsets = [0, 0], sizes = [32, 128], strides = [1, 1]} : vector<32x256xf32> to vector<32x128xf32>
    %404 = vector.extract_strided_slice %302 {offsets = [16, 0], sizes = [1, 128], strides = [1, 1]} : vector<25x128xf32> to vector<1x128xf32>
    %405 = vector.broadcast %404 : vector<1x128xf32> to vector<32x128xf32>
    %406 = arith.mulf %403, %405 : vector<32x128xf32>
    %407 = arith.addf %381, %406 : vector<32x128xf32>
    %408 = vector.extract_strided_slice %395 {offsets = [0, 0], sizes = [32, 128], strides = [1, 1]} : vector<32x256xf32> to vector<32x128xf32>
    %409 = vector.extract_strided_slice %302 {offsets = [17, 0], sizes = [1, 128], strides = [1, 1]} : vector<25x128xf32> to vector<1x128xf32>
    %410 = vector.broadcast %409 : vector<1x128xf32> to vector<32x128xf32>
    %411 = arith.mulf %408, %410 : vector<32x128xf32>
    %412 = arith.addf %387, %411 : vector<32x128xf32>
    %c248_i32_148 = arith.constant 248 : i32
    %413 = tpu.dynamic_rotate %395 by %c248_i32_148 dim 1 : vector<32x256xf32>, i32 -> vector<32x256xf32>
    %414 = vector.extract_strided_slice %413 {offsets = [0, 0], sizes = [32, 128], strides = [1, 1]} : vector<32x256xf32> to vector<32x128xf32>
    %415 = vector.extract_strided_slice %302 {offsets = [18, 0], sizes = [1, 128], strides = [1, 1]} : vector<25x128xf32> to vector<1x128xf32>
    %416 = vector.broadcast %415 : vector<1x128xf32> to vector<32x128xf32>
    %417 = arith.mulf %414, %416 : vector<32x128xf32>
    %418 = arith.addf %393, %417 : vector<32x128xf32>
    %c240_i32_149 = arith.constant 240 : i32
    %419 = tpu.dynamic_rotate %395 by %c240_i32_149 dim 1 : vector<32x256xf32>, i32 -> vector<32x256xf32>
    %420 = vector.extract_strided_slice %419 {offsets = [0, 0], sizes = [32, 128], strides = [1, 1]} : vector<32x256xf32> to vector<32x128xf32>
    %421 = vector.extract_strided_slice %302 {offsets = [19, 0], sizes = [1, 128], strides = [1, 1]} : vector<25x128xf32> to vector<1x128xf32>
    %422 = vector.broadcast %421 : vector<1x128xf32> to vector<32x128xf32>
    %423 = arith.mulf %420, %422 : vector<32x128xf32>
    %424 = arith.addf %401, %423 : vector<32x128xf32>
    %c0_150 = arith.constant 0 : index
    %c6_151 = arith.constant 6 : index
    %c0_152 = arith.constant 0 : index
    %425 = vector.load %arg18[%c0_150, %c6_151, %c0_152] : memref<2x24x256xf32, #tpu.memory_space<vmem>>, vector<2x16x256xf32>
    %426 = vector.shape_cast %425 : vector<2x16x256xf32> to vector<32x256xf32>
    %c16_i32_153 = arith.constant 16 : i32
    %427 = tpu.dynamic_rotate %426 by %c16_i32_153 dim 1 : vector<32x256xf32>, i32 -> vector<32x256xf32>
    %428 = vector.extract_strided_slice %427 {offsets = [0, 0], sizes = [32, 128], strides = [1, 1]} : vector<32x256xf32> to vector<32x128xf32>
    %429 = vector.extract_strided_slice %302 {offsets = [20, 0], sizes = [1, 128], strides = [1, 1]} : vector<25x128xf32> to vector<1x128xf32>
    %430 = vector.broadcast %429 : vector<1x128xf32> to vector<32x128xf32>
    %431 = arith.mulf %428, %430 : vector<32x128xf32>
    %432 = arith.addf %407, %431 : vector<32x128xf32>
    %c8_i32_154 = arith.constant 8 : i32
    %433 = tpu.dynamic_rotate %426 by %c8_i32_154 dim 1 : vector<32x256xf32>, i32 -> vector<32x256xf32>
    %434 = vector.extract_strided_slice %433 {offsets = [0, 0], sizes = [32, 128], strides = [1, 1]} : vector<32x256xf32> to vector<32x128xf32>
    %435 = vector.extract_strided_slice %302 {offsets = [21, 0], sizes = [1, 128], strides = [1, 1]} : vector<25x128xf32> to vector<1x128xf32>
    %436 = vector.broadcast %435 : vector<1x128xf32> to vector<32x128xf32>
    %437 = arith.mulf %434, %436 : vector<32x128xf32>
    %438 = arith.addf %412, %437 : vector<32x128xf32>
    %439 = vector.extract_strided_slice %426 {offsets = [0, 0], sizes = [32, 128], strides = [1, 1]} : vector<32x256xf32> to vector<32x128xf32>
    %440 = vector.extract_strided_slice %302 {offsets = [22, 0], sizes = [1, 128], strides = [1, 1]} : vector<25x128xf32> to vector<1x128xf32>
    %441 = vector.broadcast %440 : vector<1x128xf32> to vector<32x128xf32>
    %442 = arith.mulf %439, %441 : vector<32x128xf32>
    %443 = arith.addf %418, %442 : vector<32x128xf32>
    %c248_i32_155 = arith.constant 248 : i32
    %444 = tpu.dynamic_rotate %426 by %c248_i32_155 dim 1 : vector<32x256xf32>, i32 -> vector<32x256xf32>
    %445 = vector.extract_strided_slice %444 {offsets = [0, 0], sizes = [32, 128], strides = [1, 1]} : vector<32x256xf32> to vector<32x128xf32>
    %446 = vector.extract_strided_slice %302 {offsets = [23, 0], sizes = [1, 128], strides = [1, 1]} : vector<25x128xf32> to vector<1x128xf32>
    %447 = vector.broadcast %446 : vector<1x128xf32> to vector<32x128xf32>
    %448 = arith.mulf %445, %447 : vector<32x128xf32>
    %449 = arith.addf %424, %448 : vector<32x128xf32>
    %c240_i32_156 = arith.constant 240 : i32
    %450 = tpu.dynamic_rotate %426 by %c240_i32_156 dim 1 : vector<32x256xf32>, i32 -> vector<32x256xf32>
    %451 = vector.extract_strided_slice %450 {offsets = [0, 0], sizes = [32, 128], strides = [1, 1]} : vector<32x256xf32> to vector<32x128xf32>
    %452 = vector.extract_strided_slice %302 {offsets = [24, 0], sizes = [1, 128], strides = [1, 1]} : vector<25x128xf32> to vector<1x128xf32>
    %453 = vector.broadcast %452 : vector<1x128xf32> to vector<32x128xf32>
    %454 = arith.mulf %451, %453 : vector<32x128xf32>
    %455 = arith.addf %432, %454 : vector<32x128xf32>
    %456 = arith.addf %455, %438 : vector<32x128xf32>
    %457 = arith.addf %456, %443 : vector<32x128xf32>
    %458 = arith.addf %457, %449 : vector<32x128xf32>
    %c0_157 = arith.constant 0 : index
    %c0_158 = arith.constant 0 : index
    %459 = vector.load %arg10[%c0_157, %c0_158] : memref<128x128xf32, #tpu.memory_space<vmem>>, vector<128x128xf32>
    %cst_159 = arith.constant dense<0.000000e+00> : vector<32x128xf32>
    %460 = tpu.matmul %458, %459, %cst_159 {dimension_numbers = #tpu.dot_dimension_numbers<[1], [0], [0], [1], [0, 0, 1, 1], [], []>} : vector<32x128xf32>, vector<128x128xf32>, vector<32x128xf32> -> vector<32x128xf32>
    %cst_160 = arith.constant dense<0.000000e+00> : vector<128xf32>
    %461 = vector.multi_reduction <add>, %460, %cst_160 [0] : vector<32x128xf32> to vector<128xf32>
    %462 = vector.shape_cast %461 : vector<128xf32> to vector<1x128xf32>
    %463 = arith.mulf %460, %460 : vector<32x128xf32>
    %cst_161 = arith.constant dense<0.000000e+00> : vector<128xf32>
    %464 = vector.multi_reduction <add>, %463, %cst_161 [0] : vector<32x128xf32> to vector<128xf32>
    %465 = vector.shape_cast %464 : vector<128xf32> to vector<1x128xf32>
    %466 = tpu.concatenate %462, %465 in 0 : vector<1x128xf32>, vector<1x128xf32> -> vector<2x128xf32>
    %c0_162 = arith.constant 0 : index
    %c0_163 = arith.constant 0 : index
    %467 = vector.load %arg4[%c0_162, %c0_163] : memref<128x128xf32, #tpu.memory_space<vmem>>, vector<128x128xf32>
    %cst_164 = arith.constant dense<0.000000e+00> : vector<2x128xf32>
    %468 = tpu.matmul %466, %467, %cst_164 {dimension_numbers = #tpu.dot_dimension_numbers<[1], [0], [0], [1], [0, 0, 1, 1], [], []>} : vector<2x128xf32>, vector<128x128xf32>, vector<2x128xf32> -> vector<2x128xf32>
    %cst_165 = arith.constant 0.001953125 : f32
    %469 = vector.broadcast %cst_165 : f32 to vector<2x128xf32>
    %470 = arith.mulf %468, %469 : vector<2x128xf32>
    %471 = vector.extract_strided_slice %470 {offsets = [0, 0], sizes = [1, 128], strides = [1, 1]} : vector<2x128xf32> to vector<1x128xf32>
    %472 = vector.extract_strided_slice %470 {offsets = [1, 0], sizes = [1, 128], strides = [1, 1]} : vector<2x128xf32> to vector<1x128xf32>
    %473 = arith.mulf %471, %471 : vector<1x128xf32>
    %474 = arith.subf %472, %473 : vector<1x128xf32>
    %cst_166 = arith.constant 0.000000e+00 : f32
    %475 = vector.broadcast %cst_166 : f32 to vector<1x128xf32>
    %476 = arith.maximumf %474, %475 : vector<1x128xf32>
    %cst_167 = arith.constant 9.99999974E-6 : f32
    %477 = vector.broadcast %cst_167 : f32 to vector<1x128xf32>
    %478 = arith.addf %476, %477 : vector<1x128xf32>
    %479 = math.rsqrt %478 : vector<1x128xf32>
    %480 = vector.broadcast %479 : vector<1x128xf32> to vector<32x128xf32>
    %481 = arith.mulf %460, %480 : vector<32x128xf32>
    %482 = arith.mulf %471, %479 : vector<1x128xf32>
    %483 = vector.broadcast %482 : vector<1x128xf32> to vector<32x128xf32>
    %484 = arith.subf %481, %483 : vector<32x128xf32>
    %cst_168 = arith.constant 0.000000e+00 : f32
    %485 = vector.broadcast %cst_168 : f32 to vector<32x128xf32>
    %486 = arith.maximumf %484, %485 : vector<32x128xf32>
    %487 = vector.shape_cast %486 : vector<32x128xf32> to vector<2x16x128xf32>
    %c0_169 = arith.constant 0 : index
    %c8_170 = arith.constant 8 : index
    %c0_171 = arith.constant 0 : index
    %488 = vector.load %arg19[%c0_169, %c8_170, %c0_171] : memref<2x32x256xf32, #tpu.memory_space<vmem>>, vector<2x16x128xf32>
    tpu.vector_store %arg19[%c0_169, %c8_170, %c0_171], %487 {strides = array<i32>} : memref<2x32x256xf32, #tpu.memory_space<vmem>>, vector<2x16x128xf32>,
    %c0_172 = arith.constant 0 : index
    %c6_173 = arith.constant 6 : index
    %c0_174 = arith.constant 0 : index
    %489 = vector.load %arg19[%c0_172, %c6_173, %c0_174] : memref<2x32x256xf32, #tpu.memory_space<vmem>>, vector<2x16x256xf32>
    %490 = vector.shape_cast %489 : vector<2x16x256xf32> to vector<32x256xf32>
    %c16_i32_175 = arith.constant 16 : i32
    %491 = tpu.dynamic_rotate %490 by %c16_i32_175 dim 1 : vector<32x256xf32>, i32 -> vector<32x256xf32>
    %492 = vector.extract_strided_slice %491 {offsets = [0, 0], sizes = [32, 128], strides = [1, 1]} : vector<32x256xf32> to vector<32x128xf32>
    %493 = vector.extract_strided_slice %303 {offsets = [0, 0], sizes = [1, 128], strides = [1, 1]} : vector<25x128xf32> to vector<1x128xf32>
    %494 = vector.broadcast %493 : vector<1x128xf32> to vector<32x128xf32>
    %495 = arith.mulf %492, %494 : vector<32x128xf32>
    %c8_i32_176 = arith.constant 8 : i32
    %496 = tpu.dynamic_rotate %490 by %c8_i32_176 dim 1 : vector<32x256xf32>, i32 -> vector<32x256xf32>
    %497 = vector.extract_strided_slice %496 {offsets = [0, 0], sizes = [32, 128], strides = [1, 1]} : vector<32x256xf32> to vector<32x128xf32>
    %498 = vector.extract_strided_slice %303 {offsets = [1, 0], sizes = [1, 128], strides = [1, 1]} : vector<25x128xf32> to vector<1x128xf32>
    %499 = vector.broadcast %498 : vector<1x128xf32> to vector<32x128xf32>
    %500 = arith.mulf %497, %499 : vector<32x128xf32>
    %501 = vector.extract_strided_slice %490 {offsets = [0, 0], sizes = [32, 128], strides = [1, 1]} : vector<32x256xf32> to vector<32x128xf32>
    %502 = vector.extract_strided_slice %303 {offsets = [2, 0], sizes = [1, 128], strides = [1, 1]} : vector<25x128xf32> to vector<1x128xf32>
    %503 = vector.broadcast %502 : vector<1x128xf32> to vector<32x128xf32>
    %504 = arith.mulf %501, %503 : vector<32x128xf32>
    %c248_i32_177 = arith.constant 248 : i32
    %505 = tpu.dynamic_rotate %490 by %c248_i32_177 dim 1 : vector<32x256xf32>, i32 -> vector<32x256xf32>
    %506 = vector.extract_strided_slice %505 {offsets = [0, 0], sizes = [32, 128], strides = [1, 1]} : vector<32x256xf32> to vector<32x128xf32>
    %507 = vector.extract_strided_slice %303 {offsets = [3, 0], sizes = [1, 128], strides = [1, 1]} : vector<25x128xf32> to vector<1x128xf32>
    %508 = vector.broadcast %507 : vector<1x128xf32> to vector<32x128xf32>
    %509 = arith.mulf %506, %508 : vector<32x128xf32>
    %c240_i32_178 = arith.constant 240 : i32
    %510 = tpu.dynamic_rotate %490 by %c240_i32_178 dim 1 : vector<32x256xf32>, i32 -> vector<32x256xf32>
    %511 = vector.extract_strided_slice %510 {offsets = [0, 0], sizes = [32, 128], strides = [1, 1]} : vector<32x256xf32> to vector<32x128xf32>
    %512 = vector.extract_strided_slice %303 {offsets = [4, 0], sizes = [1, 128], strides = [1, 1]} : vector<25x128xf32> to vector<1x128xf32>
    %513 = vector.broadcast %512 : vector<1x128xf32> to vector<32x128xf32>
    %514 = arith.mulf %511, %513 : vector<32x128xf32>
    %515 = arith.addf %495, %514 : vector<32x128xf32>
    %c0_179 = arith.constant 0 : index
    %c7_180 = arith.constant 7 : index
    %c0_181 = arith.constant 0 : index
    %516 = vector.load %arg19[%c0_179, %c7_180, %c0_181] : memref<2x32x256xf32, #tpu.memory_space<vmem>>, vector<2x16x256xf32>
    %517 = vector.shape_cast %516 : vector<2x16x256xf32> to vector<32x256xf32>
    %c16_i32_182 = arith.constant 16 : i32
    %518 = tpu.dynamic_rotate %517 by %c16_i32_182 dim 1 : vector<32x256xf32>, i32 -> vector<32x256xf32>
    %519 = vector.extract_strided_slice %518 {offsets = [0, 0], sizes = [32, 128], strides = [1, 1]} : vector<32x256xf32> to vector<32x128xf32>
    %520 = vector.extract_strided_slice %303 {offsets = [5, 0], sizes = [1, 128], strides = [1, 1]} : vector<25x128xf32> to vector<1x128xf32>
    %521 = vector.broadcast %520 : vector<1x128xf32> to vector<32x128xf32>
    %522 = arith.mulf %519, %521 : vector<32x128xf32>
    %523 = arith.addf %500, %522 : vector<32x128xf32>
    %c8_i32_183 = arith.constant 8 : i32
    %524 = tpu.dynamic_rotate %517 by %c8_i32_183 dim 1 : vector<32x256xf32>, i32 -> vector<32x256xf32>
    %525 = vector.extract_strided_slice %524 {offsets = [0, 0], sizes = [32, 128], strides = [1, 1]} : vector<32x256xf32> to vector<32x128xf32>
    %526 = vector.extract_strided_slice %303 {offsets = [6, 0], sizes = [1, 128], strides = [1, 1]} : vector<25x128xf32> to vector<1x128xf32>
    %527 = vector.broadcast %526 : vector<1x128xf32> to vector<32x128xf32>
    %528 = arith.mulf %525, %527 : vector<32x128xf32>
    %529 = arith.addf %504, %528 : vector<32x128xf32>
    %530 = vector.extract_strided_slice %517 {offsets = [0, 0], sizes = [32, 128], strides = [1, 1]} : vector<32x256xf32> to vector<32x128xf32>
    %531 = vector.extract_strided_slice %303 {offsets = [7, 0], sizes = [1, 128], strides = [1, 1]} : vector<25x128xf32> to vector<1x128xf32>
    %532 = vector.broadcast %531 : vector<1x128xf32> to vector<32x128xf32>
    %533 = arith.mulf %530, %532 : vector<32x128xf32>
    %534 = arith.addf %509, %533 : vector<32x128xf32>
    %c248_i32_184 = arith.constant 248 : i32
    %535 = tpu.dynamic_rotate %517 by %c248_i32_184 dim 1 : vector<32x256xf32>, i32 -> vector<32x256xf32>
    %536 = vector.extract_strided_slice %535 {offsets = [0, 0], sizes = [32, 128], strides = [1, 1]} : vector<32x256xf32> to vector<32x128xf32>
    %537 = vector.extract_strided_slice %303 {offsets = [8, 0], sizes = [1, 128], strides = [1, 1]} : vector<25x128xf32> to vector<1x128xf32>
    %538 = vector.broadcast %537 : vector<1x128xf32> to vector<32x128xf32>
    %539 = arith.mulf %536, %538 : vector<32x128xf32>
    %540 = arith.addf %515, %539 : vector<32x128xf32>
    %c240_i32_185 = arith.constant 240 : i32
    %541 = tpu.dynamic_rotate %517 by %c240_i32_185 dim 1 : vector<32x256xf32>, i32 -> vector<32x256xf32>
    %542 = vector.extract_strided_slice %541 {offsets = [0, 0], sizes = [32, 128], strides = [1, 1]} : vector<32x256xf32> to vector<32x128xf32>
    %543 = vector.extract_strided_slice %303 {offsets = [9, 0], sizes = [1, 128], strides = [1, 1]} : vector<25x128xf32> to vector<1x128xf32>
    %544 = vector.broadcast %543 : vector<1x128xf32> to vector<32x128xf32>
    %545 = arith.mulf %542, %544 : vector<32x128xf32>
    %546 = arith.addf %523, %545 : vector<32x128xf32>
    %c0_186 = arith.constant 0 : index
    %c8_187 = arith.constant 8 : index
    %c0_188 = arith.constant 0 : index
    %547 = vector.load %arg19[%c0_186, %c8_187, %c0_188] : memref<2x32x256xf32, #tpu.memory_space<vmem>>, vector<2x16x256xf32>
    %548 = vector.shape_cast %547 : vector<2x16x256xf32> to vector<32x256xf32>
    %c16_i32_189 = arith.constant 16 : i32
    %549 = tpu.dynamic_rotate %548 by %c16_i32_189 dim 1 : vector<32x256xf32>, i32 -> vector<32x256xf32>
    %550 = vector.extract_strided_slice %549 {offsets = [0, 0], sizes = [32, 128], strides = [1, 1]} : vector<32x256xf32> to vector<32x128xf32>
    %551 = vector.extract_strided_slice %303 {offsets = [10, 0], sizes = [1, 128], strides = [1, 1]} : vector<25x128xf32> to vector<1x128xf32>
    %552 = vector.broadcast %551 : vector<1x128xf32> to vector<32x128xf32>
    %553 = arith.mulf %550, %552 : vector<32x128xf32>
    %554 = arith.addf %529, %553 : vector<32x128xf32>
    %c8_i32_190 = arith.constant 8 : i32
    %555 = tpu.dynamic_rotate %548 by %c8_i32_190 dim 1 : vector<32x256xf32>, i32 -> vector<32x256xf32>
    %556 = vector.extract_strided_slice %555 {offsets = [0, 0], sizes = [32, 128], strides = [1, 1]} : vector<32x256xf32> to vector<32x128xf32>
    %557 = vector.extract_strided_slice %303 {offsets = [11, 0], sizes = [1, 128], strides = [1, 1]} : vector<25x128xf32> to vector<1x128xf32>
    %558 = vector.broadcast %557 : vector<1x128xf32> to vector<32x128xf32>
    %559 = arith.mulf %556, %558 : vector<32x128xf32>
    %560 = arith.addf %534, %559 : vector<32x128xf32>
    %561 = vector.extract_strided_slice %548 {offsets = [0, 0], sizes = [32, 128], strides = [1, 1]} : vector<32x256xf32> to vector<32x128xf32>
    %562 = vector.extract_strided_slice %303 {offsets = [12, 0], sizes = [1, 128], strides = [1, 1]} : vector<25x128xf32> to vector<1x128xf32>
    %563 = vector.broadcast %562 : vector<1x128xf32> to vector<32x128xf32>
    %564 = arith.mulf %561, %563 : vector<32x128xf32>
    %565 = arith.addf %540, %564 : vector<32x128xf32>
    %c248_i32_191 = arith.constant 248 : i32
    %566 = tpu.dynamic_rotate %548 by %c248_i32_191 dim 1 : vector<32x256xf32>, i32 -> vector<32x256xf32>
    %567 = vector.extract_strided_slice %566 {offsets = [0, 0], sizes = [32, 128], strides = [1, 1]} : vector<32x256xf32> to vector<32x128xf32>
    %568 = vector.extract_strided_slice %303 {offsets = [13, 0], sizes = [1, 128], strides = [1, 1]} : vector<25x128xf32> to vector<1x128xf32>
    %569 = vector.broadcast %568 : vector<1x128xf32> to vector<32x128xf32>
    %570 = arith.mulf %567, %569 : vector<32x128xf32>
    %571 = arith.addf %546, %570 : vector<32x128xf32>
    %c240_i32_192 = arith.constant 240 : i32
    %572 = tpu.dynamic_rotate %548 by %c240_i32_192 dim 1 : vector<32x256xf32>, i32 -> vector<32x256xf32>
    %573 = vector.extract_strided_slice %572 {offsets = [0, 0], sizes = [32, 128], strides = [1, 1]} : vector<32x256xf32> to vector<32x128xf32>
    %574 = vector.extract_strided_slice %303 {offsets = [14, 0], sizes = [1, 128], strides = [1, 1]} : vector<25x128xf32> to vector<1x128xf32>
    %575 = vector.broadcast %574 : vector<1x128xf32> to vector<32x128xf32>
    %576 = arith.mulf %573, %575 : vector<32x128xf32>
    %577 = arith.addf %554, %576 : vector<32x128xf32>
    %c0_193 = arith.constant 0 : index
    %c9_194 = arith.constant 9 : index
    %c0_195 = arith.constant 0 : index
    %578 = vector.load %arg19[%c0_193, %c9_194, %c0_195] : memref<2x32x256xf32, #tpu.memory_space<vmem>>, vector<2x16x256xf32>
    %579 = vector.shape_cast %578 : vector<2x16x256xf32> to vector<32x256xf32>
    %c16_i32_196 = arith.constant 16 : i32
    %580 = tpu.dynamic_rotate %579 by %c16_i32_196 dim 1 : vector<32x256xf32>, i32 -> vector<32x256xf32>
    %581 = vector.extract_strided_slice %580 {offsets = [0, 0], sizes = [32, 128], strides = [1, 1]} : vector<32x256xf32> to vector<32x128xf32>
    %582 = vector.extract_strided_slice %303 {offsets = [15, 0], sizes = [1, 128], strides = [1, 1]} : vector<25x128xf32> to vector<1x128xf32>
    %583 = vector.broadcast %582 : vector<1x128xf32> to vector<32x128xf32>
    %584 = arith.mulf %581, %583 : vector<32x128xf32>
    %585 = arith.addf %560, %584 : vector<32x128xf32>
    %c8_i32_197 = arith.constant 8 : i32
    %586 = tpu.dynamic_rotate %579 by %c8_i32_197 dim 1 : vector<32x256xf32>, i32 -> vector<32x256xf32>
    %587 = vector.extract_strided_slice %586 {offsets = [0, 0], sizes = [32, 128], strides = [1, 1]} : vector<32x256xf32> to vector<32x128xf32>
    %588 = vector.extract_strided_slice %303 {offsets = [16, 0], sizes = [1, 128], strides = [1, 1]} : vector<25x128xf32> to vector<1x128xf32>
    %589 = vector.broadcast %588 : vector<1x128xf32> to vector<32x128xf32>
    %590 = arith.mulf %587, %589 : vector<32x128xf32>
    %591 = arith.addf %565, %590 : vector<32x128xf32>
    %592 = vector.extract_strided_slice %579 {offsets = [0, 0], sizes = [32, 128], strides = [1, 1]} : vector<32x256xf32> to vector<32x128xf32>
    %593 = vector.extract_strided_slice %303 {offsets = [17, 0], sizes = [1, 128], strides = [1, 1]} : vector<25x128xf32> to vector<1x128xf32>
    %594 = vector.broadcast %593 : vector<1x128xf32> to vector<32x128xf32>
    %595 = arith.mulf %592, %594 : vector<32x128xf32>
    %596 = arith.addf %571, %595 : vector<32x128xf32>
    %c248_i32_198 = arith.constant 248 : i32
    %597 = tpu.dynamic_rotate %579 by %c248_i32_198 dim 1 : vector<32x256xf32>, i32 -> vector<32x256xf32>
    %598 = vector.extract_strided_slice %597 {offsets = [0, 0], sizes = [32, 128], strides = [1, 1]} : vector<32x256xf32> to vector<32x128xf32>
    %599 = vector.extract_strided_slice %303 {offsets = [18, 0], sizes = [1, 128], strides = [1, 1]} : vector<25x128xf32> to vector<1x128xf32>
    %600 = vector.broadcast %599 : vector<1x128xf32> to vector<32x128xf32>
    %601 = arith.mulf %598, %600 : vector<32x128xf32>
    %602 = arith.addf %577, %601 : vector<32x128xf32>
    %c240_i32_199 = arith.constant 240 : i32
    %603 = tpu.dynamic_rotate %579 by %c240_i32_199 dim 1 : vector<32x256xf32>, i32 -> vector<32x256xf32>
    %604 = vector.extract_strided_slice %603 {offsets = [0, 0], sizes = [32, 128], strides = [1, 1]} : vector<32x256xf32> to vector<32x128xf32>
    %605 = vector.extract_strided_slice %303 {offsets = [19, 0], sizes = [1, 128], strides = [1, 1]} : vector<25x128xf32> to vector<1x128xf32>
    %606 = vector.broadcast %605 : vector<1x128xf32> to vector<32x128xf32>
    %607 = arith.mulf %604, %606 : vector<32x128xf32>
    %608 = arith.addf %585, %607 : vector<32x128xf32>
    %c0_200 = arith.constant 0 : index
    %c10 = arith.constant 10 : index
    %c0_201 = arith.constant 0 : index
    %609 = vector.load %arg19[%c0_200, %c10, %c0_201] : memref<2x32x256xf32, #tpu.memory_space<vmem>>, vector<2x16x256xf32>
    %610 = vector.shape_cast %609 : vector<2x16x256xf32> to vector<32x256xf32>
    %c16_i32_202 = arith.constant 16 : i32
    %611 = tpu.dynamic_rotate %610 by %c16_i32_202 dim 1 : vector<32x256xf32>, i32 -> vector<32x256xf32>
    %612 = vector.extract_strided_slice %611 {offsets = [0, 0], sizes = [32, 128], strides = [1, 1]} : vector<32x256xf32> to vector<32x128xf32>
    %613 = vector.extract_strided_slice %303 {offsets = [20, 0], sizes = [1, 128], strides = [1, 1]} : vector<25x128xf32> to vector<1x128xf32>
    %614 = vector.broadcast %613 : vector<1x128xf32> to vector<32x128xf32>
    %615 = arith.mulf %612, %614 : vector<32x128xf32>
    %616 = arith.addf %591, %615 : vector<32x128xf32>
    %c8_i32_203 = arith.constant 8 : i32
    %617 = tpu.dynamic_rotate %610 by %c8_i32_203 dim 1 : vector<32x256xf32>, i32 -> vector<32x256xf32>
    %618 = vector.extract_strided_slice %617 {offsets = [0, 0], sizes = [32, 128], strides = [1, 1]} : vector<32x256xf32> to vector<32x128xf32>
    %619 = vector.extract_strided_slice %303 {offsets = [21, 0], sizes = [1, 128], strides = [1, 1]} : vector<25x128xf32> to vector<1x128xf32>
    %620 = vector.broadcast %619 : vector<1x128xf32> to vector<32x128xf32>
    %621 = arith.mulf %618, %620 : vector<32x128xf32>
    %622 = arith.addf %596, %621 : vector<32x128xf32>
    %623 = vector.extract_strided_slice %610 {offsets = [0, 0], sizes = [32, 128], strides = [1, 1]} : vector<32x256xf32> to vector<32x128xf32>
    %624 = vector.extract_strided_slice %303 {offsets = [22, 0], sizes = [1, 128], strides = [1, 1]} : vector<25x128xf32> to vector<1x128xf32>
    %625 = vector.broadcast %624 : vector<1x128xf32> to vector<32x128xf32>
    %626 = arith.mulf %623, %625 : vector<32x128xf32>
    %627 = arith.addf %602, %626 : vector<32x128xf32>
    %c248_i32_204 = arith.constant 248 : i32
    %628 = tpu.dynamic_rotate %610 by %c248_i32_204 dim 1 : vector<32x256xf32>, i32 -> vector<32x256xf32>
    %629 = vector.extract_strided_slice %628 {offsets = [0, 0], sizes = [32, 128], strides = [1, 1]} : vector<32x256xf32> to vector<32x128xf32>
    %630 = vector.extract_strided_slice %303 {offsets = [23, 0], sizes = [1, 128], strides = [1, 1]} : vector<25x128xf32> to vector<1x128xf32>
    %631 = vector.broadcast %630 : vector<1x128xf32> to vector<32x128xf32>
    %632 = arith.mulf %629, %631 : vector<32x128xf32>
    %633 = arith.addf %608, %632 : vector<32x128xf32>
    %c240_i32_205 = arith.constant 240 : i32
    %634 = tpu.dynamic_rotate %610 by %c240_i32_205 dim 1 : vector<32x256xf32>, i32 -> vector<32x256xf32>
    %635 = vector.extract_strided_slice %634 {offsets = [0, 0], sizes = [32, 128], strides = [1, 1]} : vector<32x256xf32> to vector<32x128xf32>
    %636 = vector.extract_strided_slice %303 {offsets = [24, 0], sizes = [1, 128], strides = [1, 1]} : vector<25x128xf32> to vector<1x128xf32>
    %637 = vector.broadcast %636 : vector<1x128xf32> to vector<32x128xf32>
    %638 = arith.mulf %635, %637 : vector<32x128xf32>
    %639 = arith.addf %616, %638 : vector<32x128xf32>
    %640 = arith.addf %639, %622 : vector<32x128xf32>
    %641 = arith.addf %640, %627 : vector<32x128xf32>
    %642 = arith.addf %641, %633 : vector<32x128xf32>
    %c0_206 = arith.constant 0 : index
    %c0_207 = arith.constant 0 : index
    %643 = vector.load %arg12[%c0_206, %c0_207] : memref<128x128xf32, #tpu.memory_space<vmem>>, vector<128x128xf32>
    %cst_208 = arith.constant dense<0.000000e+00> : vector<32x128xf32>
    %644 = tpu.matmul %642, %643, %cst_208 {dimension_numbers = #tpu.dot_dimension_numbers<[1], [0], [0], [1], [0, 0, 1, 1], [], []>} : vector<32x128xf32>, vector<128x128xf32>, vector<32x128xf32> -> vector<32x128xf32>
    %cst_209 = arith.constant dense<0.000000e+00> : vector<128xf32>
    %645 = vector.multi_reduction <add>, %644, %cst_209 [0] : vector<32x128xf32> to vector<128xf32>
    %646 = vector.shape_cast %645 : vector<128xf32> to vector<1x128xf32>
    %647 = arith.mulf %644, %644 : vector<32x128xf32>
    %cst_210 = arith.constant dense<0.000000e+00> : vector<128xf32>
    %648 = vector.multi_reduction <add>, %647, %cst_210 [0] : vector<32x128xf32> to vector<128xf32>
    %649 = vector.shape_cast %648 : vector<128xf32> to vector<1x128xf32>
    %650 = tpu.concatenate %646, %649 in 0 : vector<1x128xf32>, vector<1x128xf32> -> vector<2x128xf32>
    %c0_211 = arith.constant 0 : index
    %c0_212 = arith.constant 0 : index
    %651 = vector.load %arg4[%c0_211, %c0_212] : memref<128x128xf32, #tpu.memory_space<vmem>>, vector<128x128xf32>
    %cst_213 = arith.constant dense<0.000000e+00> : vector<2x128xf32>
    %652 = tpu.matmul %650, %651, %cst_213 {dimension_numbers = #tpu.dot_dimension_numbers<[1], [0], [0], [1], [0, 0, 1, 1], [], []>} : vector<2x128xf32>, vector<128x128xf32>, vector<2x128xf32> -> vector<2x128xf32>
    %cst_214 = arith.constant 0.001953125 : f32
    %653 = vector.broadcast %cst_214 : f32 to vector<2x128xf32>
    %654 = arith.mulf %652, %653 : vector<2x128xf32>
    %655 = vector.extract_strided_slice %654 {offsets = [0, 0], sizes = [1, 128], strides = [1, 1]} : vector<2x128xf32> to vector<1x128xf32>
    %656 = vector.extract_strided_slice %654 {offsets = [1, 0], sizes = [1, 128], strides = [1, 1]} : vector<2x128xf32> to vector<1x128xf32>
    %657 = arith.mulf %655, %655 : vector<1x128xf32>
    %658 = arith.subf %656, %657 : vector<1x128xf32>
    %cst_215 = arith.constant 0.000000e+00 : f32
    %659 = vector.broadcast %cst_215 : f32 to vector<1x128xf32>
    %660 = arith.maximumf %658, %659 : vector<1x128xf32>
    %cst_216 = arith.constant 9.99999974E-6 : f32
    %661 = vector.broadcast %cst_216 : f32 to vector<1x128xf32>
    %662 = arith.addf %660, %661 : vector<1x128xf32>
    %663 = math.rsqrt %662 : vector<1x128xf32>
    %664 = vector.broadcast %304 : f32 to vector<1x128xf32>
    %665 = arith.mulf %663, %664 : vector<1x128xf32>
    %666 = vector.broadcast %665 : vector<1x128xf32> to vector<32x128xf32>
    %667 = arith.mulf %644, %666 : vector<32x128xf32>
    %668 = arith.mulf %655, %665 : vector<1x128xf32>
    %669 = vector.broadcast %668 : vector<1x128xf32> to vector<32x128xf32>
    %670 = arith.subf %667, %669 : vector<32x128xf32>
    %671 = arith.addf %301, %670 : vector<32x128xf32>
    %c0_217 = arith.constant 0 : index
    %c0_218 = arith.constant 0 : index
    %672 = vector.load %arg13[%c0_217, %c0_218] : memref<9x128xf32, #tpu.memory_space<vmem>>, vector<9x128xf32>
    %c6_219 = arith.constant 6 : index
    %673 = memref.load %arg0[%c6_219] : memref<8xf32, #tpu.memory_space<smem>>
    %c0_220 = arith.constant 0 : index
    %c2_221 = arith.constant 2 : index
    %c0_222 = arith.constant 0 : index
    %674 = vector.load %arg18[%c0_220, %c2_221, %c0_222] : memref<2x24x256xf32, #tpu.memory_space<vmem>>, vector<2x16x256xf32>
    %675 = vector.shape_cast %674 : vector<2x16x256xf32> to vector<32x256xf32>
    %c16_i32_223 = arith.constant 16 : i32
    %676 = tpu.dynamic_rotate %675 by %c16_i32_223 dim 1 : vector<32x256xf32>, i32 -> vector<32x256xf32>
    %677 = vector.extract_strided_slice %676 {offsets = [0, 0], sizes = [32, 128], strides = [1, 1]} : vector<32x256xf32> to vector<32x128xf32>
    %678 = vector.extract_strided_slice %672 {offsets = [0, 0], sizes = [1, 128], strides = [1, 1]} : vector<9x128xf32> to vector<1x128xf32>
    %679 = vector.broadcast %678 : vector<1x128xf32> to vector<32x128xf32>
    %680 = arith.mulf %677, %679 : vector<32x128xf32>
    %681 = vector.extract_strided_slice %675 {offsets = [0, 0], sizes = [32, 128], strides = [1, 1]} : vector<32x256xf32> to vector<32x128xf32>
    %682 = vector.extract_strided_slice %672 {offsets = [1, 0], sizes = [1, 128], strides = [1, 1]} : vector<9x128xf32> to vector<1x128xf32>
    %683 = vector.broadcast %682 : vector<1x128xf32> to vector<32x128xf32>
    %684 = arith.mulf %681, %683 : vector<32x128xf32>
    %c240_i32_224 = arith.constant 240 : i32
    %685 = tpu.dynamic_rotate %675 by %c240_i32_224 dim 1 : vector<32x256xf32>, i32 -> vector<32x256xf32>
    %686 = vector.extract_strided_slice %685 {offsets = [0, 0], sizes = [32, 128], strides = [1, 1]} : vector<32x256xf32> to vector<32x128xf32>
    %687 = vector.extract_strided_slice %672 {offsets = [2, 0], sizes = [1, 128], strides = [1, 1]} : vector<9x128xf32> to vector<1x128xf32>
    %688 = vector.broadcast %687 : vector<1x128xf32> to vector<32x128xf32>
    %689 = arith.mulf %686, %688 : vector<32x128xf32>
    %c0_225 = arith.constant 0 : index
    %c4_226 = arith.constant 4 : index
    %c0_227 = arith.constant 0 : index
    %690 = vector.load %arg18[%c0_225, %c4_226, %c0_227] : memref<2x24x256xf32, #tpu.memory_space<vmem>>, vector<2x16x256xf32>
    %691 = vector.shape_cast %690 : vector<2x16x256xf32> to vector<32x256xf32>
    %c16_i32_228 = arith.constant 16 : i32
    %692 = tpu.dynamic_rotate %691 by %c16_i32_228 dim 1 : vector<32x256xf32>, i32 -> vector<32x256xf32>
    %693 = vector.extract_strided_slice %692 {offsets = [0, 0], sizes = [32, 128], strides = [1, 1]} : vector<32x256xf32> to vector<32x128xf32>
    %694 = vector.extract_strided_slice %672 {offsets = [3, 0], sizes = [1, 128], strides = [1, 1]} : vector<9x128xf32> to vector<1x128xf32>
    %695 = vector.broadcast %694 : vector<1x128xf32> to vector<32x128xf32>
    %696 = arith.mulf %693, %695 : vector<32x128xf32>
    %697 = vector.extract_strided_slice %691 {offsets = [0, 0], sizes = [32, 128], strides = [1, 1]} : vector<32x256xf32> to vector<32x128xf32>
    %698 = vector.extract_strided_slice %672 {offsets = [4, 0], sizes = [1, 128], strides = [1, 1]} : vector<9x128xf32> to vector<1x128xf32>
    %699 = vector.broadcast %698 : vector<1x128xf32> to vector<32x128xf32>
    %700 = arith.mulf %697, %699 : vector<32x128xf32>
    %701 = arith.addf %680, %700 : vector<32x128xf32>
    %c240_i32_229 = arith.constant 240 : i32
    %702 = tpu.dynamic_rotate %691 by %c240_i32_229 dim 1 : vector<32x256xf32>, i32 -> vector<32x256xf32>
    %703 = vector.extract_strided_slice %702 {offsets = [0, 0], sizes = [32, 128], strides = [1, 1]} : vector<32x256xf32> to vector<32x128xf32>
    %704 = vector.extract_strided_slice %672 {offsets = [5, 0], sizes = [1, 128], strides = [1, 1]} : vector<9x128xf32> to vector<1x128xf32>
    %705 = vector.broadcast %704 : vector<1x128xf32> to vector<32x128xf32>
    %706 = arith.mulf %703, %705 : vector<32x128xf32>
    %707 = arith.addf %684, %706 : vector<32x128xf32>
    %c0_230 = arith.constant 0 : index
    %c6_231 = arith.constant 6 : index
    %c0_232 = arith.constant 0 : index
    %708 = vector.load %arg18[%c0_230, %c6_231, %c0_232] : memref<2x24x256xf32, #tpu.memory_space<vmem>>, vector<2x16x256xf32>
    %709 = vector.shape_cast %708 : vector<2x16x256xf32> to vector<32x256xf32>
    %c16_i32_233 = arith.constant 16 : i32
    %710 = tpu.dynamic_rotate %709 by %c16_i32_233 dim 1 : vector<32x256xf32>, i32 -> vector<32x256xf32>
    %711 = vector.extract_strided_slice %710 {offsets = [0, 0], sizes = [32, 128], strides = [1, 1]} : vector<32x256xf32> to vector<32x128xf32>
    %712 = vector.extract_strided_slice %672 {offsets = [6, 0], sizes = [1, 128], strides = [1, 1]} : vector<9x128xf32> to vector<1x128xf32>
    %713 = vector.broadcast %712 : vector<1x128xf32> to vector<32x128xf32>
    %714 = arith.mulf %711, %713 : vector<32x128xf32>
    %715 = arith.addf %689, %714 : vector<32x128xf32>
    %716 = vector.extract_strided_slice %709 {offsets = [0, 0], sizes = [32, 128], strides = [1, 1]} : vector<32x256xf32> to vector<32x128xf32>
    %717 = vector.extract_strided_slice %672 {offsets = [7, 0], sizes = [1, 128], strides = [1, 1]} : vector<9x128xf32> to vector<1x128xf32>
    %718 = vector.broadcast %717 : vector<1x128xf32> to vector<32x128xf32>
    %719 = arith.mulf %716, %718 : vector<32x128xf32>
    %720 = arith.addf %696, %719 : vector<32x128xf32>
    %c240_i32_234 = arith.constant 240 : i32
    %721 = tpu.dynamic_rotate %709 by %c240_i32_234 dim 1 : vector<32x256xf32>, i32 -> vector<32x256xf32>
    %722 = vector.extract_strided_slice %721 {offsets = [0, 0], sizes = [32, 128], strides = [1, 1]} : vector<32x256xf32> to vector<32x128xf32>
    %723 = vector.extract_strided_slice %672 {offsets = [8, 0], sizes = [1, 128], strides = [1, 1]} : vector<9x128xf32> to vector<1x128xf32>
    %724 = vector.broadcast %723 : vector<1x128xf32> to vector<32x128xf32>
    %725 = arith.mulf %722, %724 : vector<32x128xf32>
    %726 = arith.addf %701, %725 : vector<32x128xf32>
    %727 = arith.addf %726, %707 : vector<32x128xf32>
    %728 = arith.addf %727, %715 : vector<32x128xf32>
    %729 = arith.addf %728, %720 : vector<32x128xf32>
    %c0_235 = arith.constant 0 : index
    %c0_236 = arith.constant 0 : index
    %730 = vector.load %arg14[%c0_235, %c0_236] : memref<128x128xf32, #tpu.memory_space<vmem>>, vector<128x128xf32>
    %cst_237 = arith.constant dense<0.000000e+00> : vector<32x128xf32>
    %731 = tpu.matmul %729, %730, %cst_237 {dimension_numbers = #tpu.dot_dimension_numbers<[1], [0], [0], [1], [0, 0, 1, 1], [], []>} : vector<32x128xf32>, vector<128x128xf32>, vector<32x128xf32> -> vector<32x128xf32>
    %cst_238 = arith.constant dense<0.000000e+00> : vector<128xf32>
    %732 = vector.multi_reduction <add>, %731, %cst_238 [0] : vector<32x128xf32> to vector<128xf32>
    %733 = vector.shape_cast %732 : vector<128xf32> to vector<1x128xf32>
    %734 = arith.mulf %731, %731 : vector<32x128xf32>
    %cst_239 = arith.constant dense<0.000000e+00> : vector<128xf32>
    %735 = vector.multi_reduction <add>, %734, %cst_239 [0] : vector<32x128xf32> to vector<128xf32>
    %736 = vector.shape_cast %735 : vector<128xf32> to vector<1x128xf32>
    %737 = tpu.concatenate %733, %736 in 0 : vector<1x128xf32>, vector<1x128xf32> -> vector<2x128xf32>
    %c0_240 = arith.constant 0 : index
    %c0_241 = arith.constant 0 : index
    %738 = vector.load %arg4[%c0_240, %c0_241] : memref<128x128xf32, #tpu.memory_space<vmem>>, vector<128x128xf32>
    %cst_242 = arith.constant dense<0.000000e+00> : vector<2x128xf32>
    %739 = tpu.matmul %737, %738, %cst_242 {dimension_numbers = #tpu.dot_dimension_numbers<[1], [0], [0], [1], [0, 0, 1, 1], [], []>} : vector<2x128xf32>, vector<128x128xf32>, vector<2x128xf32> -> vector<2x128xf32>
    %cst_243 = arith.constant 0.001953125 : f32
    %740 = vector.broadcast %cst_243 : f32 to vector<2x128xf32>
    %741 = arith.mulf %739, %740 : vector<2x128xf32>
    %742 = vector.extract_strided_slice %741 {offsets = [0, 0], sizes = [1, 128], strides = [1, 1]} : vector<2x128xf32> to vector<1x128xf32>
    %743 = vector.extract_strided_slice %741 {offsets = [1, 0], sizes = [1, 128], strides = [1, 1]} : vector<2x128xf32> to vector<1x128xf32>
    %744 = arith.mulf %742, %742 : vector<1x128xf32>
    %745 = arith.subf %743, %744 : vector<1x128xf32>
    %cst_244 = arith.constant 0.000000e+00 : f32
    %746 = vector.broadcast %cst_244 : f32 to vector<1x128xf32>
    %747 = arith.maximumf %745, %746 : vector<1x128xf32>
    %cst_245 = arith.constant 9.99999974E-6 : f32
    %748 = vector.broadcast %cst_245 : f32 to vector<1x128xf32>
    %749 = arith.addf %747, %748 : vector<1x128xf32>
    %750 = math.rsqrt %749 : vector<1x128xf32>
    %751 = vector.broadcast %673 : f32 to vector<1x128xf32>
    %752 = arith.mulf %750, %751 : vector<1x128xf32>
    %753 = vector.broadcast %752 : vector<1x128xf32> to vector<32x128xf32>
    %754 = arith.mulf %731, %753 : vector<32x128xf32>
    %755 = arith.mulf %742, %752 : vector<1x128xf32>
    %756 = vector.broadcast %755 : vector<1x128xf32> to vector<32x128xf32>
    %757 = arith.subf %754, %756 : vector<32x128xf32>
    %758 = arith.addf %671, %757 : vector<32x128xf32>
    %c0_246 = arith.constant 0 : index
    %c0_247 = arith.constant 0 : index
    %759 = vector.load %arg15[%c0_246, %c0_247] : memref<25x128xf32, #tpu.memory_space<vmem>>, vector<25x128xf32>
    %c7_248 = arith.constant 7 : index
    %760 = memref.load %arg0[%c7_248] : memref<8xf32, #tpu.memory_space<smem>>
    %c0_249 = arith.constant 0 : index
    %c0_250 = arith.constant 0 : index
    %c0_251 = arith.constant 0 : index
    %761 = vector.load %arg18[%c0_249, %c0_250, %c0_251] : memref<2x24x256xf32, #tpu.memory_space<vmem>>, vector<2x16x256xf32>
    %762 = vector.shape_cast %761 : vector<2x16x256xf32> to vector<32x256xf32>
    %c32_i32 = arith.constant 32 : i32
    %763 = tpu.dynamic_rotate %762 by %c32_i32 dim 1 : vector<32x256xf32>, i32 -> vector<32x256xf32>
    %764 = vector.extract_strided_slice %763 {offsets = [0, 0], sizes = [32, 128], strides = [1, 1]} : vector<32x256xf32> to vector<32x128xf32>
    %765 = vector.extract_strided_slice %759 {offsets = [0, 0], sizes = [1, 128], strides = [1, 1]} : vector<25x128xf32> to vector<1x128xf32>
    %766 = vector.broadcast %765 : vector<1x128xf32> to vector<32x128xf32>
    %767 = arith.mulf %764, %766 : vector<32x128xf32>
    %c16_i32_252 = arith.constant 16 : i32
    %768 = tpu.dynamic_rotate %762 by %c16_i32_252 dim 1 : vector<32x256xf32>, i32 -> vector<32x256xf32>
    %769 = vector.extract_strided_slice %768 {offsets = [0, 0], sizes = [32, 128], strides = [1, 1]} : vector<32x256xf32> to vector<32x128xf32>
    %770 = vector.extract_strided_slice %759 {offsets = [1, 0], sizes = [1, 128], strides = [1, 1]} : vector<25x128xf32> to vector<1x128xf32>
    %771 = vector.broadcast %770 : vector<1x128xf32> to vector<32x128xf32>
    %772 = arith.mulf %769, %771 : vector<32x128xf32>
    %773 = vector.extract_strided_slice %762 {offsets = [0, 0], sizes = [32, 128], strides = [1, 1]} : vector<32x256xf32> to vector<32x128xf32>
    %774 = vector.extract_strided_slice %759 {offsets = [2, 0], sizes = [1, 128], strides = [1, 1]} : vector<25x128xf32> to vector<1x128xf32>
    %775 = vector.broadcast %774 : vector<1x128xf32> to vector<32x128xf32>
    %776 = arith.mulf %773, %775 : vector<32x128xf32>
    %c240_i32_253 = arith.constant 240 : i32
    %777 = tpu.dynamic_rotate %762 by %c240_i32_253 dim 1 : vector<32x256xf32>, i32 -> vector<32x256xf32>
    %778 = vector.extract_strided_slice %777 {offsets = [0, 0], sizes = [32, 128], strides = [1, 1]} : vector<32x256xf32> to vector<32x128xf32>
    %779 = vector.extract_strided_slice %759 {offsets = [3, 0], sizes = [1, 128], strides = [1, 1]} : vector<25x128xf32> to vector<1x128xf32>
    %780 = vector.broadcast %779 : vector<1x128xf32> to vector<32x128xf32>
    %781 = arith.mulf %778, %780 : vector<32x128xf32>
    %c224_i32 = arith.constant 224 : i32
    %782 = tpu.dynamic_rotate %762 by %c224_i32 dim 1 : vector<32x256xf32>, i32 -> vector<32x256xf32>
    %783 = vector.extract_strided_slice %782 {offsets = [0, 0], sizes = [32, 128], strides = [1, 1]} : vector<32x256xf32> to vector<32x128xf32>
    %784 = vector.extract_strided_slice %759 {offsets = [4, 0], sizes = [1, 128], strides = [1, 1]} : vector<25x128xf32> to vector<1x128xf32>
    %785 = vector.broadcast %784 : vector<1x128xf32> to vector<32x128xf32>
    %786 = arith.mulf %783, %785 : vector<32x128xf32>
    %787 = arith.addf %767, %786 : vector<32x128xf32>
    %c0_254 = arith.constant 0 : index
    %c2_255 = arith.constant 2 : index
    %c0_256 = arith.constant 0 : index
    %788 = vector.load %arg18[%c0_254, %c2_255, %c0_256] : memref<2x24x256xf32, #tpu.memory_space<vmem>>, vector<2x16x256xf32>
    %789 = vector.shape_cast %788 : vector<2x16x256xf32> to vector<32x256xf32>
    %c32_i32_257 = arith.constant 32 : i32
    %790 = tpu.dynamic_rotate %789 by %c32_i32_257 dim 1 : vector<32x256xf32>, i32 -> vector<32x256xf32>
    %791 = vector.extract_strided_slice %790 {offsets = [0, 0], sizes = [32, 128], strides = [1, 1]} : vector<32x256xf32> to vector<32x128xf32>
    %792 = vector.extract_strided_slice %759 {offsets = [5, 0], sizes = [1, 128], strides = [1, 1]} : vector<25x128xf32> to vector<1x128xf32>
    %793 = vector.broadcast %792 : vector<1x128xf32> to vector<32x128xf32>
    %794 = arith.mulf %791, %793 : vector<32x128xf32>
    %795 = arith.addf %772, %794 : vector<32x128xf32>
    %c16_i32_258 = arith.constant 16 : i32
    %796 = tpu.dynamic_rotate %789 by %c16_i32_258 dim 1 : vector<32x256xf32>, i32 -> vector<32x256xf32>
    %797 = vector.extract_strided_slice %796 {offsets = [0, 0], sizes = [32, 128], strides = [1, 1]} : vector<32x256xf32> to vector<32x128xf32>
    %798 = vector.extract_strided_slice %759 {offsets = [6, 0], sizes = [1, 128], strides = [1, 1]} : vector<25x128xf32> to vector<1x128xf32>
    %799 = vector.broadcast %798 : vector<1x128xf32> to vector<32x128xf32>
    %800 = arith.mulf %797, %799 : vector<32x128xf32>
    %801 = arith.addf %776, %800 : vector<32x128xf32>
    %802 = vector.extract_strided_slice %789 {offsets = [0, 0], sizes = [32, 128], strides = [1, 1]} : vector<32x256xf32> to vector<32x128xf32>
    %803 = vector.extract_strided_slice %759 {offsets = [7, 0], sizes = [1, 128], strides = [1, 1]} : vector<25x128xf32> to vector<1x128xf32>
    %804 = vector.broadcast %803 : vector<1x128xf32> to vector<32x128xf32>
    %805 = arith.mulf %802, %804 : vector<32x128xf32>
    %806 = arith.addf %781, %805 : vector<32x128xf32>
    %c240_i32_259 = arith.constant 240 : i32
    %807 = tpu.dynamic_rotate %789 by %c240_i32_259 dim 1 : vector<32x256xf32>, i32 -> vector<32x256xf32>
    %808 = vector.extract_strided_slice %807 {offsets = [0, 0], sizes = [32, 128], strides = [1, 1]} : vector<32x256xf32> to vector<32x128xf32>
    %809 = vector.extract_strided_slice %759 {offsets = [8, 0], sizes = [1, 128], strides = [1, 1]} : vector<25x128xf32> to vector<1x128xf32>
    %810 = vector.broadcast %809 : vector<1x128xf32> to vector<32x128xf32>
    %811 = arith.mulf %808, %810 : vector<32x128xf32>
    %812 = arith.addf %787, %811 : vector<32x128xf32>
    %c224_i32_260 = arith.constant 224 : i32
    %813 = tpu.dynamic_rotate %789 by %c224_i32_260 dim 1 : vector<32x256xf32>, i32 -> vector<32x256xf32>
    %814 = vector.extract_strided_slice %813 {offsets = [0, 0], sizes = [32, 128], strides = [1, 1]} : vector<32x256xf32> to vector<32x128xf32>
    %815 = vector.extract_strided_slice %759 {offsets = [9, 0], sizes = [1, 128], strides = [1, 1]} : vector<25x128xf32> to vector<1x128xf32>
    %816 = vector.broadcast %815 : vector<1x128xf32> to vector<32x128xf32>
    %817 = arith.mulf %814, %816 : vector<32x128xf32>
    %818 = arith.addf %795, %817 : vector<32x128xf32>
    %c0_261 = arith.constant 0 : index
    %c4_262 = arith.constant 4 : index
    %c0_263 = arith.constant 0 : index
    %819 = vector.load %arg18[%c0_261, %c4_262, %c0_263] : memref<2x24x256xf32, #tpu.memory_space<vmem>>, vector<2x16x256xf32>
    %820 = vector.shape_cast %819 : vector<2x16x256xf32> to vector<32x256xf32>
    %c32_i32_264 = arith.constant 32 : i32
    %821 = tpu.dynamic_rotate %820 by %c32_i32_264 dim 1 : vector<32x256xf32>, i32 -> vector<32x256xf32>
    %822 = vector.extract_strided_slice %821 {offsets = [0, 0], sizes = [32, 128], strides = [1, 1]} : vector<32x256xf32> to vector<32x128xf32>
    %823 = vector.extract_strided_slice %759 {offsets = [10, 0], sizes = [1, 128], strides = [1, 1]} : vector<25x128xf32> to vector<1x128xf32>
    %824 = vector.broadcast %823 : vector<1x128xf32> to vector<32x128xf32>
    %825 = arith.mulf %822, %824 : vector<32x128xf32>
    %826 = arith.addf %801, %825 : vector<32x128xf32>
    %c16_i32_265 = arith.constant 16 : i32
    %827 = tpu.dynamic_rotate %820 by %c16_i32_265 dim 1 : vector<32x256xf32>, i32 -> vector<32x256xf32>
    %828 = vector.extract_strided_slice %827 {offsets = [0, 0], sizes = [32, 128], strides = [1, 1]} : vector<32x256xf32> to vector<32x128xf32>
    %829 = vector.extract_strided_slice %759 {offsets = [11, 0], sizes = [1, 128], strides = [1, 1]} : vector<25x128xf32> to vector<1x128xf32>
    %830 = vector.broadcast %829 : vector<1x128xf32> to vector<32x128xf32>
    %831 = arith.mulf %828, %830 : vector<32x128xf32>
    %832 = arith.addf %806, %831 : vector<32x128xf32>
    %833 = vector.extract_strided_slice %820 {offsets = [0, 0], sizes = [32, 128], strides = [1, 1]} : vector<32x256xf32> to vector<32x128xf32>
    %834 = vector.extract_strided_slice %759 {offsets = [12, 0], sizes = [1, 128], strides = [1, 1]} : vector<25x128xf32> to vector<1x128xf32>
    %835 = vector.broadcast %834 : vector<1x128xf32> to vector<32x128xf32>
    %836 = arith.mulf %833, %835 : vector<32x128xf32>
    %837 = arith.addf %812, %836 : vector<32x128xf32>
    %c240_i32_266 = arith.constant 240 : i32
    %838 = tpu.dynamic_rotate %820 by %c240_i32_266 dim 1 : vector<32x256xf32>, i32 -> vector<32x256xf32>
    %839 = vector.extract_strided_slice %838 {offsets = [0, 0], sizes = [32, 128], strides = [1, 1]} : vector<32x256xf32> to vector<32x128xf32>
    %840 = vector.extract_strided_slice %759 {offsets = [13, 0], sizes = [1, 128], strides = [1, 1]} : vector<25x128xf32> to vector<1x128xf32>
    %841 = vector.broadcast %840 : vector<1x128xf32> to vector<32x128xf32>
    %842 = arith.mulf %839, %841 : vector<32x128xf32>
    %843 = arith.addf %818, %842 : vector<32x128xf32>
    %c224_i32_267 = arith.constant 224 : i32
    %844 = tpu.dynamic_rotate %820 by %c224_i32_267 dim 1 : vector<32x256xf32>, i32 -> vector<32x256xf32>
    %845 = vector.extract_strided_slice %844 {offsets = [0, 0], sizes = [32, 128], strides = [1, 1]} : vector<32x256xf32> to vector<32x128xf32>
    %846 = vector.extract_strided_slice %759 {offsets = [14, 0], sizes = [1, 128], strides = [1, 1]} : vector<25x128xf32> to vector<1x128xf32>
    %847 = vector.broadcast %846 : vector<1x128xf32> to vector<32x128xf32>
    %848 = arith.mulf %845, %847 : vector<32x128xf32>
    %849 = arith.addf %826, %848 : vector<32x128xf32>
    %c0_268 = arith.constant 0 : index
    %c6_269 = arith.constant 6 : index
    %c0_270 = arith.constant 0 : index
    %850 = vector.load %arg18[%c0_268, %c6_269, %c0_270] : memref<2x24x256xf32, #tpu.memory_space<vmem>>, vector<2x16x256xf32>
    %851 = vector.shape_cast %850 : vector<2x16x256xf32> to vector<32x256xf32>
    %c32_i32_271 = arith.constant 32 : i32
    %852 = tpu.dynamic_rotate %851 by %c32_i32_271 dim 1 : vector<32x256xf32>, i32 -> vector<32x256xf32>
    %853 = vector.extract_strided_slice %852 {offsets = [0, 0], sizes = [32, 128], strides = [1, 1]} : vector<32x256xf32> to vector<32x128xf32>
    %854 = vector.extract_strided_slice %759 {offsets = [15, 0], sizes = [1, 128], strides = [1, 1]} : vector<25x128xf32> to vector<1x128xf32>
    %855 = vector.broadcast %854 : vector<1x128xf32> to vector<32x128xf32>
    %856 = arith.mulf %853, %855 : vector<32x128xf32>
    %857 = arith.addf %832, %856 : vector<32x128xf32>
    %c16_i32_272 = arith.constant 16 : i32
    %858 = tpu.dynamic_rotate %851 by %c16_i32_272 dim 1 : vector<32x256xf32>, i32 -> vector<32x256xf32>
    %859 = vector.extract_strided_slice %858 {offsets = [0, 0], sizes = [32, 128], strides = [1, 1]} : vector<32x256xf32> to vector<32x128xf32>
    %860 = vector.extract_strided_slice %759 {offsets = [16, 0], sizes = [1, 128], strides = [1, 1]} : vector<25x128xf32> to vector<1x128xf32>
    %861 = vector.broadcast %860 : vector<1x128xf32> to vector<32x128xf32>
    %862 = arith.mulf %859, %861 : vector<32x128xf32>
    %863 = arith.addf %837, %862 : vector<32x128xf32>
    %864 = vector.extract_strided_slice %851 {offsets = [0, 0], sizes = [32, 128], strides = [1, 1]} : vector<32x256xf32> to vector<32x128xf32>
    %865 = vector.extract_strided_slice %759 {offsets = [17, 0], sizes = [1, 128], strides = [1, 1]} : vector<25x128xf32> to vector<1x128xf32>
    %866 = vector.broadcast %865 : vector<1x128xf32> to vector<32x128xf32>
    %867 = arith.mulf %864, %866 : vector<32x128xf32>
    %868 = arith.addf %843, %867 : vector<32x128xf32>
    %c240_i32_273 = arith.constant 240 : i32
    %869 = tpu.dynamic_rotate %851 by %c240_i32_273 dim 1 : vector<32x256xf32>, i32 -> vector<32x256xf32>
    %870 = vector.extract_strided_slice %869 {offsets = [0, 0], sizes = [32, 128], strides = [1, 1]} : vector<32x256xf32> to vector<32x128xf32>
    %871 = vector.extract_strided_slice %759 {offsets = [18, 0], sizes = [1, 128], strides = [1, 1]} : vector<25x128xf32> to vector<1x128xf32>
    %872 = vector.broadcast %871 : vector<1x128xf32> to vector<32x128xf32>
    %873 = arith.mulf %870, %872 : vector<32x128xf32>
    %874 = arith.addf %849, %873 : vector<32x128xf32>
    %c224_i32_274 = arith.constant 224 : i32
    %875 = tpu.dynamic_rotate %851 by %c224_i32_274 dim 1 : vector<32x256xf32>, i32 -> vector<32x256xf32>
    %876 = vector.extract_strided_slice %875 {offsets = [0, 0], sizes = [32, 128], strides = [1, 1]} : vector<32x256xf32> to vector<32x128xf32>
    %877 = vector.extract_strided_slice %759 {offsets = [19, 0], sizes = [1, 128], strides = [1, 1]} : vector<25x128xf32> to vector<1x128xf32>
    %878 = vector.broadcast %877 : vector<1x128xf32> to vector<32x128xf32>
    %879 = arith.mulf %876, %878 : vector<32x128xf32>
    %880 = arith.addf %857, %879 : vector<32x128xf32>
    %c0_275 = arith.constant 0 : index
    %c8_276 = arith.constant 8 : index
    %c0_277 = arith.constant 0 : index
    %881 = vector.load %arg18[%c0_275, %c8_276, %c0_277] : memref<2x24x256xf32, #tpu.memory_space<vmem>>, vector<2x16x256xf32>
    %882 = vector.shape_cast %881 : vector<2x16x256xf32> to vector<32x256xf32>
    %c32_i32_278 = arith.constant 32 : i32
    %883 = tpu.dynamic_rotate %882 by %c32_i32_278 dim 1 : vector<32x256xf32>, i32 -> vector<32x256xf32>
    %884 = vector.extract_strided_slice %883 {offsets = [0, 0], sizes = [32, 128], strides = [1, 1]} : vector<32x256xf32> to vector<32x128xf32>
    %885 = vector.extract_strided_slice %759 {offsets = [20, 0], sizes = [1, 128], strides = [1, 1]} : vector<25x128xf32> to vector<1x128xf32>
    %886 = vector.broadcast %885 : vector<1x128xf32> to vector<32x128xf32>
    %887 = arith.mulf %884, %886 : vector<32x128xf32>
    %888 = arith.addf %863, %887 : vector<32x128xf32>
    %c16_i32_279 = arith.constant 16 : i32
    %889 = tpu.dynamic_rotate %882 by %c16_i32_279 dim 1 : vector<32x256xf32>, i32 -> vector<32x256xf32>
    %890 = vector.extract_strided_slice %889 {offsets = [0, 0], sizes = [32, 128], strides = [1, 1]} : vector<32x256xf32> to vector<32x128xf32>
    %891 = vector.extract_strided_slice %759 {offsets = [21, 0], sizes = [1, 128], strides = [1, 1]} : vector<25x128xf32> to vector<1x128xf32>
    %892 = vector.broadcast %891 : vector<1x128xf32> to vector<32x128xf32>
    %893 = arith.mulf %890, %892 : vector<32x128xf32>
    %894 = arith.addf %868, %893 : vector<32x128xf32>
    %895 = vector.extract_strided_slice %882 {offsets = [0, 0], sizes = [32, 128], strides = [1, 1]} : vector<32x256xf32> to vector<32x128xf32>
    %896 = vector.extract_strided_slice %759 {offsets = [22, 0], sizes = [1, 128], strides = [1, 1]} : vector<25x128xf32> to vector<1x128xf32>
    %897 = vector.broadcast %896 : vector<1x128xf32> to vector<32x128xf32>
    %898 = arith.mulf %895, %897 : vector<32x128xf32>
    %899 = arith.addf %874, %898 : vector<32x128xf32>
    %c240_i32_280 = arith.constant 240 : i32
    %900 = tpu.dynamic_rotate %882 by %c240_i32_280 dim 1 : vector<32x256xf32>, i32 -> vector<32x256xf32>
    %901 = vector.extract_strided_slice %900 {offsets = [0, 0], sizes = [32, 128], strides = [1, 1]} : vector<32x256xf32> to vector<32x128xf32>
    %902 = vector.extract_strided_slice %759 {offsets = [23, 0], sizes = [1, 128], strides = [1, 1]} : vector<25x128xf32> to vector<1x128xf32>
    %903 = vector.broadcast %902 : vector<1x128xf32> to vector<32x128xf32>
    %904 = arith.mulf %901, %903 : vector<32x128xf32>
    %905 = arith.addf %880, %904 : vector<32x128xf32>
    %c224_i32_281 = arith.constant 224 : i32
    %906 = tpu.dynamic_rotate %882 by %c224_i32_281 dim 1 : vector<32x256xf32>, i32 -> vector<32x256xf32>
    %907 = vector.extract_strided_slice %906 {offsets = [0, 0], sizes = [32, 128], strides = [1, 1]} : vector<32x256xf32> to vector<32x128xf32>
    %908 = vector.extract_strided_slice %759 {offsets = [24, 0], sizes = [1, 128], strides = [1, 1]} : vector<25x128xf32> to vector<1x128xf32>
    %909 = vector.broadcast %908 : vector<1x128xf32> to vector<32x128xf32>
    %910 = arith.mulf %907, %909 : vector<32x128xf32>
    %911 = arith.addf %888, %910 : vector<32x128xf32>
    %912 = arith.addf %911, %894 : vector<32x128xf32>
    %913 = arith.addf %912, %899 : vector<32x128xf32>
    %914 = arith.addf %913, %905 : vector<32x128xf32>
    %c0_282 = arith.constant 0 : index
    %c0_283 = arith.constant 0 : index
    %915 = vector.load %arg16[%c0_282, %c0_283] : memref<128x128xf32, #tpu.memory_space<vmem>>, vector<128x128xf32>
    %cst_284 = arith.constant dense<0.000000e+00> : vector<32x128xf32>
    %916 = tpu.matmul %914, %915, %cst_284 {dimension_numbers = #tpu.dot_dimension_numbers<[1], [0], [0], [1], [0, 0, 1, 1], [], []>} : vector<32x128xf32>, vector<128x128xf32>, vector<32x128xf32> -> vector<32x128xf32>
    %cst_285 = arith.constant dense<0.000000e+00> : vector<128xf32>
    %917 = vector.multi_reduction <add>, %916, %cst_285 [0] : vector<32x128xf32> to vector<128xf32>
    %918 = vector.shape_cast %917 : vector<128xf32> to vector<1x128xf32>
    %919 = arith.mulf %916, %916 : vector<32x128xf32>
    %cst_286 = arith.constant dense<0.000000e+00> : vector<128xf32>
    %920 = vector.multi_reduction <add>, %919, %cst_286 [0] : vector<32x128xf32> to vector<128xf32>
    %921 = vector.shape_cast %920 : vector<128xf32> to vector<1x128xf32>
    %922 = tpu.concatenate %918, %921 in 0 : vector<1x128xf32>, vector<1x128xf32> -> vector<2x128xf32>
    %c0_287 = arith.constant 0 : index
    %c0_288 = arith.constant 0 : index
    %923 = vector.load %arg4[%c0_287, %c0_288] : memref<128x128xf32, #tpu.memory_space<vmem>>, vector<128x128xf32>
    %cst_289 = arith.constant dense<0.000000e+00> : vector<2x128xf32>
    %924 = tpu.matmul %922, %923, %cst_289 {dimension_numbers = #tpu.dot_dimension_numbers<[1], [0], [0], [1], [0, 0, 1, 1], [], []>} : vector<2x128xf32>, vector<128x128xf32>, vector<2x128xf32> -> vector<2x128xf32>
    %cst_290 = arith.constant 0.001953125 : f32
    %925 = vector.broadcast %cst_290 : f32 to vector<2x128xf32>
    %926 = arith.mulf %924, %925 : vector<2x128xf32>
    %927 = vector.extract_strided_slice %926 {offsets = [0, 0], sizes = [1, 128], strides = [1, 1]} : vector<2x128xf32> to vector<1x128xf32>
    %928 = vector.extract_strided_slice %926 {offsets = [1, 0], sizes = [1, 128], strides = [1, 1]} : vector<2x128xf32> to vector<1x128xf32>
    %929 = arith.mulf %927, %927 : vector<1x128xf32>
    %930 = arith.subf %928, %929 : vector<1x128xf32>
    %cst_291 = arith.constant 0.000000e+00 : f32
    %931 = vector.broadcast %cst_291 : f32 to vector<1x128xf32>
    %932 = arith.maximumf %930, %931 : vector<1x128xf32>
    %cst_292 = arith.constant 9.99999974E-6 : f32
    %933 = vector.broadcast %cst_292 : f32 to vector<1x128xf32>
    %934 = arith.addf %932, %933 : vector<1x128xf32>
    %935 = math.rsqrt %934 : vector<1x128xf32>
    %936 = vector.broadcast %760 : f32 to vector<1x128xf32>
    %937 = arith.mulf %935, %936 : vector<1x128xf32>
    %938 = vector.broadcast %937 : vector<1x128xf32> to vector<32x128xf32>
    %939 = arith.mulf %916, %938 : vector<32x128xf32>
    %940 = arith.mulf %927, %937 : vector<1x128xf32>
    %941 = vector.broadcast %940 : vector<1x128xf32> to vector<32x128xf32>
    %942 = arith.subf %939, %941 : vector<32x128xf32>
    %943 = arith.addf %758, %942 : vector<32x128xf32>
    %944 = vector.shape_cast %943 : vector<32x128xf32> to vector<2x16x128xf32>
    %c0_293 = arith.constant 0 : index
    %c0_294 = arith.constant 0 : index
    %c0_295 = arith.constant 0 : index
    %945 = vector.load %arg17[%c0_293, %c0_294, %c0_295] : memref<2x16x128xf32, #tpu.memory_space<vmem>>, vector<2x16x128xf32>
    tpu.vector_store %arg17[%c0_293, %c0_294, %c0_295], %944 {strides = array<i32>} : memref<2x16x128xf32, #tpu.memory_space<vmem>>, vector<2x16x128xf32>,
    return
  }
}

</mosaic_0001>

<bundles_post_ra>
// kernel: tpu_custom_call.1
= control target key start
LH: loop header
LB: loop body
LE: loop exit
PB: predicated region body
PF: predicated region fallthrough
CT: control target
= control target key end

     0   :  { %s14061_s0 = inlined_call_operand.hbm [shape: f32[8], index: 0, kind: input, shape index: {}]   ;;  %s14062_s1 = inlined_call_operand.hbm [shape: f32[2,24,256], index: 1, kind: input, shape index: {}]   ;;  %s14063_s2 = inlined_call_operand.hbm [shape: f32[32,128], index: 2, kind: input, shape index: {}]   ;;  %s14064_s3 = inlined_call_operand.hbm [shape: f32[9,32,128], index: 3, kind: input, shape index: {}]   ;;  %s14065_s4 = inlined_call_operand.hbm [shape: f32[128,128], index: 4, kind: input, shape index: {}]   ;;  %s14066_s5 = inlined_call_operand.hbm [shape: f32[9,128], index: 5, kind: input, shape index: {}]   ;;  %s14067_s6 = inlined_call_operand.hbm [shape: f32[128,128], index: 6, kind: input, shape index: {}]   ;;  %s14068_s7 = inlined_call_operand.hbm [shape: f32[9,128], index: 7, kind: input, shape index: {}]   ;;  %s14069_s8 = inlined_call_operand.hbm [shape: f32[128,128], index: 8, kind: input, shape index: {}]   ;;  %s14070_s9 = inlined_call_operand.vmem [shape: f32[25,128], index: 9, kind: input, shape index: {}]   ;;  %s14071_s10 = inlined_call_operand.hbm [shape: f32[128,128], index: 10, kind: input, shape index: {}]   ;;  %s14072_s11 = inlined_call_operand.hbm [shape: f32[25,128], index: 11, kind: input, shape index: {}]   ;;  %s14073_s12 = inlined_call_operand.hbm [shape: f32[128,128], index: 12, kind: input, shape index: {}]   ;;  %s14074_s13 = inlined_call_operand.vmem [shape: f32[9,128], index: 13, kind: input, shape index: {}]   ;;  %s14075_s14 = inlined_call_operand.hbm [shape: f32[128,128], index: 14, kind: input, shape index: {}]   ;;  %s14076_s15 = inlined_call_operand.hbm [shape: f32[25,128], index: 15, kind: input, shape index: {}]   ;;  %s14077_s16 = inlined_call_operand.hbm [shape: f32[128,128], index: 16, kind: input, shape index: {}]   ;;  %s14078_s17 = inlined_call_operand.hbm [shape: f32[2,16,128], index: 17, kind: output, shape index: {}]  }
   0x1   :  { %14383 = sst [smem:[#allocation285_spill]] %s14061_s0 }
   0x2   :  { %14384 = sst [smem:[#allocation286_spill]] %s14062_s1 }
   0x3   :  { %14385 = sst [smem:[#allocation287_spill]] %s14078_s17 }
   0x4   :  { %22 = vsyncpa [#allocation7], 0 }
   0x5   :  { %23 = vsyncpa [#allocation5], 0 }
   0x6   :  { %24 = vsyncpa [#allocation10], 0 }
   0x7   :  { %25 = vsyncpa [#allocation13], 0 }
   0x8   :  { %26 = vsyncpa [#allocation16], 0 }
   0x9   :  { %27 = vsyncpa [#allocation19], 0 }
   0xa   :  { %28 = vsyncpa [#allocation22], 0 }
   0xb   :  { %29 = vsyncpa [#allocation25], 0 }
   0xc   :  { %30 = vsyncpa [#allocation28], 0 }
   0xd   :  { %31 = vsyncpa [#allocation6], 0  ;;  %s7781_s24 = smov [#allocation9]   ;;  %s7421_s28 = scalar_lea.hbm %s14063_s2, 512 }
   0xe   :  { %s57_s25 = sshll.u32 %s7781_s24, 4  ;;  %p7422_p0 = scmp.ne.s32.totalorder %s14063_s2, %s7421_s28  ;;  %s58_s25 = int_to_ptr.vmem [resolvable:$true] %s57_s25 }
   0xf   :  { %p7425_p1 = scmp.lt.u32.totalorder %s7421_s28, %s14063_s2 }
  0x11   :  { %p7427_p2 = pnand %p7425_p1, %p7422_p0 }
  0x13   :  { %7430 = shalt.err (!%p7427_p2)
}
  0x14   :  { %s7431_s19 = scalar_lea.vmem %s58_s25, 512  ;;  %p7436_p4 = scmp.lt.s32.totalorder %s58_s25, %s58_s25 }
  0x15   :  { %p7432_p3 = scmp.ne.s32.totalorder %s58_s25, %s7431_s19  ;;  %p7437_p5 = scmp.lt.s32.totalorder %s7431_s19, %s7431_s19 }
  0x17   :  { %p7438_p6 = por %p7437_p5, %p7436_p4 }
  0x19   :  { %p7439_p7 = pnand %p7438_p6, %p7432_p3 }
  0x1b   :  { %7442 = shalt.err (!%p7439_p7)
}
  0x1c   :  { %s7782_s1 = smov 128   ;;  %s7783_s20 = smov 8  }
  0x1d   :  { %63 = dma.hbm_to_vmem [thread:$0]  %s14063_s2, 512, %s58_s25, [#allocation10], %s7782_s1, %s7782_s1, %s7783_s20  }
  0x1e   :  { %s7784_s23 = smov [#allocation12]   ;;  %s7785_s26 = smov [#allocation15]  }
  0x1f   :  { %s81_s24 = sshll.u32 %s7784_s23, 4  ;;  %s105_s27 = sshll.u32 %s7785_s26, 4  ;;  %s82_s24 = int_to_ptr.vmem [resolvable:$true] %s81_s24  ;;  %s106_s27 = int_to_ptr.vmem [resolvable:$true] %s105_s27 }
  0x20   :  { %s7443_s0 = scalar_lea.hbm %s14065_s4, 2048 }
  0x21   :  { %p7444_p8 = scmp.ne.s32.totalorder %s14065_s4, %s7443_s0  ;;  %p7447_p9 = scmp.lt.u32.totalorder %s7443_s0, %s14065_s4 }
  0x23   :  { %p7449_p10 = pnand %p7447_p9, %p7444_p8 }
  0x25   :  { %7452 = shalt.err (!%p7449_p10)
}
  0x26   :  { %s7453_s2 = scalar_lea.vmem %s82_s24, 2048  ;;  %p7458_p12 = scmp.lt.s32.totalorder %s82_s24, %s82_s24 }
  0x27   :  { %p7454_p11 = scmp.ne.s32.totalorder %s82_s24, %s7453_s2  ;;  %p7459_p13 = scmp.lt.s32.totalorder %s7453_s2, %s7453_s2 }
  0x29   :  { %p7460_p0 = por %p7459_p13, %p7458_p12 }
  0x2b   :  { %p7461_p1 = pnand %p7460_p0, %p7454_p11 }
  0x2d   :  { %7464 = shalt.err (!%p7461_p1)
}
  0x2e   :  { %87 = dma.hbm_to_vmem [thread:$0]  %s14065_s4, 2048, %s82_s24, [#allocation13], %s7782_s1, %s7782_s1, %s7783_s20  }
  0x2f   :  { %s7465_s23 = scalar_lea.hbm %s14067_s6, 2048 }
  0x30   :  { %p7466_p2 = scmp.ne.s32.totalorder %s14067_s6, %s7465_s23  ;;  %p7469_p3 = scmp.lt.u32.totalorder %s7465_s23, %s14067_s6 }
  0x32   :  { %p7471_p4 = pnand %p7469_p3, %p7466_p2 }
  0x34   :  { %7474 = shalt.err (!%p7471_p4)
}
  0x35   :  { %s7475_s30 = scalar_lea.vmem %s106_s27, 2048  ;;  %p7480_p6 = scmp.lt.s32.totalorder %s106_s27, %s106_s27 }
  0x36   :  { %p7476_p5 = scmp.ne.s32.totalorder %s106_s27, %s7475_s30  ;;  %p7481_p7 = scmp.lt.s32.totalorder %s7475_s30, %s7475_s30 }
  0x38   :  { %p7482_p8 = por %p7481_p7, %p7480_p6 }
  0x3a   :  { %p7483_p9 = pnand %p7482_p8, %p7476_p5 }
  0x3c   :  { %7486 = shalt.err (!%p7483_p9)
}
  0x3d   :  { %111 = dma.hbm_to_vmem [thread:$0]  %s14067_s6, 2048, %s106_s27, [#allocation16], %s7782_s1, %s7782_s1, %s7783_s20  }
  0x3e   :  { %s7786_s18 = smov [#allocation18]   ;;  %s7787_s2 = smov [#allocation21]  }
  0x3f   :  { %s129_s19 = sshll.u32 %s7786_s18, 4  ;;  %s155_s25 = sshll.u32 %s7787_s2, 4  ;;  %s130_s19 = int_to_ptr.vmem [resolvable:$true] %s129_s19  ;;  %s156_s25 = int_to_ptr.vmem [resolvable:$true] %s155_s25 }
  0x40   :  { %s7487_s17 = scalar_lea.hbm %s14069_s8, 2048 }
  0x41   :  { %p7488_p10 = scmp.ne.s32.totalorder %s14069_s8, %s7487_s17  ;;  %p7491_p11 = scmp.lt.u32.totalorder %s7487_s17, %s14069_s8 }
  0x43   :  { %p7493_p12 = pnand %p7491_p11, %p7488_p10 }
  0x45   :  { %7496 = shalt.err (!%p7493_p12)
}
  0x46   :  { %s7497_s6 = scalar_lea.vmem %s130_s19, 2048  ;;  %p7502_p0 = scmp.lt.s32.totalorder %s130_s19, %s130_s19 }
  0x47   :  { %p7498_p13 = scmp.ne.s32.totalorder %s130_s19, %s7497_s6  ;;  %p7503_p1 = scmp.lt.s32.totalorder %s7497_s6, %s7497_s6 }
  0x49   :  { %p7504_p2 = por %p7503_p1, %p7502_p0 }
  0x4b   :  { %p7505_p3 = pnand %p7504_p2, %p7498_p13 }
  0x4d   :  { %7508 = shalt.err (!%p7505_p3)
}
  0x4e   :  { %135 = dma.hbm_to_vmem [thread:$0]  %s14069_s8, 2048, %s130_s19, [#allocation19], %s7782_s1, %s7782_s1, %s7783_s20  }
  0x4f   :  { %s7509_s24 = scalar_lea.hbm %s14072_s11, 512 }
  0x50   :  { %p7510_p4 = scmp.ne.s32.totalorder %s14072_s11, %s7509_s24  ;;  %p7513_p5 = scmp.lt.u32.totalorder %s7509_s24, %s14072_s11 }
  0x52   :  { %p7515_p6 = pnand %p7513_p5, %p7510_p4 }
  0x54   :  { %7518 = shalt.err (!%p7515_p6)
}
  0x55   :  { %s7519_s17 = scalar_lea.vmem %s156_s25, 512  ;;  %p7524_p8 = scmp.lt.s32.totalorder %s156_s25, %s156_s25 }
  0x56   :  { %p7520_p7 = scmp.ne.s32.totalorder %s156_s25, %s7519_s17  ;;  %p7525_p9 = scmp.lt.s32.totalorder %s7519_s17, %s7519_s17 }
  0x58   :  { %p7526_p10 = por %p7525_p9, %p7524_p8 }
  0x5a   :  { %p7527_p11 = pnand %p7526_p10, %p7520_p7 }
  0x5c   :  { %7530 = shalt.err (!%p7527_p11)
}
  0x5d   :  { %161 = dma.hbm_to_vmem [thread:$0]  %s14072_s11, 512, %s156_s25, [#allocation22], %s7782_s1, %s7782_s1, %s7783_s20  }
  0x5e   :  { %s7788_s23 = smov [#allocation24]   ;;  %s7531_s6 = scalar_lea.hbm %s14075_s14, 2048 }
  0x5f   :  { %s181_s26 = sshll.u32 %s7788_s23, 4  ;;  %p7532_p12 = scmp.ne.s32.totalorder %s14075_s14, %s7531_s6  ;;  %s182_s26 = int_to_ptr.vmem [resolvable:$true] %s181_s26 }
  0x60   :  { %p7535_p13 = scmp.lt.u32.totalorder %s7531_s6, %s14075_s14 }
  0x62   :  { %p7537_p0 = pnand %p7535_p13, %p7532_p12 }
  0x64   :  { %7540 = shalt.err (!%p7537_p0)
}
  0x65   :  { %s7541_s24 = scalar_lea.vmem %s182_s26, 2048  ;;  %p7546_p2 = scmp.lt.s32.totalorder %s182_s26, %s182_s26 }
  0x66   :  { %p7542_p1 = scmp.ne.s32.totalorder %s182_s26, %s7541_s24  ;;  %p7547_p3 = scmp.lt.s32.totalorder %s7541_s24, %s7541_s24 }
  0x68   :  { %p7548_p4 = por %p7547_p3, %p7546_p2 }
  0x6a   :  { %p7549_p5 = pnand %p7548_p4, %p7542_p1 }
  0x6c   :  { %7552 = shalt.err (!%p7549_p5)
}
  0x6d   :  { %187 = dma.hbm_to_vmem [thread:$0]  %s14075_s14, 2048, %s182_s26, [#allocation25], %s7782_s1, %s7782_s1, %s7783_s20  }
  0x6e   :  { %s14386_s21 = sld [smem:[#allocation285_spill]] }
  0x74   :  { %s7553_s22 = scalar_lea.hbm %s14386_s21, 16 }
  0x75   :  { %p7554_p6 = scmp.ne.s32.totalorder %s14386_s21, %s7553_s22  ;;  %p7557_p7 = scmp.lt.u32.totalorder %s7553_s22, %s14386_s21 }
  0x77   :  { %p7559_p8 = pnand %p7557_p7, %p7554_p6 }
  0x79   :  { %7562 = shalt.err (!%p7559_p8)
}
  0x7a   :  { %s7789_s28 = smov [#allocation4]   ;;  %s7790_s14 = smov [#allocation8]  }
  0x7b   :  { %39 = dma.hbm_to_smem %s14386_s21, 16, %s7789_s28, [#allocation7]  }
  0x7c   :  { %s45_s26 = sshll.u32 %s7790_s14, 4  ;;  %s14387_s30 = sld [smem:[#allocation286_spill]]  ;;  %s46_s26 = int_to_ptr.vmem [resolvable:$true] %s45_s26 }
  0x82   :  { %s7563_s4 = scalar_lea.hbm %s14387_s30, 1536 }
  0x83   :  { %p7564_p9 = scmp.ne.s32.totalorder %s14387_s30, %s7563_s4  ;;  %p7567_p10 = scmp.lt.u32.totalorder %s7563_s4, %s14387_s30 }
  0x85   :  { %p7569_p11 = pnand %p7567_p10, %p7564_p9 }
  0x87   :  { %7572 = shalt.err (!%p7569_p11)
}
  0x88   :  { %s7573_s2 = scalar_lea.vmem %s46_s26, 1536  ;;  %p7578_p13 = scmp.lt.s32.totalorder %s46_s26, %s46_s26 }
  0x89   :  { %p7574_p12 = scmp.ne.s32.totalorder %s46_s26, %s7573_s2  ;;  %p7579_p0 = scmp.lt.s32.totalorder %s7573_s2, %s7573_s2 }
  0x8b   :  { %p7580_p1 = por %p7579_p0, %p7578_p13 }
  0x8d   :  { %p7581_p2 = pnand %p7580_p1, %p7574_p12 }
  0x8f   :  { %7584 = shalt.err (!%p7581_p2)
}
  0x90   :  { %s7791_s21 = smov 256   ;;  %s7792_s22 = smov 16  }
  0x91   :  { %51 = dma.hbm_to_vmem [thread:$0]  %s14387_s30, 1536, %s46_s26, [#allocation5], %s7791_s21, %s7791_s21, %s7792_s22  }
  0x92   :  { %s7793_s19 = smov [#allocation11]   ;;  %s7794_s28 = smov [#allocation14]  }
  0x93   :  { %s69_s23 = sshll.u32 %s7793_s19, 4  ;;  %s93_s29 = sshll.u32 %s7794_s28, 4  ;;  %s70_s23 = int_to_ptr.vmem [resolvable:$true] %s69_s23  ;;  %s8013_s29 = int_to_ptr.vmem [resolvable:$true] %s93_s29 }
  0x94   :  { %s7585_s27 = scalar_lea.hbm %s14064_s3, 4608 }
  0x95   :  { %p7586_p3 = scmp.ne.s32.totalorder %s14064_s3, %s7585_s27  ;;  %p7589_p4 = scmp.lt.u32.totalorder %s7585_s27, %s14064_s3 }
  0x97   :  { %p7591_p5 = pnand %p7589_p4, %p7586_p3 }
  0x99   :  { %7594 = shalt.err (!%p7591_p5)
}
  0x9a   :  { %s7595_s26 = scalar_lea.vmem %s70_s23, 4608  ;;  %p7600_p7 = scmp.lt.s32.totalorder %s70_s23, %s70_s23 }
  0x9b   :  { %p7596_p6 = scmp.ne.s32.totalorder %s70_s23, %s7595_s26  ;;  %p7601_p8 = scmp.lt.s32.totalorder %s7595_s26, %s7595_s26 }
  0x9d   :  { %p7602_p9 = por %p7601_p8, %p7600_p7 }
  0x9f   :  { %p7603_p10 = pnand %p7602_p9, %p7596_p6 }
  0xa1   :  { %7606 = shalt.err (!%p7603_p10)
}
  0xa2   :  { %75 = dma.hbm_to_vmem [thread:$0]  %s14064_s3, 4608, %s70_s23, [#allocation10], %s7782_s1, %s7782_s1, %s7783_s20  }
  0xa3   :  { %s7607_s21 = scalar_lea.hbm %s14066_s5, 256 }
  0xa4   :  { %p7608_p11 = scmp.ne.s32.totalorder %s14066_s5, %s7607_s21  ;;  %p7611_p12 = scmp.lt.u32.totalorder %s7607_s21, %s14066_s5 }
  0xa6   :  { %p7613_p13 = pnand %p7611_p12, %p7608_p11 }
  0xa8   :  { %7616 = shalt.err (!%p7613_p13)
}
  0xa9   :  { %s7617_s6 = scalar_lea.vmem %s8013_s29, 256  ;;  %p7622_p1 = scmp.lt.s32.totalorder %s8013_s29, %s8013_s29 }
  0xaa   :  { %p7618_p0 = scmp.ne.s32.totalorder %s8013_s29, %s7617_s6  ;;  %p7623_p2 = scmp.lt.s32.totalorder %s7617_s6, %s7617_s6 }
  0xac   :  { %p7624_p3 = por %p7623_p2, %p7622_p1 }
  0xae   :  { %p7625_p4 = pnand %p7624_p3, %p7618_p0 }
  0xb0   :  { %7628 = shalt.err (!%p7625_p4)
}
  0xb1   :  { %99 = dma.hbm_to_vmem [thread:$0]  %s14066_s5, 256, %s8013_s29, [#allocation13], %s7782_s1, %s7782_s1, %s7783_s20  }
  0xb2   :  { %s7795_s14 = smov [#allocation17]   ;;  %s7796_s0 = smov [#allocation20]  }
  0xb3   :  { %s117_s27 = sshll.u32 %s7795_s14, 4  ;;  %s143_s4 = sshll.u32 %s7796_s0, 4  ;;  %s118_s27 = int_to_ptr.vmem [resolvable:$true] %s117_s27  ;;  %s8050_s4 = int_to_ptr.vmem [resolvable:$true] %s143_s4 }
  0xb4   :  { %s7629_s26 = scalar_lea.hbm %s14068_s7, 256 }
  0xb5   :  { %p7630_p5 = scmp.ne.s32.totalorder %s14068_s7, %s7629_s26  ;;  %p7633_p6 = scmp.lt.u32.totalorder %s7629_s26, %s14068_s7 }
  0xb7   :  { %p7635_p7 = pnand %p7633_p6, %p7630_p5 }
  0xb9   :  { %7638 = shalt.err (!%p7635_p7)
}
  0xba   :  { %s7639_s5 = scalar_lea.vmem %s118_s27, 256  ;;  %p7644_p9 = scmp.lt.s32.totalorder %s118_s27, %s118_s27 }
  0xbb   :  { %p7640_p8 = scmp.ne.s32.totalorder %s118_s27, %s7639_s5  ;;  %p7645_p10 = scmp.lt.s32.totalorder %s7639_s5, %s7639_s5 }
  0xbd   :  { %p7646_p11 = por %p7645_p10, %p7644_p9 }
  0xbf   :  { %p7647_p12 = pnand %p7646_p11, %p7640_p8 }
  0xc1   :  { %7650 = shalt.err (!%p7647_p12)
}
  0xc2   :  { %123 = dma.hbm_to_vmem [thread:$0]  %s14068_s7, 256, %s118_s27, [#allocation16], %s7782_s1, %s7782_s1, %s7783_s20  }
  0xc3   :  { %s7651_s19 = scalar_lea.hbm %s14071_s10, 2048 }
  0xc4   :  { %p7652_p13 = scmp.ne.s32.totalorder %s14071_s10, %s7651_s19  ;;  %p7655_p0 = scmp.lt.u32.totalorder %s7651_s19, %s14071_s10 }
  0xc6   :  { %p7657_p1 = pnand %p7655_p0, %p7652_p13 }
  0xc8   :  { %7660 = shalt.err (!%p7657_p1)
}
  0xc9   :  { %s7661_s14 = scalar_lea.vmem %s8050_s4, 2048  ;;  %p7666_p3 = scmp.lt.s32.totalorder %s8050_s4, %s8050_s4 }
  0xca   :  { %p7662_p2 = scmp.ne.s32.totalorder %s8050_s4, %s7661_s14  ;;  %p7667_p4 = scmp.lt.s32.totalorder %s7661_s14, %s7661_s14 }
  0xcc   :  { %p7668_p5 = por %p7667_p4, %p7666_p3 }
  0xce   :  { %p7669_p6 = pnand %p7668_p5, %p7662_p2 }
  0xd0   :  { %7672 = shalt.err (!%p7669_p6)
}
  0xd1   :  { %149 = dma.hbm_to_vmem [thread:$0]  %s14071_s10, 2048, %s8050_s4, [#allocation19], %s7782_s1, %s7782_s1, %s7783_s20  }
  0xd2   :  { %s7797_s0 = smov [#allocation23]   ;;  %s7798_s11 = smov [#allocation26]  }
  0xd3   :  { %s167_s24 = sshll.u32 %s7797_s0, 4  ;;  %s193_s26 = sshll.u32 %s7798_s11, 4  ;;  %s168_s24 = int_to_ptr.vmem [resolvable:$true] %s167_s24  ;;  %s8087_s26 = int_to_ptr.vmem [resolvable:$true] %s193_s26 }
  0xd4   :  { %s7673_s18 = scalar_lea.hbm %s14073_s12, 2048 }
  0xd5   :  { %p7674_p7 = scmp.ne.s32.totalorder %s14073_s12, %s7673_s18  ;;  %p7677_p8 = scmp.lt.u32.totalorder %s7673_s18, %s14073_s12 }
  0xd7   :  { %p7679_p9 = pnand %p7677_p8, %p7674_p7 }
  0xd9   :  { %7682 = shalt.err (!%p7679_p9)
}
  0xda   :  { %s7683_s10 = scalar_lea.vmem %s168_s24, 2048  ;;  %p7688_p11 = scmp.lt.s32.totalorder %s168_s24, %s168_s24 }
  0xdb   :  { %p7684_p10 = scmp.ne.s32.totalorder %s168_s24, %s7683_s10  ;;  %p7689_p12 = scmp.lt.s32.totalorder %s7683_s10, %s7683_s10 }
  0xdd   :  { %p7690_p13 = por %p7689_p12, %p7688_p11 }
  0xdf   :  { %p7691_p0 = pnand %p7690_p13, %p7684_p10 }
  0xe1   :  { %7694 = shalt.err (!%p7691_p0)
}
  0xe2   :  { %173 = dma.hbm_to_vmem [thread:$0]  %s14073_s12, 2048, %s168_s24, [#allocation22], %s7782_s1, %s7782_s1, %s7783_s20  }
  0xe3   :  { %s7695_s28 = scalar_lea.hbm %s14076_s15, 512 }
  0xe4   :  { %p7696_p1 = scmp.ne.s32.totalorder %s14076_s15, %s7695_s28  ;;  %p7699_p2 = scmp.lt.u32.totalorder %s7695_s28, %s14076_s15 }
  0xe6   :  { %p7701_p3 = pnand %p7699_p2, %p7696_p1 }
  0xe8   :  { %7704 = shalt.err (!%p7701_p3)
}
  0xe9   :  { %s7705_s7 = scalar_lea.vmem %s8087_s26, 512  ;;  %p7710_p5 = scmp.lt.s32.totalorder %s8087_s26, %s8087_s26 }
  0xea   :  { %p7706_p4 = scmp.ne.s32.totalorder %s8087_s26, %s7705_s7  ;;  %p7711_p6 = scmp.lt.s32.totalorder %s7705_s7, %s7705_s7 }
  0xec   :  { %p7712_p7 = por %p7711_p6, %p7710_p5 }
  0xee   :  { %p7713_p8 = pnand %p7712_p7, %p7706_p4 }
  0xf0   :  { %7716 = shalt.err (!%p7713_p8)
}
  0xf1   :  { %199 = dma.hbm_to_vmem [thread:$0]  %s14076_s15, 512, %s8087_s26, [#allocation25], %s7782_s1, %s7782_s1, %s7783_s20  }
  0xf2   :  { %s7799_s0 = smov [#allocation27]   ;;  %s7717_s25 = scalar_lea.hbm %s14077_s16, 2048 }
  0xf3   :  { %s205_s24 = sshll.u32 %s7799_s0, 4  ;;  %p7718_p9 = scmp.ne.s32.totalorder %s14077_s16, %s7717_s25  ;;  %s206_s24 = int_to_ptr.vmem [resolvable:$true] %s205_s24 }
  0xf4   :  { %p7721_p10 = scmp.lt.u32.totalorder %s7717_s25, %s14077_s16 }
  0xf6   :  { %p7723_p11 = pnand %p7721_p10, %p7718_p9 }
  0xf8   :  { %7726 = shalt.err (!%p7723_p11)
}
  0xf9   :  { %s7727_s21 = scalar_lea.vmem %s206_s24, 2048  ;;  %p7732_p13 = scmp.lt.s32.totalorder %s206_s24, %s206_s24 }
  0xfa   :  { %p7728_p12 = scmp.ne.s32.totalorder %s206_s24, %s7727_s21  ;;  %p7733_p0 = scmp.lt.s32.totalorder %s7727_s21, %s7727_s21 }
  0xfc   :  { %p7734_p1 = por %p7733_p0, %p7732_p13 }
  0xfe   :  { %p7735_p2 = pnand %p7734_p1, %p7728_p12 }
 0x100   :  { %7738 = shalt.err (!%p7735_p2)
}
 0x101   :  { %211 = dma.hbm_to_vmem [thread:$0]  %s14077_s16, 2048, %s206_s24, [#allocation28], %s7782_s1, %s7782_s1, %s7783_s20  }
 0x102   :  { %7761 = dma.done.wait [#allocation7], 16  }
 0x103   :  { %7762 = vsyncadd [#allocation7], 4294967280 }
 0x104   :  { %7763 = dma.done.wait [#allocation5], 1536  }
 0x105   :  { %7764 = vsyncadd [#allocation5], 4294965760 }
 0x106   :  { %7765 = dma.done.wait [#allocation10], 5120  }
 0x107   :  { %7766 = vsyncadd [#allocation10], 4294962176 }
 0x108   :  { %7767 = dma.done.wait [#allocation13], 2304  }
 0x109   :  { %7768 = vsyncadd [#allocation13], 4294964992 }
 0x10a   :  { %7769 = dma.done.wait [#allocation16], 2304  }
 0x10b   :  { %7770 = vsyncadd [#allocation16], 4294964992 }
 0x10c   :  { %7771 = dma.done.wait [#allocation19], 4096  }
 0x10d   :  { %7772 = vsyncadd [#allocation19], 4294963200 }
 0x10e   :  { %7773 = dma.done.wait [#allocation22], 2560  }
 0x10f   :  { %7774 = vsyncadd [#allocation22], 4294964736 }
 0x110   :  { %7775 = dma.done.wait [#allocation25], 2560  }
 0x111   :  { %7776 = vsyncadd [#allocation25], 4294964736 }
 0x112   :  { %7777 = dma.done.wait [#allocation28], 2048  }
 0x113   :  { %7778 = vsyncadd [#allocation28], 4294965248 }
 0x114   :  { %257 = sfence }
 0x115   :  { %v311_v0 = vld [vmem:[#allocation8 + $0x8] sm:$0xf8]  ;;  %v8139_v1 = vld [vmem:[#allocation8 + $0x18] sm:$0xff]  ;;  %vm334_vm0 = vcmask 1044480   ;;  %v310_v2 = vld [vmem:[#allocation8] sm:$0xf8] }
 0x116   :  { %v338_v3 = vrot.slane %v311_v0, 3  ;;  %v339_v4 = vrot.slane %v8139_v1, 3  ;;  %v8142_v5 = vld [vmem:[#allocation8 + $0x10] sm:$0xff]  ;;  %v335_v6 = vrot.slane %v310_v2, 3  ;;  %v315_v7 = vld [vmem:[#allocation8 + $0x28] sm:$0x7] }
 0x117   :  { %v336_v8 = vrot.slane %v8142_v5, 3  ;;  %v343_v9 = vrot.slane %v315_v7, 3  ;;  %v314_v10 = vld [vmem:[#allocation8 + $0x20] sm:$0x7]  ;;  %v317_v16 = vld [vmem:[#allocation8 + $0x38] sm:$0xf8] }
 0x118   :  { %v340_v11 = vsel %vm334_vm0, %v338_v3, %v339_v4  ;;  %v341_v12 = vrot.slane %v314_v10, 3  ;;  %v8159_v17 = vld [vmem:[#allocation8 + $0x48] sm:$0xff]  ;;  %v316_v18 = vld [vmem:[#allocation8 + $0x30] sm:$0xf8]  ;;  %v8161_v19 = vld [vmem:[#allocation8 + $0x40] sm:$0xff]  ;;  %s7800_s16 = smov 120  }
 0x119   :  { %371 = vrot.lane.b32.xlu1 %v340_v11, %s7783_s20  ;;  %v8148_v13 = vsel %vm334_vm0, %v335_v6, %v336_v8  ;;  %v344_v14 = vsel %vm334_vm0, %v339_v4, %v343_v9  ;;  %v348_v20 = vrot.slane %v317_v16, 3  ;;  %v349_v21 = vrot.slane %v8159_v17, 3  ;;  %v259_v24 = vld [vmem:[#allocation8 + $0x8] sm:$0xff]  ;;  %v258_v25 = vld [vmem:[#allocation8] sm:$0xff]  ;;  %v265_v42 = vld [vmem:[#allocation8 + $0x38] sm:$0xff]  ;;  %s7804_s10 = smov 112  }
 0x11a   :  { %363 = vrot.lane.b32.xlu0 %v8148_v13, %s7783_s20  ;;  %v8154_v15 = vsel %vm334_vm0, %v336_v8, %v341_v12  ;;  %v345_v22 = vrot.slane %v316_v18, 3  ;;  %v346_v23 = vrot.slane %v8161_v19, 3  ;;  %v443_v28 = vld [vmem:[#allocation8 + $0x20] sm:$0xf]  ;;  %v441_v29 = vld [vmem:[#allocation8] sm:$0xf0] }
 0x11b   :  { %v350_v26 = vsel %vm334_vm0, %v348_v20, %v349_v21  ;;  %v271_v30 = vmax.f32 %v259_v24, 0.0  ;;  %v8180_v31 = vmax.f32 %v8139_v1, 0.0  ;;  %v270_v32 = vmax.f32 %v258_v25, 0.0  ;;  %v263_v33 = vld [vmem:[#allocation8 + $0x28] sm:$0xff]  ;;  %v262_v34 = vld [vmem:[#allocation8 + $0x20] sm:$0xff]  ;;  %v264_v45 = vld [vmem:[#allocation8 + $0x30] sm:$0xff] }
 0x11c   :  { %v8177_v27 = vsel %vm334_vm0, %v345_v22, %v346_v23  ;;  %v8184_v35 = vmax.f32 %v8142_v5, 0.0  ;;  %vm457_vm1 = vcmask 1043456   ;;  %v459_v36 = vrot.slane %v8142_v5, 4  ;;  %v444_v39 = vld [vmem:[#allocation8 + $0x28] sm:$0xf]  ;;  %v269_v56 = vld [vmem:[#allocation8 + $0x58] sm:$0xff] }
 0x11d   :  { %373 = vrot.lane.b32.xlu1 %v344_v14, %s7783_s20  ;;  %v464_v37 = vrot.slane %v443_v28, 4  ;;  %283 = vst [vmem:[#allocation2 + $0x8] sm:$0xff] %v271_v30  ;;  %285 = vst [vmem:[#allocation2 + $0x18] sm:$0xff] %v8180_v31  ;;  %v458_v38 = vrot.slane %v441_v29, 4  ;;  %v275_v40 = vmax.f32 %v263_v33, 0.0  ;;  %v274_v41 = vmax.f32 %v262_v34, 0.0 }
 0x11e   :  { %365 = vrot.lane.b32.xlu0 %v8154_v15, %s7783_s20  ;;  %282 = vst [vmem:[#allocation2] sm:$0xff] %v270_v32  ;;  %284 = vst [vmem:[#allocation2 + $0x10] sm:$0xff] %v8184_v35  ;;  %v442_v43 = vld [vmem:[#allocation8 + $0x8] sm:$0xf0]  ;;  %v462_v44 = vrot.slane %v8139_v1, 4  ;;  %v466_v47 = vrot.slane %v444_v39, 4 }
 0x11f   :  { %287 = vst [vmem:[#allocation2 + $0x28] sm:$0xff] %v275_v40  ;;  %286 = vst [vmem:[#allocation2 + $0x20] sm:$0xff] %v274_v41  ;;  %v8196_v46 = vsel %vm457_vm1, %v459_v36, %v464_v37  ;;  %v277_v48 = vmax.f32 %v265_v42, 0.0  ;;  %v8199_v49 = vmax.f32 %v8159_v17, 0.0  ;;  %v8202_v50 = vsel %vm457_vm1, %v458_v38, %v459_v36  ;;  %v321_v52 = vld [vmem:[#allocation8 + $0x58] sm:$0x7] }
 0x120   :  { %14388 = vst [vmem:[#allocation40_spill] sm:$0xff] %v8196_v46  ;;  %14389 = vst [vmem:[#allocation41_spill] sm:$0xff] %v8202_v50  ;;  %v461_v51 = vrot.slane %v442_v43, 4  ;;  %v320_v53 = vld [vmem:[#allocation8 + $0x50] sm:$0x7]  ;;  %v276_v54 = vmax.f32 %v264_v45, 0.0  ;;  %v467_v57 = vsel %vm457_vm1, %v462_v44, %v466_v47 }
 0x121   :  { %405 = vrot.lane.b32.xlu1 %v8154_v15, %s7800_s16  ;;  %289 = vst [vmem:[#allocation2 + $0x38] sm:$0xff] %v277_v48  ;;  %291 = vst [vmem:[#allocation2 + $0x48] sm:$0xff] %v8199_v49  ;;  %v8206_v55 = vmax.f32 %v8161_v19, 0.0  ;;  %v353_v58 = vrot.slane %v321_v52, 3  ;;  %v351_v60 = vrot.slane %v320_v53, 3  ;;  %v281_v61 = vmax.f32 %v269_v56, 0.0 }
 0x122   :  { %403 = vrot.lane.b32.xlu0 %v8148_v13, %s7800_s16  ;;  %288 = vst [vmem:[#allocation2 + $0x30] sm:$0xff] %v276_v54  ;;  %v463_v59 = vsel %vm457_vm1, %v461_v51, %v462_v44  ;;  %v446_v0 = vld [vmem:[#allocation8 + $0x38] sm:$0xf0]  ;;  %v268_v2 = vld [vmem:[#allocation8 + $0x50] sm:$0xff]  ;;  %v472_v6 = vrot.slane %v8159_v17, 4  ;;  %v469_v9 = vrot.slane %v8161_v19, 4 }
 0x123   :  { %290 = vst [vmem:[#allocation2 + $0x40] sm:$0xff] %v8206_v55  ;;  %293 = vst [vmem:[#allocation2 + $0x58] sm:$0xff] %v281_v61  ;;  %v354_v62 = vsel %vm334_vm0, %v349_v21, %v353_v58  ;;  %v8223_v63 = vsel %vm334_vm0, %v346_v23, %v351_v60  ;;  %v445_v3 = vld [vmem:[#allocation8 + $0x30] sm:$0xf0]  ;;  %v471_v4 = vrot.slane %v446_v0, 4  ;;  %v280_v7 = vmax.f32 %v268_v2, 0.0 }
 0x124   :  { %v468_v8 = vrot.slane %v445_v3, 4  ;;  %v570_v12 = vld [vmem:[#allocation8 + $0x20] sm:$0x1f]  ;;  %v586_v16 = vrot.slane %v8142_v5, 5  ;;  %vm584_vm2 = vcmask 1042432   ;;  %v589_v24 = vrot.slane %v8139_v1, 5 }
 0x125   :  { %413 = vrot.lane.b32.xlu1 %v344_v14, %s7800_s16  ;;  %292 = vst [vmem:[#allocation2 + $0x50] sm:$0xff] %v280_v7  ;;  %v473_v10 = vsel %vm457_vm1, %v471_v4, %v472_v6  ;;  %v568_v14 = vld [vmem:[#allocation8] sm:$0xe0]  ;;  %v591_v18 = vrot.slane %v570_v12, 5  ;;  %v571_v21 = vld [vmem:[#allocation8 + $0x28] sm:$0x1f] }
 0x126   :  { %411 = vrot.lane.b32.xlu0 %v340_v11, %s7800_s16  ;;  %v8235_v11 = vsel %vm457_vm1, %v468_v8, %v469_v9  ;;  %v585_v20 = vrot.slane %v568_v14, 5  ;;  %v569_v22 = vld [vmem:[#allocation8 + $0x8] sm:$0xe0]  ;;  %v593_v25 = vrot.slane %v571_v21, 5  ;;  %v448_v5 = vld [vmem:[#allocation8 + $0x58] sm:$0xf] }
 0x127   :  { %14390 = vst [vmem:[#allocation42_spill] sm:$0xff] %v8235_v11  ;;  %v8248_v23 = vsel %vm584_vm2, %v586_v16, %v591_v18  ;;  %v588_v28 = vrot.slane %v569_v22, 5  ;;  %v447_v29 = vld [vmem:[#allocation8 + $0x50] sm:$0xf]  ;;  %v476_v32 = vrot.slane %v448_v5, 4  ;;  %v599_v40 = vrot.slane %v8159_v17, 5 }
 0x128   :  { %v594_v30 = vsel %vm584_vm2, %v589_v24, %v593_v25  ;;  %v474_v34 = vrot.slane %v447_v29, 4  ;;  %v573_v37 = vld [vmem:[#allocation8 + $0x38] sm:$0xe0]  ;;  %v572_v38 = vld [vmem:[#allocation8 + $0x30] sm:$0xe0]  ;;  %v596_v42 = vrot.slane %v8161_v19, 5 }
 0x129   :  { %375 = vrot.lane.b32.xlu1 %v350_v26, %s7783_s20  ;;  %v590_v33 = vsel %vm584_vm2, %v588_v28, %v589_v24  ;;  %v477_v1 = vsel %vm457_vm1, %v472_v6, %v476_v32  ;;  %v598_v39 = vrot.slane %v573_v37, 5  ;;  %v595_v41 = vrot.slane %v572_v38, 5  ;;  %v745_v17 = vld [vmem:[#allocation12] sm:$0xff]  ;;  %v746_v45 = vld [vmem:[#allocation12 + $0x8] sm:$0xff]  ;;  %v575_v48 = vld [vmem:[#allocation8 + $0x58] sm:$0x1f] }
 0x12a   :  { %367 = vrot.lane.b32.xlu0 %v8177_v27, %s7783_s20  ;;  %v8264_v36 = vsel %vm457_vm1, %v469_v9, %v474_v34  ;;  %v8286_v19 = vpack.c.bf16 %v746_v45, %v745_v17  ;;  %v14082_v47 = vmov 0.0|0.0   ;;  %v574_v51 = vld [vmem:[#allocation8 + $0x50] sm:$0x1f]  ;;  %v748_v53 = vld [vmem:[#allocation12 + $0x18] sm:$0xff]  ;;  %v603_v54 = vrot.slane %v575_v48, 5  ;;  %v750_v60 = vld [vmem:[#allocation12 + $0x28] sm:$0xff] }
 0x12b   :  { %14392 = vst [vmem:[#allocation44_spill] sm:$0xff] %v8264_v36  ;;  %v8275_v43 = vsel %vm584_vm2, %v598_v39, %v599_v40  ;;  %v8278_v44 = vsel %vm584_vm2, %v595_v41, %v596_v42  ;;  %6710 = vmatprep.subr.bf16.mxu0 %v14082_v47  ;;  %6734 = vmatprep.subr.bf16.mxu1 %v14082_v47  ;;  %v747_v52 = vld [vmem:[#allocation12 + $0x10] sm:$0xff]  ;;  %v14084_v58 = vmov 0.0   ;;  %v752_v3 = vld [vmem:[#allocation12 + $0x38] sm:$0xff]  ;;  %v1007_v6 = vld [vmem:[#allocation2 + $0x8] sm:$0xf8] }
 0x12c   :  { %14393 = vst [vmem:[#allocation45_spill] sm:$0xff] %v8278_v44  ;;  %14394 = vst [vmem:[#allocation46_spill] sm:$0xff] %v8286_v19  ;;  %6712 = vmatpush3.bf16.msra.mxu0 %v8286_v19  ;;  %6736 = vmatpush3.bf16.msra.mxu1 %v8286_v19  ;;  %v8298_v56 = vpack.c.bf16 %v748_v53, %v747_v52  ;;  %v751_v2 = vld [vmem:[#allocation12 + $0x30] sm:$0xff]  ;;  %v1006_v7 = vld [vmem:[#allocation2] sm:$0xf8]  ;;  %v1033_v12 = vrot.slane %v1007_v6, 3 }
 0x12d   :  { %415 = vrot.lane.b32.xlu1 %v350_v26, %s7800_s16  ;;  %v8252_v26 = vsel %vm584_vm2, %v585_v20, %v586_v16  ;;  %6713 = vmatprep.subr.bf16.mxu0 %v14082_v47  ;;  %295 = vst [vmem:[#allocation3 + $0x8] sm:$0xff] %v14084_v58  ;;  %297 = vst [vmem:[#allocation3 + $0x18] sm:$0xff] %v14084_v58  ;;  %v8329_v4 = vpack.c.bf16 %v752_v3, %v751_v2  ;;  %v753_v8 = vld [vmem:[#allocation12 + $0x40] sm:$0xff]  ;;  %v754_v9 = vld [vmem:[#allocation12 + $0x48] sm:$0xff]  ;;  %v1034_v14 = vrot.slane %v8180_v31, 3  ;;  %vm7803_vm3 = vmmov 0  }
 0x12e   :  { %407 = vrot.lane.b32.xlu0 %v8177_v27, %s7800_s16  ;;  %14391 = vst [vmem:[#allocation43_spill] sm:$0xff] %v8252_v26  ;;  %6737 = vmatprep.subr.bf16.mxu1 %v14082_v47  ;;  %14395 = vst [vmem:[#allocation47_spill] sm:$0xff] %v8298_v56  ;;  %v1030_v16 = vrot.slane %v1006_v7, 3  ;;  %v1031_v18 = vrot.slane %v8184_v35, 3  ;;  %v1011_v20 = vld [vmem:[#allocation2 + $0x28] sm:$0x7] }
 0x12f   :  { %299 = vst [vmem:[#allocation3 + $0x28] sm:$0xff] %v14084_v58  ;;  %294 = vst [vmem:[#allocation3] sm:$0xff] %v14084_v58  ;;  %v1010_v21 = vld [vmem:[#allocation2 + $0x20] sm:$0x7]  ;;  %v755_v22 = vld [vmem:[#allocation12 + $0x50] sm:$0xff]  ;;  %v8355_v28 = vsel %vm334_vm0, %v1033_v12, %v1034_v14  ;;  %v1038_v5 = vrot.slane %v1011_v20, 3  ;;  %6234 = vmatprep.mubr.msk.f32.mxu0 %vm7803_vm3, %v14084_v58  ;;  %6269 = vmatprep.mubr.msk.f32.mxu1 %vm7803_vm3, %v14084_v58 }
 0x130   :  { %300 = vst [vmem:[#allocation3 + $0x30] sm:$0xff] %v14084_v58  ;;  %301 = vst [vmem:[#allocation3 + $0x38] sm:$0xff] %v14084_v58  ;;  %6715 = vmatpush3.bf16.msra.mxu0 %v8298_v56  ;;  %6739 = vmatpush3.bf16.msra.mxu1 %v8298_v56  ;;  %v756_v24 = vld [vmem:[#allocation12 + $0x58] sm:$0xff]  ;;  %v8359_v29 = vsel %vm334_vm0, %v1030_v16, %v1031_v18  ;;  %v1123_v32 = vld [vmem:[#allocation2 + $0x8] sm:$0xf0]  ;;  %vm743_vm4 = vcmask 1040384  }
 0x131   :  { %488 = vrot.lane.b32.xlu1 %v8196_v46, %s7783_s20  ;;  %302 = vst [vmem:[#allocation3 + $0x40] sm:$0xff] %v14084_v58  ;;  %303 = vst [vmem:[#allocation3 + $0x48] sm:$0xff] %v14084_v58  ;;  %6716 = vmatprep.subr.bf16.mxu0 %v14082_v47  ;;  %v8350_v25 = vpack.c.bf16 %v756_v24, %v755_v22  ;;  %v757_v34 = vld [vmem:[#allocation12 + $0x60] sm:$0xff]  ;;  %v8371_v38 = vsel %vm334_vm0, %v1034_v14, %v1038_v5  ;;  %v1141_v39 = vrot.slane %v1123_v32, 4  ;;  %v1239_v17 = vld [vmem:[#allocation2 + $0x8] sm:$0xe0] }
 0x132   :  { %486 = vrot.lane.b32.xlu0 %v8202_v50, %s7783_s20  ;;  %305 = vst [vmem:[#allocation3 + $0x58] sm:$0xff] %v14084_v58  ;;  %307 = vst [vmem:[#allocation3 + $0x68] sm:$0xff] %v14084_v58  ;;  %6740 = vmatprep.subr.bf16.mxu1 %v14082_v47  ;;  %v1238_v45 = vld [vmem:[#allocation2] sm:$0xe0]  ;;  %v759_v48 = vld [vmem:[#allocation12 + $0x70] sm:$0xff]  ;;  %v1044_v5 = vrot.slane %v8199_v49, 3 }
 0x133   :  { %308 = vst [vmem:[#allocation3 + $0x70] sm:$0xff] %v14084_v58  ;;  %309 = vst [vmem:[#allocation3 + $0x78] sm:$0xff] %v14084_v58  ;;  %v1125_v2 = vld [vmem:[#allocation2 + $0x28] sm:$0xf]  ;;  %v1124_v3 = vld [vmem:[#allocation2 + $0x20] sm:$0xf] }
 0x134   :  { %14398 = vst [vmem:[#allocation50_spill] sm:$0xff] %v8329_v4  ;;  %14400 = vst [vmem:[#allocation52_spill] sm:$0xff] %v8350_v25  ;;  %v1146_v6 = vrot.slane %v1125_v2, 4  ;;  %v1144_v7 = vrot.slane %v1124_v3, 4  ;;  %v1013_v20 = vld [vmem:[#allocation2 + $0x38] sm:$0xf8] }
 0x135   :  { %496 = vrot.lane.b32.xlu1 %v467_v57, %s7783_s20  ;;  %14401 = vst [vmem:[#allocation53_spill] sm:$0xff] %v8359_v29  ;;  %v1043_v24 = vrot.slane %v1013_v20, 3  ;;  %v1127_v20 = vld [vmem:[#allocation2 + $0x38] sm:$0xf0]  ;;  %v1265_v58 = vrot.slane %v8206_v55, 5  ;;  %vm1817_vm6 = vcmask 1046528  }
 0x136   :  { %494 = vrot.lane.b32.xlu0 %v463_v59, %s7783_s20  ;;  %v654_v56 = vld [vmem:[#allocation11 + $0xf8] sm:$0xff]  ;;  %vm2212_vm8 = vcmask 1045504   ;;  %vm2935_vm9 = vcmask 1041408   ;;  %s5933_s4 = sld [smem:[#allocation4 + $0x1]]  ;;  %s5934_s17 = sld [smem:[#allocation4 + $0x2]] }
 0x137   :  { %s7806_s0 = smov 96   ;;  %s5936_s24 = sld [smem:[#allocation4 + $0x4]] }
 0x138   :  { %s5935_s11 = sld [smem:[#allocation4 + $0x3]]  ;;  %s5944_s5 = sld [smem:[#allocation4 + $0x7]] }
 0x139   :  { %377 = vrot.lane.b32.xlu1 %v354_v62, %s7783_s20  ;;  %s7807_s29 = smov [#allocation29]  }
 0x13a   :  { %369 = vrot.lane.b32.xlu0 %v8223_v63, %s7783_s20  ;;  %s5913_s21 = sshll.u32 %s7807_s29, 4  ;;  %s5914_s21 = int_to_ptr.vmem [resolvable:$true] %s5913_s21 }
 0x13b   :  { %s7739_s15 = scalar_lea.vmem %s5914_s21, 512  ;;  %p7744_p4 = scmp.lt.s32.totalorder %s5914_s21, %s5914_s21 }
 0x13c   :  { %p7740_p3 = scmp.ne.s32.totalorder %s5914_s21, %s7739_s15  ;;  %p7745_p5 = scmp.lt.s32.totalorder %s7739_s15, %s7739_s15 }
 0x13d   :  { %417 = vrot.lane.b32.xlu1 %v354_v62, %s7800_s16  ;;  %v604_v62 = vsel %vm584_vm2, %v599_v40, %v603_v54  ;;  %v1142_v40 = vrot.slane %v8180_v31, 4  ;;  %v1257_v54 = vrot.slane %v1239_v17, 5  ;;  %v1371_v17 = vld [vmem:[#allocation15 + $0x8] sm:$0xff] }
 0x13e   :  { %409 = vrot.lane.b32.xlu0 %v8223_v63, %s7800_s16  ;;  %p7746_p6 = por %p7745_p5, %p7744_p4 }
 0x13f   :  { %v8389_v53 = vsel %vm457_vm1, %v1141_v39, %v1142_v40  ;;  %v8416_v12 = vsel %vm457_vm1, %v1142_v40, %v1146_v6  ;;  %v8439_v39 = vsel %vm334_vm0, %v1043_v24, %v1044_v5  ;;  %v1126_v24 = vld [vmem:[#allocation2 + $0x30] sm:$0xf0] }
 0x140   :  { %p7747_p7 = pnand %p7746_p6, %p7740_p3 }
 0x141   :  { %498 = vrot.lane.b32.xlu1 %v473_v10, %s7783_s20 }
 0x142   :  { %490 = vrot.lane.b32.xlu0 %v8235_v11, %s7783_s20 }
 0x145   :  { %533 = vrot.lane.b32.xlu1 %v8196_v46, %s7800_s16 }
 0x146   :  { %531 = vrot.lane.b32.xlu0 %v8202_v50, %s7800_s16 }
 0x149   :  { %541 = vrot.lane.b32.xlu1 %v467_v57, %s7800_s16  ;;  %v601_v57 = vrot.slane %v574_v51, 5  ;;  %v760_v51 = vld [vmem:[#allocation12 + $0x78] sm:$0xff] }
 0x14a   :  { %539 = vrot.lane.b32.xlu0 %v463_v59, %s7800_s16  ;;  %v749_v59 = vld [vmem:[#allocation12 + $0x20] sm:$0xff]  ;;  %v8384_v52 = vpack.c.bf16 %v760_v51, %v759_v48 }
 0x14b   :  { %v8316_v61 = vpack.c.bf16 %v750_v60, %v749_v59  ;;  %v8323_v0 = vsel %vm584_vm2, %v596_v42, %v601_v57  ;;  %v1258_v57 = vrot.slane %v8180_v31, 5  ;;  %v1254_v60 = vrot.slane %v1238_v45, 5 }
 0x14c   :  { %14397 = vst [vmem:[#allocation49_spill] sm:$0xff] %v8323_v0  ;;  %14404 = vst [vmem:[#allocation56_spill] sm:$0xff] %v8384_v52 }
 0x14d   :  { %615 = vrot.lane.b32.xlu1 %v8248_v23, %s7783_s20  ;;  %14396 = vst [vmem:[#allocation48_spill] sm:$0xff] %v8316_v61  ;;  %6718 = vmatpush3.bf16.msra.mxu0 %v8316_v61  ;;  %v1259_v31 = vsel %vm584_vm2, %v1257_v54, %v1258_v57  ;;  %v1017_v54 = vld [vmem:[#allocation2 + $0x58] sm:$0x7] }
 0x14e   :  { %613 = vrot.lane.b32.xlu0 %v8252_v26, %s7783_s20  ;;  %6742 = vmatpush3.bf16.msra.mxu1 %v8316_v61  ;;  %v653_v61 = vld [vmem:[#allocation11 + $0xf0] sm:$0xff] }
 0x14f   :  { %6719 = vmatprep.subr.bf16.mxu0 %v14082_v47  ;;  %6743 = vmatprep.subr.bf16.mxu1 %v14082_v47 }
 0x151   :  { %623 = vrot.lane.b32.xlu1 %v594_v30, %s7783_s20  ;;  %6721 = vmatpush3.bf16.msra.mxu0 %v8329_v4 }
 0x152   :  { %621 = vrot.lane.b32.xlu0 %v590_v33, %s7783_s20  ;;  %6745 = vmatpush3.bf16.msra.mxu1 %v8329_v4  ;;  %v651_v4 = vld [vmem:[#allocation11 + $0xe0] sm:$0xff] }
 0x153   :  { %6722 = vmatprep.subr.bf16.mxu0 %v14082_v47  ;;  %6746 = vmatprep.subr.bf16.mxu1 %v14082_v47 }
 0x155   :  { %500 = vrot.lane.b32.xlu1 %v477_v1, %s7783_s20 }
 0x156   :  { %492 = vrot.lane.b32.xlu0 %v8264_v36, %s7783_s20 }
 0x159   :  { %543 = vrot.lane.b32.xlu1 %v473_v10, %s7800_s16  ;;  %v8339_v10 = vpack.c.bf16 %v754_v9, %v753_v8  ;;  %v1241_v8 = vld [vmem:[#allocation2 + $0x28] sm:$0x1f]  ;;  %v1240_v9 = vld [vmem:[#allocation2 + $0x20] sm:$0x1f] }
 0x15a   :  { %535 = vrot.lane.b32.xlu0 %v8235_v11, %s7800_s16  ;;  %v1262_v14 = vrot.slane %v1241_v8, 5 }
 0x15b   :  { %14399 = vst [vmem:[#allocation51_spill] sm:$0xff] %v8339_v10  ;;  %6724 = vmatpush3.bf16.msra.mxu0 %v8339_v10  ;;  %6748 = vmatpush3.bf16.msra.mxu1 %v8339_v10 }
 0x15c   :  { %6725 = vmatprep.subr.bf16.mxu0 %v14082_v47  ;;  %6749 = vmatprep.subr.bf16.mxu1 %v14082_v47  ;;  %v1263_v22 = vsel %vm584_vm2, %v1258_v57, %v1262_v14 }
 0x15d   :  { %625 = vrot.lane.b32.xlu1 %v8275_v43, %s7783_s20 }
 0x15e   :  { %617 = vrot.lane.b32.xlu0 %v8278_v44, %s7783_s20 }
 0x15f   :  { %6727 = vmatpush3.bf16.msra.mxu0 %v8350_v25  ;;  %6751 = vmatpush3.bf16.msra.mxu1 %v8350_v25 }
 0x160   :  { %6728 = vmatprep.subr.bf16.mxu0 %v14082_v47  ;;  %6752 = vmatprep.subr.bf16.mxu1 %v14082_v47 }
 0x161   :  { %669 = vrot.lane.b32.xlu1 %v8248_v23, %s7800_s16 }
 0x162   :  { %667 = vrot.lane.b32.xlu0 %v8252_v26, %s7800_s16 }
 0x165   :  { %677 = vrot.lane.b32.xlu1 %v594_v30, %s7800_s16  ;;  %v1036_v30 = vrot.slane %v1010_v21, 3  ;;  %v1012_v21 = vld [vmem:[#allocation2 + $0x30] sm:$0xf8] }
 0x166   :  { %675 = vrot.lane.b32.xlu0 %v590_v33, %s7800_s16  ;;  %v1122_v33 = vld [vmem:[#allocation2] sm:$0xf0] }
 0x167   :  { %v8376_v41 = vsel %vm334_vm0, %v1031_v18, %v1036_v30  ;;  %v1138_v42 = vrot.slane %v1122_v33, 4  ;;  %v1260_v18 = vrot.slane %v1240_v9, 5  ;;  %v1040_v33 = vrot.slane %v1012_v21, 3 }
 0x168   :  { %14403 = vst [vmem:[#allocation55_spill] sm:$0xff] %v8376_v41 }
 0x169   :  { %545 = vrot.lane.b32.xlu1 %v477_v1, %s7800_s16  ;;  %v758_v1 = vld [vmem:[#allocation12 + $0x68] sm:$0xff] }
 0x16a   :  { %537 = vrot.lane.b32.xlu0 %v8264_v36, %s7800_s16  ;;  %v8366_v37 = vpack.c.bf16 %v758_v1, %v757_v34  ;;  %v1041_v34 = vrot.slane %v8206_v55, 3 }
 0x16c   :  { %14402 = vst [vmem:[#allocation54_spill] sm:$0xff] %v8366_v37  ;;  %6730 = vmatpush3.bf16.msra.mxu0 %v8366_v37  ;;  %6754 = vmatpush3.bf16.msra.mxu1 %v8366_v37  ;;  %v1245_v37 = vld [vmem:[#allocation2 + $0x58] sm:$0x1f] }
 0x16d   :  { %627 = vrot.lane.b32.xlu1 %v604_v62, %s7783_s20  ;;  %6731 = vmatprep.subr.bf16.mxu0 %v14082_v47  ;;  %v1272_v25 = vrot.slane %v1245_v37, 5 }
 0x16e   :  { %619 = vrot.lane.b32.xlu0 %v8323_v0, %s7783_s20  ;;  %6755 = vmatprep.subr.bf16.mxu1 %v14082_v47 }
 0x170   :  { %6733 = vmatpush3.bf16.msra.mxu0 %v8384_v52  ;;  %6757 = vmatpush3.bf16.msra.mxu1 %v8384_v52 }
 0x171   :  { %679 = vrot.lane.b32.xlu1 %v8275_v43, %s7800_s16  ;;  %v1139_v43 = vrot.slane %v8184_v35, 4  ;;  %6790 = vmatprep.subr.bf16.mxu1 %v14082_v47 }
 0x172   :  { %671 = vrot.lane.b32.xlu0 %v8278_v44, %s7800_s16 }
 0x173   :  { %v8394_v59 = vsel %vm457_vm1, %v1138_v42, %v1139_v43  ;;  %v8419_v16 = vsel %vm457_vm1, %v1139_v43, %v1144_v7  ;;  %v8444_v42 = vsel %vm334_vm0, %v1040_v33, %v1041_v34  ;;  %v1370_v43 = vld [vmem:[#allocation15] sm:$0xff]  ;;  %v1152_v33 = vrot.slane %v8199_v49, 4 }
 0x174   :  { %14405 = vst [vmem:[#allocation57_spill] sm:$0xff] %v8394_v59  ;;  %14407 = vst [vmem:[#allocation59_spill] sm:$0xff] %v8419_v16  ;;  %v8448_v48 = vpack.c.bf16 %v1371_v17, %v1370_v43  ;;  %v1149_v43 = vrot.slane %v8206_v55, 4  ;;  %v1243_v17 = vld [vmem:[#allocation2 + $0x38] sm:$0xe0] }
 0x175   :  { %681 = vrot.lane.b32.xlu1 %v604_v62, %s7800_s16  ;;  %v1255_v62 = vrot.slane %v8184_v35, 5  ;;  %14409 = vst [vmem:[#allocation61_spill] sm:$0xff] %v8444_v42 }
 0x176   :  { %673 = vrot.lane.b32.xlu0 %v8323_v0, %s7800_s16  ;;  %14410 = vst [vmem:[#allocation62_spill] sm:$0xff] %v8448_v48  ;;  %6759 = vmatprep.subr.bf16.mxu0 %v8448_v48  ;;  %v396_v48 = vld [vmem:[#allocation11 + $0x28] sm:$0xff] }
 0x177   :  { %v8409_v35 = vsel %vm584_vm2, %v1254_v60, %v1255_v62  ;;  %v8430_v32 = vsel %vm584_vm2, %v1255_v62, %v1260_v18  ;;  %v1016_v60 = vld [vmem:[#allocation2 + $0x50] sm:$0x7]  ;;  %v1048_v62 = vrot.slane %v1017_v54, 3 }
 0x178   :  { %14406 = vst [vmem:[#allocation58_spill] sm:$0xff] %v8409_v35  ;;  %14408 = vst [vmem:[#allocation60_spill] sm:$0xff] %v8430_v32  ;;  %v1046_v3 = vrot.slane %v1016_v60, 3  ;;  %v1242_v60 = vld [vmem:[#allocation2 + $0x30] sm:$0xe0] }
 0x179   :  { %1066 = vrot.lane.b32.xlu1 %v8355_v28, %s7783_s20  ;;  %v8471_v7 = vsel %vm334_vm0, %v1044_v5, %v1048_v62  ;;  %v1151_v5 = vrot.slane %v1127_v20, 4  ;;  %v1267_v62 = vrot.slane %v1243_v17, 5  ;;  %v1264_v47 = vrot.slane %v1242_v60, 5  ;;  %v1128_v60 = vld [vmem:[#allocation2 + $0x50] sm:$0xf] }
 0x17a   :  { %1058 = vrot.lane.b32.xlu0 %v8359_v29, %s7783_s20  ;;  %v1154_v52 = vrot.slane %v1128_v60, 4 }
 0x17d   :  { %1068 = vrot.lane.b32.xlu1 %v8371_v38, %s7783_s20 }
 0x17e   :  { %1060 = vrot.lane.b32.xlu0 %v8376_v41, %s7783_s20 }
 0x181   :  { %1214 = vrot.lane.b32.xlu1 %v8389_v53, %s7800_s16 }
 0x182   :  { %1206 = vrot.lane.b32.xlu0 %v8394_v59, %s7800_s16 }
 0x185   :  { %1334 = vrot.lane.b32.xlu1 %v1259_v31, %s7800_s16 }
 0x186   :  { %1326 = vrot.lane.b32.xlu0 %v8409_v35, %s7800_s16 }
 0x189   :  { %1216 = vrot.lane.b32.xlu1 %v8416_v12, %s7800_s16 }
 0x18a   :  { %1208 = vrot.lane.b32.xlu0 %v8419_v16, %s7800_s16 }
 0x18b   :  { %v8427_v30 = vpop.permute.xlu1 %371 }
 0x18c   :  { %v8433_v1 = vpop.permute.xlu0 %363 }
 0x18d   :  { %1336 = vrot.lane.b32.xlu1 %v1263_v22, %s7800_s16 }
 0x18e   :  { %1328 = vrot.lane.b32.xlu0 %v8430_v32, %s7800_s16 }
 0x18f   :  { %v8441_v40 = vpop.permute.xlu1 %373 }
 0x190   :  { %v8446_v45 = vpop.permute.xlu0 %365 }
 0x191   :  { %1070 = vrot.lane.b32.xlu1 %v8439_v39, %s7783_s20 }
 0x192   :  { %1062 = vrot.lane.b32.xlu0 %v8444_v42, %s7783_s20 }
 0x193   :  { %v8455_v51 = vpop.permute.xlu1 %405 }
 0x194   :  { %v8457_v57 = vpop.permute.xlu0 %403 }
 0x195   :  { %1102 = vrot.lane.b32.xlu1 %v8355_v28, %s7800_s16  ;;  %v8476_v28 = vsel %vm334_vm0, %v1041_v34, %v1046_v3  ;;  %v1268_v3 = vrot.slane %v8199_v49, 5  ;;  %v8529_v49 = vsel %vm584_vm2, %v1264_v47, %v1265_v58 }
 0x196   :  { %1094 = vrot.lane.b32.xlu0 %v8359_v29, %s7800_s16  ;;  %14411 = vst [vmem:[#allocation63_spill] sm:$0xff] %v8476_v28  ;;  %14413 = vst [vmem:[#allocation65_spill] sm:$0xff] %v8529_v49 }
 0x197   :  { %v8463_v2 = vpop.permute.xlu1 %413 }
 0x198   :  { %v8465_v6 = vpop.permute.xlu0 %411 }
 0x199   :  { %1290 = vrot.lane.b32.xlu1 %v1259_v31, %s7783_s20 }
 0x19a   :  { %1282 = vrot.lane.b32.xlu0 %v8409_v35, %s7783_s20  ;;  %v1244_v35 = vld [vmem:[#allocation2 + $0x50] sm:$0x1f] }
 0x19b   :  { %v8473_v8 = vpop.permute.xlu1 %375  ;;  %v1270_v60 = vrot.slane %v1244_v35, 5 }
 0x19c   :  { %v8478_v9 = vpop.permute.xlu0 %367 }
 0x19d   :  { %1072 = vrot.lane.b32.xlu1 %v8471_v7, %s7783_s20  ;;  %v8564_v37 = vsel %vm584_vm2, %v1265_v58, %v1270_v60  ;;  %v652_v58 = vld [vmem:[#allocation11 + $0xe8] sm:$0xff] }
 0x19e   :  { %1064 = vrot.lane.b32.xlu0 %v8476_v28, %s7783_s20  ;;  %14418 = vst [vmem:[#allocation70_spill] sm:$0xff] %v8564_v37 }
 0x19f   :  { %v8484_v31 = vpop.permute.xlu1 %415 }
 0x1a0   :  { %v8486_v14 = vpop.permute.xlu0 %407 }
 0x1a1   :  { %1104 = vrot.lane.b32.xlu1 %v8371_v38, %s7800_s16  ;;  %v1148_v38 = vrot.slane %v1126_v24, 4 }
 0x1a2   :  { %1096 = vrot.lane.b32.xlu0 %v8376_v41, %s7800_s16 }
 0x1a3   :  { %v8492_v18 = vpop.permute.xlu1 %488  ;;  %v8516_v24 = vsel %vm457_vm1, %v1148_v38, %v1149_v43  ;;  %v1129_v38 = vld [vmem:[#allocation2 + $0x58] sm:$0xf] }
 0x1a4   :  { %v8494_v21 = vpop.permute.xlu0 %486  ;;  %14412 = vst [vmem:[#allocation64_spill] sm:$0xff] %v8516_v24  ;;  %v1156_v55 = vrot.slane %v1129_v38, 4  ;;  %v8550_v38 = vsel %vm457_vm1, %v1149_v43, %v1154_v52  ;;  %v14103_v52 = vlaneseq }
 0x1a5   :  { %1292 = vrot.lane.b32.xlu1 %v1263_v22, %s7783_s20  ;;  %v8510_v22 = vsel %vm457_vm1, %v1151_v5, %v1152_v33  ;;  %14416 = vst [vmem:[#allocation68_spill] sm:$0xff] %v8550_v38 }
 0x1a6   :  { %1284 = vrot.lane.b32.xlu0 %v8430_v32, %s7783_s20  ;;  %v8545_v47 = vsel %vm457_vm1, %v1152_v33, %v1156_v55  ;;  %v8579_v60 = vand.u32 127, %v14103_v52 }
 0x1a7   :  { %v8500_v34 = vpop.permute.xlu1 %496 }
 0x1a8   :  { %v8503_v54 = vpop.permute.xlu0 %494  ;;  %vm381_vm5 = vcmp.lt.s32.totalorder %v8579_v60, 8  ;;  %vm419_vm7 = vcmp.lt.s32.totalorder %v8579_v60, 120  ;;  %vm2257_vm10 = vcmp.lt.s32.totalorder %v8579_v60, 16  ;;  %vm2350_vm11 = vcmp.lt.s32.totalorder %v8579_v60, 112 }
 0x1a9   :  { %1174 = vrot.lane.b32.xlu1 %v8389_v53, %s7783_s20  ;;  %v1269_v53 = vsel %vm584_vm2, %v1267_v62, %v1268_v3  ;;  %vm5109_vm12 = vcmp.lt.s32.totalorder %v8579_v60, 32  ;;  %vm5202_vm13 = vcmp.lt.s32.totalorder %v8579_v60, 96 }
 0x1aa   :  { %1166 = vrot.lane.b32.xlu0 %v8394_v59, %s7783_s20  ;;  %v1798_v59 = vld [vmem:[#allocation3 + $0x38] sm:$0x1] }
 0x1ab   :  { %v8513_v20 = vpop.permute.xlu1 %377 }
 0x1ac   :  { %v8519_v32 = vpop.permute.xlu0 %369 }
 0x1ad   :  { %1218 = vrot.lane.b32.xlu1 %v8510_v22, %s7800_s16 }
 0x1ae   :  { %1210 = vrot.lane.b32.xlu0 %v8516_v24, %s7800_s16 }
 0x1af   :  { %v8526_v5 = vpop.permute.xlu1 %417 }
 0x1b0   :  { %v8531_v17 = vpop.permute.xlu0 %409 }
 0x1b1   :  { %1338 = vrot.lane.b32.xlu1 %v1269_v53, %s7800_s16 }
 0x1b2   :  { %1330 = vrot.lane.b32.xlu0 %v8529_v49, %s7800_s16 }
 0x1b3   :  { %v8536_v41 = vpop.permute.xlu1 %498 }
 0x1b4   :  { %14414 = vst [vmem:[#allocation66_spill] sm:$0xff] %v8536_v41  ;;  %v8538_v62 = vpop.permute.xlu0 %490 }
 0x1b5   :  { %14415 = vst [vmem:[#allocation67_spill] sm:$0xff] %v8538_v62  ;;  %1176 = vrot.lane.b32.xlu1 %v8416_v12, %s7783_s20  ;;  %v8559_v12 = vsel %vm584_vm2, %v1268_v3, %v1272_v25  ;;  %v1602_v25 = vld [vmem:[#allocation3 + $0x8] sm:$0x80]  ;;  %v1606_v3 = vld [vmem:[#allocation3 + $0x28] sm:$0x7f] }
 0x1b6   :  { %1168 = vrot.lane.b32.xlu0 %v8419_v16, %s7783_s20  ;;  %v1794_v16 = vld [vmem:[#allocation3 + $0x18] sm:$0xfe]  ;;  %v1633_v62 = vrot.slane %v1606_v3, 7 }
 0x1b7   :  { %v8547_v29 = vpop.permute.xlu1 %533  ;;  %v1821_v52 = vrot.slane %v1794_v16, 1  ;;  %v8600_v16 = vadd.f32 %v653_v61, %v8278_v44  ;;  %v1800_v3 = vld [vmem:[#allocation3 + $0x58] sm:$0xfe] }
 0x1b8   :  { %v8552_v10 = vpop.permute.xlu0 %531 }
 0x1b9   :  { %14417 = vst [vmem:[#allocation69_spill] sm:$0xff] %v8552_v10  ;;  %1220 = vrot.lane.b32.xlu1 %v8545_v47, %s7800_s16  ;;  %v1826_v10 = vrot.slane %v1798_v59, 1  ;;  %14427 = vst [vmem:[#allocation78_spill] sm:$0xff] %v8600_v16  ;;  %v8603_v59 = vadd.f32 %v654_v56, %v8323_v0  ;;  %v426_v0 = vld [vmem:[#allocation11 + $0x48] sm:$0xff] }
 0x1ba   :  { %1212 = vrot.lane.b32.xlu0 %v8550_v38, %s7800_s16  ;;  %v8591_v38 = vadd.f32 %v652_v58, %v8248_v23  ;;  %v1804_v58 = vld [vmem:[#allocation3 + $0x78] sm:$0x1] }
 0x1bb   :  { %v8561_v33 = vpop.permute.xlu1 %541  ;;  %14428 = vst [vmem:[#allocation79_spill] sm:$0xff] %v8603_v59 }
 0x1bc   :  { %v8566_v55 = vpop.permute.xlu0 %539  ;;  %14425 = vst [vmem:[#allocation76_spill] sm:$0xff] %v8591_v38  ;;  %v398_v38 = vld [vmem:[#allocation11 + $0x38] sm:$0xff] }
 0x1bd   :  { %14419 = vst [vmem:[#allocation71_spill] sm:$0xff] %v8566_v55  ;;  %1340 = vrot.lane.b32.xlu1 %v8559_v12, %s7800_s16  ;;  %v1612_v55 = vld [vmem:[#allocation3 + $0x68] sm:$0x7f] }
 0x1be   :  { %1332 = vrot.lane.b32.xlu0 %v8564_v37, %s7800_s16  ;;  %v1643_v16 = vrot.slane %v1612_v55, 7  ;;  %v425_v55 = vld [vmem:[#allocation11 + $0x40] sm:$0xff] }
 0x1bf   :  { %v8572_v35 = vpop.permute.xlu1 %615 }
 0x1c0   :  { %14420 = vst [vmem:[#allocation72_spill] sm:$0xff] %v8572_v35  ;;  %v8574_v43 = vpop.permute.xlu0 %613  ;;  %v1608_v35 = vld [vmem:[#allocation3 + $0x48] sm:$0x80] }
 0x1c1   :  { %14421 = vst [vmem:[#allocation73_spill] sm:$0xff] %v8574_v43  ;;  %1106 = vrot.lane.b32.xlu1 %v8439_v39, %s7800_s16  ;;  %v1628_v39 = vrot.slane %v1602_v25, 7  ;;  %v14424_v43 = vmov 0.0   ;;  %v395_v25 = vld [vmem:[#allocation11 + $0x20] sm:$0xff] }
 0x1c2   :  { %1098 = vrot.lane.b32.xlu0 %v8444_v42, %s7800_s16  ;;  %v1629_v41 = vrot.slane %v14424_v43, 7  ;;  %v1822_v42 = vrot.slane %v14424_v43, 1  ;;  %v8616_v56 = vadd.f32 %v395_v25, %v8148_v13  ;;  %v8644_v25 = vadd.f32 %v398_v38, %v8223_v63 }
 0x1c3   :  { %v8583_v19 = vpop.permute.xlu1 %623 }
 0x1c4   :  { %14422 = vst [vmem:[#allocation74_spill] sm:$0xff] %v8583_v19  ;;  %v8585_v36 = vpop.permute.xlu0 %621  ;;  %v8594_v19 = vadd.f32 %v651_v4, %v8252_v26  ;;  %v1638_v4 = vrot.slane %v1608_v35, 7  ;;  %v1634_v61 = vsel %vm743_vm4, %v1629_v41, %v1633_v62  ;;  %v8627_v35 = vsel %vm1817_vm6, %v1822_v42, %v1826_v10  ;;  %14429 = vst [vmem:[#allocation80_spill] sm:$0xff] %v8644_v25  ;;  %v8700_v25 = vld [vmem:[#allocation2 + $0x18] sm:$0xff] }
 0x1c5   :  { %14423 = vst [vmem:[#allocation75_spill] sm:$0xff] %v8585_v36  ;;  %1294 = vrot.lane.b32.xlu1 %v1269_v53, %s7783_s20  ;;  %v397_v36 = vld [vmem:[#allocation11 + $0x30] sm:$0xff]  ;;  %v421_v62 = vsel %vm419_vm7, %v8455_v51, %v8463_v2  ;;  %v422_v10 = vsel %vm419_vm7, %v8486_v14, %v8484_v31  ;;  %v383_v31 = vsel %vm381_vm5, %v8441_v40, %v8446_v45  ;;  %14431 = vst [vmem:[#allocation82_spill] sm:$0xff] %v8700_v25  ;;  %v689_v25 = vld [vmem:[#allocation11 + $0x108] sm:$0xff] }
 0x1c6   :  { %14426 = vst [vmem:[#allocation77_spill] sm:$0xff] %v8594_v19  ;;  %1286 = vrot.lane.b32.xlu0 %v8529_v49, %s7783_s20  ;;  %v8609_v19 = vadd.f32 %v396_v48, %v8154_v15  ;;  %v1630_v49 = vsel %vm743_vm4, %v1628_v39, %v1629_v41  ;;  %v8619_v59 = vadd.f32 %v397_v36, %v8177_v27  ;;  %v427_v39 = vld [vmem:[#allocation11 + $0x50] sm:$0xff] }
 0x1c7   :  { %v8606_v53 = vpop.permute.xlu1 %500  ;;  %v8624_v48 = vsel %vm1817_vm6, %v1821_v52, %v1822_v42  ;;  %v420_v36 = vsel %vm419_vm7, %v8457_v57, %v8465_v6  ;;  %v1836_v52 = vrot.slane %v1804_v58, 1  ;;  %v8648_v2 = vpack.i.bf16 %v1634_v61, %v1630_v49  ;;  %v386_v6 = vld [vmem:[#allocation11] sm:$0xff]  ;;  %v387_v58 = vld [vmem:[#allocation11 + $0x8] sm:$0xff] }
 0x1c8   :  { %v8611_v26 = vpop.permute.xlu0 %492  ;;  %v8651_v57 = vsel %vm743_vm4, %v1638_v4, %v1629_v41  ;;  %v8665_v49 = vpack.i.bf16 %v8624_v48, %v14424_v43  ;;  %v8668_v38 = vsel %vm743_vm4, %v1629_v41, %v1643_v16  ;;  %v430_v4 = vadd.f32 %v426_v0, %v421_v62 }
 0x1c9   :  { %1108 = vrot.lane.b32.xlu1 %v8471_v7, %s7800_s16  ;;  %v1831_v7 = vrot.slane %v1800_v3, 1  ;;  %v382_v3 = vsel %vm381_vm5, %v8427_v30, %v8433_v1  ;;  %v429_v61 = vadd.f32 %v425_v55, %v420_v36  ;;  %v384_v30 = vsel %vm381_vm5, %v8473_v8, %v8478_v9 }
 0x1ca   :  { %1100 = vrot.lane.b32.xlu0 %v8476_v28, %s7800_s16  ;;  %v388_v28 = vld [vmem:[#allocation11 + $0x10] sm:$0xff]  ;;  %v8678_v1 = vpack.i.bf16 %v8627_v35, %v14424_v43  ;;  %v431_v40 = vadd.f32 %v427_v39, %v422_v10  ;;  %v8688_v45 = vsel %vm1817_vm6, %v1822_v42, %v1836_v52  ;;  %v390_v8 = vadd.f32 %v386_v6, %v382_v3 }
 0x1cb   :  { %v8646_v51 = vpop.permute.xlu1 %543  ;;  %v8685_v41 = vsel %vm1817_vm6, %v1831_v7, %v1822_v42  ;;  %v391_v9 = vadd.f32 %v387_v58, %v383_v31  ;;  %v438_v39 = vadd.f32 %v421_v62, %v383_v31  ;;  %v392_v44 = vadd.f32 %v388_v28, %v384_v30  ;;  %v8698_v7 = vld [vmem:[#allocation2 + $0x8] sm:$0xfc]  ;;  %v8702_v42 = vld [vmem:[#allocation2] sm:$0xfc]  ;;  %v8712_v62 = vld [vmem:[#allocation2 + $0x10] sm:$0xff] }
 0x1cc   :  { %v8661_v14 = vpop.permute.xlu0 %535  ;;  %14430 = vst [vmem:[#allocation81_spill] sm:$0xff] %v8698_v7  ;;  %14432 = vst [vmem:[#allocation83_spill] sm:$0xff] %v8702_v42  ;;  %v433_v6 = vmax.f32 %v390_v8, %v429_v61  ;;  %v8708_v58 = vpack.i.bf16 %v8685_v41, %v14424_v43  ;;  %v508_v31 = vld [vmem:[#allocation11 + $0x68] sm:$0xff]  ;;  %v507_v61 = vld [vmem:[#allocation11 + $0x60] sm:$0xff] }
 0x1cd   :  { %1296 = vrot.lane.b32.xlu1 %v8559_v12, %s7783_s20  ;;  %v434_v52 = vmax.f32 %v391_v9, %v430_v4  ;;  %14433 = vst [vmem:[#allocation84_spill] sm:$0xff] %v8712_v62  ;;  %v503_v4 = vsel %vm381_vm5, %v8500_v34, %v8492_v18  ;;  %v428_v34 = vld [vmem:[#allocation11 + $0x58] sm:$0xff]  ;;  %v634_v42 = vld [vmem:[#allocation11 + $0xc0] sm:$0xff]  ;;  %v14441_v62 = vld [vmem:[#allocation73_spill] sm:$0xff] }
 0x1ce   :  { %1288 = vrot.lane.b32.xlu0 %v8564_v37, %s7783_s20  ;;  %v437_v37 = vadd.f32 %v420_v36, %v382_v3  ;;  %v435_v36 = vmax.f32 %v392_v44, %v431_v40  ;;  %v439_v3 = vadd.f32 %v422_v10, %v384_v30  ;;  %v8726_v44 = vpack.i.bf16 %v8688_v45, %v14424_v43  ;;  %v389_v30 = vld [vmem:[#allocation11 + $0x18] sm:$0xff] }
 0x1cf   :  { %v8690_v12 = vpop.permute.xlu1 %625  ;;  %v512_v16 = vadd.f32 %v508_v31, %v503_v4  ;;  %v8739_v10 = vmax.f32 %v434_v52, %v8196_v46  ;;  %v8742_v18 = vmax.f32 %v433_v6, %v8202_v50  ;;  %v14435_v28 = vld [vmem:[#allocation71_spill] sm:$0xff] }
 0x1d0   :  { %v8696_v0 = vpop.permute.xlu0 %617  ;;  %v527_v40 = vadd.f32 %v8202_v50, %v437_v37  ;;  %v548_v37 = vsel %vm419_vm7, %v8547_v29, %v8561_v33  ;;  %v8758_v52 = vadd.f32 %v8235_v11, %v439_v3  ;;  %v635_v50 = vld [vmem:[#allocation11 + $0xc8] sm:$0xff]  ;;  %v14438_v29 = vld [vmem:[#allocation74_spill] sm:$0xff]  ;;  %v520_v3 = vadd.f32 %v503_v4, %v8154_v15 }
 0x1d1   :  { %1178 = vrot.lane.b32.xlu1 %v8510_v22, %s7783_s20  ;;  %v502_v22 = vsel %vm381_vm5, %v8503_v54, %v8494_v21  ;;  %v423_v21 = vsel %vm419_vm7, %v8531_v17, %v8526_v5  ;;  %v528_v54 = vadd.f32 %v8196_v46, %v438_v39  ;;  %v385_v5 = vsel %vm381_vm5, %v8513_v20, %v8519_v32  ;;  %v553_v17 = vld [vmem:[#allocation11 + $0xa8] sm:$0xff]  ;;  %v14437_v46 = vld [vmem:[#allocation72_spill] sm:$0xff] }
 0x1d2   :  { %1170 = vrot.lane.b32.xlu0 %v8516_v24, %s7783_s20  ;;  %v511_v55 = vadd.f32 %v507_v61, %v502_v22  ;;  %v8755_v39 = vmax.f32 %v435_v36, %v8235_v11  ;;  %v432_v6 = vadd.f32 %v428_v34, %v423_v21  ;;  %v440_v31 = vadd.f32 %v423_v21, %v385_v5  ;;  %v552_v61 = vld [vmem:[#allocation11 + $0xa0] sm:$0xff]  ;;  %v14436_v32 = vld [vmem:[#allocation69_spill] sm:$0xff]  ;;  %v14439_v34 = vld [vmem:[#allocation67_spill] sm:$0xff] }
 0x1d3   :  { %v670_v8 = vpop.permute.xlu1 %669  ;;  %v547_v20 = vsel %vm419_vm7, %v14436_v32, %v14435_v28  ;;  %v630_v33 = vsel %vm381_vm5, %v14438_v29, %v14437_v46  ;;  %v519_v11 = vadd.f32 %v502_v22, %v8148_v13  ;;  %v14440_v21 = vld [vmem:[#allocation66_spill] sm:$0xff]  ;;  %v14442_v28 = vld [vmem:[#allocation75_spill] sm:$0xff]  ;;  %v516_v46 = vmax.f32 %v8609_v19, %v512_v16 }
 0x1d4   :  { %v668_v9 = vpop.permute.xlu0 %667  ;;  %v504_v24 = vsel %vm381_vm5, %v14440_v21, %v14439_v34  ;;  %v629_v32 = vsel %vm381_vm5, %v14442_v28, %v14441_v62  ;;  %v515_v29 = vmax.f32 %v8616_v56, %v511_v55  ;;  %v393_v15 = vadd.f32 %v389_v30, %v385_v5  ;;  %v688_v21 = vld [vmem:[#allocation11 + $0x100] sm:$0xff]  ;;  %v554_v28 = vld [vmem:[#allocation11 + $0xb0] sm:$0xff] }
 0x1d5   :  { %1180 = vrot.lane.b32.xlu1 %v8545_v47, %s7783_s20  ;;  %v14434_v47 = vld [vmem:[#allocation68_spill] sm:$0xff]  ;;  %v557_v4 = vadd.f32 %v553_v17, %v548_v37  ;;  %v556_v13 = vadd.f32 %v552_v61, %v547_v20  ;;  %v639_v22 = vadd.f32 %v635_v50, %v630_v33  ;;  %v638_v16 = vadd.f32 %v634_v42, %v629_v32 }
 0x1d6   :  { %1172 = vrot.lane.b32.xlu0 %v14434_v47, %s7783_s20  ;;  %v509_v47 = vld [vmem:[#allocation11 + $0x70] sm:$0xff]  ;;  %v436_v19 = vmax.f32 %v393_v15, %v432_v6  ;;  %v14443_v30 = vld [vmem:[#allocation44_spill] sm:$0xff]  ;;  %v521_v50 = vadd.f32 %v504_v24, %v8177_v27  ;;  %v565_v17 = vadd.f32 %v548_v37, %v520_v3  ;;  %v564_v61 = vadd.f32 %v547_v20, %v519_v11  ;;  %v555_v15 = vld [vmem:[#allocation11 + $0xb8] sm:$0xff] }
 0x1d7   :  { %v678_v36 = vpop.permute.xlu1 %677  ;;  %v513_v56 = vadd.f32 %v509_v47, %v504_v24  ;;  %v8791_v5 = vadd.f32 %v14443_v30, %v440_v31  ;;  %v505_v42 = vsel %vm381_vm5, %v8606_v53, %v8611_v26  ;;  %v561_v27 = vmax.f32 %v516_v46, %v557_v4  ;;  %v636_v31 = vld [vmem:[#allocation11 + $0xd0] sm:$0xff] }
 0x1d8   :  { %v676_v7 = vpop.permute.xlu0 %675  ;;  %v684_v34 = vsel %vm419_vm7, %v670_v8, %v678_v36  ;;  %v560_v11 = vmax.f32 %v515_v29, %v556_v13  ;;  %v643_v24 = vmax.f32 %v8739_v10, %v639_v22  ;;  %v646_v37 = vadd.f32 %v629_v32, %v527_v40 }
 0x1d9   :  { %7122 = vrot.lane.b32.xlu1 %v8648_v2, %s7783_s20  ;;  %v683_v62 = vsel %vm419_vm7, %v668_v9, %v676_v7  ;;  %v549_v7 = vsel %vm419_vm7, %v8661_v14, %v8646_v51  ;;  %v647_v9 = vadd.f32 %v630_v33, %v528_v54  ;;  %v693_v47 = vadd.f32 %v689_v25, %v684_v34 }
 0x1da   :  { %7127 = vrot.lane.b32.xlu0 %v8665_v49, %s7800_s16  ;;  %v510_v49 = vld [vmem:[#allocation11 + $0x78] sm:$0xff]  ;;  %v692_v6 = vadd.f32 %v688_v21, %v683_v62  ;;  %v14444_v51 = vpack.i.bf16 %v8624_v48, %v8651_v57  ;;  %v642_v14 = vmax.f32 %v8742_v18, %v638_v16  ;;  %v558_v54 = vadd.f32 %v554_v28, %v549_v7 }
 0x1db   :  { %v546_v55 = vpop.permute.xlu1 %545  ;;  %v631_v26 = vsel %vm381_vm5, %v8690_v12, %v8696_v0  ;;  %v701_v53 = vadd.f32 %v684_v34, %v647_v9  ;;  %v514_v10 = vadd.f32 %v510_v49, %v505_v42  ;;  %v700_v40 = vadd.f32 %v683_v62, %v646_v37  ;;  %v14445_v18 = vld [vmem:[#allocation43_spill] sm:$0xff]  ;;  %v14447_v12 = vld [vmem:[#allocation76_spill] sm:$0xff] }
 0x1dc   :  { %v538_v8 = vpop.permute.xlu0 %537  ;;  %v8816_v20 = vmax.f32 %v436_v19, %v14443_v30  ;;  %v664_v33 = vadd.f32 %v8248_v23, %v565_v17  ;;  %v663_v36 = vadd.f32 %v14445_v18, %v564_v61  ;;  %v697_v3 = vmax.f32 %v643_v24, %v693_v47  ;;  %v14448_v23 = vld [vmem:[#allocation77_spill] sm:$0xff]  ;;  %v14449_v19 = vld [vmem:[#allocation80_spill] sm:$0xff]  ;;  %v637_v61 = vld [vmem:[#allocation11 + $0xd8] sm:$0xff] }
 0x1dd   :  { %7132 = vrot.lane.b32.xlu1 %v8678_v1, %s7800_s16  ;;  %v517_v1 = vmax.f32 %v8619_v59, %v513_v56  ;;  %v696_v32 = vmax.f32 %v642_v14, %v692_v6  ;;  %v14446_v0 = vpack.i.bf16 %v8627_v35, %v8668_v38  ;;  %v660_v46 = vmax.f32 %v561_v27, %v14447_v12  ;;  %v690_v35 = vld [vmem:[#allocation11 + $0x110] sm:$0xff] }
 0x1de   :  { %7137 = vrot.lane.b32.xlu0 %v14444_v51, %s7783_s20  ;;  %v566_v59 = vadd.f32 %v549_v7, %v521_v50  ;;  %v640_v29 = vadd.f32 %v636_v31, %v631_v26  ;;  %v550_v4 = vsel %vm419_vm7, %v538_v8, %v546_v55  ;;  %v659_v13 = vmax.f32 %v560_v11, %v14448_v23  ;;  %v713_v50 = vld [vmem:[#allocation9 + $0x8] sm:$0xff]  ;;  %v712_v7 = vld [vmem:[#allocation9] sm:$0xff]  ;;  %v14452_v11 = vld [vmem:[#allocation78_spill] sm:$0xff] }
 0x1df   :  { %v628_v25 = vpop.permute.xlu1 %627  ;;  %v522_v22 = vadd.f32 %v505_v42, %v8223_v63  ;;  %v562_v34 = vmax.f32 %v517_v1, %v558_v54  ;;  %v709_v21 = vadd.f32 %v701_v53, %v664_v33  ;;  %v518_v56 = vmax.f32 %v14449_v19, %v514_v10  ;;  %v714_v54 = vld [vmem:[#allocation9 + $0x10] sm:$0xff]  ;;  %v14462_v19 = vld [vmem:[#allocation81_spill] sm:$0xff] }
 0x1e0   :  { %v620_v48 = vpop.permute.xlu0 %619  ;;  %v648_v16 = vadd.f32 %v631_v26, %v8758_v52  ;;  %v708_v17 = vadd.f32 %v700_v40, %v663_v36  ;;  %v8837_v8 = vmax.f32 %v696_v32, %v659_v13  ;;  %v559_v63 = vadd.f32 %v555_v15, %v550_v4  ;;  %v14450_v52 = vld [vmem:[#allocation45_spill] sm:$0xff]  ;;  %v691_v26 = vld [vmem:[#allocation11 + $0x118] sm:$0xff] }
 0x1e1   :  { %7147 = vrot.lane.b32.xlu1 %v14446_v0, %s7783_s20  ;;  %v632_v55 = vsel %vm381_vm5, %v628_v25, %v620_v48  ;;  %v665_v49 = vadd.f32 %v14450_v52, %v566_v59  ;;  %v644_v42 = vmax.f32 %v8755_v39, %v640_v29  ;;  %v14451_v27 = vpack.i.bf16 %v8668_v38, %v8651_v57  ;;  %v14458_v32 = vld [vmem:[#allocation49_spill] sm:$0xff] }
 0x1e2   :  { %7142 = vrot.lane.b32.xlu0 %v8648_v2, %s7800_s16  ;;  %v8835_v2 = vmax.f32 %v697_v3, %v660_v46  ;;  %v661_v24 = vmax.f32 %v562_v34, %v14452_v11  ;;  %v8850_v37 = vmul.f32 %v713_v50, %v709_v21  ;;  %v567_v51 = vadd.f32 %v550_v4, %v522_v22  ;;  %v14459_v4 = vld [vmem:[#allocation79_spill] sm:$0xff]  ;;  %v14464_v50 = vld [vmem:[#allocation84_spill] sm:$0xff]  ;;  %v2193_v52 = vld [vmem:[#allocation2 + $0x28] sm:$0x3] }
 0x1e3   :  { %v680_v62 = vpop.permute.xlu1 %679  ;;  %v641_v14 = vadd.f32 %v637_v61, %v632_v55  ;;  %v8852_v53 = vmul.f32 %v712_v7, %v708_v17  ;;  %v649_v39 = vadd.f32 %v632_v55, %v8791_v5  ;;  %v730_v38 = vmul.f32 %v8837_v8, %v8837_v8  ;;  %v14466_v61 = vld [vmem:[#allocation83_spill] sm:$0xff] }
 0x1e4   :  { %v672_v28 = vpop.permute.xlu0 %671  ;;  %14453 = vst [vmem:[#allocation71_spill] sm:$0xff] %v8850_v37  ;;  %v731_v57 = vmul.f32 %v8835_v2, %v8835_v2  ;;  %v563_v40 = vmax.f32 %v518_v56, %v559_v63  ;;  %v14457_v3 = vpack.i.bf16 %v8688_v45, %v8685_v41  ;;  %v666_v0 = vadd.f32 %v14458_v32, %v567_v51  ;;  %v715_v45 = vld [vmem:[#allocation9 + $0x18] sm:$0xff] }
 0x1e5   :  { %v685_v9 = vsel %vm419_vm7, %v672_v28, %v680_v62  ;;  %7152 = vrot.lane.b32.xlu1 %v14424_v43, %s7783_s20  ;;  %14454 = vst [vmem:[#allocation69_spill] sm:$0xff] %v8852_v53  ;;  %v645_v12 = vmax.f32 %v8816_v20, %v641_v14  ;;  %v721_v59 = vadd.f32 %v8835_v2, %v8837_v8  ;;  %v14460_v62 = vld [vmem:[#allocation82_spill] sm:$0xff]  ;;  %v14463_v56 = vrot.slane %v14462_v19, 2 }
 0x1e6   :  { %v694_v47 = vadd.f32 %v690_v35, %v685_v9  ;;  %v702_v6 = vadd.f32 %v685_v9, %v648_v16  ;;  %7167 = vrot.lane.b32.xlu0 %v14451_v27, %s7800_s16  ;;  %v872_v29 = vmul.f32 %v8852_v53, %v8852_v53  ;;  %v863_v20 = vadd.f32 %v8850_v37, %v8852_v53 }
 0x1e7   :  { %v682_v31 = vpop.permute.xlu1 %681  ;;  %v662_v23 = vmax.f32 %v563_v40, %v14459_v4  ;;  %v734_v34 = vadd.f32 %v731_v57, %v730_v38  ;;  %v14461_v35 = vrot.slane %v14460_v62, 2  ;;  %v14465_v17 = vrot.slane %v14464_v50, 2 }
 0x1e8   :  { %v698_v25 = vmax.f32 %v644_v42, %v694_v47  ;;  %v710_v1 = vadd.f32 %v702_v6, %v665_v49  ;;  %v674_v10 = vpop.permute.xlu0 %673  ;;  %v14467_v55 = vrot.slane %v14466_v61, 2  ;;  %v2192_v6 = vld [vmem:[#allocation2 + $0x20] sm:$0x3]  ;;  %v2367_v61 = vld [vmem:[#allocation2] sm:$0xf8] }
 0x1e9   :  { %v686_v48 = vsel %vm419_vm7, %v674_v10, %v682_v31  ;;  %7157 = vrot.lane.b32.xlu1 %v8708_v58, %s7800_s16  ;;  %v873_v58 = vmul.f32 %v8850_v37, %v8850_v37  ;;  %v8899_v16 = vsel %vm2212_vm8, %v14463_v56, %v14461_v35 }
 0x1ea   :  { %v8863_v33 = vmax.f32 %v698_v25, %v661_v24  ;;  %v8865_v18 = vmul.f32 %v714_v54, %v710_v1  ;;  %v695_v5 = vadd.f32 %v691_v26, %v686_v48  ;;  %v703_v36 = vadd.f32 %v686_v48, %v649_v39  ;;  %7172 = vrot.lane.b32.xlu0 %v14457_v3, %s7783_s20 }
 0x1eb   :  { %v8873_v46 = vpop.permute.xlu1 %1066  ;;  %v876_v49 = vadd.f32 %v873_v58, %v872_v29  ;;  %v2221_v54 = vrot.slane %v2193_v52, 2  ;;  %v2219_v1 = vrot.slane %v2192_v6, 2  ;;  %v14471_v58 = vmov %v14465_v17 }
 0x1ec   :  { %14455 = vst [vmem:[#allocation72_spill] sm:$0xff] %v8863_v33  ;;  %14456 = vst [vmem:[#allocation74_spill] sm:$0xff] %v8865_v18  ;;  %v732_v41 = vmul.f32 %v8863_v33, %v8863_v33  ;;  %v8883_v15 = vpop.permute.xlu0 %1058  ;;  %v699_v13 = vmax.f32 %v645_v12, %v695_v5  ;;  %v711_v22 = vadd.f32 %v703_v36, %v666_v0  ;;  %v14470_v36 = vmov %v14461_v35  ;;  %v2368_v35 = vld [vmem:[#allocation2 + $0x8] sm:$0xf8] }
 0x1ed   :  { %7162 = vrot.lane.b32.xlu1 %v8726_v44, %s7800_s16  ;;  %v874_v21 = vmul.f32 %v8865_v18, %v8865_v18  ;;  %v8906_v44 = vsel %vm2212_vm8, %v14467_v55, %v14465_v17  ;;  %v722_v28 = vadd.f32 %v721_v59, %v8863_v33  ;;  %v864_v7 = vadd.f32 %v863_v20, %v8865_v18  ;;  %v14490_v33 = vld [vmem:[#allocation51_spill] sm:$0xff] }
 0x1ee   :  { %7177 = vrot.lane.b32.xlu0 %v14424_v43, %s7783_s20  ;;  %v8910_v63 = vmax.f32 %v699_v13, %v662_v23  ;;  %v8912_v43 = vmul.f32 %v715_v45, %v711_v22  ;;  %v735_v42 = vadd.f32 %v734_v34, %v732_v41  ;;  %v8939_v3 = vsel %vm2212_vm8, %v14470_v36, %v2221_v54 }
 0x1ef   :  { %v8914_v9 = vpop.permute.xlu1 %1068  ;;  %v877_v14 = vadd.f32 %v876_v49, %v874_v21  ;;  %v8946_v59 = vsel %vm2212_vm8, %v14471_v58, %v2219_v1  ;;  %v2386_v49 = vrot.slane %v2368_v35, 3  ;;  %v1374_v1 = vld [vmem:[#allocation15 + $0x20] sm:$0xff] }
 0x1f0   :  { %14468 = vst [vmem:[#allocation67_spill] sm:$0xff] %v8910_v63  ;;  %14469 = vst [vmem:[#allocation66_spill] sm:$0xff] %v8912_v43  ;;  %v8916_v47 = vpop.permute.xlu0 %1060  ;;  %v723_v27 = vadd.f32 %v722_v28, %v8910_v63  ;;  %v733_v11 = vmul.f32 %v8910_v63, %v8910_v63  ;;  %v865_v24 = vadd.f32 %v864_v7, %v8912_v43  ;;  %v1372_v28 = vld [vmem:[#allocation15 + $0x10] sm:$0xff]  ;;  %v1373_v7 = vld [vmem:[#allocation15 + $0x18] sm:$0xff] }
 0x1f1   :  { %v875_v51 = vmul.f32 %v8912_v43, %v8912_v43  ;;  %2249 = vrot.lane.b32.xlu1 %v8899_v16, %s7792_s22  ;;  %14472 = vst [vmem:[#allocation73_spill] sm:$0xff] %v8946_v59  ;;  %v14475_v58 = vld [vmem:[#allocation46_spill] sm:$0xff]  ;;  %v1385_v63 = vld [vmem:[#allocation15 + $0x78] sm:$0xff] }
 0x1f2   :  { %2241 = vrot.lane.b32.xlu0 %v8906_v44, %s7792_s22  ;;  %v724_v26 = vrot.slane %v723_v27, 4  ;;  %v736_v39 = vadd.f32 %v735_v42, %v733_v11  ;;  %v866_v25 = vrot.slane %v865_v24, 4  ;;  %v2387_v42 = vrot.slane %v14460_v62, 3 }
 0x1f3   :  { %v8928_v31 = vpop.permute.xlu1 %1214  ;;  %v878_v57 = vadd.f32 %v877_v14, %v875_v51  ;;  %v2384_v51 = vrot.slane %v14464_v50, 3 }
 0x1f4   :  { %v8930_v10 = vpop.permute.xlu0 %1206  ;;  %v725_v38 = vadd.f32 %v724_v26, %v723_v27  ;;  %v737_v40 = vrot.slane %v736_v39, 4  ;;  %v867_v48 = vadd.f32 %v866_v25, %v865_v24  ;;  %v2383_v24 = vrot.slane %v2367_v61, 3  ;;  %v14478_v61 = vld [vmem:[#allocation47_spill] sm:$0xff] }
 0x1f5   :  { %2342 = vrot.lane.b32.xlu1 %v8899_v16, %s7804_s10  ;;  %v879_v5 = vrot.slane %v878_v57, 4 }
 0x1f6   :  { %2334 = vrot.lane.b32.xlu0 %v8906_v44, %s7804_s10  ;;  %v726_v0 = vrot.slane %v725_v38, 2  ;;  %v738_v12 = vadd.f32 %v737_v40, %v736_v39  ;;  %v868_v41 = vrot.slane %v867_v48, 2  ;;  %v6762_v39 = vpack.c.bf16 %v1373_v7, %v1372_v28  ;;  %v1379_v28 = vld [vmem:[#allocation15 + $0x48] sm:$0xff] }
 0x1f7   :  { %v8941_v32 = vpop.permute.xlu1 %1334  ;;  %v880_v45 = vadd.f32 %v879_v5, %v878_v57  ;;  %v1375_v57 = vld [vmem:[#allocation15 + $0x28] sm:$0xff]  ;;  %v8977_v40 = vsel %vm334_vm0, %v2386_v49, %v2387_v42  ;;  %v14473_v5 = vld [vmem:[#allocation62_spill] sm:$0xff]  ;;  %v8985_v36 = vsel %vm334_vm0, %v2383_v24, %v2384_v51  ;;  %v9012_v49 = vld [vmem:[#allocation14] sm:$0xff] }
 0x1f8   :  { %v8948_v29 = vpop.permute.xlu0 %1326  ;;  %v727_v20 = vadd.f32 %v726_v0, %v725_v38  ;;  %v739_v4 = vrot.slane %v738_v12, 2  ;;  %v869_v23 = vadd.f32 %v868_v41, %v867_v48  ;;  %14474 = vst [vmem:[#allocation75_spill] sm:$0xff] %v8985_v36  ;;  %v1376_v41 = vld [vmem:[#allocation15 + $0x30] sm:$0xff] }
 0x1f9   :  { %2251 = vrot.lane.b32.xlu1 %v8939_v3, %s7792_s22  ;;  %v881_v13 = vrot.slane %v880_v45, 2 }
 0x1fa   :  { %2243 = vrot.lane.b32.xlu0 %v8946_v59, %s7792_s22  ;;  %v728_v34 = vrot.slane %v727_v20, 1  ;;  %v740_v21 = vadd.f32 %v739_v4, %v738_v12  ;;  %v870_v56 = vrot.slane %v869_v23, 1  ;;  %v6766_v12 = vpack.c.bf16 %v1375_v57, %v1374_v1  ;;  %v1380_v1 = vld [vmem:[#allocation15 + $0x50] sm:$0xff]  ;;  %v1381_v57 = vld [vmem:[#allocation15 + $0x58] sm:$0xff] }
 0x1fb   :  { %v8954_v22 = vpop.permute.xlu1 %1216  ;;  %v882_v17 = vadd.f32 %v881_v13, %v880_v45  ;;  %v1377_v45 = vld [vmem:[#allocation15 + $0x38] sm:$0xff]  ;;  %v14477_v4 = vlaneseq }
 0x1fc   :  { %v8956_v19 = vpop.permute.xlu0 %1208  ;;  %v741_v55 = vrot.slane %v740_v21, 1  ;;  %v729_v27 = vadd.f32 %v728_v34, %v727_v20  ;;  %v871_v54 = vadd.f32 %v870_v56, %v869_v23  ;;  %v14476_v20 = vmov 0.0|0.0   ;;  %v7397_v13 = vld [vmem:[#allocation3 + $0x8] sm:$0xff] }
 0x1fd   :  { %2344 = vrot.lane.b32.xlu1 %v8939_v3, %s7804_s10  ;;  %v883_v52 = vrot.slane %v882_v17, 1  ;;  %v8994_v23 = vshrl.u32 %v14477_v4, 7  ;;  %v6770_v56 = vpack.c.bf16 %v1377_v45, %v1376_v41  ;;  %v2195_v45 = vld [vmem:[#allocation2 + $0x38] sm:$0xfc]  ;;  %v9045_v4 = vld [vmem:[#allocation2 + $0x48] sm:$0xff] }
 0x1fe   :  { %2336 = vrot.lane.b32.xlu0 %v8946_v59, %s7804_s10  ;;  %v742_v11 = vadd.f32 %v741_v55, %v740_v21  ;;  %v2370_v21 = vld [vmem:[#allocation2 + $0x28] sm:$0x7]  ;;  %v1378_v55 = vld [vmem:[#allocation15 + $0x40] sm:$0xff]  ;;  %v2226_v30 = vrot.slane %v2195_v45, 2 }
 0x1ff   :  { %v8963_v6 = vpop.permute.xlu1 %1336  ;;  %v884_v26 = vadd.f32 %v883_v52, %v882_v17  ;;  %v2369_v17 = vld [vmem:[#allocation2 + $0x20] sm:$0x7]  ;;  %v9008_v7 = vsub.s32 4, %v8994_v23  ;;  %v2391_v52 = vrot.slane %v2370_v21, 3  ;;  %v9015_v24 = vsub.s32 0, %v8994_v23 }
 0x200   :  { %v8966_v14 = vpop.permute.xlu0 %1328  ;;  %v744_v25 = vsel %vm743_vm4, %v729_v27, %v742_v11  ;;  %v2389_v11 = vrot.slane %v2369_v17, 3  ;;  %v6778_v17 = vpack.c.bf16 %v1381_v57, %v1380_v1  ;;  %v14488_v1 = vld [vmem:[#allocation57_spill] sm:$0xff] }
 0x201   :  { %2278 = vrot.lane.b32.xlu1 %v8899_v16, %s7783_s20  ;;  %6235 = vmatmul.mubr.f32.vlgmr.msra.gmra.mrb[0].mxu0 %v744_v25  ;;  %v885_v38 = vsel %vm743_vm4, %v871_v54, %v884_v26  ;;  %14479 = vst [vmem:[#allocation43_spill] sm:$0xff] %v9008_v7  ;;  %14480 = vst [vmem:[#allocation76_spill] sm:$0xff] %v9015_v24  ;;  %v6774_v26 = vpack.c.bf16 %v1379_v28, %v1378_v55  ;;  %v9019_v25 = vsub.s32 1, %v8994_v23  ;;  %v14486_v55 = vld [vmem:[#allocation50_spill] sm:$0xff] }
 0x202   :  { %2270 = vrot.lane.b32.xlu0 %v8906_v44, %s7783_s20  ;;  %6270 = vmatmul.mubr.f32.vlgmr.msra.gmra.mrb[0].mxu1 %v885_v38  ;;  %v9026_v38 = vrot.slane %v9012_v49, %v9008_v7  ;;  %v9043_v41 = vsel %vm334_vm0, %v2384_v51, %v2389_v11  ;;  %v9064_v28 = vsub.s32 7, %v8994_v23  ;;  %v1382_v11 = vld [vmem:[#allocation15 + $0x60] sm:$0xff] }
 0x203   :  { %v8979_v48 = vpop.permute.xlu1 %1070  ;;  %6761 = vmatpush3.bf16.msra.mxu0 %v14473_v5  ;;  %6792 = vmatpush3.bf16.msra.mxu1 %v14475_v58  ;;  %14482 = vst [vmem:[#allocation77_spill] sm:$0xff] %v9019_v25  ;;  %v9033_v5 = vsel %vm334_vm0, %v2387_v42, %v2391_v52  ;;  %14484 = vst [vmem:[#allocation45_spill] sm:$0xff] %v9043_v41  ;;  %v9052_v42 = vsub.s32 6, %v8994_v23  ;;  %v9061_v51 = vrot.slane %v9012_v49, %v9019_v25 }
 0x204   :  { %v8987_v0 = vpop.permute.xlu0 %1062  ;;  %6763 = vmatprep.subr.bf16.mxu0 %v6762_v39  ;;  %6793 = vmatprep.subr.bf16.mxu1 %v14476_v20  ;;  %14487 = vst [vmem:[#allocation49_spill] sm:$0xff] %v9064_v28  ;;  %v1074_v52 = vsel %vm381_vm5, %v8873_v46, %v8883_v15  ;;  %v1198_v57 = vmul.f32 %v9026_v38, %v14488_v1  ;;  %v9085_v15 = vld [vmem:[#allocation14 + $0x8] ss:$0 sm:$0xff] }
 0x205   :  { %2419 = vrot.lane.b32.xlu1 %v8977_v40, %s7792_s22  ;;  %6342 = vmatprep.mubr.msk.f32.mxu1 %vm7803_vm3, %v7397_v13  ;;  %v9049_v13 = vrot.slane %v9012_v49, %v9015_v24  ;;  %14485 = vst [vmem:[#allocation78_spill] sm:$0xff] %v9052_v42  ;;  %v1342_v1 = vsel %vm419_vm7, %v8948_v29, %v8941_v32  ;;  %v1384_v24 = vld [vmem:[#allocation15 + $0x70] sm:$0xff] }
 0x206   :  { %2411 = vrot.lane.b32.xlu0 %v8985_v36, %s7792_s22  ;;  %v9097_v7 = vrot.slane %v9012_v49, %v9052_v42  ;;  %v9104_v32 = vrot.slane %v9012_v49, %v9064_v28  ;;  %v1222_v29 = vsel %vm419_vm7, %v8930_v10, %v8928_v31  ;;  %v14492_v31 = vrot.slane %v9045_v4, 2 }
 0x207   :  { %v8999_v34 = vpop.permute.xlu1 %1102  ;;  %6765 = vmatpush3.bf16.msra.mxu0 %v6762_v39  ;;  %6795 = vmatpush3.bf16.msra.mxu1 %v14478_v61  ;;  %v14481_v39 = vld [vmem:[#allocation48_spill] sm:$0xff]  ;;  %v1082_v45 = vmul.f32 %v9049_v13, %v1074_v52  ;;  %v9121_v52 = vsub.s32 3, %v8994_v23 }
 0x208   :  { %v9001_v35 = vpop.permute.xlu0 %1094  ;;  %6767 = vmatprep.subr.bf16.mxu0 %v6766_v12  ;;  %6796 = vmatprep.subr.bf16.mxu1 %v14476_v20  ;;  %v9056_v61 = vld [vmem:[#allocation2 + $0x40] sm:$0xff]  ;;  %v9128_v10 = vsel %vm2212_vm8, %v2226_v30, %v14492_v31 }
 0x209   :  { %2495 = vrot.lane.b32.xlu1 %v8977_v40, %s7800_s16  ;;  %v2224_v37 = vrot.slane %v9056_v61, 2  ;;  %14491 = vst [vmem:[#allocation82_spill] sm:$0xff] %v9121_v52  ;;  %v1202_v28 = vadd.f32 %v1198_v57, %v1082_v45 }
 0x20a   :  { %2487 = vrot.lane.b32.xlu0 %v8985_v36, %s7800_s16 }
 0x20b   :  { %v1291_v27 = vpop.permute.xlu1 %1290  ;;  %6769 = vmatpush3.bf16.msra.mxu0 %v6766_v12  ;;  %6798 = vmatpush3.bf16.msra.mxu1 %v14481_v39  ;;  %v9036_v12 = vsub.s32 5, %v8994_v23  ;;  %v1383_v39 = vld [vmem:[#allocation15 + $0x68] sm:$0xff] }
 0x20c   :  { %v1283_v54 = vpop.permute.xlu0 %1282  ;;  %6771 = vmatprep.subr.bf16.mxu0 %v6770_v56  ;;  %6799 = vmatprep.subr.bf16.mxu1 %v14476_v20  ;;  %v6782_v53 = vpack.c.bf16 %v1383_v39, %v1382_v11  ;;  %v1110_v11 = vsel %vm419_vm7, %v9001_v35, %v8999_v34 }
 0x20d   :  { %2280 = vrot.lane.b32.xlu1 %v8939_v3, %s7783_s20  ;;  %14483 = vst [vmem:[#allocation80_spill] sm:$0xff] %v9036_v12  ;;  %v9083_v46 = vrot.slane %v9012_v49, %v9036_v12 }
 0x20e   :  { %2272 = vrot.lane.b32.xlu0 %v8946_v59, %s7783_s20 }
 0x20f   :  { %v9038_v58 = vpop.permute.xlu1 %1072  ;;  %6773 = vmatpush3.bf16.msra.mxu0 %v6770_v56  ;;  %v2194_v56 = vld [vmem:[#allocation2 + $0x30] sm:$0xfc]  ;;  %6801 = vmatpush3.bf16.msra.mxu1 %v14486_v55  ;;  %v9076_v55 = vsub.s32 2, %v8994_v23  ;;  %v6786_v23 = vpack.c.bf16 %v1385_v63, %v1384_v24  ;;  %v1230_v30 = vmul.f32 %v9083_v46, %v1222_v29 }
 0x210   :  { %v9054_v21 = vpop.permute.xlu0 %1064  ;;  %6775 = vmatprep.subr.bf16.mxu0 %v6774_v26  ;;  %6802 = vmatprep.subr.bf16.mxu1 %v14476_v20  ;;  %v2223_v18 = vrot.slane %v2194_v56, 2  ;;  %v1350_v56 = vmul.f32 %v9085_v15, %v1342_v1  ;;  %v14496_v24 = vld [vmem:[#allocation58_spill] sm:$0xff] }
 0x211   :  { %2421 = vrot.lane.b32.xlu1 %v9033_v5, %s7792_s22  ;;  %14489 = vst [vmem:[#allocation79_spill] sm:$0xff] %v9076_v55 }
 0x212   :  { %2413 = vrot.lane.b32.xlu0 %v9043_v41, %s7792_s22  ;;  %v9139_v1 = vsel %vm2212_vm8, %v2223_v18, %v2224_v37  ;;  %v1354_v63 = vadd.f32 %v1350_v56, %v1202_v28  ;;  %v9150_v18 = vrot.slane %v9012_v49, %v9121_v52 }
 0x213   :  { %v9091_v43 = vpop.permute.xlu1 %1104  ;;  %6777 = vmatpush3.bf16.msra.mxu0 %v6774_v26  ;;  %6804 = vmatpush3.bf16.msra.mxu1 %v14490_v33  ;;  %v1298_v26 = vsel %vm381_vm5, %v1291_v27, %v1283_v54  ;;  %v9118_v33 = vrot.slane %v9012_v49, %v9076_v55  ;;  %v14493_v27 = vld [vmem:[#allocation53_spill] sm:$0xff]  ;;  %14494 = vst [vmem:[#allocation81_spill] sm:$0xff] %v9139_v1 }
 0x214   :  { %v9099_v12 = vpop.permute.xlu0 %1096  ;;  %6779 = vmatprep.subr.bf16.mxu0 %v6778_v17  ;;  %6805 = vmatprep.subr.bf16.mxu1 %v14476_v20  ;;  %v1090_v54 = vmul.f32 %v9061_v51, %v14493_v27  ;;  %v1306_v31 = vmul.f32 %v9097_v7, %v1298_v26  ;;  %v14495_v27 = vld [vmem:[#allocation52_spill] sm:$0xff]  ;;  %v14497_v26 = vld [vmem:[#allocation54_spill] sm:$0xff]  ;;  %v1075_v49 = vsel %vm381_vm5, %v8914_v9, %v8916_v47  ;;  %v2199_v47 = vld [vmem:[#allocation2 + $0x58] sm:$0x3] }
 0x215   :  { %2497 = vrot.lane.b32.xlu1 %v9033_v5, %s7800_s16  ;;  %v1118_v34 = vmul.f32 %v9118_v33, %v1110_v11  ;;  %v14498_v11 = vld [vmem:[#allocation59_spill] sm:$0xff] }
 0x216   :  { %2489 = vrot.lane.b32.xlu0 %v9043_v41, %s7800_s16  ;;  %v1234_v57 = vadd.f32 %v1230_v30, %v1090_v54  ;;  %v1343_v54 = vsel %vm419_vm7, %v8966_v14, %v8963_v6  ;;  %v1199_v30 = vmul.f32 %v9026_v38, %v14498_v11  ;;  %v1223_v6 = vsel %vm419_vm7, %v8956_v19, %v8954_v22  ;;  %v14503_v11 = vld [vmem:[#allocation60_spill] sm:$0xff] }
 0x217   :  { %v1293_v39 = vpop.permute.xlu1 %1292  ;;  %6781 = vmatpush3.bf16.msra.mxu0 %v6778_v17  ;;  %6807 = vmatpush3.bf16.msra.mxu1 %v14495_v27  ;;  %v1318_v17 = vmul.f32 %v9104_v32, %v14496_v24  ;;  %v1310_v45 = vadd.f32 %v1306_v31, %v1118_v34  ;;  %v1083_v31 = vmul.f32 %v9049_v13, %v1075_v49  ;;  %v14499_v24 = vld [vmem:[#allocation56_spill] sm:$0xff] }
 0x218   :  { %v1285_v42 = vpop.permute.xlu0 %1284  ;;  %6783 = vmatprep.subr.bf16.mxu0 %v6782_v53  ;;  %6808 = vmatprep.subr.bf16.mxu1 %v14476_v20  ;;  %v1111_v22 = vsel %vm419_vm7, %v9099_v12, %v9091_v43  ;;  %v14501_v43 = vrot.slane %v9045_v4, 2 }
 0x219   :  { %2253 = vrot.lane.b32.xlu1 %v9128_v10, %s7792_s22  ;;  %v1299_v14 = vsel %vm381_vm5, %v1293_v39, %v1285_v42  ;;  %v14500_v42 = vld [vmem:[#allocation55_spill] sm:$0xff] }
 0x21a   :  { %2245 = vrot.lane.b32.xlu0 %v9139_v1, %s7792_s22  ;;  %v1091_v39 = vmul.f32 %v9061_v51, %v14500_v42  ;;  %v1307_v49 = vmul.f32 %v9097_v7, %v1299_v14 }
 0x21b   :  { %v1175_v35 = vpop.permute.xlu1 %1174  ;;  %6785 = vmatpush3.bf16.msra.mxu0 %v6782_v53  ;;  %6810 = vmatpush3.bf16.msra.mxu1 %v14497_v26  ;;  %v1358_v53 = vadd.f32 %v1354_v63, %v1234_v57  ;;  %v2231_v57 = vrot.slane %v2199_v47, 2  ;;  %v1231_v26 = vmul.f32 %v9083_v46, %v1223_v6 }
 0x21c   :  { %v1167_v29 = vpop.permute.xlu0 %1166  ;;  %6787 = vmatprep.subr.bf16.mxu0 %v6786_v23  ;;  %6811 = vmatprep.subr.bf16.mxu1 %v14476_v20 }
 0x21d   :  { %v1182_v28 = vsel %vm381_vm5, %v1175_v35, %v1167_v29  ;;  %2346 = vrot.lane.b32.xlu1 %v9128_v10, %s7804_s10  ;;  %v1362_v34 = vadd.f32 %v1358_v53, %v1310_v45  ;;  %v2198_v35 = vld [vmem:[#allocation2 + $0x50] sm:$0x3]  ;;  %v1203_v29 = vadd.f32 %v1199_v30, %v1083_v31  ;;  %v9209_v12 = vsel %vm2212_vm8, %v14501_v43, %v2231_v57 }
 0x21e   :  { %v1190_v56 = vmul.f32 %v9150_v18, %v1182_v28  ;;  %2338 = vrot.lane.b32.xlu0 %v9139_v1, %s7804_s10  ;;  %v2229_v45 = vrot.slane %v2198_v35, 2  ;;  %v1235_v30 = vadd.f32 %v1231_v26, %v1091_v39 }
 0x21f   :  { %v9173_v9 = vpop.permute.xlu1 %1218  ;;  %6789 = vmatpush3.bf16.msra.mxu0 %v6786_v23  ;;  %6813 = vmatpush3.bf16.msra.mxu1 %v14499_v24  ;;  %v1351_v23 = vmul.f32 %v9085_v15, %v1343_v54 }
 0x220   :  { %v1322_v27 = vadd.f32 %v1318_v17, %v1190_v56  ;;  %v9178_v63 = vpop.permute.xlu0 %1210  ;;  %6846 = vmatprep.subr.bf16.mxu1 %v14476_v20  ;;  %v1119_v56 = vmul.f32 %v9118_v33, %v1111_v22  ;;  %v9214_v47 = vsel %vm2212_vm8, %v2224_v37, %v2229_v45  ;;  %v2922_v20 = vld [vmem:[#allocation2 + $0x28] sm:$0x3f] }
 0x221   :  { %2451 = vrot.lane.b32.xlu1 %v8977_v40, %s7783_s20  ;;  %v1355_v53 = vadd.f32 %v1351_v23, %v1203_v29  ;;  %14502 = vst [vmem:[#allocation84_spill] sm:$0xff] %v9214_v47  ;;  %v2372_v29 = vld [vmem:[#allocation2 + $0x38] sm:$0xf8] }
 0x222   :  { %v1366_v17 = vadd.f32 %v1362_v34, %v1322_v27  ;;  %2443 = vrot.lane.b32.xlu0 %v8985_v36, %s7783_s20  ;;  %v1311_v31 = vadd.f32 %v1307_v49, %v1119_v56  ;;  %v2371_v49 = vld [vmem:[#allocation2 + $0x30] sm:$0xf8]  ;;  %v2396_v56 = vrot.slane %v2372_v29, 3 }
 0x223   :  { %v1339_v19 = vpop.permute.xlu1 %1338  ;;  %v1359_v35 = vadd.f32 %v1355_v53, %v1235_v30  ;;  %v1076_v53 = vsel %vm381_vm5, %v8979_v48, %v8987_v0  ;;  %v14504_v30 = vld [vmem:[#allocation64_spill] sm:$0xff]  ;;  %v1077_v0 = vsel %vm381_vm5, %v9038_v58, %v9054_v21 }
 0x224   :  { %v1331_v28 = vpop.permute.xlu0 %1330  ;;  %6304 = vmatprep.mubr.f32.mxu0 %v1366_v17  ;;  %v1084_v48 = vmul.f32 %v9049_v13, %v1076_v53 }
 0x225   :  { %2527 = vrot.lane.b32.xlu1 %v8977_v40, %s7804_s10  ;;  %v1319_v40 = vmul.f32 %v9104_v32, %v14503_v11  ;;  %v1363_v6 = vadd.f32 %v1359_v35, %v1311_v31  ;;  %v1344_v43 = vsel %vm419_vm7, %v1331_v28, %v1339_v19  ;;  %v2393_v11 = vrot.slane %v2371_v49, 3 }
 0x226   :  { %2519 = vrot.lane.b32.xlu0 %v8985_v36, %s7804_s10  ;;  %v1200_v31 = vmul.f32 %v9026_v38, %v14504_v30  ;;  %v1224_v19 = vsel %vm419_vm7, %v9178_v63, %v9173_v9  ;;  %v1352_v58 = vmul.f32 %v9085_v15, %v1344_v43  ;;  %v2552_v9 = vld [vmem:[#allocation2 + $0x8] sm:$0xf0]  ;;  %v1085_v63 = vmul.f32 %v9049_v13, %v1077_v0  ;;  %v14509_v43 = vld [vmem:[#allocation63_spill] sm:$0xff] }
 0x227   :  { %v1177_v54 = vpop.permute.xlu1 %1176  ;;  %v1232_v49 = vmul.f32 %v9083_v46, %v1224_v19 }
 0x228   :  { %v1169_v27 = vpop.permute.xlu0 %1168 }
 0x229   :  { %v1183_v34 = vsel %vm381_vm5, %v1177_v54, %v1169_v27  ;;  %2255 = vrot.lane.b32.xlu1 %v9209_v12, %s7792_s22 }
 0x22a   :  { %v1191_v24 = vmul.f32 %v9150_v18, %v1183_v34  ;;  %2247 = vrot.lane.b32.xlu0 %v9214_v47, %s7792_s22  ;;  %v14505_v34 = vld [vmem:[#allocation61_spill] sm:$0xff] }
 0x22b   :  { %v1221_v37 = vpop.permute.xlu1 %1220  ;;  %v1092_v35 = vmul.f32 %v9061_v51, %v14505_v34 }
 0x22c   :  { %v1323_v14 = vadd.f32 %v1319_v40, %v1191_v24  ;;  %v1213_v23 = vpop.permute.xlu0 %1212  ;;  %v2394_v40 = vrot.slane %v9056_v61, 3  ;;  %v14506_v24 = vld [vmem:[#allocation68_spill] sm:$0xff] }
 0x22d   :  { %2348 = vrot.lane.b32.xlu1 %v9209_v12, %s7804_s10  ;;  %v1236_v34 = vadd.f32 %v1232_v49, %v1092_v35 }
 0x22e   :  { %v1367_v17 = vadd.f32 %v1363_v6, %v1323_v14  ;;  %2340 = vrot.lane.b32.xlu0 %v9214_v47, %s7804_s10  ;;  %v1201_v6 = vmul.f32 %v9026_v38, %v14506_v24 }
 0x22f   :  { %v1341_v57 = vpop.permute.xlu1 %1340 }
 0x230   :  { %v1333_v22 = vpop.permute.xlu0 %1332  ;;  %6305 = vmatmul.mubr.f32.vlgmr.msra.gmra.mrb[2].mxu0 %v1367_v17  ;;  %v9284_v17 = vsel %vm334_vm0, %v2393_v11, %v2394_v40  ;;  %v1093_v11 = vmul.f32 %v9061_v51, %v14509_v43  ;;  %v9335_v43 = vld [vmem:[#allocation2 + $0x18] sm:$0xff] }
 0x231   :  { %2453 = vrot.lane.b32.xlu1 %v9033_v5, %s7783_s20  ;;  %14507 = vst [vmem:[#allocation83_spill] sm:$0xff] %v9284_v17 }
 0x232   :  { %2445 = vrot.lane.b32.xlu0 %v9043_v41, %s7783_s20 }
 0x233   :  { %v1107_v45 = vpop.permute.xlu1 %1106 }
 0x234   :  { %v1099_v42 = vpop.permute.xlu0 %1098 }
 0x235   :  { %2529 = vrot.lane.b32.xlu1 %v9033_v5, %s7804_s10  ;;  %v2397_v5 = vrot.slane %v9045_v4, 3  ;;  %v1112_v14 = vsel %vm419_vm7, %v1099_v42, %v1107_v45  ;;  %v2570_v45 = vrot.slane %v2552_v9, 4  ;;  %v2571_v42 = vrot.slane %v14460_v62, 4 }
 0x236   :  { %2521 = vrot.lane.b32.xlu0 %v9043_v41, %s7804_s10 }
 0x237   :  { %v1295_v39 = vpop.permute.xlu1 %1294  ;;  %v9274_v21 = vsel %vm334_vm0, %v2396_v56, %v2397_v5  ;;  %v2551_v56 = vld [vmem:[#allocation2] sm:$0xf0] }
 0x238   :  { %v1287_v26 = vpop.permute.xlu0 %1286  ;;  %v2567_v19 = vrot.slane %v2551_v56, 4 }
 0x239   :  { %2282 = vrot.lane.b32.xlu1 %v9128_v10, %s7783_s20  ;;  %v1300_v28 = vsel %vm381_vm5, %v1295_v39, %v1287_v26  ;;  %v14508_v39 = vld [vmem:[#allocation65_spill] sm:$0xff]  ;;  %v1204_v26 = vadd.f32 %v1200_v31, %v1084_v48  ;;  %v1120_v48 = vmul.f32 %v9118_v33, %v1112_v14 }
 0x23a   :  { %2274 = vrot.lane.b32.xlu0 %v9139_v1, %s7783_s20  ;;  %v1320_v29 = vmul.f32 %v9104_v32, %v14508_v39  ;;  %v1308_v13 = vmul.f32 %v9097_v7, %v1300_v28  ;;  %v2568_v28 = vrot.slane %v14464_v50, 4 }
 0x23b   :  { %v1109_v54 = vpop.permute.xlu1 %1108  ;;  %v1356_v30 = vadd.f32 %v1352_v58, %v1204_v26 }
 0x23c   :  { %v1101_v27 = vpop.permute.xlu0 %1100  ;;  %v1312_v51 = vadd.f32 %v1308_v13, %v1120_v48 }
 0x23d   :  { %2314 = vrot.lane.b32.xlu1 %v8899_v16, %s7800_s16  ;;  %v1345_v16 = vsel %vm419_vm7, %v1333_v22, %v1341_v57  ;;  %v1225_v57 = vsel %vm419_vm7, %v1213_v23, %v1221_v37  ;;  %v1205_v37 = vadd.f32 %v1201_v6, %v1085_v63  ;;  %v1113_v23 = vsel %vm419_vm7, %v1101_v27, %v1109_v54  ;;  %v14510_v63 = vld [vmem:[#allocation70_spill] sm:$0xff] }
 0x23e   :  { %2306 = vrot.lane.b32.xlu0 %v8906_v44, %s7800_s16  ;;  %v1353_v31 = vmul.f32 %v9085_v15, %v1345_v16  ;;  %v1233_v24 = vmul.f32 %v9083_v46, %v1225_v57  ;;  %v9315_v54 = vsel %vm457_vm1, %v2570_v45, %v2571_v42  ;;  %v1360_v27 = vadd.f32 %v1356_v30, %v1236_v34 }
 0x23f   :  { %v1297_v38 = vpop.permute.xlu1 %1296  ;;  %v1121_v35 = vmul.f32 %v9118_v33, %v1113_v23  ;;  %v1321_v16 = vmul.f32 %v9104_v32, %v14510_v63 }
 0x240   :  { %v1289_v53 = vpop.permute.xlu0 %1288  ;;  %v1357_v6 = vadd.f32 %v1353_v31, %v1205_v37  ;;  %v1237_v39 = vadd.f32 %v1233_v24, %v1093_v11  ;;  %v1364_v33 = vadd.f32 %v1360_v27, %v1312_v51  ;;  %v9340_v31 = vld [vmem:[#allocation2 + $0x10] sm:$0xff] }
 0x241   :  { %v1301_v22 = vsel %vm381_vm5, %v1297_v38, %v1289_v53  ;;  %2423 = vrot.lane.b32.xlu1 %v9274_v21, %s7792_s22  ;;  %v9326_v38 = vsel %vm457_vm1, %v2567_v19, %v2568_v28  ;;  %v2735_v53 = vld [vmem:[#allocation2] sm:$0xe0]  ;;  %v2752_v48 = vrot.slane %v9340_v31, 5  ;;  %v2373_v27 = vld [vmem:[#allocation2 + $0x50] sm:$0x7] }
 0x242   :  { %2415 = vrot.lane.b32.xlu0 %v9284_v17, %s7792_s22  ;;  %v1309_v58 = vmul.f32 %v9097_v7, %v1301_v22  ;;  %v2736_v7 = vld [vmem:[#allocation2 + $0x8] sm:$0xe0]  ;;  %v1361_v32 = vadd.f32 %v1357_v6, %v1237_v39  ;;  %v2751_v30 = vrot.slane %v2735_v53, 5  ;;  %v2554_v39 = vld [vmem:[#allocation2 + $0x28] sm:$0xf] }
 0x243   :  { %v1179_v0 = vpop.permute.xlu1 %1178  ;;  %v2754_v57 = vrot.slane %v2736_v7, 5 }
 0x244   :  { %v1171_v15 = vpop.permute.xlu0 %1170  ;;  %v1313_v26 = vadd.f32 %v1309_v58, %v1121_v35  ;;  %v9355_v24 = vsel %vm584_vm2, %v2751_v30, %v2752_v48 }
 0x245   :  { %v1184_v9 = vsel %vm381_vm5, %v1179_v0, %v1171_v15  ;;  %2499 = vrot.lane.b32.xlu1 %v9274_v21, %s7800_s16  ;;  %14514 = vst [vmem:[#allocation48_spill] sm:$0xff] %v9355_v24  ;;  %v2374_v15 = vld [vmem:[#allocation2 + $0x58] sm:$0x7] }
 0x246   :  { %v1192_v46 = vmul.f32 %v9150_v18, %v1184_v9  ;;  %2491 = vrot.lane.b32.xlu0 %v9284_v17, %s7800_s16  ;;  %v1365_v23 = vadd.f32 %v1361_v32, %v1313_v26  ;;  %v2401_v6 = vrot.slane %v2374_v15, 3 }
 0x247   :  { %v1181_v14 = vpop.permute.xlu1 %1180 }
 0x248   :  { %v1324_v49 = vadd.f32 %v1320_v29, %v1192_v46  ;;  %v1173_v13 = vpop.permute.xlu0 %1172  ;;  %v2755_v29 = vrot.slane %v9335_v43, 5  ;;  %v2399_v46 = vrot.slane %v2373_v27, 3  ;;  %v9382_v63 = vsel %vm334_vm0, %v2397_v5, %v2401_v6  ;;  %v2920_v6 = vld [vmem:[#allocation2 + $0x8] sm:$0xc0] }
 0x249   :  { %v1185_v56 = vsel %vm381_vm5, %v1181_v14, %v1173_v13  ;;  %2603 = vrot.lane.b32.xlu1 %v9315_v54, %s7792_s22 }
 0x24a   :  { %v1193_v22 = vmul.f32 %v9150_v18, %v1185_v56  ;;  %v1368_v45 = vadd.f32 %v1364_v33, %v1324_v49  ;;  %2595 = vrot.lane.b32.xlu0 %v9326_v38, %s7792_s22  ;;  %v9350_v19 = vsel %vm584_vm2, %v2754_v57, %v2755_v29  ;;  %v9389_v14 = vsel %vm334_vm0, %v2394_v40, %v2399_v46  ;;  %v2553_v49 = vld [vmem:[#allocation2 + $0x20] sm:$0xf]  ;;  %v2738_v57 = vld [vmem:[#allocation2 + $0x28] sm:$0x1f] }
 0x24b   :  { %v9338_v11 = vpop.permute.xlu1 %7122  ;;  %14521 = vst [vmem:[#allocation54_spill] sm:$0xff] %v9389_v14  ;;  %v2573_v13 = vrot.slane %v2553_v49, 4  ;;  %v2759_v62 = vrot.slane %v2738_v57, 5  ;;  %v2939_v49 = vrot.slane %v2920_v6, 6  ;;  %v2937_v57 = vrot.slane %v9340_v31, 6 }
 0x24c   :  { %14511 = vst [vmem:[#allocation62_spill] sm:$0xff] %v9338_v11  ;;  %v1325_v37 = vadd.f32 %v1321_v16, %v1193_v22  ;;  %6307 = vmatprep.mubr.f32.mxu0 %v1368_v45  ;;  %v9343_v0 = vpop.permute.xlu0 %7127  ;;  %v2737_v22 = vld [vmem:[#allocation2 + $0x20] sm:$0x1f] }
 0x24d   :  { %14512 = vst [vmem:[#allocation46_spill] sm:$0xff] %v9343_v0  ;;  %2679 = vrot.lane.b32.xlu1 %v9315_v54, %s7800_s16  ;;  %v9415_v56 = vsel %vm457_vm1, %v2568_v28, %v2573_v13  ;;  %v2757_v45 = vrot.slane %v2737_v22, 5  ;;  %v9432_v50 = vsel %vm584_vm2, %v2755_v29, %v2759_v62 }
 0x24e   :  { %v1369_v18 = vadd.f32 %v1365_v23, %v1325_v37  ;;  %2671 = vrot.lane.b32.xlu0 %v9326_v38, %s7800_s16  ;;  %14525 = vst [vmem:[#allocation60_spill] sm:$0xff] %v9415_v56 }
 0x24f   :  { %v9352_v34 = vpop.permute.xlu1 %7132  ;;  %v9437_v37 = vsel %vm584_vm2, %v2752_v48, %v2757_v45 }
 0x250   :  { %14513 = vst [vmem:[#allocation47_spill] sm:$0xff] %v9352_v34  ;;  %6308 = vmatmul.mubr.f32.gmra.mrb[4].mxu0 %v1369_v18  ;;  %v9357_v51 = vpop.permute.xlu0 %7137  ;;  %14527 = vst [vmem:[#allocation61_spill] sm:$0xff] %v9437_v37 }
 0x251   :  { %14515 = vst [vmem:[#allocation50_spill] sm:$0xff] %v9357_v51  ;;  %2819 = vrot.lane.b32.xlu1 %v9350_v19, %s7783_s20 }
 0x252   :  { %2811 = vrot.lane.b32.xlu0 %v9355_v24, %s7783_s20 }
 0x253   :  { %v9363_v58 = vpop.permute.xlu1 %7147 }
 0x254   :  { %14516 = vst [vmem:[#allocation57_spill] sm:$0xff] %v9363_v58  ;;  %v9365_v9 = vpop.permute.xlu0 %7142 }
 0x255   :  { %14517 = vst [vmem:[#allocation51_spill] sm:$0xff] %v9365_v9  ;;  %2284 = vrot.lane.b32.xlu1 %v9209_v12, %s7783_s20  ;;  %v2578_v9 = vrot.slane %v9056_v61, 4 }
 0x256   :  { %2276 = vrot.lane.b32.xlu0 %v9214_v47, %s7783_s20 }
 0x257   :  { %v9371_v35 = vpop.permute.xlu1 %7152 }
 0x258   :  { %14518 = vst [vmem:[#allocation53_spill] sm:$0xff] %v9371_v35  ;;  %v9373_v7 = vpop.permute.xlu0 %7167 }
 0x259   :  { %14519 = vst [vmem:[#allocation52_spill] sm:$0xff] %v9373_v7  ;;  %2316 = vrot.lane.b32.xlu1 %v8939_v3, %s7800_s16  ;;  %v2575_v3 = vrot.slane %v2554_v39, 4  ;;  %v2919_v39 = vld [vmem:[#allocation2] sm:$0xc0] }
 0x25a   :  { %2308 = vrot.lane.b32.xlu0 %v8946_v59, %s7800_s16 }
 0x25b   :  { %v9384_v16 = vpop.permute.xlu1 %7157  ;;  %v9408_v40 = vsel %vm457_vm1, %v2571_v42, %v2575_v3  ;;  %v2940_v3 = vrot.slane %v9335_v43, 6 }
 0x25c   :  { %14520 = vst [vmem:[#allocation58_spill] sm:$0xff] %v9384_v16  ;;  %v9391_v26 = vpop.permute.xlu0 %7172 }
 0x25d   :  { %14522 = vst [vmem:[#allocation59_spill] sm:$0xff] %v9391_v26  ;;  %2425 = vrot.lane.b32.xlu1 %v9382_v63, %s7792_s22  ;;  %v9480_v62 = vsel %vm2935_vm9, %v2939_v49, %v2940_v3  ;;  %v2944_v26 = vrot.slane %v2922_v20, 6  ;;  %v2556_v20 = vld [vmem:[#allocation2 + $0x38] sm:$0xf0] }
 0x25e   :  { %2417 = vrot.lane.b32.xlu0 %v9389_v14, %s7792_s22 }
 0x25f   :  { %v9397_v5 = vpop.permute.xlu1 %7162 }
 0x260   :  { %14523 = vst [vmem:[#allocation56_spill] sm:$0xff] %v9397_v5  ;;  %v9399_v33 = vpop.permute.xlu0 %7177  ;;  %v2921_v5 = vld [vmem:[#allocation2 + $0x20] sm:$0x3f] }
 0x261   :  { %14524 = vst [vmem:[#allocation55_spill] sm:$0xff] %v9399_v33  ;;  %2501 = vrot.lane.b32.xlu1 %v9382_v63, %s7800_s16  ;;  %v2942_v7 = vrot.slane %v2921_v5, 6  ;;  %v2555_v5 = vld [vmem:[#allocation2 + $0x30] sm:$0xf0] }
 0x262   :  { %2493 = vrot.lane.b32.xlu0 %v9389_v14, %s7800_s16 }
 0x263   :  { %v9410_v53 = vpop.permute.xlu1 %2249  ;;  %v9531_v35 = vsel %vm2935_vm9, %v2937_v57, %v2942_v7 }
 0x264   :  { %v9417_v32 = vpop.permute.xlu0 %2241  ;;  %14542 = vst [vmem:[#allocation95_spill] sm:$0xff] %v9531_v35 }
 0x265   :  { %2605 = vrot.lane.b32.xlu1 %v9408_v40, %s7792_s22 }
 0x266   :  { %2597 = vrot.lane.b32.xlu0 %v9415_v56, %s7792_s22 }
 0x267   :  { %v9423_v42 = vpop.permute.xlu1 %2342 }
 0x268   :  { %v9425_v30 = vpop.permute.xlu0 %2334 }
 0x269   :  { %2681 = vrot.lane.b32.xlu1 %v9408_v40, %s7800_s16 }
 0x26a   :  { %2673 = vrot.lane.b32.xlu0 %v9415_v56, %s7800_s16 }
 0x26b   :  { %v9434_v28 = vpop.permute.xlu1 %2251 }
 0x26c   :  { %14526 = vst [vmem:[#allocation64_spill] sm:$0xff] %v9434_v28  ;;  %v9439_v23 = vpop.permute.xlu0 %2243 }
 0x26d   :  { %14528 = vst [vmem:[#allocation68_spill] sm:$0xff] %v9439_v23  ;;  %2821 = vrot.lane.b32.xlu1 %v9432_v50, %s7783_s20 }
 0x26e   :  { %2813 = vrot.lane.b32.xlu0 %v9437_v37, %s7783_s20 }
 0x26f   :  { %v9445_v18 = vpop.permute.xlu1 %2344 }
 0x270   :  { %14529 = vst [vmem:[#allocation65_spill] sm:$0xff] %v9445_v18  ;;  %v9447_v15 = vpop.permute.xlu0 %2336 }
 0x271   :  { %14530 = vst [vmem:[#allocation63_spill] sm:$0xff] %v9447_v15  ;;  %2455 = vrot.lane.b32.xlu1 %v9274_v21, %s7783_s20  ;;  %v2923_v15 = vld [vmem:[#allocation2 + $0x30] sm:$0xc0] }
 0x272   :  { %2447 = vrot.lane.b32.xlu0 %v9284_v17, %s7783_s20  ;;  %v2946_v23 = vrot.slane %v2923_v15, 6 }
 0x273   :  { %v9453_v29 = vpop.permute.xlu1 %2278 }
 0x274   :  { %v9455_v48 = vpop.permute.xlu0 %2270 }
 0x275   :  { %2531 = vrot.lane.b32.xlu1 %v9274_v21, %s7804_s10  ;;  %v2936_v21 = vrot.slane %v2919_v39, 6 }
 0x276   :  { %2523 = vrot.lane.b32.xlu0 %v9284_v17, %s7804_s10 }
 0x277   :  { %v9461_v27 = vpop.permute.xlu1 %2419  ;;  %v9485_v43 = vsel %vm2935_vm9, %v2936_v21, %v2937_v57 }
 0x278   :  { %v9463_v46 = vpop.permute.xlu0 %2411 }
 0x279   :  { %2635 = vrot.lane.b32.xlu1 %v9315_v54, %s7783_s20 }
 0x27a   :  { %2627 = vrot.lane.b32.xlu0 %v9326_v38, %s7783_s20 }
 0x27b   :  { %v9470_v13 = vpop.permute.xlu1 %2495 }
 0x27c   :  { %v9473_v22 = vpop.permute.xlu0 %2487 }
 0x27d   :  { %2711 = vrot.lane.b32.xlu1 %v9315_v54, %s7804_s10 }
 0x27e   :  { %2703 = vrot.lane.b32.xlu0 %v9326_v38, %s7804_s10 }
 0x27f   :  { %v9482_v45 = vpop.permute.xlu1 %2280 }
 0x280   :  { %14531 = vst [vmem:[#allocation70_spill] sm:$0xff] %v9482_v45  ;;  %v9487_v6 = vpop.permute.xlu0 %2272 }
 0x281   :  { %14532 = vst [vmem:[#allocation85_spill] sm:$0xff] %v9487_v6  ;;  %2972 = vrot.lane.b32.xlu1 %v9480_v62, %s7792_s22 }
 0x282   :  { %2964 = vrot.lane.b32.xlu0 %v9485_v43, %s7792_s22 }
 0x283   :  { %v9493_v54 = vpop.permute.xlu1 %2421 }
 0x284   :  { %14533 = vst [vmem:[#allocation86_spill] sm:$0xff] %v9493_v54  ;;  %v9495_v31 = vpop.permute.xlu0 %2413 }
 0x285   :  { %14534 = vst [vmem:[#allocation87_spill] sm:$0xff] %v9495_v31  ;;  %2457 = vrot.lane.b32.xlu1 %v9382_v63, %s7783_s20 }
 0x286   :  { %2449 = vrot.lane.b32.xlu0 %v9389_v14, %s7783_s20 }
 0x287   :  { %v9501_v39 = vpop.permute.xlu1 %2497 }
 0x288   :  { %14535 = vst [vmem:[#allocation88_spill] sm:$0xff] %v9501_v39  ;;  %v9503_v49 = vpop.permute.xlu0 %2489 }
 0x289   :  { %14536 = vst [vmem:[#allocation89_spill] sm:$0xff] %v9503_v49  ;;  %2533 = vrot.lane.b32.xlu1 %v9382_v63, %s7804_s10 }
 0x28a   :  { %2525 = vrot.lane.b32.xlu0 %v9389_v14, %s7804_s10  ;;  %v9526_v14 = vsel %vm2935_vm9, %v2940_v3, %v2944_v26  ;;  %v2577_v3 = vrot.slane %v2555_v5, 4  ;;  %v2740_v5 = vld [vmem:[#allocation2 + $0x38] sm:$0xe0] }
 0x28b   :  { %v9509_v21 = vpop.permute.xlu1 %2253  ;;  %14541 = vst [vmem:[#allocation94_spill] sm:$0xff] %v9526_v14 }
 0x28c   :  { %14537 = vst [vmem:[#allocation90_spill] sm:$0xff] %v9509_v21  ;;  %v9511_v33 = vpop.permute.xlu0 %2245 }
 0x28d   :  { %14538 = vst [vmem:[#allocation91_spill] sm:$0xff] %v9511_v33  ;;  %2637 = vrot.lane.b32.xlu1 %v9408_v40, %s7783_s20  ;;  %v2762_v33 = vrot.slane %v9056_v61, 5 }
 0x28e   :  { %2629 = vrot.lane.b32.xlu0 %v9415_v56, %s7783_s20 }
 0x28f   :  { %v9517_v16 = vpop.permute.xlu1 %2346 }
 0x290   :  { %14539 = vst [vmem:[#allocation92_spill] sm:$0xff] %v9517_v16  ;;  %v9519_v63 = vpop.permute.xlu0 %2338 }
 0x291   :  { %14540 = vst [vmem:[#allocation93_spill] sm:$0xff] %v9519_v63  ;;  %2713 = vrot.lane.b32.xlu1 %v9408_v40, %s7804_s10  ;;  %v2580_v40 = vrot.slane %v2556_v20, 4  ;;  %v9555_v20 = vsel %vm457_vm1, %v2577_v3, %v2578_v9  ;;  %v2764_v3 = vrot.slane %v2740_v5, 5 }
 0x292   :  { %2705 = vrot.lane.b32.xlu0 %v9415_v56, %s7804_s10  ;;  %v2581_v56 = vrot.slane %v9045_v4, 4  ;;  %14544 = vst [vmem:[#allocation97_spill] sm:$0xff] %v9555_v20 }
 0x293   :  { %v9528_v17 = vpop.permute.xlu1 %2451 }
 0x294   :  { %v9533_v41 = vpop.permute.xlu0 %2443  ;;  %v9550_v57 = vsel %vm457_vm1, %v2580_v40, %v2581_v56  ;;  %v2739_v40 = vld [vmem:[#allocation2 + $0x30] sm:$0xe0] }
 0x295   :  { %2974 = vrot.lane.b32.xlu1 %v9526_v14, %s7792_s22  ;;  %v2761_v21 = vrot.slane %v2739_v40, 5 }
 0x296   :  { %2966 = vrot.lane.b32.xlu0 %v9531_v35, %s7792_s22 }
 0x297   :  { %v9540_v26 = vpop.permute.xlu1 %2527  ;;  %v9587_v5 = vsel %vm584_vm2, %v2761_v21, %v2762_v33 }
 0x298   :  { %v9543_v7 = vpop.permute.xlu0 %2519  ;;  %14552 = vst [vmem:[#allocation105_spill] sm:$0xff] %v9587_v5 }
 0x299   :  { %2318 = vrot.lane.b32.xlu1 %v9128_v10, %s7800_s16 }
 0x29a   :  { %2310 = vrot.lane.b32.xlu0 %v9139_v1, %s7800_s16 }
 0x29b   :  { %v9552_v63 = vpop.permute.xlu1 %2255 }
 0x29c   :  { %14543 = vst [vmem:[#allocation96_spill] sm:$0xff] %v9552_v63  ;;  %v9557_v16 = vpop.permute.xlu0 %2247  ;;  %v2765_v63 = vrot.slane %v9045_v4, 5 }
 0x29d   :  { %14545 = vst [vmem:[#allocation98_spill] sm:$0xff] %v9557_v16  ;;  %2607 = vrot.lane.b32.xlu1 %v9550_v57, %s7792_s22 }
 0x29e   :  { %2599 = vrot.lane.b32.xlu0 %v9555_v20, %s7792_s22 }
 0x29f   :  { %v9563_v10 = vpop.permute.xlu1 %2348 }
 0x2a0   :  { %14546 = vst [vmem:[#allocation99_spill] sm:$0xff] %v9563_v10  ;;  %v9565_v1 = vpop.permute.xlu0 %2340 }
 0x2a1   :  { %14547 = vst [vmem:[#allocation100_spill] sm:$0xff] %v9565_v1  ;;  %2683 = vrot.lane.b32.xlu1 %v9550_v57, %s7800_s16  ;;  %v9582_v1 = vsel %vm584_vm2, %v2764_v3, %v2765_v63 }
 0x2a2   :  { %2675 = vrot.lane.b32.xlu0 %v9555_v20, %s7800_s16  ;;  %14550 = vst [vmem:[#allocation103_spill] sm:$0xff] %v9582_v1 }
 0x2a3   :  { %v9572_v16 = vpop.permute.xlu1 %2453 }
 0x2a4   :  { %14548 = vst [vmem:[#allocation101_spill] sm:$0xff] %v9572_v16  ;;  %v9575_v54 = vpop.permute.xlu0 %2445 }
 0x2a5   :  { %14549 = vst [vmem:[#allocation102_spill] sm:$0xff] %v9575_v54  ;;  %2787 = vrot.lane.b32.xlu1 %v9350_v19, %s7792_s22 }
 0x2a6   :  { %2779 = vrot.lane.b32.xlu0 %v9355_v24, %s7792_s22 }
 0x2a7   :  { %v9584_v10 = vpop.permute.xlu1 %2529 }
 0x2a8   :  { %14551 = vst [vmem:[#allocation104_spill] sm:$0xff] %v9584_v10  ;;  %v9589_v16 = vpop.permute.xlu0 %2521  ;;  %v2557_v10 = vld [vmem:[#allocation2 + $0x50] sm:$0xf] }
 0x2a9   :  { %14553 = vst [vmem:[#allocation106_spill] sm:$0xff] %v9589_v16  ;;  %2823 = vrot.lane.b32.xlu1 %v9582_v1, %s7783_s20  ;;  %v2583_v6 = vrot.slane %v2557_v10, 4  ;;  %v2742_v10 = vld [vmem:[#allocation2 + $0x58] sm:$0x1f] }
 0x2aa   :  { %2815 = vrot.lane.b32.xlu0 %v9587_v5, %s7783_s20 }
 0x2ab   :  { %v9595_v40 = vpop.permute.xlu1 %2282  ;;  %v9633_v49 = vsel %vm457_vm1, %v2578_v9, %v2583_v6  ;;  %v2769_v9 = vrot.slane %v2742_v10, 5 }
 0x2ac   :  { %14554 = vst [vmem:[#allocation107_spill] sm:$0xff] %v9595_v40  ;;  %v9597_v54 = vpop.permute.xlu0 %2274  ;;  %v2558_v40 = vld [vmem:[#allocation2 + $0x58] sm:$0xf]  ;;  %14560 = vst [vmem:[#allocation113_spill] sm:$0xff] %v9633_v49 }
 0x2ad   :  { %14555 = vst [vmem:[#allocation108_spill] sm:$0xff] %v9597_v54  ;;  %2863 = vrot.lane.b32.xlu1 %v9350_v19, %s7800_s16  ;;  %v2585_v31 = vrot.slane %v2558_v40, 4 }
 0x2ae   :  { %2855 = vrot.lane.b32.xlu0 %v9355_v24, %s7800_s16 }
 0x2af   :  { %v9603_v21 = vpop.permute.xlu1 %2314 }
 0x2b0   :  { %v9605_v3 = vpop.permute.xlu0 %2306 }
 0x2b1   :  { %3004 = vrot.lane.b32.xlu1 %v9480_v62, %s7783_s20 }
 0x2b2   :  { %2996 = vrot.lane.b32.xlu0 %v9485_v43, %s7783_s20 }
 0x2b3   :  { %v9611_v16 = vpop.permute.xlu1 %2423 }
 0x2b4   :  { %14556 = vst [vmem:[#allocation109_spill] sm:$0xff] %v9611_v16  ;;  %v9613_v54 = vpop.permute.xlu0 %2415  ;;  %v9628_v16 = vsel %vm457_vm1, %v2581_v56, %v2585_v31  ;;  %v2741_v56 = vld [vmem:[#allocation2 + $0x50] sm:$0x1f] }
 0x2b5   :  { %14557 = vst [vmem:[#allocation110_spill] sm:$0xff] %v9613_v54  ;;  %3080 = vrot.lane.b32.xlu1 %v9480_v62, %s7804_s10  ;;  %v2767_v31 = vrot.slane %v2741_v56, 5 }
 0x2b6   :  { %3072 = vrot.lane.b32.xlu0 %v9485_v43, %s7804_s10 }
 0x2b7   :  { %v9619_v45 = vpop.permute.xlu1 %2499  ;;  %v9663_v51 = vsel %vm584_vm2, %v2762_v33, %v2767_v31 }
 0x2b8   :  { %14558 = vst [vmem:[#allocation111_spill] sm:$0xff] %v9619_v45  ;;  %v9621_v58 = vpop.permute.xlu0 %2491  ;;  %v9658_v45 = vsel %vm584_vm2, %v2765_v63, %v2769_v9  ;;  %14563 = vst [vmem:[#allocation116_spill] sm:$0xff] %v9663_v51 }
 0x2b9   :  { %14559 = vst [vmem:[#allocation112_spill] sm:$0xff] %v9621_v58  ;;  %2320 = vrot.lane.b32.xlu1 %v9209_v12, %s7800_s16  ;;  %14561 = vst [vmem:[#allocation114_spill] sm:$0xff] %v9658_v45 }
 0x2ba   :  { %2312 = vrot.lane.b32.xlu0 %v9214_v47, %s7800_s16 }
 0x2bb   :  { %v9630_v54 = vpop.permute.xlu1 %2603 }
 0x2bc   :  { %v9635_v40 = vpop.permute.xlu0 %2595 }
 0x2bd   :  { %2609 = vrot.lane.b32.xlu1 %v9628_v16, %s7792_s22 }
 0x2be   :  { %2601 = vrot.lane.b32.xlu0 %v9633_v49, %s7792_s22 }
 0x2bf   :  { %v9641_v12 = vpop.permute.xlu1 %2679 }
 0x2c0   :  { %v9643_v47 = vpop.permute.xlu0 %2671 }
 0x2c1   :  { %2685 = vrot.lane.b32.xlu1 %v9628_v16, %s7800_s16 }
 0x2c2   :  { %2677 = vrot.lane.b32.xlu0 %v9633_v49, %s7800_s16 }
 0x2c3   :  { %v9649_v6 = vpop.permute.xlu1 %2819 }
 0x2c4   :  { %v9651_v58 = vpop.permute.xlu0 %2811 }
 0x2c5   :  { %2789 = vrot.lane.b32.xlu1 %v9432_v50, %s7792_s22 }
 0x2c6   :  { %2781 = vrot.lane.b32.xlu0 %v9437_v37, %s7792_s22 }
 0x2c7   :  { %v9660_v39 = vpop.permute.xlu1 %2284 }
 0x2c8   :  { %14562 = vst [vmem:[#allocation115_spill] sm:$0xff] %v9660_v39  ;;  %v9665_v10 = vpop.permute.xlu0 %2276 }
 0x2c9   :  { %14564 = vst [vmem:[#allocation117_spill] sm:$0xff] %v9665_v10  ;;  %2825 = vrot.lane.b32.xlu1 %v9658_v45, %s7783_s20 }
 0x2ca   :  { %2817 = vrot.lane.b32.xlu0 %v9663_v51, %s7783_s20 }
 0x2cb   :  { %v9671_v56 = vpop.permute.xlu1 %2316 }
 0x2cc   :  { %14565 = vst [vmem:[#allocation118_spill] sm:$0xff] %v9671_v56  ;;  %v9673_v34 = vpop.permute.xlu0 %2308 }
 0x2cd   :  { %14566 = vst [vmem:[#allocation119_spill] sm:$0xff] %v9673_v34  ;;  %2865 = vrot.lane.b32.xlu1 %v9432_v50, %s7800_s16 }
 0x2ce   :  { %2857 = vrot.lane.b32.xlu0 %v9437_v37, %s7800_s16 }
 0x2cf   :  { %v9679_v33 = vpop.permute.xlu1 %2425 }
 0x2d0   :  { %14567 = vst [vmem:[#allocation120_spill] sm:$0xff] %v9679_v33  ;;  %v9681_v63 = vpop.permute.xlu0 %2417 }
 0x2d1   :  { %14568 = vst [vmem:[#allocation121_spill] sm:$0xff] %v9681_v63  ;;  %3006 = vrot.lane.b32.xlu1 %v9526_v14, %s7783_s20 }
 0x2d2   :  { %2998 = vrot.lane.b32.xlu0 %v9531_v35, %s7783_s20 }
 0x2d3   :  { %v9687_v9 = vpop.permute.xlu1 %2501 }
 0x2d4   :  { %14569 = vst [vmem:[#allocation122_spill] sm:$0xff] %v9687_v9  ;;  %v9689_v31 = vpop.permute.xlu0 %2493  ;;  %v827_v39 = vpop.f32.mrb[0].mxu0 }
 0x2d5   :  { %14570 = vst [vmem:[#allocation123_spill] sm:$0xff] %v9689_v31  ;;  %3082 = vrot.lane.b32.xlu1 %v9526_v14, %s7804_s10  ;;  %v9693_v10 = vmul.f32 0.001953125, %v827_v39  ;;  %v952_v34 = vpop.f32.mrb[0].mxu1  ;;  %v6236_v33 = vpop.f32.mrb[1].mxu0 }
 0x2d6   :  { %3074 = vrot.lane.b32.xlu0 %v9531_v35, %s7804_s10  ;;  %v9697_v63 = vmul.f32 0.001953125, %v952_v34  ;;  %v6271_v56 = vpop.f32.mrb[1].mxu1 }
 0x2d7   :  { %v9699_v0 = vpop.permute.xlu1 %2605  ;;  %v832_v9 = vmul.f32 %v9693_v10, %v9693_v10  ;;  %v2924_v56 = vld [vmem:[#allocation2 + $0x38] sm:$0xc0] }
 0x2d8   :  { %14571 = vst [vmem:[#allocation124_spill] sm:$0xff] %v9699_v0  ;;  %v9703_v31 = vpop.permute.xlu0 %2597  ;;  %v957_v59 = vmul.f32 %v9697_v63, %v9697_v63 }
 0x2d9   :  { %14572 = vst [vmem:[#allocation125_spill] sm:$0xff] %v9703_v31  ;;  %2639 = vrot.lane.b32.xlu1 %v9550_v57, %s7783_s20  ;;  %v834_v39 = vrot.slane %v832_v9, 7  ;;  %v2949_v9 = vrot.slane %v2924_v56, 6 }
 0x2da   :  { %2631 = vrot.lane.b32.xlu0 %v9555_v20, %s7783_s20  ;;  %v959_v34 = vrot.slane %v957_v59, 7  ;;  %v2950_v59 = vrot.slane %v9045_v4, 6 }
 0x2db   :  { %v9711_v33 = vpop.permute.xlu1 %2681  ;;  %v836_v0 = vsub.f32 %v9693_v10, %v834_v39  ;;  %v2947_v39 = vrot.slane %v9056_v61, 6 }
 0x2dc   :  { %14573 = vst [vmem:[#allocation126_spill] sm:$0xff] %v9711_v33  ;;  %v9714_v11 = vpop.permute.xlu0 %2673  ;;  %v961_v31 = vsub.f32 %v9697_v63, %v959_v34  ;;  %v9732_v4 = vsel %vm2935_vm9, %v2949_v9, %v2950_v59  ;;  %v2925_v9 = vld [vmem:[#allocation2 + $0x50] sm:$0x3f] }
 0x2dd   :  { %14574 = vst [vmem:[#allocation127_spill] sm:$0xff] %v9714_v11  ;;  %2715 = vrot.lane.b32.xlu1 %v9550_v57, %s7804_s10  ;;  %v837_v18 = vmax.f32 %v836_v0, 0.0  ;;  %14577 = vst [vmem:[#allocation130_spill] sm:$0xff] %v9732_v4  ;;  %v9737_v61 = vsel %vm2935_vm9, %v2946_v23, %v2947_v39  ;;  %v965_v23 = vstv %s5934_s17  ;;  %v2926_v57 = vld [vmem:[#allocation2 + $0x58] sm:$0x3f] }
 0x2de   :  { %2707 = vrot.lane.b32.xlu0 %v9555_v20, %s7804_s10  ;;  %v962_v28 = vmax.f32 %v961_v31, 0.0  ;;  %14579 = vst [vmem:[#allocation132_spill] sm:$0xff] %v9737_v61  ;;  %v2952_v20 = vrot.slane %v2925_v9, 6 }
 0x2df   :  { %v9722_v33 = vpop.permute.xlu1 %2821  ;;  %v838_v11 = vadd.f32 1e-05, %v837_v18 }
 0x2e0   :  { %14575 = vst [vmem:[#allocation128_spill] sm:$0xff] %v9722_v33  ;;  %v9725_v35 = vpop.permute.xlu0 %2813  ;;  %v963_v34 = vadd.f32 1e-05, %v962_v28  ;;  %v840_v28 = vstv %s5933_s4 }
 0x2e1   :  { %14576 = vst [vmem:[#allocation129_spill] sm:$0xff] %v9725_v35  ;;  %2895 = vrot.lane.b32.xlu1 %v9350_v19, %s7804_s10  ;;  %7381 = vrsqrt.f32 %v838_v11 }
 0x2e2   :  { %2887 = vrot.lane.b32.xlu0 %v9355_v24, %s7804_s10  ;;  %7383 = vrsqrt.f32 %v963_v34 }
 0x2e3   :  { %v9734_v0 = vpop.permute.xlu1 %2455 }
 0x2e4   :  { %14578 = vst [vmem:[#allocation131_spill] sm:$0xff] %v9734_v0  ;;  %v9739_v18 = vpop.permute.xlu0 %2447 }
 0x2e5   :  { %14580 = vst [vmem:[#allocation133_spill] sm:$0xff] %v9739_v18  ;;  %2976 = vrot.lane.b32.xlu1 %v9732_v4, %s7792_s22 }
 0x2e6   :  { %2968 = vrot.lane.b32.xlu0 %v9737_v61, %s7792_s22 }
 0x2e7   :  { %v9745_v11 = vpop.permute.xlu1 %2531 }
 0x2e8   :  { %14581 = vst [vmem:[#allocation134_spill] sm:$0xff] %v9745_v11  ;;  %v9747_v19 = vpop.permute.xlu0 %2523  ;;  %v2954_v11 = vrot.slane %v2926_v57, 6 }
 0x2e9   :  { %14582 = vst [vmem:[#allocation135_spill] sm:$0xff] %v9747_v19  ;;  %2641 = vrot.lane.b32.xlu1 %v9628_v16, %s7783_s20 }
 0x2ea   :  { %2633 = vrot.lane.b32.xlu0 %v9633_v49, %s7783_s20 }
 0x2eb   :  { %v9753_v15 = vpop.permute.xlu1 %2635  ;;  %v7382_v31 = vpop.eup %7381 }
 0x2ec   :  { %14583 = vst [vmem:[#allocation136_spill] sm:$0xff] %v9753_v15  ;;  %v9755_v56 = vpop.permute.xlu0 %2627  ;;  %v7384_v34 = vpop.eup %7383  ;;  %v841_v0 = vmul.f32 %v7382_v31, %v840_v28  ;;  %v9773_v28 = vsel %vm2935_vm9, %v2950_v59, %v2954_v11  ;;  %v9781_v31 = vsel %vm2935_vm9, %v2947_v39, %v2952_v20 }
 0x2ed   :  { %14584 = vst [vmem:[#allocation137_spill] sm:$0xff] %v9755_v56  ;;  %2717 = vrot.lane.b32.xlu1 %v9628_v16, %s7804_s10  ;;  %v966_v19 = vmul.f32 %v7384_v34, %v965_v23  ;;  %14585 = vst [vmem:[#allocation138_spill] sm:$0xff] %v9773_v28  ;;  %v14589_v34 = vld [vmem:[#allocation76_spill] sm:$0xff] }
 0x2ee   :  { %2709 = vrot.lane.b32.xlu0 %v9633_v49, %s7804_s10  ;;  %v845_v18 = vrot.slane %v841_v0, %v9019_v25  ;;  %v851_v33 = vrot.slane %v841_v0, 1  ;;  %14586 = vst [vmem:[#allocation139_spill] sm:$0xff] %v9781_v31  ;;  %v14590_v49 = vld [vmem:[#allocation69_spill] sm:$0xff] }
 0x2ef   :  { %v9762_v35 = vpop.permute.xlu1 %2711  ;;  %v970_v14 = vrot.slane %v966_v19, %v9019_v25  ;;  %v976_v51 = vrot.slane %v966_v19, 1 }
 0x2f0   :  { %v9765_v45 = vpop.permute.xlu0 %2703  ;;  %v853_v16 = vmul.f32 %v851_v33, %v9693_v10  ;;  %v846_v0 = vmul.f32 %v845_v18, %v8837_v8  ;;  %v847_v23 = vmul.f32 %v845_v18, %v8835_v2  ;;  %v14588_v10 = vld [vmem:[#allocation67_spill] sm:$0xff]  ;;  %v14592_v2 = vld [vmem:[#allocation74_spill] sm:$0xff] }
 0x2f1   :  { %2897 = vrot.lane.b32.xlu1 %v9432_v50, %s7804_s10  ;;  %v978_v57 = vmul.f32 %v976_v51, %v9697_v63  ;;  %v14587_v50 = vld [vmem:[#allocation72_spill] sm:$0xff]  ;;  %v849_v33 = vmul.f32 %v845_v18, %v14588_v10  ;;  %v971_v59 = vmul.f32 %v970_v14, %v14590_v49  ;;  %v14591_v8 = vld [vmem:[#allocation71_spill] sm:$0xff]  ;;  %v973_v56 = vmul.f32 %v970_v14, %v14592_v2  ;;  %v14593_v51 = vld [vmem:[#allocation66_spill] sm:$0xff] }
 0x2f2   :  { %2889 = vrot.lane.b32.xlu0 %v9437_v37, %s7804_s10  ;;  %v848_v9 = vmul.f32 %v845_v18, %v14587_v50  ;;  %v857_v37 = vrot.slane %v853_v16, %v14589_v34  ;;  %v972_v15 = vmul.f32 %v970_v14, %v14591_v8  ;;  %v974_v63 = vmul.f32 %v970_v14, %v14593_v51 }
 0x2f3   :  { %v9778_v19 = vpop.permute.xlu1 %2972  ;;  %v982_v24 = vrot.slane %v978_v57, %v14589_v34 }
 0x2f4   :  { %v9787_v11 = vpop.permute.xlu0 %2964  ;;  %v858_v20 = vsub.f32 %v846_v0, %v857_v37  ;;  %v859_v39 = vsub.f32 %v847_v23, %v857_v37  ;;  %v860_v18 = vsub.f32 %v848_v9, %v857_v37  ;;  %v861_v50 = vsub.f32 %v849_v33, %v857_v37 }
 0x2f5   :  { %2978 = vrot.lane.b32.xlu1 %v9773_v28, %s7792_s22  ;;  %v983_v49 = vsub.f32 %v971_v59, %v982_v24  ;;  %v984_v16 = vsub.f32 %v972_v15, %v982_v24  ;;  %v985_v10 = vsub.f32 %v973_v56, %v982_v24  ;;  %v986_v8 = vsub.f32 %v974_v63, %v982_v24 }
 0x2f6   :  { %2970 = vrot.lane.b32.xlu0 %v9781_v31, %s7792_s22 }
 0x2f7   :  { %v9797_v36 = vpop.permute.xlu1 %2457  ;;  %v9803_v14 = vadd.f32 %v983_v49, %v858_v20  ;;  %v9805_v0 = vadd.f32 %v984_v16, %v859_v39  ;;  %v9807_v23 = vadd.f32 %v985_v10, %v860_v18  ;;  %v9811_v37 = vadd.f32 %v986_v8, %v861_v50 }
 0x2f8   :  { %14594 = vst [vmem:[#allocation72_spill] sm:$0xff] %v9797_v36  ;;  %v9799_v2 = vpop.permute.xlu0 %2449 }
 0x2f9   :  { %14595 = vst [vmem:[#allocation67_spill] sm:$0xff] %v9799_v2  ;;  %2791 = vrot.lane.b32.xlu1 %v9582_v1, %s7792_s22  ;;  %14596 = vst [vmem:[#allocation69_spill] sm:$0xff] %v9803_v14 }
 0x2fa   :  { %14597 = vst [vmem:[#allocation71_spill] sm:$0xff] %v9805_v0  ;;  %14598 = vst [vmem:[#allocation74_spill] sm:$0xff] %v9807_v23  ;;  %2783 = vrot.lane.b32.xlu0 %v9587_v5, %s7792_s22 }
 0x2fb   :  { %14599 = vst [vmem:[#allocation66_spill] sm:$0xff] %v9811_v37  ;;  %v9813_v15 = vpop.permute.xlu1 %2533 }
 0x2fc   :  { %14600 = vst [vmem:[#allocation140_spill] sm:$0xff] %v9813_v15  ;;  %v9815_v24 = vpop.permute.xlu0 %2525 }
 0x2fd   :  { %14601 = vst [vmem:[#allocation141_spill] sm:$0xff] %v9815_v24  ;;  %2867 = vrot.lane.b32.xlu1 %v9582_v1, %s7800_s16 }
 0x2fe   :  { %2859 = vrot.lane.b32.xlu0 %v9587_v5, %s7800_s16 }
 0x2ff   :  { %v9821_v56 = vpop.permute.xlu1 %2637 }
 0x300   :  { %14602 = vst [vmem:[#allocation142_spill] sm:$0xff] %v9821_v56  ;;  %v9823_v57 = vpop.permute.xlu0 %2629 }
 0x301   :  { %14603 = vst [vmem:[#allocation143_spill] sm:$0xff] %v9823_v57  ;;  %3008 = vrot.lane.b32.xlu1 %v9732_v4, %s7783_s20 }
 0x302   :  { %3000 = vrot.lane.b32.xlu0 %v9737_v61, %s7783_s20 }
 0x303   :  { %v9829_v9 = vpop.f32.mrb[2].mxu0  ;;  %v9831_v33 = vpop.permute.xlu1 %2713 }
 0x304   :  { %14604 = vst [vmem:[#allocation144_spill] sm:$0xff] %v9831_v33  ;;  %v1481_v59 = vmul.f32 %v9829_v9, %v9829_v9  ;;  %v9835_v51 = vpop.f32.mrb[3].mxu0  ;;  %v9837_v63 = vpop.permute.xlu0 %2705 }
 0x305   :  { %14605 = vst [vmem:[#allocation145_spill] sm:$0xff] %v9837_v63  ;;  %v1471_v20 = vadd.f32 %v9829_v9, %v9835_v51  ;;  %v1480_v39 = vmul.f32 %v9835_v51, %v9835_v51  ;;  %3048 = vrot.lane.b32.xlu1 %v9480_v62, %s7800_s16 }
 0x306   :  { %3040 = vrot.lane.b32.xlu0 %v9485_v43, %s7800_s16 }
 0x307   :  { %v1484_v18 = vadd.f32 %v1481_v59, %v1480_v39  ;;  %v9847_v50 = vpop.permute.xlu1 %2974 }
 0x308   :  { %14606 = vst [vmem:[#allocation146_spill] sm:$0xff] %v9847_v50  ;;  %v9849_v49 = vpop.permute.xlu0 %2966 }
 0x309   :  { %14607 = vst [vmem:[#allocation147_spill] sm:$0xff] %v9849_v49  ;;  %3084 = vrot.lane.b32.xlu1 %v9732_v4, %s7804_s10 }
 0x30a   :  { %3076 = vrot.lane.b32.xlu0 %v9737_v61, %s7804_s10 }
 0x30b   :  { %v9855_v16 = vpop.permute.xlu1 %2318 }
 0x30c   :  { %14608 = vst [vmem:[#allocation148_spill] sm:$0xff] %v9855_v16  ;;  %v9857_v10 = vpop.permute.xlu0 %2310 }
 0x30d   :  { %14609 = vst [vmem:[#allocation149_spill] sm:$0xff] %v9857_v10 }
 0x30f   :  { %v9859_v8 = vpop.permute.xlu1 %2607 }
 0x310   :  { %14610 = vst [vmem:[#allocation150_spill] sm:$0xff] %v9859_v8  ;;  %v9861_v62 = vpop.permute.xlu0 %2599 }
 0x311   :  { %14611 = vst [vmem:[#allocation151_spill] sm:$0xff] %v9861_v62 }
 0x313   :  { %v9863_v37 = vpop.permute.xlu1 %2683 }
 0x314   :  { %14612 = vst [vmem:[#allocation152_spill] sm:$0xff] %v9863_v37  ;;  %v9865_v59 = vpop.permute.xlu0 %2675 }
 0x315   :  { %14613 = vst [vmem:[#allocation153_spill] sm:$0xff] %v9865_v59 }
 0x317   :  { %v9867_v39 = vpop.permute.xlu1 %2787 }
 0x318   :  { %v9869_v23 = vpop.permute.xlu0 %2779 }
 0x31b   :  { %v9871_v0 = vpop.permute.xlu1 %2823 }
 0x31c   :  { %14614 = vst [vmem:[#allocation154_spill] sm:$0xff] %v9871_v0  ;;  %v9873_v14 = vpop.permute.xlu0 %2815 }
 0x31d   :  { %14615 = vst [vmem:[#allocation155_spill] sm:$0xff] %v9873_v14 }
 0x31f   :  { %v9875_v50 = vpop.permute.xlu1 %2863 }
 0x320   :  { %v9877_v16 = vpop.permute.xlu0 %2855 }
 0x323   :  { %v9879_v10 = vpop.f32.mrb[4].mxu0  ;;  %v9881_v8 = vpop.permute.xlu1 %3004 }
 0x324   :  { %14616 = vst [vmem:[#allocation156_spill] sm:$0xff] %v9879_v10  ;;  %v9883_v62 = vpop.f32.mrb[5].mxu0  ;;  %v9885_v49 = vpop.permute.xlu0 %2996  ;;  %v1483_v0 = vmul.f32 %v9879_v10, %v9879_v10 }
 0x325   :  { %v1472_v59 = vadd.f32 %v1471_v20, %v9883_v62  ;;  %v1482_v37 = vmul.f32 %v9883_v62, %v9883_v62 }
 0x327   :  { %v1473_v14 = vadd.f32 %v9879_v10, %v1472_v59  ;;  %v1485_v63 = vadd.f32 %v1484_v18, %v1482_v37  ;;  %v9893_v33 = vpop.permute.xlu1 %3080 }
 0x328   :  { %v9895_v56 = vpop.permute.xlu0 %3072 }
 0x329   :  { %v1474_v57 = vrot.slane %v1473_v14, 4  ;;  %v1486_v24 = vadd.f32 %v1485_v63, %v1483_v0 }
 0x32b   :  { %v1475_v15 = vadd.f32 %v1474_v57, %v1473_v14  ;;  %v1487_v36 = vrot.slane %v1486_v24, 4  ;;  %v9897_v2 = vpop.permute.xlu1 %2320 }
 0x32c   :  { %14617 = vst [vmem:[#allocation157_spill] sm:$0xff] %v9897_v2  ;;  %v9899_v20 = vpop.permute.xlu0 %2312 }
 0x32d   :  { %14618 = vst [vmem:[#allocation158_spill] sm:$0xff] %v9899_v20  ;;  %v1476_v61 = vrot.slane %v1475_v15, 2  ;;  %v1488_v4 = vadd.f32 %v1487_v36, %v1486_v24 }
 0x32f   :  { %v1477_v5 = vadd.f32 %v1476_v61, %v1475_v15  ;;  %v1489_v1 = vrot.slane %v1488_v4, 2  ;;  %v9901_v31 = vpop.permute.xlu1 %2609  ;;  %v9914_v61 = vld [vmem:[#allocation3 + $0x8] sm:$0xff] }
 0x330   :  { %14619 = vst [vmem:[#allocation159_spill] sm:$0xff] %v9901_v31  ;;  %v9903_v59 = vpop.permute.xlu0 %2601 }
 0x331   :  { %14620 = vst [vmem:[#allocation160_spill] sm:$0xff] %v9903_v59  ;;  %v1478_v37 = vrot.slane %v1477_v5, 1  ;;  %v1490_v18 = vadd.f32 %v1489_v1, %v1488_v4 }
 0x333   :  { %v1491_v28 = vrot.slane %v1490_v18, 1  ;;  %v9905_v10 = vpop.permute.xlu1 %2685  ;;  %v1479_v14 = vadd.f32 %v1478_v37, %v1477_v5 }
 0x334   :  { %14621 = vst [vmem:[#allocation161_spill] sm:$0xff] %v9905_v10  ;;  %v9907_v0 = vpop.permute.xlu0 %2677  ;;  %v2351_v10 = vsel %vm2350_vm11, %v9425_v30, %v9423_v42  ;;  %v2286_v42 = vsel %vm381_vm5, %v9453_v29, %v9455_v48  ;;  %v2427_v30 = vsel %vm2257_vm10, %v9461_v27, %v9463_v46  ;;  %v2459_v27 = vsel %vm381_vm5, %v9528_v17, %v9533_v41 }
 0x335   :  { %14622 = vst [vmem:[#allocation162_spill] sm:$0xff] %v9907_v0  ;;  %v1492_v57 = vadd.f32 %v1491_v28, %v1490_v18 }
 0x337   :  { %v1493_v63 = vsel %vm743_vm4, %v1479_v14, %v1492_v57  ;;  %v9910_v20 = vpop.permute.xlu1 %2789 }
 0x338   :  { %14623 = vst [vmem:[#allocation163_spill] sm:$0xff] %v9910_v20  ;;  %6343 = vmatmul.mubr.f32.vlgmr.msra.gmra.mrb[2].mxu1 %v1493_v63  ;;  %v9912_v36 = vpop.permute.xlu0 %2781 }
 0x339   :  { %14624 = vst [vmem:[#allocation164_spill] sm:$0xff] %v9912_v36  ;;  %6415 = vmatprep.mubr.msk.f32.mxu1 %vm7803_vm3, %v9914_v61 }
 0x33b   :  { %v9918_v1 = vpop.permute.xlu1 %2825 }
 0x33c   :  { %14625 = vst [vmem:[#allocation165_spill] sm:$0xff] %v9918_v1  ;;  %v9920_v4 = vpop.permute.xlu0 %2817 }
 0x33d   :  { %14626 = vst [vmem:[#allocation166_spill] sm:$0xff] %v9920_v4  ;;  %v2179_v4 = vld [vmem:[%s14070_s9] sm:$0xff] }
 0x33e   :  { %v9975_v2 = vrot.slane %v2179_v4, %v9019_v25 }
 0x33f   :  { %v9922_v15 = vpop.permute.xlu1 %2865 }
 0x340   :  { %14627 = vst [vmem:[#allocation167_spill] sm:$0xff] %v9922_v15  ;;  %v9924_v5 = vpop.permute.xlu0 %2857  ;;  %v2294_v29 = vmul.f32 %v9975_v2, %v2286_v42  ;;  %v10026_v42 = vld [vmem:[%s14070_s9 + $0x10] sm:$0xff] }
 0x341   :  { %14628 = vst [vmem:[#allocation168_spill] sm:$0xff] %v9924_v5 }
 0x343   :  { %v9926_v28 = vpop.permute.xlu1 %3006 }
 0x344   :  { %14629 = vst [vmem:[#allocation169_spill] sm:$0xff] %v9926_v28  ;;  %v9928_v24 = vpop.permute.xlu0 %2998 }
 0x345   :  { %14630 = vst [vmem:[#allocation170_spill] sm:$0xff] %v9928_v24 }
 0x347   :  { %v9930_v37 = vpop.permute.xlu1 %3082 }
 0x348   :  { %14631 = vst [vmem:[#allocation171_spill] sm:$0xff] %v9930_v37  ;;  %v9932_v18 = vpop.permute.xlu0 %3074 }
 0x349   :  { %14632 = vst [vmem:[#allocation172_spill] sm:$0xff] %v9932_v18  ;;  %v14640_v18 = vld [vmem:[#allocation80_spill] sm:$0xff] }
 0x34a   :  { %v9978_v37 = vrot.slane %v2179_v4, %v14640_v18 }
 0x34b   :  { %v9934_v14 = vpop.permute.xlu1 %2639 }
 0x34c   :  { %14633 = vst [vmem:[#allocation173_spill] sm:$0xff] %v9934_v14  ;;  %v9936_v57 = vpop.permute.xlu0 %2631  ;;  %v9952_v14 = vrot.slane %v2179_v4, %v14589_v34  ;;  %v2435_v48 = vmul.f32 %v9978_v37, %v2427_v30 }
 0x34d   :  { %14634 = vst [vmem:[#allocation174_spill] sm:$0xff] %v9936_v57  ;;  %v14637_v57 = vld [vmem:[#allocation43_spill] sm:$0xff] }
 0x34e   :  { %v9955_v0 = vrot.slane %v2179_v4, %v14637_v57 }
 0x34f   :  { %v9938_v63 = vpop.permute.xlu1 %2715 }
 0x350   :  { %14635 = vst [vmem:[#allocation175_spill] sm:$0xff] %v9938_v63  ;;  %v9940_v1 = vpop.permute.xlu0 %2707  ;;  %v2258_v63 = vsel %vm2257_vm10, %v9410_v53, %v9417_v32  ;;  %v2359_v32 = vmul.f32 %v9955_v0, %v2351_v10  ;;  %v14642_v10 = vld [vmem:[#allocation78_spill] sm:$0xff] }
 0x351   :  { %14636 = vst [vmem:[#allocation176_spill] sm:$0xff] %v9940_v1  ;;  %v9960_v1 = vld [vmem:[%s14070_s9 + $0x8] sm:$0xff]  ;;  %v2266_v53 = vmul.f32 %v9952_v14, %v2258_v63  ;;  %v10001_v63 = vrot.slane %v2179_v4, %v9076_v55  ;;  %v10004_v24 = vrot.slane %v2179_v4, %v14642_v10 }
 0x352   :  { %v9982_v28 = vrot.slane %v9960_v1, %v14589_v34  ;;  %v10016_v46 = vrot.slane %v9960_v1, %v9019_v25  ;;  %v10030_v41 = vrot.slane %v9960_v1, %v14637_v57 }
 0x353   :  { %v9945_v20 = vpop.permute.xlu1 %2895 }
 0x354   :  { %v9949_v36 = vpop.permute.xlu0 %2887 }
 0x357   :  { %v9970_v31 = vpop.permute.xlu1 %2976 }
 0x358   :  { %14638 = vst [vmem:[#allocation177_spill] sm:$0xff] %v9970_v31  ;;  %v9972_v59 = vpop.permute.xlu0 %2968  ;;  %v2503_v31 = vsel %vm419_vm7, %v9473_v22, %v9470_v13  ;;  %v2363_v13 = vadd.f32 %v2359_v32, %v2266_v53  ;;  %v2302_v53 = vmul.f32 %v10001_v63, %v8906_v44  ;;  %v10039_v32 = vrot.slane %v9960_v1, %v9076_v55 }
 0x359   :  { %14639 = vst [vmem:[#allocation178_spill] sm:$0xff] %v9972_v59  ;;  %v2511_v22 = vmul.f32 %v9982_v28, %v2503_v31  ;;  %v2467_v31 = vmul.f32 %v10004_v24, %v2459_v27  ;;  %v2611_v27 = vsel %vm2257_vm10, %v9630_v54, %v9635_v40  ;;  %v14650_v54 = vld [vmem:[#allocation49_spill] sm:$0xff] }
 0x35a   :  { %14645 = vst [vmem:[#allocation182_spill] sm:$0xff] %v10039_v32  ;;  %v10072_v40 = vrot.slane %v2179_v4, %v14650_v54 }
 0x35b   :  { %v9998_v59 = vpop.permute.xlu1 %2641  ;;  %v2515_v44 = vadd.f32 %v2511_v22, %v2363_v13  ;;  %v2827_v13 = vsel %vm381_vm5, %v9649_v6, %v9651_v58  ;;  %v2322_v58 = vsel %vm419_vm7, %v9605_v3, %v9603_v21  ;;  %v2619_v6 = vmul.f32 %v10039_v32, %v2611_v27 }
 0x35c   :  { %14641 = vst [vmem:[#allocation179_spill] sm:$0xff] %v9998_v59  ;;  %v10006_v5 = vpop.permute.xlu0 %2633  ;;  %v2535_v59 = vsel %vm2350_vm11, %v9543_v7, %v9540_v26  ;;  %v2439_v7 = vadd.f32 %v2435_v48, %v2294_v29  ;;  %v2687_v29 = vsel %vm419_vm7, %v9643_v47, %v9641_v12  ;;  %v10063_v48 = vrot.slane %v2179_v4, %v9121_v52 }
 0x35d   :  { %14643 = vst [vmem:[#allocation180_spill] sm:$0xff] %v10006_v5  ;;  %v2543_v30 = vmul.f32 %v10016_v46, %v2535_v59  ;;  %v10046_v5 = vrot.slane %v9960_v1, %v14640_v18  ;;  %v2663_v59 = vmul.f32 %v10030_v41, %v9326_v38  ;;  %v10076_v47 = vrot.slane %v9960_v1, %v14642_v10 }
 0x35e   :  { %v10080_v38 = vrot.slane %v10026_v42, %v9019_v25  ;;  %v2980_v21 = vsel %vm2257_vm10, %v9778_v19, %v9787_v11  ;;  %v2330_v27 = vmul.f32 %v10063_v48, %v2322_v58  ;;  %v14661_v19 = vld [vmem:[#allocation136_spill] sm:$0xff] }
 0x35f   :  { %v10032_v17 = vpop.permute.xlu1 %2717  ;;  %14647 = vst [vmem:[#allocation184_spill] sm:$0xff] %v10046_v5  ;;  %14651 = vst [vmem:[#allocation187_spill] sm:$0xff] %v10076_v47  ;;  %v2547_v15 = vadd.f32 %v2543_v30, %v2439_v7  ;;  %v2695_v4 = vmul.f32 %v10046_v5, %v2687_v29  ;;  %v10097_v7 = vrot.slane %v10026_v42, %v14637_v57  ;;  %v14656_v30 = vld [vmem:[#allocation75_spill] sm:$0xff]  ;;  %v14660_v57 = vld [vmem:[#allocation137_spill] sm:$0xff] }
 0x360   :  { %14644 = vst [vmem:[#allocation181_spill] sm:$0xff] %v10032_v17  ;;  %v10041_v26 = vpop.permute.xlu0 %2709  ;;  %v10050_v17 = vrot.slane %v10026_v42, %v14589_v34  ;;  %14652 = vst [vmem:[#allocation188_spill] sm:$0xff] %v10080_v38  ;;  %v10110_v29 = vrot.slane %v9960_v1, %v9121_v52  ;;  %v2643_v11 = vsel %vm381_vm5, %v14661_v19, %v14660_v57 }
 0x361   :  { %14646 = vst [vmem:[#allocation183_spill] sm:$0xff] %v10041_v26  ;;  %v2471_v26 = vadd.f32 %v2467_v31, %v2302_v53  ;;  %v2667_v53 = vadd.f32 %v2663_v59, %v2515_v44  ;;  %14654 = vst [vmem:[#allocation190_spill] sm:$0xff] %v10097_v7  ;;  %v2479_v44 = vmul.f32 %v10072_v40, %v14656_v30 }
 0x362   :  { %14648 = vst [vmem:[#allocation185_spill] sm:$0xff] %v10050_v17  ;;  %v2835_v31 = vmul.f32 %v10050_v17, %v2827_v13  ;;  %14657 = vst [vmem:[#allocation75_spill] sm:$0xff] %v10110_v29  ;;  %v2988_v58 = vmul.f32 %v10097_v7, %v2980_v21  ;;  %v10124_v17 = vrot.slane %v10026_v42, %v9076_v55  ;;  %v14719_v55 = vld [vmem:[#allocation93_spill] sm:$0xff] }
 0x363   :  { %v10069_v22 = vpop.permute.xlu1 %2897  ;;  %v2623_v13 = vadd.f32 %v2619_v6, %v2471_v26  ;;  %v3012_v57 = vsel %vm381_vm5, %v9881_v8, %v9885_v49  ;;  %v5940_v26 = vld [vmem:[%s14070_s9 + $0x18] ss:$0 sm:$0xff]  ;;  %v2795_v8 = vsel %vm2257_vm10, %v9867_v39, %v9869_v23  ;;  %v2903_v39 = vsel %vm2350_vm11, %v9949_v36, %v9945_v20 }
 0x364   :  { %14649 = vst [vmem:[#allocation186_spill] sm:$0xff] %v10069_v22  ;;  %v10082_v12 = vpop.permute.xlu0 %2889  ;;  %v2719_v22 = vsel %vm2350_vm11, %v9765_v45, %v9762_v35  ;;  %v14658_v35 = vld [vmem:[#allocation48_spill] sm:$0xff]  ;;  %14662 = vst [vmem:[#allocation137_spill] sm:$0xff] %v10124_v17 }
 0x365   :  { %14653 = vst [vmem:[#allocation189_spill] sm:$0xff] %v10082_v12  ;;  %v2847_v45 = vmul.f32 %v10080_v38, %v14658_v35  ;;  %v2699_v12 = vadd.f32 %v2695_v4, %v2547_v15  ;;  %v2727_v30 = vmul.f32 %v10076_v47, %v2719_v22  ;;  %v10128_v35 = vrot.slane %v10026_v42, %v14640_v18 }
 0x366   :  { %v2871_v15 = vsel %vm419_vm7, %v9877_v16, %v9875_v50  ;;  %v3088_v22 = vsel %vm2350_vm11, %v9895_v56, %v9893_v33  ;;  %v2483_v4 = vadd.f32 %v2479_v44, %v2330_v27  ;;  %v10150_v50 = vrot.slane %v9960_v1, %v14650_v54 }
 0x367   :  { %v10103_v3 = vpop.permute.xlu1 %2978  ;;  %14663 = vst [vmem:[#allocation136_spill] sm:$0xff] %v10128_v35  ;;  %v2731_v49 = vadd.f32 %v2727_v30, %v2623_v13  ;;  %v10160_v56 = vrot.slane %v10026_v42, %v14642_v10  ;;  %v2851_v33 = vadd.f32 %v2847_v45, %v2699_v12  ;;  %v2879_v21 = vmul.f32 %v10124_v17, %v2871_v15  ;;  %v3528_v17 = vld [vmem:[#allocation3 + $0x48] sm:$0x80] }
 0x368   :  { %14655 = vst [vmem:[#allocation191_spill] sm:$0xff] %v10103_v3  ;;  %v10114_v59 = vpop.permute.xlu0 %2970  ;;  %v2839_v3 = vadd.f32 %v2835_v31, %v2667_v53  ;;  %v2651_v53 = vmul.f32 %v10110_v29, %v2643_v11  ;;  %14665 = vst [vmem:[#allocation193_spill] sm:$0xff] %v10150_v50  ;;  %v3020_v44 = vmul.f32 %v10128_v35, %v3012_v57  ;;  %v14703_v35 = vld [vmem:[#allocation63_spill] sm:$0xff] }
 0x369   :  { %14659 = vst [vmem:[#allocation48_spill] sm:$0xff] %v10114_v59  ;;  %14667 = vst [vmem:[#allocation195_spill] sm:$0xff] %v10160_v56  ;;  %v3096_v1 = vmul.f32 %v5940_v26, %v3088_v22  ;;  %v2803_v13 = vmul.f32 %v10150_v50, %v2795_v8  ;;  %v10169_v11 = vrot.slane %v10026_v42, %v9121_v52  ;;  %v14730_v52 = vld [vmem:[#allocation60_spill] sm:$0xff] }
 0x36a   :  { %v2992_v31 = vadd.f32 %v2988_v58, %v2839_v3  ;;  %v2655_v19 = vadd.f32 %v2651_v53, %v2483_v4  ;;  %v3032_v12 = vmul.f32 %v10160_v56, %v9485_v43  ;;  %v2883_v3 = vadd.f32 %v2879_v21, %v2731_v49 }
 0x36b   :  { %v10145_v6 = vpop.permute.xlu1 %2791  ;;  %14669 = vst [vmem:[#allocation197_spill] sm:$0xff] %v10169_v11  ;;  %v3024_v45 = vadd.f32 %v3020_v44, %v2851_v33  ;;  %v2911_v57 = vmul.f32 %v10169_v11, %v2903_v39  ;;  %v10186_v53 = vrot.slane %v10026_v42, %v14650_v54 }
 0x36c   :  { %14664 = vst [vmem:[#allocation192_spill] sm:$0xff] %v10145_v6  ;;  %v10152_v16 = vpop.permute.xlu0 %2783  ;;  %v3100_v30 = vadd.f32 %v3096_v1, %v2992_v31  ;;  %v2807_v15 = vadd.f32 %v2803_v13, %v2655_v19  ;;  %v3036_v22 = vadd.f32 %v3032_v12, %v2883_v3 }
 0x36d   :  { %14666 = vst [vmem:[#allocation194_spill] sm:$0xff] %v10152_v16  ;;  %14673 = vst [vmem:[#allocation201_spill] sm:$0xff] %v10186_v53  ;;  %v3375_v16 = vrot.slane %v9914_v61, 6 }
 0x36e   :  { %v3104_v4 = vadd.f32 %v3100_v30, %v3024_v45  ;;  %v2915_v36 = vadd.f32 %v2911_v57, %v2807_v15 }
 0x36f   :  { %v10164_v27 = vpop.permute.xlu1 %2867 }
 0x370   :  { %14668 = vst [vmem:[#allocation196_spill] sm:$0xff] %v10164_v27  ;;  %v10171_v23 = vpop.permute.xlu0 %2859  ;;  %v3108_v33 = vadd.f32 %v3104_v4, %v3036_v22 }
 0x371   :  { %14670 = vst [vmem:[#allocation198_spill] sm:$0xff] %v10171_v23  ;;  %v14698_v23 = vld [vmem:[#allocation132_spill] sm:$0xff] }
 0x373   :  { %v10179_v58 = vpop.permute.xlu1 %3008 }
 0x374   :  { %14671 = vst [vmem:[#allocation199_spill] sm:$0xff] %v10179_v58  ;;  %v10182_v26 = vpop.permute.xlu0 %3000 }
 0x375   :  { %14672 = vst [vmem:[#allocation200_spill] sm:$0xff] %v10182_v26 }
 0x377   :  { %v3049_v20 = vpop.permute.xlu1 %3048 }
 0x378   :  { %v3041_v8 = vpop.permute.xlu0 %3040 }
 0x379   :  { %v3056_v43 = vsel %vm419_vm7, %v3041_v8, %v3049_v20  ;;  %v14675_v20 = vld [vmem:[#allocation156_spill] sm:$0xff] }
 0x37a   :  { %v3064_v49 = vmul.f32 %v10186_v53, %v3056_v43  ;;  %v14697_v53 = vld [vmem:[#allocation130_spill] sm:$0xff] }
 0x37c   :  { %v3068_v31 = vadd.f32 %v3064_v49, %v2915_v36  ;;  %v1934_v49 = vld [vmem:[#allocation18] sm:$0xff] }
 0x37e   :  { %v10191_v21 = vadd.f32 %v3108_v33, %v3068_v31  ;;  %v1935_v33 = vld [vmem:[#allocation18 + $0x8] sm:$0xff] }
 0x37f   :  { %v6814_v31 = vpack.c.bf16 %v1935_v33, %v1934_v49 }
 0x380   :  { %14674 = vst [vmem:[#allocation202_spill] sm:$0xff] %v10191_v21 }
 0x381   :  { %6815 = vmatprep.subr.bf16.mxu0 %v6814_v31 }
 0x382   :  { %6817 = vmatpush3.bf16.msra.mxu0 %v6814_v31 }
 0x40b   :  { %v1560_v44 = vpop.f32.mrb[2].mxu1 }
 0x40c   :  { %v1564_v1 = vmul.f32 0.001953125, %v1560_v44  ;;  %v6344_v19 = vpop.f32.mrb[3].mxu1 }
 0x40e   :  { %v1565_v13 = vmul.f32 %v1564_v1, %v1564_v1 }
 0x410   :  { %v1567_v39 = vrot.slane %v1565_v13, 7 }
 0x412   :  { %v1569_v12 = vsub.f32 %v1564_v1, %v1567_v39 }
 0x414   :  { %v1570_v42 = vmax.f32 %v1569_v12, 0.0 }
 0x416   :  { %v1571_v3 = vadd.f32 1e-05, %v1570_v42  ;;  %v1937_v42 = vld [vmem:[#allocation18 + $0x18] sm:$0xff] }
 0x418   :  { %7385 = vrsqrt.f32 %v1571_v3 }
 0x422   :  { %v7386_v45 = vpop.eup %7385 }
 0x423   :  { %v1576_v30 = vrot.slane %v7386_v45, %v9019_v25  ;;  %v1582_v15 = vrot.slane %v7386_v45, 1  ;;  %v1938_v45 = vld [vmem:[#allocation18 + $0x20] sm:$0xff] }
 0x425   :  { %v1577_v57 = vmul.f32 %v1576_v30, %v9835_v51  ;;  %v1578_v22 = vmul.f32 %v9829_v9, %v1576_v30  ;;  %v1579_v4 = vmul.f32 %v1576_v30, %v9883_v62  ;;  %v1580_v36 = vmul.f32 %v14675_v20, %v1576_v30  ;;  %v1939_v30 = vld [vmem:[#allocation18 + $0x28] sm:$0xff] }
 0x426   :  { %v1584_v8 = vmul.f32 %v1582_v15, %v1564_v1  ;;  %v1936_v1 = vld [vmem:[#allocation18 + $0x10] sm:$0xff]  ;;  %v6822_v15 = vpack.c.bf16 %v1939_v30, %v1938_v45 }
 0x427   :  { %v6818_v3 = vpack.c.bf16 %v1937_v42, %v1936_v1 }
 0x428   :  { %v1588_v43 = vrot.slane %v1584_v8, %v14589_v34  ;;  %v1942_v8 = vld [vmem:[#allocation18 + $0x40] sm:$0xff] }
 0x429   :  { %6819 = vmatprep.subr.bf16.mxu0 %v6818_v3 }
 0x42a   :  { %v1589_v44 = vsub.f32 %v1577_v57, %v1588_v43  ;;  %v1590_v19 = vsub.f32 %v1578_v22, %v1588_v43  ;;  %v1591_v13 = vsub.f32 %v1579_v4, %v1588_v43  ;;  %v1592_v39 = vsub.f32 %v1580_v36, %v1588_v43  ;;  %6821 = vmatpush3.bf16.msra.mxu0 %v6818_v3  ;;  %v1940_v57 = vld [vmem:[#allocation18 + $0x30] sm:$0xff]  ;;  %v1941_v22 = vld [vmem:[#allocation18 + $0x38] sm:$0xff]  ;;  %v1601_v36 = vld [vmem:[#allocation3] sm:$0x80] }
 0x42b   :  { %6823 = vmatprep.subr.bf16.mxu0 %v6822_v15  ;;  %v6826_v4 = vpack.c.bf16 %v1941_v22, %v1940_v57  ;;  %v1943_v43 = vld [vmem:[#allocation18 + $0x48] sm:$0xff]  ;;  %v1625_v33 = vrot.slane %v1601_v36, 7  ;;  %v1944_v57 = vld [vmem:[#allocation18 + $0x50] sm:$0xff]  ;;  %v1945_v22 = vld [vmem:[#allocation18 + $0x58] sm:$0xff] }
 0x42c   :  { %v10199_v12 = vmax.f32 %v1589_v44, 0.0  ;;  %v10201_v51 = vmax.f32 %v1590_v19, 0.0  ;;  %v10203_v9 = vmax.f32 %v1591_v13, 0.0  ;;  %v10205_v62 = vmax.f32 %v1592_v39, 0.0  ;;  %v1607_v44 = vld [vmem:[#allocation3 + $0x40] sm:$0x80] }
 0x42d   :  { %v6830_v13 = vpack.c.bf16 %v1943_v43, %v1942_v8  ;;  %v1635_v1 = vrot.slane %v1607_v44, 7 }
 0x42e   :  { %14676 = vst [vmem:[#allocation156_spill] sm:$0xff] %v10199_v12  ;;  %14677 = vst [vmem:[#allocation203_spill] sm:$0xff] %v10201_v51  ;;  %1763 = vrot.lane.b32.xlu0 %v10201_v51, %s7800_s16  ;;  %1761 = vrot.lane.b32.xlu1 %v10199_v12, %s7800_s16  ;;  %v1626_v31 = vrot.slane %v10199_v12, 7  ;;  %v1819_v39 = vrot.slane %v10201_v51, 1  ;;  %v1636_v45 = vrot.slane %v10203_v9, 7 }
 0x42f   :  { %14678 = vst [vmem:[#allocation204_spill] sm:$0xff] %v10203_v9  ;;  %14679 = vst [vmem:[#allocation205_spill] sm:$0xff] %v10205_v62  ;;  %6825 = vmatpush3.bf16.msra.mxu0 %v6822_v15  ;;  %v1797_v15 = vld [vmem:[#allocation3 + $0x30] sm:$0x1] }
 0x430   :  { %1597 = vst [vmem:[#allocation3 + $0x10] sm:$0xff] %v10199_v12  ;;  %1598 = vst [vmem:[#allocation3 + $0x20] sm:$0xff] %v10201_v51  ;;  %6827 = vmatprep.subr.bf16.mxu0 %v6826_v4  ;;  %v10233_v3 = vsel %vm743_vm4, %v1625_v33, %v1626_v31  ;;  %v1824_v8 = vrot.slane %v1797_v15, 1  ;;  %v1947_v33 = vld [vmem:[#allocation18 + $0x68] sm:$0xff] }
 0x431   :  { %1599 = vst [vmem:[#allocation3 + $0x50] sm:$0xff] %v10203_v9  ;;  %1600 = vst [vmem:[#allocation3 + $0x60] sm:$0xff] %v10205_v62 }
 0x432   :  { %1721 = vrot.lane.b32.xlu0 %v10199_v12, %s7783_s20  ;;  %1723 = vrot.lane.b32.xlu1 %v10201_v51, %s7783_s20  ;;  %14681 = vst [vmem:[#allocation207_spill] sm:$0xff] %v10233_v3 }
 0x433   :  { %6829 = vmatpush3.bf16.msra.mxu0 %v6826_v4  ;;  %v6834_v4 = vpack.c.bf16 %v1945_v22, %v1944_v57  ;;  %v3116_v57 = vld [vmem:[#allocation20] sm:$0xff]  ;;  %v3117_v22 = vld [vmem:[#allocation20 + $0x8] sm:$0xff] }
 0x434   :  { %6831 = vmatprep.subr.bf16.mxu0 %v6830_v13 }
 0x436   :  { %1765 = vrot.lane.b32.xlu0 %v10203_v9, %s7800_s16  ;;  %1725 = vrot.lane.b32.xlu1 %v10203_v9, %s7783_s20  ;;  %v14712_v9 = vld [vmem:[#allocation85_spill] sm:$0xff] }
 0x437   :  { %v1793_v20 = vld [vmem:[#allocation3 + $0x10] sm:$0xfe]  ;;  %v1605_v19 = vld [vmem:[#allocation3 + $0x20] sm:$0x7f]  ;;  %6833 = vmatpush3.bf16.msra.mxu0 %v6830_v13 }
 0x438   :  { %v1818_v49 = vrot.slane %v1793_v20, 1  ;;  %v1631_v30 = vrot.slane %v1605_v19, 7  ;;  %v10241_v20 = vsel %vm743_vm4, %v1635_v1, %v1636_v45  ;;  %v1611_v43 = vld [vmem:[#allocation3 + $0x60] sm:$0x7f]  ;;  %6835 = vmatprep.subr.bf16.mxu0 %v6834_v4  ;;  %v10251_v19 = vsel %vm1817_vm6, %v1819_v39, %v1824_v8  ;;  %v1949_v1 = vld [vmem:[#allocation18 + $0x78] sm:$0xff] }
 0x439   :  { %14682 = vst [vmem:[#allocation208_spill] sm:$0xff] %v10241_v20  ;;  %14684 = vst [vmem:[#allocation210_spill] sm:$0xff] %v10251_v19  ;;  %v1641_v13 = vrot.slane %v1611_v43, 7  ;;  %v1829_v43 = vrot.slane %v10205_v62, 1 }
 0x43a   :  { %1767 = vrot.lane.b32.xlu0 %v10205_v62, %s7800_s16  ;;  %1727 = vrot.lane.b32.xlu1 %v10205_v62, %s7783_s20  ;;  %v10230_v42 = vsel %vm1817_vm6, %v1818_v49, %v1819_v39  ;;  %v10244_v36 = vsel %vm743_vm4, %v1626_v31, %v1631_v30  ;;  %v1946_v49 = vld [vmem:[#allocation18 + $0x60] sm:$0xff]  ;;  %v1948_v31 = vld [vmem:[#allocation18 + $0x70] sm:$0xff] }
 0x43b   :  { %14680 = vst [vmem:[#allocation206_spill] sm:$0xff] %v10230_v42  ;;  %14683 = vst [vmem:[#allocation209_spill] sm:$0xff] %v10244_v36  ;;  %6837 = vmatpush3.bf16.msra.mxu0 %v6834_v4  ;;  %v6838_v44 = vpack.c.bf16 %v1947_v33, %v1946_v49  ;;  %v6842_v30 = vpack.c.bf16 %v1949_v1, %v1948_v31  ;;  %v10258_v15 = vsel %vm743_vm4, %v1636_v45, %v1641_v13  ;;  %v1799_v39 = vld [vmem:[#allocation3 + $0x50] sm:$0xfe]  ;;  %v1803_v45 = vld [vmem:[#allocation3 + $0x70] sm:$0x1] }
 0x43c   :  { %14685 = vst [vmem:[#allocation211_spill] sm:$0xff] %v10258_v15  ;;  %v10264_v4 = vpack.c.bf16 %v3117_v22, %v3116_v57  ;;  %v1828_v8 = vrot.slane %v1799_v39, 1  ;;  %v1834_v33 = vrot.slane %v1803_v45, 1  ;;  %v14689_v13 = vld [vmem:[#allocation114_spill] sm:$0xff]  ;;  %v14690_v31 = vld [vmem:[#allocation116_spill] sm:$0xff]  ;;  %v14694_v57 = vld [vmem:[#allocation95_spill] sm:$0xff] }
 0x43d   :  { %6839 = vmatprep.subr.bf16.mxu0 %v6838_v44  ;;  %v14691_v1 = vld [vmem:[#allocation138_spill] sm:$0xff]  ;;  %v14695_v22 = vld [vmem:[#allocation103_spill] sm:$0xff]  ;;  %v3348_v45 = vld [vmem:[#allocation3 + $0x8] sm:$0xc0] }
 0x43e   :  { %1890 = vrot.lane.b32.xlu1 %v10230_v42, %s7800_s16  ;;  %1653 = vrot.lane.b32.xlu0 %v10233_v3, %s7783_s20  ;;  %14686 = vst [vmem:[#allocation212_spill] sm:$0xff] %v10264_v4  ;;  %v10273_v49 = vsel %vm1817_vm6, %v1828_v8, %v1829_v43  ;;  %v14693_v39 = vld [vmem:[#allocation94_spill] sm:$0xff]  ;;  %v14696_v8 = vld [vmem:[#allocation105_spill] sm:$0xff]  ;;  %v3374_v6 = vrot.slane %v3348_v45, 6  ;;  %v14709_v62 = vld [vmem:[#allocation88_spill] sm:$0xff] }
 0x43f   :  { %6841 = vmatpush3.bf16.msra.mxu0 %v6838_v44  ;;  %14687 = vst [vmem:[#allocation213_spill] sm:$0xff] %v10273_v49  ;;  %v10280_v44 = vsel %vm1817_vm6, %v1829_v43, %v1834_v33  ;;  %v3352_v43 = vld [vmem:[#allocation3 + $0x28] sm:$0x3f]  ;;  %v3524_v33 = vld [vmem:[#allocation3 + $0x8] sm:$0x80] }
 0x440   :  { %6843 = vmatprep.subr.bf16.mxu0 %v6842_v30  ;;  %14688 = vst [vmem:[#allocation214_spill] sm:$0xff] %v10280_v44  ;;  %v3379_v59 = vrot.slane %v3352_v43, 6  ;;  %v3542_v58 = vrot.slane %v3524_v33, 7  ;;  %v3358_v43 = vld [vmem:[#allocation3 + $0x68] sm:$0x3f] }
 0x441   :  { %v3526_v33 = vld [vmem:[#allocation3 + $0x28] sm:$0x7f] }
 0x442   :  { %1657 = vrot.lane.b32.xlu1 %v10241_v20, %s7783_s20  ;;  %1655 = vrot.lane.b32.xlu0 %v10244_v36, %s7783_s20 }
 0x443   :  { %6845 = vmatpush3.bf16.msra.mxu0 %v6842_v30  ;;  %v14692_v30 = vld [vmem:[#allocation139_spill] sm:$0xff] }
 0x444   :  { %6871 = vmatprep.subr.bf16.mxu0 %v10264_v4 }
 0x446   :  { %1689 = vrot.lane.b32.xlu1 %v10233_v3, %s7800_s16  ;;  %1892 = vrot.lane.b32.xlu0 %v10251_v19, %s7800_s16  ;;  %v2664_v3 = vmul.f32 %v10030_v41, %v14730_v52 }
 0x44a   :  { %1846 = vrot.lane.b32.xlu1 %v10230_v42, %s7783_s20  ;;  %1659 = vrot.lane.b32.xlu0 %v10258_v15, %s7783_s20 }
 0x44e   :  { %1848 = vrot.lane.b32.xlu1 %v10251_v19, %s7783_s20  ;;  %1691 = vrot.lane.b32.xlu0 %v10244_v36, %s7800_s16  ;;  %v14716_v19 = vld [vmem:[#allocation91_spill] sm:$0xff]  ;;  %v14728_v36 = vld [vmem:[#allocation106_spill] sm:$0xff] }
 0x452   :  { %1693 = vrot.lane.b32.xlu1 %v10241_v20, %s7800_s16  ;;  %1894 = vrot.lane.b32.xlu0 %v10273_v49, %s7800_s16  ;;  %v14717_v20 = vld [vmem:[#allocation90_spill] sm:$0xff] }
 0x456   :  { %1850 = vrot.lane.b32.xlu1 %v10273_v49, %s7783_s20  ;;  %1896 = vrot.lane.b32.xlu0 %v10280_v44, %s7800_s16 }
 0x45a   :  { %1695 = vrot.lane.b32.xlu1 %v10258_v15, %s7800_s16  ;;  %1852 = vrot.lane.b32.xlu0 %v10280_v44, %s7783_s20  ;;  %v3856_v44 = vld [vmem:[#allocation3 + $0x38] sm:$0x1] }
 0x45e   :  { %2793 = vrot.lane.b32.xlu1 %v14689_v13, %s7792_s22  ;;  %2785 = vrot.lane.b32.xlu0 %v14690_v31, %s7792_s22 }
 0x462   :  { %2869 = vrot.lane.b32.xlu1 %v14689_v13, %s7800_s16  ;;  %2861 = vrot.lane.b32.xlu0 %v14690_v31, %s7800_s16 }
 0x466   :  { %3010 = vrot.lane.b32.xlu1 %v14691_v1, %s7783_s20  ;;  %3002 = vrot.lane.b32.xlu0 %v14692_v30, %s7783_s20 }
 0x46a   :  { %3050 = vrot.lane.b32.xlu1 %v14693_v39, %s7800_s16  ;;  %3042 = vrot.lane.b32.xlu0 %v14694_v57, %s7800_s16  ;;  %v3354_v39 = vld [vmem:[#allocation3 + $0x48] sm:$0xc0] }
 0x46b   :  { %v3384_v26 = vrot.slane %v3354_v39, 6  ;;  %v3547_v39 = vrot.slane %v3526_v33, 7  ;;  %v14701_v33 = vld [vmem:[#allocation64_spill] sm:$0xff] }
 0x46d   :  { %v10335_v27 = vsel %vm2935_vm9, %v3384_v26, %v3375_v16 }
 0x46e   :  { %3086 = vrot.lane.b32.xlu1 %v14691_v1, %s7804_s10  ;;  %3078 = vrot.lane.b32.xlu0 %v14692_v30, %s7804_s10 }
 0x472   :  { %2899 = vrot.lane.b32.xlu1 %v14695_v22, %s7804_s10  ;;  %2891 = vrot.lane.b32.xlu0 %v14696_v8, %s7804_s10  ;;  %v10320_v22 = vrot.slane %v9914_v61, 7 }
 0x474   :  { %v3544_v45 = vsel %vm743_vm4, %v3542_v58, %v10320_v22  ;;  %v3548_v26 = vsel %vm743_vm4, %v10320_v22, %v3547_v39 }
 0x475   :  { %v7201_v11 = vpack.i.bf16 %v3548_v26, %v3544_v45 }
 0x476   :  { %2901 = vrot.lane.b32.xlu1 %v14689_v13, %s7804_s10  ;;  %2893 = vrot.lane.b32.xlu0 %v14690_v31, %s7804_s10  ;;  %v10327_v13 = vsel %vm2935_vm9, %v3374_v6, %v3375_v16  ;;  %v10330_v31 = vsel %vm2935_vm9, %v3375_v16, %v3379_v59  ;;  %v7186_v59 = vpack.i.bf16 %v3544_v45, %v10335_v27  ;;  %v3883_v45 = vrot.slane %v3856_v44, 1  ;;  %v14714_v44 = vld [vmem:[#allocation87_spill] sm:$0xff] }
 0x477   :  { %v7181_v6 = vpack.i.bf16 %v10330_v31, %v10327_v13 }
 0x47a   :  { %3052 = vrot.lane.b32.xlu1 %v14697_v53, %s7800_s16  ;;  %3044 = vrot.lane.b32.xlu0 %v14698_v23, %s7800_s16  ;;  %v3389_v53 = vrot.slane %v3358_v43, 6  ;;  %v14700_v43 = vld [vmem:[#allocation68_spill] sm:$0xff] }
 0x47b   :  { %v2259_v50 = vsel %vm2257_vm10, %v14701_v33, %v14700_v43  ;;  %v14706_v43 = vld [vmem:[#allocation46_spill] sm:$0xff] }
 0x47c   :  { %v10347_v58 = vsel %vm2935_vm9, %v3375_v16, %v3389_v53  ;;  %v10359_v16 = vrot.slane %v9914_v61, 1  ;;  %v14702_v53 = vld [vmem:[#allocation65_spill] sm:$0xff]  ;;  %v2267_v42 = vmul.f32 %v9952_v14, %v2259_v50 }
 0x47d   :  { %14699 = vst [vmem:[#allocation114_spill] sm:$0xff] %v10347_v58  ;;  %v2352_v39 = vsel %vm2350_vm11, %v14703_v35, %v14702_v53  ;;  %v7221_v35 = vpack.i.bf16 %v3548_v26, %v10347_v58 }
 0x47e   :  { %3054 = vrot.lane.b32.xlu1 %v14691_v1, %s7800_s16  ;;  %3046 = vrot.lane.b32.xlu0 %v14692_v30, %s7800_s16  ;;  %v3852_v1 = vld [vmem:[#allocation3 + $0x18] sm:$0xfe]  ;;  %v7206_v30 = vpack.i.bf16 %v10347_v58, %v3548_v26  ;;  %v2360_v53 = vmul.f32 %v9955_v0, %v2352_v39  ;;  %v14726_v39 = vld [vmem:[#allocation101_spill] sm:$0xff] }
 0x47f   :  { %v3878_v21 = vrot.slane %v3852_v1, 1  ;;  %v14715_v1 = vld [vmem:[#allocation86_spill] sm:$0xff] }
 0x480   :  { %v2428_v33 = vsel %vm2257_vm10, %v14715_v1, %v14714_v44  ;;  %v2364_v1 = vadd.f32 %v2360_v53, %v2267_v42  ;;  %v14724_v42 = vld [vmem:[#allocation100_spill] sm:$0xff] }
 0x481   :  { %v10380_v49 = vsel %vm1817_vm6, %v3878_v21, %v10359_v16  ;;  %v14713_v21 = vld [vmem:[#allocation70_spill] sm:$0xff] }
 0x482   :  { %7182 = vrot.lane.b32.xlu0 %v7181_v6, %s7792_s22  ;;  %7187 = vrot.lane.b32.xlu1 %v7186_v59, %s7792_s22 }
 0x486   :  { %7197 = vrot.lane.b32.xlu0 %v7181_v6, %s7783_s20  ;;  %7192 = vrot.lane.b32.xlu1 %v7181_v6, %s7804_s10  ;;  %v14705_v6 = vld [vmem:[#allocation73_spill] sm:$0xff] }
 0x487   :  { %v10369_v15 = vmul.f32 %v10001_v63, %v14705_v6  ;;  %v3552_v6 = vrot.slane %v3528_v17, 7  ;;  %v2287_v17 = vsel %vm381_vm5, %v14713_v21, %v14712_v9  ;;  %v7226_v9 = vpack.i.bf16 %v10380_v49, %v10335_v27 }
 0x489   :  { %v3554_v44 = vsel %vm743_vm4, %v3552_v6, %v10320_v22 }
 0x48a   :  { %7207 = vrot.lane.b32.xlu0 %v7206_v30, %s7792_s22  ;;  %7202 = vrot.lane.b32.xlu1 %v7201_v11, %s7800_s16  ;;  %v14710_v30 = vld [vmem:[#allocation89_spill] sm:$0xff] }
 0x48b   :  { %v2504_v26 = vsel %vm419_vm7, %v14710_v30, %v14709_v62  ;;  %v2260_v62 = vsel %vm2257_vm10, %v14717_v20, %v14716_v19  ;;  %v14718_v30 = vld [vmem:[#allocation92_spill] sm:$0xff]  ;;  %v10417_v20 = vsel %vm1817_vm6, %v10359_v16, %v3883_v45  ;;  %v2295_v19 = vmul.f32 %v9975_v2, %v2287_v17  ;;  %v14725_v45 = vld [vmem:[#allocation102_spill] sm:$0xff] }
 0x48c   :  { %v2353_v51 = vsel %vm2350_vm11, %v14719_v55, %v14718_v30  ;;  %v2512_v21 = vmul.f32 %v9982_v28, %v2504_v26  ;;  %14720 = vst [vmem:[#allocation138_spill] sm:$0xff] %v10417_v20  ;;  %v2436_v55 = vmul.f32 %v9978_v37, %v2428_v33  ;;  %v14722_v30 = vld [vmem:[#allocation96_spill] sm:$0xff]  ;;  %v2268_v6 = vmul.f32 %v9952_v14, %v2260_v62 }
 0x48d   :  { %v2361_v26 = vmul.f32 %v9955_v0, %v2353_v51  ;;  %v2460_v17 = vsel %vm381_vm5, %v14726_v39, %v14725_v45  ;;  %v14727_v33 = vld [vmem:[#allocation104_spill] sm:$0xff]  ;;  %v7231_v62 = vpack.i.bf16 %v3554_v44, %v10327_v13  ;;  %v7246_v51 = vpack.i.bf16 %v10417_v20, %v10347_v58  ;;  %v3530_v20 = vld [vmem:[#allocation3 + $0x68] sm:$0x7f]  ;;  %v14740_v58 = vld [vmem:[#allocation122_spill] sm:$0xff] }
 0x48e   :  { %7222 = vrot.lane.b32.xlu0 %v7221_v35, %s7804_s10  ;;  %7212 = vrot.lane.b32.xlu1 %v7186_v59, %s7804_s10  ;;  %v14721_v35 = vld [vmem:[#allocation98_spill] sm:$0xff]  ;;  %v14723_v59 = vld [vmem:[#allocation99_spill] sm:$0xff]  ;;  %v2536_v10 = vsel %vm2350_vm11, %v14728_v36, %v14727_v33  ;;  %v2516_v39 = vadd.f32 %v2512_v21, %v2364_v1  ;;  %v14732_v45 = vld [vmem:[#allocation112_spill] sm:$0xff]  ;;  %v2440_v52 = vadd.f32 %v2436_v55, %v2295_v19 }
 0x48f   :  { %v2261_v50 = vsel %vm2257_vm10, %v14722_v30, %v14721_v35  ;;  %v2354_v53 = vsel %vm2350_vm11, %v14724_v42, %v14723_v59  ;;  %v14731_v36 = vld [vmem:[#allocation111_spill] sm:$0xff]  ;;  %v2544_v13 = vmul.f32 %v10016_v46, %v2536_v10  ;;  %v14733_v30 = vld [vmem:[#allocation45_spill] sm:$0xff]  ;;  %v2365_v21 = vadd.f32 %v2361_v26, %v2268_v6  ;;  %v14737_v19 = vld [vmem:[#allocation84_spill] sm:$0xff] }
 0x490   :  { %v2269_v59 = vmul.f32 %v9952_v14, %v2261_v50  ;;  %v2362_v42 = vmul.f32 %v9955_v0, %v2354_v53  ;;  %v2505_v33 = vsel %vm419_vm7, %v14732_v45, %v14731_v36  ;;  %v4046_v1 = vld [vmem:[#allocation3 + $0x38] sm:$0x3]  ;;  %v14734_v14 = vld [vmem:[#allocation108_spill] sm:$0xff]  ;;  %v14736_v53 = vld [vmem:[#allocation81_spill] sm:$0xff]  ;;  %v10469_v55 = vmul.f32 %v10001_v63, %v14737_v19 }
 0x491   :  { %v14735_v50 = vld [vmem:[#allocation107_spill] sm:$0xff]  ;;  %v10465_v36 = vmul.f32 %v10001_v63, %v14736_v53  ;;  %v2513_v26 = vmul.f32 %v9982_v28, %v2505_v33  ;;  %v7236_v45 = vpack.i.bf16 %v9914_v61, %v3554_v44  ;;  %v2668_v53 = vadd.f32 %v2664_v3, %v2516_v39  ;;  %v14742_v44 = vld [vmem:[#allocation126_spill] sm:$0xff] }
 0x492   :  { %7227 = vrot.lane.b32.xlu0 %v7226_v9, %s7783_s20  ;;  %7217 = vrot.lane.b32.xlu1 %v7201_v11, %s7783_s20  ;;  %v2468_v9 = vmul.f32 %v10004_v24, %v2460_v17  ;;  %v10457_v11 = vmul.f32 %v10072_v40, %v14733_v30  ;;  %v2288_v0 = vsel %vm381_vm5, %v14735_v50, %v14734_v14  ;;  %v14738_v17 = vld [vmem:[#allocation110_spill] sm:$0xff]  ;;  %v14739_v30 = vld [vmem:[#allocation109_spill] sm:$0xff]  ;;  %v4044_v14 = vld [vmem:[#allocation3 + $0x18] sm:$0xfc]  ;;  %v3557_v63 = vrot.slane %v3530_v20, 7 }
 0x493   :  { %v2429_v6 = vsel %vm2257_vm10, %v14739_v30, %v14738_v17  ;;  %v2366_v50 = vadd.f32 %v2362_v42, %v2269_v59  ;;  %v4067_v19 = vrot.slane %v4046_v1, 2  ;;  %v2548_v35 = vadd.f32 %v2544_v13, %v2440_v52  ;;  %v14741_v17 = vld [vmem:[#allocation123_spill] sm:$0xff]  ;;  %v14745_v42 = vld [vmem:[#allocation97_spill] sm:$0xff] }
 0x494   :  { %v2472_v10 = vadd.f32 %v2468_v9, %v10369_v15  ;;  %v2296_v54 = vmul.f32 %v9975_v2, %v2288_v0  ;;  %v2506_v33 = vsel %vm419_vm7, %v14741_v17, %v14740_v58  ;;  %v14743_v30 = vld [vmem:[#allocation127_spill] sm:$0xff]  ;;  %v4062_v3 = vrot.slane %v4044_v14, 2  ;;  %v14746_v9 = vld [vmem:[#allocation118_spill] sm:$0xff]  ;;  %v14750_v17 = vld [vmem:[#allocation121_spill] sm:$0xff] }
 0x495   :  { %v10492_v20 = vrot.slane %v9914_v61, 2  ;;  %v2517_v59 = vadd.f32 %v2513_v26, %v2365_v21  ;;  %v2665_v52 = vmul.f32 %v10030_v41, %v14745_v42  ;;  %v7241_v58 = vpack.i.bf16 %v10330_v31, %v9914_v61  ;;  %v14747_v13 = vld [vmem:[#allocation119_spill] sm:$0xff]  ;;  %v14748_v26 = vld [vmem:[#allocation117_spill] sm:$0xff] }
 0x496   :  { %7232 = vrot.lane.b32.xlu0 %v7231_v62, %s7800_s16  ;;  %7247 = vrot.lane.b32.xlu1 %v7246_v51, %s7783_s20  ;;  %v2437_v62 = vmul.f32 %v9978_v37, %v2429_v6  ;;  %v2688_v51 = vsel %vm419_vm7, %v14743_v30, %v14742_v44  ;;  %v2323_v1 = vsel %vm419_vm7, %v14747_v13, %v14746_v9  ;;  %v14749_v14 = vld [vmem:[#allocation115_spill] sm:$0xff]  ;;  %v14751_v44 = vld [vmem:[#allocation120_spill] sm:$0xff]  ;;  %v14752_v42 = vld [vmem:[#allocation125_spill] sm:$0xff] }
 0x497   :  { %v2514_v0 = vmul.f32 %v9982_v28, %v2506_v33  ;;  %v3558_v21 = vsel %vm743_vm4, %v10320_v22, %v3557_v63  ;;  %v10510_v6 = vsel %vm2212_vm8, %v10492_v20, %v4067_v19  ;;  %v2289_v31 = vsel %vm381_vm5, %v14749_v14, %v14748_v26  ;;  %v14753_v9 = vld [vmem:[#allocation124_spill] sm:$0xff]  ;;  %v10525_v63 = vpop.permute.xlu1 %3084  ;;  %v10527_v19 = vpop.permute.xlu0 %3076  ;;  %v14756_v33 = vld [vmem:[#allocation129_spill] sm:$0xff]  ;;  %v14764_v15 = vld [vmem:[#allocation135_spill] sm:$0xff] }
 0x498   :  { %v2430_v30 = vsel %vm2257_vm10, %v14751_v44, %v14750_v17  ;;  %v2612_v28 = vsel %vm2257_vm10, %v14753_v9, %v14752_v42  ;;  %v2696_v22 = vmul.f32 %v10046_v5, %v2688_v51  ;;  %14754 = vst [vmem:[#allocation94_spill] sm:$0xff] %v10525_v63  ;;  %14755 = vst [vmem:[#allocation95_spill] sm:$0xff] %v10527_v19  ;;  %v14757_v13 = vld [vmem:[#allocation128_spill] sm:$0xff]  ;;  %v14758_v14 = vld [vmem:[#allocation113_spill] sm:$0xff] }
 0x499   :  { %v2828_v26 = vsel %vm381_vm5, %v14757_v13, %v14756_v33  ;;  %v2666_v39 = vmul.f32 %v10030_v41, %v14758_v14  ;;  %v14759_v17 = vld [vmem:[#allocation61_spill] sm:$0xff]  ;;  %v10539_v42 = vsel %vm2212_vm8, %v4062_v3, %v10492_v20  ;;  %v2331_v9 = vmul.f32 %v10063_v48, %v2323_v1  ;;  %v14762_v63 = vld [vmem:[#allocation131_spill] sm:$0xff] }
 0x49a   :  { %7237 = vrot.lane.b32.xlu0 %v7236_v45, %s7792_s22  ;;  %7262 = vrot.lane.b32.xlu1 %v7236_v45, %s7783_s20  ;;  %v2848_v44 = vmul.f32 %v10080_v38, %v14759_v17  ;;  %v10545_v19 = vpack.i.bf16 %v9914_v61, %v3558_v21  ;;  %v10550_v41 = vpack.i.bf16 %v10510_v6, %v10539_v42  ;;  %v14760_v1 = vld [vmem:[#allocation185_spill] sm:$0xff] }
 0x49b   :  { %v2297_v33 = vmul.f32 %v9975_v2, %v2289_v31  ;;  %v2438_v3 = vmul.f32 %v9978_v37, %v2430_v30  ;;  %v2518_v13 = vadd.f32 %v2514_v0, %v2366_v50  ;;  %v2620_v14 = vmul.f32 %v10039_v32, %v2612_v28  ;;  %v14765_v50 = vld [vmem:[#allocation83_spill] sm:$0xff]  ;;  %v14766_v31 = vld [vmem:[#allocation54_spill] sm:$0xff]  ;;  %v14768_v28 = vld [vmem:[#allocation52_spill] sm:$0xff] }
 0x49c   :  { %v2700_v17 = vadd.f32 %v2696_v22, %v2548_v35  ;;  %v2836_v51 = vmul.f32 %v14760_v1, %v2828_v26  ;;  %v2441_v37 = vadd.f32 %v2437_v62, %v2296_v54  ;;  %v10570_v35 = vmul.f32 %v10072_v40, %v14765_v50  ;;  %v14770_v26 = vld [vmem:[#allocation72_spill] sm:$0xff] }
 0x49d   :  { %v10572_v0 = vadd.f32 %v2665_v52, %v2517_v59  ;;  %v10576_v30 = vmul.f32 %v10072_v40, %v14766_v31  ;;  %v10586_v54 = vmul.f32 %v10160_v56, %v14694_v57  ;;  %v2442_v40 = vadd.f32 %v2438_v3, %v2297_v33  ;;  %v14772_v59 = vld [vmem:[#allocation140_spill] sm:$0xff]  ;;  %v14773_v52 = vld [vmem:[#allocation141_spill] sm:$0xff]  ;;  %v3858_v33 = vld [vmem:[#allocation3 + $0x58] sm:$0xfe] }
 0x49e   :  { %7242 = vrot.lane.b32.xlu0 %v7241_v58, %s7800_s16  ;;  %7267 = vrot.lane.b32.xlu1 %v7236_v45, %s7804_s10  ;;  %v14761_v58 = vld [vmem:[#allocation133_spill] sm:$0xff]  ;;  %v14763_v45 = vld [vmem:[#allocation134_spill] sm:$0xff]  ;;  %v2840_v50 = vadd.f32 %v2836_v51, %v2668_v53  ;;  %v10598_v57 = vadd.f32 %v2666_v39, %v2518_v13  ;;  %v10600_v31 = vadd.f32 %v2848_v44, %v2700_v17  ;;  %v14779_v53 = vld [vmem:[#allocation152_spill] sm:$0xff] }
 0x49f   :  { %v2461_v21 = vsel %vm381_vm5, %v14762_v63, %v14761_v58  ;;  %v2537_v4 = vsel %vm2350_vm11, %v14764_v15, %v14763_v45  ;;  %14767 = vst [vmem:[#allocation103_spill] sm:$0xff] %v10576_v30  ;;  %v2484_v63 = vadd.f32 %v10457_v11, %v2331_v9  ;;  %v14769_v15 = vld [vmem:[#allocation67_spill] sm:$0xff]  ;;  %14771 = vst [vmem:[#allocation105_spill] sm:$0xff] %v10586_v54  ;;  %v14777_v54 = vld [vmem:[#allocation144_spill] sm:$0xff] }
 0x4a0   :  { %v10564_v12 = vpop.permute.xlu0 %1763  ;;  %v10566_v2 = vpop.permute.xlu1 %1761  ;;  %v2462_v58 = vsel %vm381_vm5, %v14770_v26, %v14769_v15  ;;  %v2469_v62 = vmul.f32 %v10004_v24, %v2461_v21  ;;  %v2545_v11 = vmul.f32 %v10016_v46, %v2537_v4  ;;  %v2538_v9 = vsel %vm2350_vm11, %v14773_v52, %v14772_v59  ;;  %14774 = vst [vmem:[#allocation130_spill] sm:$0xff] %v10598_v57  ;;  %v14775_v21 = vld [vmem:[#allocation143_spill] sm:$0xff]  ;;  %v14776_v4 = vld [vmem:[#allocation142_spill] sm:$0xff]  ;;  %v14778_v59 = vld [vmem:[#allocation145_spill] sm:$0xff] }
 0x4a1   :  { %v2624_v45 = vadd.f32 %v2620_v14, %v2472_v10  ;;  %v2470_v3 = vmul.f32 %v10004_v24, %v2462_v58  ;;  %v2644_v22 = vsel %vm381_vm5, %v14776_v4, %v14775_v21  ;;  %v2720_v10 = vsel %vm2350_vm11, %v14778_v59, %v14777_v54  ;;  %v14780_v39 = vld [vmem:[#allocation153_spill] sm:$0xff]  ;;  %v14781_v24 = vld [vmem:[#allocation147_spill] sm:$0xff]  ;;  %v14782_v14 = vld [vmem:[#allocation146_spill] sm:$0xff] }
 0x4a2   :  { %7252 = vrot.lane.b32.xlu0 %v10545_v19, %s7792_s22  ;;  %7272 = vrot.lane.b32.xlu1 %v10550_v41, %s7792_s22  ;;  %v2689_v44 = vsel %vm419_vm7, %v14780_v39, %v14779_v53  ;;  %v2546_v13 = vmul.f32 %v10016_v46, %v2538_v9  ;;  %v2981_v17 = vsel %vm2257_vm10, %v14782_v14, %v14781_v24  ;;  %v3862_v54 = vld [vmem:[#allocation3 + $0x78] sm:$0x1]  ;;  %v3888_v9 = vrot.slane %v3858_v33, 1  ;;  %v14784_v53 = vld [vmem:[#allocation148_spill] sm:$0xff]  ;;  %v14785_v39 = vld [vmem:[#allocation149_spill] sm:$0xff] }
 0x4a3   :  { %v7286_v58 = vpack.i.bf16 %v9914_v61, %v10335_v27  ;;  %v2473_v52 = vadd.f32 %v2469_v62, %v10465_v36  ;;  %v2549_v21 = vadd.f32 %v2545_v11, %v2441_v37  ;;  %v10634_v46 = vmul.f32 %v10160_v56, %v14698_v23  ;;  %v4048_v37 = vld [vmem:[#allocation3 + $0x58] sm:$0xfc]  ;;  %v4050_v62 = vld [vmem:[#allocation3 + $0x78] sm:$0x3]  ;;  %v14787_v33 = vld [vmem:[#allocation150_spill] sm:$0xff] }
 0x4a4   :  { %v10602_v15 = vpop.permute.xlu0 %1721  ;;  %v10604_v26 = vpop.permute.xlu1 %1723  ;;  %v2652_v4 = vmul.f32 %v10110_v29, %v2644_v22  ;;  %v2728_v59 = vmul.f32 %v10076_v47, %v2720_v10  ;;  %v2324_v27 = vsel %vm419_vm7, %v14785_v39, %v14784_v53  ;;  %v2697_v24 = vmul.f32 %v10046_v5, %v2689_v44  ;;  %v14786_v11 = vld [vmem:[#allocation151_spill] sm:$0xff]  ;;  %v14788_v53 = vld [vmem:[#allocation58_spill] sm:$0xff] }
 0x4a5   :  { %14783 = vst [vmem:[#allocation132_spill] sm:$0xff] %v10634_v46  ;;  %v2989_v23 = vmul.f32 %v10097_v7, %v2981_v17  ;;  %v2613_v22 = vsel %vm2257_vm10, %v14787_v33, %v14786_v11  ;;  %v2849_v10 = vmul.f32 %v10080_v38, %v14696_v8  ;;  %v3893_v51 = vrot.slane %v3862_v54, 1  ;;  %v10660_v46 = vld [vmem:[#allocation17] sm:$0xff]  ;;  %v14826_v7 = vld [vmem:[#allocation209_spill] sm:$0xff]  ;;  %v3119_v30 = vld [vmem:[#allocation20 + $0x18] sm:$0xff] }
 0x4a6   :  { %7257 = vrot.lane.b32.xlu0 %v10545_v19, %s7800_s16  ;;  %7277 = vrot.lane.b32.xlu1 %v10545_v19, %s7783_s20  ;;  %v10656_v44 = vadd.f32 %v2470_v3, %v10469_v55  ;;  %v10658_v56 = vadd.f32 %v2546_v13, %v2442_v40  ;;  %v10665_v17 = vpack.i.bf16 %v10380_v49, %v9914_v61  ;;  %v4072_v55 = vrot.slane %v4048_v37, 2  ;;  %v14830_v29 = vld [vmem:[#allocation78_spill] sm:$0xff] }
 0x4a7   :  { %v2332_v8 = vmul.f32 %v10063_v48, %v2324_v27  ;;  %v10672_v54 = vsel %vm1817_vm6, %v3888_v9, %v10359_v16  ;;  %v4077_v40 = vrot.slane %v4050_v62, 2  ;;  %v10674_v3 = vadd.f32 %v2652_v4, %v2484_v63  ;;  %v14793_v9 = vld [vmem:[#allocation43_spill] sm:$0xff] }
 0x4a8   :  { %v10643_v14 = vpop.permute.xlu0 %1765  ;;  %v10645_v36 = vpop.permute.xlu1 %1725  ;;  %14789 = vst [vmem:[#allocation68_spill] sm:$0xff] %v10656_v44  ;;  %14790 = vst [vmem:[#allocation64_spill] sm:$0xff] %v10658_v56  ;;  %v10676_v13 = vadd.f32 %v2728_v59, %v2624_v45  ;;  %v2701_v11 = vadd.f32 %v2697_v24, %v2549_v21  ;;  %v10687_v27 = vrot.slane %v10660_v46, %v14640_v18  ;;  %v14796_v4 = vunpack.i.l.bf16 %v14706_v43  ;;  %v14798_v62 = vld [vmem:[#allocation155_spill] sm:$0xff]  ;;  %v4488_v44 = vld [vmem:[#allocation2 + $0x8] sm:$0xfc] }
 0x4a9   :  { %14791 = vst [vmem:[#allocation65_spill] sm:$0xff] %v10674_v3  ;;  %v1752_v37 = vrot.slane %v10660_v46, %v14793_v9  ;;  %v10693_v63 = vsel %vm1817_vm6, %v10359_v16, %v3893_v51  ;;  %v10698_v21 = vrot.slane %v10660_v46, %v14589_v34  ;;  %v10713_v51 = vadd.f32 %v10570_v35, %v2332_v8  ;;  %v14825_v3 = vld [vmem:[#allocation205_spill] sm:$0xff] }
 0x4aa   :  { %7287 = vrot.lane.b32.xlu0 %v7286_v58, %s7800_s16  ;;  %7282 = vrot.lane.b32.xlu1 %v10545_v19, %s7804_s10  ;;  %v2621_v58 = vmul.f32 %v10039_v32, %v2613_v22  ;;  %v10683_v19 = vadd.f32 %v2989_v23, %v2840_v50  ;;  %v10704_v50 = vpack.i.bf16 %v10539_v42, %v10672_v54  ;;  %v3118_v32 = vld [vmem:[#allocation20 + $0x10] sm:$0xff] }
 0x4ab   :  { %v10710_v16 = vpack.i.bf16 %v10510_v6, %v10693_v63  ;;  %14795 = vst [vmem:[#allocation46_spill] sm:$0xff] %v10713_v51  ;;  %v1777_v59 = vsel %vm419_vm7, %v10566_v2, %v14796_v4  ;;  %v4074_v42 = vsel %vm2212_vm8, %v4072_v55, %v10492_v20  ;;  %v4078_v24 = vsel %vm2212_vm8, %v10492_v20, %v4077_v40  ;;  %v14799_v6 = vld [vmem:[#allocation154_spill] sm:$0xff]  ;;  %v10734_v4 = vld [vmem:[#allocation17 + $0x8] ss:$0 sm:$0xff] }
 0x4ac   :  { %v10679_v61 = vpop.permute.xlu0 %1767  ;;  %v10681_v33 = vpop.permute.xlu1 %1727  ;;  %14792 = vst [vmem:[#allocation63_spill] sm:$0xff] %v10683_v19  ;;  %v2829_v35 = vsel %vm381_vm5, %v14799_v6, %v14798_v62  ;;  %v10730_v23 = vadd.f32 %v2849_v10, %v2701_v11  ;;  %v1684_v22 = vrot.slane %v10660_v46, %v9019_v25  ;;  %v14801_v55 = vunpack.i.h.bf16 %v14706_v43  ;;  %v14805_v11 = vld [vmem:[#allocation114_spill] sm:$0xff]  ;;  %v14806_v6 = vld [vmem:[#allocation59_spill] sm:$0xff] }
 0x4ad   :  { %14794 = vst [vmem:[#allocation73_spill] sm:$0xff] %v10710_v16  ;;  %v7301_v62 = vpack.i.bf16 %v14805_v11, %v10380_v49  ;;  %v1785_v18 = vmul.f32 %v10687_v27, %v1777_v59  ;;  %v10754_v43 = vpack.i.bf16 %v4078_v24, %v4074_v42  ;;  %v14810_v59 = vld [vmem:[#allocation170_spill] sm:$0xff]  ;;  %v14813_v42 = vld [vmem:[#allocation207_spill] sm:$0xff] }
 0x4ae   :  { %7292 = vrot.lane.b32.xlu0 %v10665_v17, %s7792_s22  ;;  %7307 = vrot.lane.b32.xlu1 %v10550_v41, %s7804_s10  ;;  %v10724_v41 = vadd.f32 %v2621_v58, %v2473_v52  ;;  %14800 = vst [vmem:[#allocation89_spill] sm:$0xff] %v10730_v23  ;;  %v14802_v52 = vld [vmem:[#allocation156_spill] sm:$0xff]  ;;  %v14803_v58 = vld [vmem:[#allocation62_spill] sm:$0xff]  ;;  %v1685_v24 = vmul.f32 %v1684_v22, %v14813_v42  ;;  %v14815_v23 = vld [vmem:[#allocation47_spill] sm:$0xff] }
 0x4af   :  { %v1753_v40 = vmul.f32 %v1752_v37, %v14802_v52  ;;  %v14804_v39 = vunpack.i.l.bf16 %v14803_v58  ;;  %14807 = vst [vmem:[#allocation85_spill] sm:$0xff] %v10754_v43  ;;  %v14816_v38 = vunpack.i.l.bf16 %v14815_v23 }
 0x4b0   :  { %14797 = vst [vmem:[#allocation88_spill] sm:$0xff] %v10724_v41  ;;  %v1891_v8 = vpop.permute.xlu1 %1890  ;;  %v1654_v2 = vpop.permute.xlu0 %1653 }
 0x4b1   :  { %v1906_v20 = vsel %vm419_vm7, %v1891_v8, %v14801_v55  ;;  %v1669_v10 = vsel %vm381_vm5, %v14804_v39, %v1654_v2  ;;  %v10757_v8 = vmul.f32 %v14760_v1, %v2829_v35  ;;  %v14808_v39 = vld [vmem:[#allocation167_spill] sm:$0xff]  ;;  %v14809_v2 = vld [vmem:[#allocation168_spill] sm:$0xff]  ;;  %v14811_v55 = vld [vmem:[#allocation169_spill] sm:$0xff] }
 0x4b2   :  { %v1677_v9 = vmul.f32 %v10698_v21, %v1669_v10  ;;  %7297 = vrot.lane.b32.xlu0 %v10704_v50, %s7783_s20  ;;  %7322 = vrot.lane.b32.xlu1 %v10710_v16, %s7783_s20  ;;  %v10763_v49 = vsel %vm419_vm7, %v14809_v2, %v14808_v39  ;;  %v10769_v52 = vsel %vm381_vm5, %v14811_v55, %v14810_v59  ;;  %v14812_v10 = vld [vmem:[#allocation49_spill] sm:$0xff]  ;;  %v14814_v35 = vld [vmem:[#allocation82_spill] sm:$0xff]  ;;  %v14817_v55 = vunpack.i.h.bf16 %v14803_v58 }
 0x4b3   :  { %v10773_v11 = vrot.slane %v10660_v46, %v14812_v10  ;;  %v10778_v45 = vrot.slane %v10660_v46, %v14814_v35  ;;  %v1914_v34 = vmul.f32 %v10734_v4, %v1906_v20  ;;  %v1778_v59 = vsel %vm419_vm7, %v10564_v12, %v14816_v38  ;;  %v10790_v10 = vld [vmem:[#allocation3 + $0x8] sm:$0xff]  ;;  %v14818_v35 = vld [vmem:[#allocation138_spill] sm:$0xff]  ;;  %v14820_v38 = vld [vmem:[#allocation208_spill] sm:$0xff] }
 0x4b4   :  { %v1757_v39 = vadd.f32 %v1753_v40, %v1677_v9  ;;  %v1658_v2 = vpop.permute.xlu1 %1657  ;;  %v1656_v25 = vpop.permute.xlu0 %1655  ;;  %v10794_v41 = vpack.i.bf16 %v14818_v35, %v10790_v10  ;;  %v14819_v9 = vld [vmem:[#allocation56_spill] sm:$0xff]  ;;  %v1789_v40 = vadd.f32 %v1785_v18, %v1685_v24  ;;  %v10802_v12 = vmul.f32 %v1684_v22, %v14820_v38  ;;  %v14823_v20 = vld [vmem:[#allocation203_spill] sm:$0xff]  ;;  %v14827_v16 = vld [vmem:[#allocation53_spill] sm:$0xff] }
 0x4b5   :  { %v1670_v42 = vsel %vm381_vm5, %v14817_v55, %v1656_v25  ;;  %v14821_v25 = vld [vmem:[#allocation210_spill] sm:$0xff]  ;;  %v14822_v35 = vld [vmem:[#allocation204_spill] sm:$0xff]  ;;  %v1754_v18 = vmul.f32 %v1752_v37, %v14823_v20  ;;  %v14824_v24 = vld [vmem:[#allocation79_spill] sm:$0xff]  ;;  %v10818_v38 = vmul.f32 %v1752_v37, %v14825_v3  ;;  %v14828_v20 = vunpack.i.l.bf16 %v14827_v16 }
 0x4b6   :  { %v1918_v51 = vadd.f32 %v1914_v34, %v1757_v39  ;;  %v1678_v57 = vmul.f32 %v10698_v21, %v1670_v42  ;;  %7302 = vrot.lane.b32.xlu0 %v7301_v62, %s7800_s16  ;;  %7337 = vrot.lane.b32.xlu1 %v10754_v43, %s7792_s22  ;;  %v10806_v58 = vmul.f32 %v10773_v11, %v14821_v25  ;;  %v10820_v25 = vld [vmem:[#allocation2 + $0x18] sm:$0xff] }
 0x4b7   :  { %v10809_v55 = vmul.f32 %v1752_v37, %v14822_v35  ;;  %v1786_v34 = vmul.f32 %v10687_v27, %v1778_v59  ;;  %v10815_v62 = vrot.slane %v10660_v46, %v14824_v24  ;;  %v1686_v35 = vmul.f32 %v1684_v22, %v14826_v7 }
 0x4b8   :  { %v1690_v39 = vpop.permute.xlu1 %1689  ;;  %v1893_v42 = vpop.permute.xlu0 %1892  ;;  %v1922_v56 = vadd.f32 %v1918_v51, %v1789_v40  ;;  %v1737_v59 = vsel %vm381_vm5, %v14828_v20, %v10602_v15  ;;  %v14829_v24 = vunpack.i.h.bf16 %v14815_v23  ;;  %v10834_v3 = vrot.slane %v10660_v46, %v14830_v29  ;;  %v14831_v23 = vld [vmem:[#allocation206_spill] sm:$0xff]  ;;  %v14832_v46 = vld [vmem:[#allocation51_spill] sm:$0xff] }
 0x4b9   :  { %v7164_v37 = vunpack.i.l.bf16 %v14819_v9  ;;  %v1758_v51 = vadd.f32 %v1754_v18, %v1678_v57  ;;  %v10844_v15 = vpack.i.bf16 %v10693_v63, %v10672_v54  ;;  %v1882_v40 = vmul.f32 %v10773_v11, %v14831_v23  ;;  %v4492_v23 = vld [vmem:[#allocation2 + $0x28] sm:$0x3] }
 0x4ba   :  { %v1907_v47 = vsel %vm419_vm7, %v1893_v42, %v14829_v24  ;;  %7312 = vrot.lane.b32.xlu0 %v10794_v41, %s7792_s22  ;;  %7362 = vrot.lane.b32.xlu1 %v10754_v43, %s7804_s10  ;;  %v14833_v24 = vunpack.i.l.bf16 %v14832_v46  ;;  %v4514_v18 = vrot.slane %v4488_v44, 2  ;;  %v14834_v42 = vld [vmem:[#allocation211_spill] sm:$0xff]  ;;  %v1790_v29 = vadd.f32 %v1786_v34, %v1686_v35 }
 0x4bb   :  { %v1915_v7 = vmul.f32 %v10734_v4, %v1907_v47  ;;  %v4515_v47 = vrot.slane %v10820_v25, 2  ;;  %v10854_v20 = vmul.f32 %v1684_v22, %v14834_v42  ;;  %v1745_v1 = vmul.f32 %v10778_v45, %v1737_v59 }
 0x4bc   :  { %v1705_v57 = vsel %vm419_vm7, %v1690_v39, %v14833_v24  ;;  %v1847_v54 = vpop.permute.xlu1 %1846  ;;  %v1660_v63 = vpop.permute.xlu0 %1659  ;;  %v14835_v43 = vunpack.i.h.bf16 %v14827_v16  ;;  %v14836_v39 = vld [vmem:[#allocation50_spill] sm:$0xff]  ;;  %v7326_v59 = vpack.i.bf16 %v10790_v10, %v10790_v10 }
 0x4bd   :  { %v1919_v5 = vadd.f32 %v1915_v7, %v1758_v51  ;;  %v14837_v24 = vunpack.i.l.bf16 %v14836_v39  ;;  %v14838_v34 = vunpack.i.h.bf16 %v14836_v39  ;;  %v14839_v51 = vld [vmem:[#allocation55_spill] sm:$0xff]  ;;  %v1713_v16 = vmul.f32 %v10815_v62, %v1705_v57 }
 0x4be   :  { %v1738_v44 = vsel %vm381_vm5, %v14835_v43, %v10604_v26  ;;  %v7180_v7 = vunpack.i.h.bf16 %v14839_v51  ;;  %7317 = vrot.lane.b32.xlu0 %v10794_v41, %s7800_s16  ;;  %7372 = vrot.lane.b32.xlu1 %v10844_v15, %s7804_s10  ;;  %v10879_v43 = vpack.c.bf16 %v3119_v30, %v3118_v32  ;;  %v1886_v10 = vadd.f32 %v1882_v40, %v1745_v1  ;;  %v14841_v30 = vld [vmem:[#allocation57_spill] sm:$0xff] }
 0x4bf   :  { %v1671_v22 = vsel %vm381_vm5, %v14837_v24, %v1658_v2  ;;  %v1862_v35 = vsel %vm381_vm5, %v14838_v34, %v1847_v54  ;;  %v1923_v42 = vadd.f32 %v1919_v5, %v1790_v29  ;;  %v10882_v2 = vsel %vm2212_vm8, %v4514_v18, %v4515_v47 }
 0x4c0   :  { %v1870_v26 = vmul.f32 %v10834_v3, %v1862_v35  ;;  %v4519_v54 = vrot.slane %v4492_v23, 2  ;;  %v1746_v39 = vmul.f32 %v10778_v45, %v1738_v44  ;;  %v14840_v57 = vunpack.i.l.bf16 %v14788_v53  ;;  %v1849_v24 = vpop.permute.xlu1 %1848  ;;  %v1692_v34 = vpop.permute.xlu0 %1691  ;;  %v4604_v35 = vld [vmem:[#allocation2 + $0x8] sm:$0xf0] }
 0x4c1   :  { %v1679_v32 = vmul.f32 %v10698_v21, %v1671_v22  ;;  %v14842_v19 = vunpack.i.l.bf16 %v14841_v30  ;;  %v14843_v1 = vunpack.i.h.bf16 %v14841_v30  ;;  %v14844_v23 = vunpack.i.h.bf16 %v14832_v46  ;;  %v4720_v30 = vld [vmem:[#allocation2 + $0x8] sm:$0xc0] }
 0x4c2   :  { %v1779_v5 = vsel %vm419_vm7, %v10643_v14, %v14840_v57  ;;  %v1874_v29 = vadd.f32 %v1870_v26, %v1713_v16  ;;  %v7179_v44 = vunpack.i.l.bf16 %v14839_v51  ;;  %7327 = vrot.lane.b32.xlu0 %v7326_v59, %s7783_s20  ;;  %4547 = vrot.lane.b32.xlu1 %v10882_v2, %s7792_s22  ;;  %v4622_v46 = vrot.slane %v4604_v35, 4 }
 0x4c3   :  { %v1672_v18 = vsel %vm381_vm5, %v14842_v19, %v1660_v63  ;;  %v1863_v40 = vsel %vm381_vm5, %v14843_v1, %v1849_v24  ;;  %v1706_v14 = vsel %vm419_vm7, %v1692_v34, %v14844_v23  ;;  %v1787_v19 = vmul.f32 %v10687_v27, %v1779_v5  ;;  %v3120_v23 = vld [vmem:[#allocation20 + $0x20] sm:$0xff] }
 0x4c4   :  { %v1871_v16 = vmul.f32 %v10834_v3, %v1863_v40  ;;  %v1714_v22 = vmul.f32 %v10815_v62, %v1706_v14  ;;  %v1926_v26 = vadd.f32 %v1922_v56, %v1874_v29  ;;  %v10911_v63 = vsel %vm2212_vm8, %v4515_v47, %v4519_v54  ;;  %v1694_v29 = vpop.permute.xlu1 %1693  ;;  %v1895_v59 = vpop.permute.xlu0 %1894  ;;  %v3121_v14 = vld [vmem:[#allocation20 + $0x28] sm:$0xff] }
 0x4c5   :  { %v4623_v57 = vrot.slane %v10820_v25, 4  ;;  %v1887_v51 = vadd.f32 %v10806_v58, %v1746_v39  ;;  %v1739_v24 = vsel %vm381_vm5, %v7179_v44, %v10645_v36  ;;  %v1780_v5 = vsel %vm419_vm7, %v10679_v61, %v7164_v37  ;;  %v4606_v44 = vld [vmem:[#allocation2 + $0x28] sm:$0xf] }
 0x4c6   :  { %v1875_v56 = vadd.f32 %v1871_v16, %v1714_v22  ;;  %v1930_v34 = vadd.f32 %v1926_v26, %v1886_v10  ;;  %v1759_v47 = vadd.f32 %v10809_v55, %v1679_v32  ;;  %v1680_v54 = vmul.f32 %v10698_v21, %v1672_v18  ;;  %7332 = vrot.lane.b32.xlu0 %v10665_v17, %s7804_s10 }
 0x4c7   :  { %v14845_v35 = vunpack.i.h.bf16 %v14788_v53  ;;  %v14846_v36 = vunpack.i.l.bf16 %v14768_v28  ;;  %v4739_v61 = vrot.slane %v10820_v25, 6  ;;  %v1791_v21 = vadd.f32 %v1787_v19, %v10802_v12  ;;  %4549 = vrot.lane.b32.xlu1 %v10911_v63, %s7792_s22 }
 0x4c8   :  { %v1927_v39 = vadd.f32 %v1923_v42, %v1875_v56  ;;  %6377 = vmatprep.mubr.f32.mxu0 %v1930_v34  ;;  %v1747_v53 = vmul.f32 %v10778_v45, %v1739_v24  ;;  %v10942_v55 = vsel %vm457_vm1, %v4622_v46, %v4623_v57  ;;  %v4738_v37 = vrot.slane %v4720_v30, 6  ;;  %v1851_v12 = vpop.permute.xlu1 %1850  ;;  %v1897_v40 = vpop.permute.xlu0 %1896  ;;  %v14850_v56 = vld [vmem:[#allocation172_spill] sm:$0xff] }
 0x4c9   :  { %v1908_v58 = vsel %vm419_vm7, %v1895_v59, %v14845_v35  ;;  %v1707_v10 = vsel %vm419_vm7, %v1694_v29, %v14846_v36  ;;  %v1788_v42 = vmul.f32 %v10687_v27, %v1780_v5  ;;  %v1740_v17 = vsel %vm381_vm5, %v7180_v7, %v10681_v33  ;;  %v14852_v34 = vld [vmem:[#allocation212_spill] sm:$0xff] }
 0x4ca   :  { %v1916_v1 = vmul.f32 %v10734_v4, %v1908_v58  ;;  %v1931_v32 = vadd.f32 %v1927_v39, %v1887_v51  ;;  %v1760_v16 = vadd.f32 %v10818_v38, %v1680_v54  ;;  %v1715_v22 = vmul.f32 %v10815_v62, %v1707_v10  ;;  %7342 = vrot.lane.b32.xlu0 %v10794_v41, %s7804_s10  ;;  %v14849_v38 = vld [vmem:[#allocation171_spill] sm:$0xff] }
 0x4cb   :  { %v14847_v26 = vunpack.i.l.bf16 %v14806_v6  ;;  %v14848_v19 = vunpack.i.h.bf16 %v14819_v9  ;;  %v7175_v7 = vunpack.i.h.bf16 %v14806_v6  ;;  %v3089_v29 = vsel %vm2350_vm11, %v14850_v56, %v14849_v38  ;;  %v14851_v9 = vld [vmem:[#allocation213_spill] sm:$0xff]  ;;  %4695 = vrot.lane.b32.xlu1 %v10942_v55, %s7804_s10 }
 0x4cc   :  { %v1920_v18 = vadd.f32 %v1916_v1, %v1759_v47  ;;  %6378 = vmatmul.mubr.f32.vlgmr.msra.gmra.mrb[6].mxu0 %v1931_v32  ;;  %v1884_v59 = vmul.f32 %v10773_v11, %v14851_v9  ;;  %v6878_v6 = vpack.c.bf16 %v3121_v14, %v3120_v23  ;;  %v4627_v30 = vrot.slane %v4606_v44, 4  ;;  %v1696_v41 = vpop.permute.xlu1 %1695  ;;  %v1853_v54 = vpop.permute.xlu0 %1852  ;;  %v3122_v1 = vld [vmem:[#allocation20 + $0x30] sm:$0xff]  ;;  %v14861_v56 = vld [vmem:[#allocation161_spill] sm:$0xff] }
 0x4cd   :  { %v1864_v27 = vsel %vm381_vm5, %v14847_v26, %v1851_v12  ;;  %v1909_v33 = vsel %vm419_vm7, %v1897_v40, %v14848_v19  ;;  %6873 = vmatpush3.bf16.msra.mxu0 %v14852_v34  ;;  %v10977_v35 = vsel %vm2935_vm9, %v4738_v37, %v4739_v61  ;;  %v1748_v39 = vmul.f32 %v10778_v45, %v1740_v17  ;;  %v4722_v45 = vld [vmem:[#allocation2 + $0x28] sm:$0x3f]  ;;  %v14855_v17 = vld [vmem:[#allocation158_spill] sm:$0xff] }
 0x4ce   :  { %v1924_v46 = vadd.f32 %v1920_v18, %v1791_v21  ;;  %v1872_v51 = vmul.f32 %v10834_v3, %v1864_v27  ;;  %v1917_v24 = vmul.f32 %v10734_v4, %v1909_v33  ;;  %v1792_v4 = vadd.f32 %v1788_v42, %v10854_v20  ;;  %6875 = vmatprep.subr.bf16.mxu0 %v10879_v43  ;;  %v3123_v21 = vld [vmem:[#allocation20 + $0x38] sm:$0xff]  ;;  %v14856_v40 = vld [vmem:[#allocation214_spill] sm:$0xff]  ;;  %v3124_v27 = vld [vmem:[#allocation20 + $0x40] sm:$0xff] }
 0x4cf   :  { %v1888_v58 = vadd.f32 %v1884_v59, %v1747_v53  ;;  %v14853_v36 = vunpack.i.h.bf16 %v14768_v28  ;;  %v1865_v20 = vsel %vm381_vm5, %v7175_v7, %v1853_v54  ;;  %7347 = vrot.lane.b32.xlu0 %v10844_v15, %s7792_s22  ;;  %v10992_v28 = vadd.f32 %v10757_v8, %v10572_v0  ;;  %v14854_v53 = vld [vmem:[#allocation157_spill] sm:$0xff]  ;;  %4815 = vrot.lane.b32.xlu1 %v10977_v35, %s7804_s10  ;;  %v14864_v59 = vld [vmem:[#allocation163_spill] sm:$0xff] }
 0x4d0   :  { %v1876_v5 = vadd.f32 %v1872_v51, %v1715_v22  ;;  %v1921_v47 = vadd.f32 %v1917_v24, %v1760_v16  ;;  %v1873_v18 = vmul.f32 %v10834_v3, %v1865_v20  ;;  %v2325_v12 = vsel %vm419_vm7, %v14855_v17, %v14854_v53  ;;  %v11003_v3 = vpop.permute.xlu1 %2793  ;;  %v11005_v15 = vpop.permute.xlu0 %2785  ;;  %v11019_v22 = vld [vmem:[%s14070_s9 + $0x18] ss:$0 sm:$0xff]  ;;  %v14859_v51 = vld [vmem:[#allocation160_spill] sm:$0xff]  ;;  %v14860_v24 = vld [vmem:[#allocation159_spill] sm:$0xff]  ;;  %s7805_s9 = smov 32  }
 0x4d1   :  { %v1708_v10 = vsel %vm419_vm7, %v1696_v41, %v14853_v36  ;;  %v1885_v23 = vmul.f32 %v10773_v11, %v14856_v40  ;;  %6877 = vmatpush3.bf16.msra.mxu0 %v10879_v43  ;;  %v6882_v8 = vpack.c.bf16 %v3123_v21, %v3122_v1  ;;  %v11010_v14 = vsel %vm457_vm1, %v4623_v57, %v4627_v30  ;;  %v14857_v11 = vld [vmem:[#allocation137_spill] sm:$0xff]  ;;  %v14858_v43 = vld [vmem:[#allocation136_spill] sm:$0xff]  ;;  %v14867_v21 = vld [vmem:[#allocation63_spill] sm:$0xff] }
 0x4d2   :  { %v1925_v42 = vadd.f32 %v1921_v47, %v1792_v4  ;;  %v1716_v32 = vmul.f32 %v10815_v62, %v1708_v10  ;;  %v1928_v37 = vadd.f32 %v1924_v46, %v1876_v5  ;;  %6879 = vmatprep.subr.bf16.mxu0 %v6878_v6  ;;  %v2880_v44 = vmul.f32 %v14857_v11, %v10763_v49  ;;  %v3125_v19 = vld [vmem:[#allocation20 + $0x48] sm:$0xff]  ;;  %v4494_v49 = vld [vmem:[#allocation2 + $0x38] sm:$0xfc]  ;;  %v14874_v40 = vld [vmem:[#allocation176_spill] sm:$0xff] }
 0x4d3   :  { %v3021_v16 = vmul.f32 %v14858_v43, %v10769_v52  ;;  %v3097_v26 = vmul.f32 %v11019_v22, %v3089_v29  ;;  %v4743_v33 = vrot.slane %v4722_v45, 6  ;;  %v1889_v7 = vadd.f32 %v1885_v23, %v1748_v39  ;;  %7352 = vrot.lane.b32.xlu0 %v10704_v50, %s7800_s16  ;;  %v11024_v46 = vld [vmem:[#allocation2 + $0x48] sm:$0xff]  ;;  %v14862_v29 = vld [vmem:[#allocation162_spill] sm:$0xff]  ;;  %4697 = vrot.lane.b32.xlu1 %v11010_v14, %s7804_s10  ;;  %v14863_v50 = vld [vmem:[#allocation164_spill] sm:$0xff] }
 0x4d4   :  { %v1877_v62 = vadd.f32 %v1873_v18, %v1716_v32  ;;  %v1932_v0 = vadd.f32 %v1928_v37, %v1888_v58  ;;  %v2333_v52 = vmul.f32 %v10063_v48, %v2325_v12  ;;  %v2614_v38 = vsel %vm2257_vm10, %v14860_v24, %v14859_v51  ;;  %v14865_v48 = vld [vmem:[#allocation166_spill] sm:$0xff]  ;;  %v14866_v30 = vld [vmem:[#allocation165_spill] sm:$0xff]  ;;  %v11045_v5 = vpop.permute.xlu1 %2869  ;;  %v11047_v47 = vpop.permute.xlu0 %2861  ;;  %v3127_v39 = vld [vmem:[#allocation20 + $0x58] sm:$0xff] }
 0x4d5   :  { %v2690_v9 = vsel %vm419_vm7, %v14862_v29, %v14861_v56  ;;  %6881 = vmatpush3.bf16.msra.mxu0 %v6878_v6  ;;  %v2796_v34 = vsel %vm2257_vm10, %v14864_v59, %v14863_v50  ;;  %v2830_v4 = vsel %vm381_vm5, %v14866_v30, %v14865_v48  ;;  %v6886_v6 = vpack.c.bf16 %v3125_v19, %v3124_v27  ;;  %v3126_v58 = vld [vmem:[#allocation20 + $0x50] sm:$0xff]  ;;  %v14869_v18 = vld [vmem:[#allocation173_spill] sm:$0xff]  ;;  %v14871_v45 = vld [vmem:[#allocation103_spill] sm:$0xff] }
 0x4d6   :  { %6380 = vmatprep.mubr.f32.mxu0 %v1932_v0  ;;  %v1929_v57 = vadd.f32 %v1925_v42, %v1877_v62  ;;  %6883 = vmatprep.subr.bf16.mxu0 %v6882_v8  ;;  %v2884_v54 = vadd.f32 %v2880_v44, %v10676_v13  ;;  %v11053_v36 = vsel %vm2935_vm9, %v4739_v61, %v4743_v33  ;;  %v4524_v10 = vrot.slane %v4494_v49, 2  ;;  %v14868_v32 = vld [vmem:[#allocation174_spill] sm:$0xff]  ;;  %v14870_v13 = vld [vmem:[#allocation85_spill] sm:$0xff]  ;;  %v14873_v12 = vld [vmem:[#allocation175_spill] sm:$0xff] }
 0x4d7   :  { %v4525_v20 = vrot.slane %v11024_v46, 2  ;;  %v3025_v1 = vadd.f32 %v3021_v16, %v10600_v31  ;;  %v3101_v42 = vadd.f32 %v3097_v26, %v14867_v21  ;;  %v2645_v37 = vsel %vm381_vm5, %v14869_v18, %v14868_v32  ;;  %7357 = vrot.lane.b32.xlu0 %v14870_v13, %s7783_s20  ;;  %v14872_v61 = vld [vmem:[#allocation182_spill] sm:$0xff]  ;;  %v14876_v62 = vld [vmem:[#allocation184_spill] sm:$0xff]  ;;  %v14878_v16 = vld [vmem:[#allocation177_spill] sm:$0xff]  ;;  %4817 = vrot.lane.b32.xlu1 %v11053_v36, %s7804_s10 }
 0x4d8   :  { %v1933_v41 = vadd.f32 %v1929_v57, %v1889_v7  ;;  %v11065_v53 = vadd.f32 %v14871_v45, %v2333_v52  ;;  %v2622_v17 = vmul.f32 %v14872_v61, %v2614_v38  ;;  %v2721_v31 = vsel %vm2350_vm11, %v14874_v40, %v14873_v12  ;;  %v14875_v23 = vld [vmem:[#allocation202_spill] sm:$0xff]  ;;  %v11078_v27 = vpop.permute.xlu1 %3010  ;;  %v11080_v19 = vpop.permute.xlu0 %3002  ;;  %v4487_v7 = vld [vmem:[#allocation2] sm:$0xfc]  ;;  %v14880_v52 = vld [vmem:[#allocation185_spill] sm:$0xff] }
 0x4d9   :  { %6885 = vmatpush3.bf16.msra.mxu0 %v6882_v8  ;;  %v2698_v0 = vmul.f32 %v14876_v62, %v2690_v9  ;;  %v14877_v44 = vld [vmem:[#allocation178_spill] sm:$0xff]  ;;  %v6890_v33 = vpack.c.bf16 %v3127_v39, %v3126_v58  ;;  %v14879_v8 = vld [vmem:[#allocation193_spill] sm:$0xff]  ;;  %v2838_v51 = vmul.f32 %v14880_v52, %v2830_v4  ;;  %v14881_v24 = vld [vmem:[#allocation75_spill] sm:$0xff]  ;;  %v11092_v9 = vsel %vm2212_vm8, %v4524_v10, %v4525_v20 }
 0x4da   :  { %6381 = vmatmul.mubr.f32.gmra.mrb[8].mxu0 %v1933_v41  ;;  %v2982_v26 = vsel %vm2257_vm10, %v14878_v16, %v14877_v44  ;;  %6887 = vmatprep.subr.bf16.mxu0 %v6886_v6  ;;  %v11082_v57 = vld [vmem:[#allocation2 + $0x10] sm:$0xff]  ;;  %v2804_v49 = vmul.f32 %v14879_v8, %v2796_v34  ;;  %v2653_v38 = vmul.f32 %v14881_v24, %v2645_v37  ;;  %v3128_v56 = vld [vmem:[#allocation20 + $0x60] sm:$0xff]  ;;  %v3129_v29 = vld [vmem:[#allocation20 + $0x68] sm:$0xff]  ;;  %v4511_v18 = vrot.slane %v4487_v7, 2 }
 0x4db   :  { %6450 = vmatprep.mubr.f32.mxu0 %v14875_v23  ;;  %v14882_v50 = vld [vmem:[#allocation105_spill] sm:$0xff]  ;;  %v3105_v48 = vadd.f32 %v3101_v42, %v3025_v1  ;;  %v14883_v30 = vld [vmem:[#allocation187_spill] sm:$0xff]  ;;  %v14885_v34 = vld [vmem:[#allocation190_spill] sm:$0xff]  ;;  %v4512_v10 = vrot.slane %v11082_v57, 2  ;;  %v6894_v12 = vpack.c.bf16 %v3129_v29, %v3128_v56  ;;  %4551 = vrot.lane.b32.xlu1 %v11092_v9, %s7792_s22 }
 0x4dc   :  { %v3037_v59 = vadd.f32 %v14882_v50, %v2884_v54  ;;  %v2729_v41 = vmul.f32 %v14883_v30, %v2721_v31  ;;  %v14884_v58 = vld [vmem:[#allocation73_spill] sm:$0xff]  ;;  %v2990_v39 = vmul.f32 %v14885_v34, %v2982_v26  ;;  %v14886_v4 = vld [vmem:[#allocation186_spill] sm:$0xff]  ;;  %v14888_v37 = vld [vmem:[#allocation68_spill] sm:$0xff]  ;;  %v3051_v42 = vpop.permute.xlu1 %3050  ;;  %v3043_v61 = vpop.permute.xlu0 %3042 }
 0x4dd   :  { %7367 = vrot.lane.b32.xlu0 %v14884_v58, %s7800_s16  ;;  %v14887_v21 = vld [vmem:[#allocation189_spill] sm:$0xff]  ;;  %6889 = vmatpush3.bf16.msra.mxu0 %v6886_v6  ;;  %v11105_v45 = vadd.f32 %v2622_v17, %v14888_v37  ;;  %v14889_v54 = vld [vmem:[#allocation64_spill] sm:$0xff]  ;;  %v14891_v6 = vld [vmem:[#allocation130_spill] sm:$0xff]  ;;  %v3057_v17 = vsel %vm419_vm7, %v3043_v61, %v3051_v42 }
 0x4de   :  { %v2904_v32 = vsel %vm2350_vm11, %v14887_v21, %v14886_v4  ;;  %v11108_v1 = vadd.f32 %v2698_v0, %v14889_v54  ;;  %6891 = vmatprep.subr.bf16.mxu0 %v6890_v33  ;;  %v4491_v40 = vld [vmem:[#allocation2 + $0x20] sm:$0x3]  ;;  %v14890_v31 = vld [vmem:[#allocation65_spill] sm:$0xff]  ;;  %v11114_v62 = vadd.f32 %v2838_v51, %v14891_v6  ;;  %v14892_v44 = vld [vmem:[#allocation46_spill] sm:$0xff]  ;;  %v3109_v4 = vadd.f32 %v3105_v48, %v3037_v59 }
 0x4df   :  { %v2808_v23 = vadd.f32 %v2804_v49, %v14890_v31  ;;  %v11117_v16 = vadd.f32 %v2653_v38, %v14892_v44  ;;  %v3130_v0 = vld [vmem:[#allocation20 + $0x70] sm:$0xff]  ;;  %v3131_v26 = vld [vmem:[#allocation20 + $0x78] sm:$0xff]  ;;  %v14893_v7 = vld [vmem:[#allocation88_spill] sm:$0xff]  ;;  %v2994_v38 = vadd.f32 %v2990_v39, %v10992_v28  ;;  %v4517_v42 = vrot.slane %v4491_v40, 2  ;;  %4583 = vrot.lane.b32.xlu1 %v10882_v2, %s7804_s10 }
 0x4e0   :  { %v2733_v52 = vadd.f32 %v2729_v41, %v14893_v7  ;;  %v14894_v56 = vld [vmem:[#allocation180_spill] sm:$0xff]  ;;  %v14895_v29 = vld [vmem:[#allocation179_spill] sm:$0xff]  ;;  %v14896_v58 = vld [vmem:[#allocation197_spill] sm:$0xff]  ;;  %v11135_v41 = vsel %vm2212_vm8, %v4511_v18, %v4512_v10  ;;  %v3079_v6 = vpop.permute.xlu0 %3078  ;;  %v6898_v28 = vpack.c.bf16 %v3131_v26, %v3130_v0 }
 0x4e1   :  { %v2646_v50 = vsel %vm381_vm5, %v14895_v29, %v14894_v56  ;;  %v2912_v49 = vmul.f32 %v14896_v58, %v2904_v32  ;;  %7377 = vrot.lane.b32.xlu0 %v14870_v13, %s7800_s16  ;;  %v4498_v51 = vld [vmem:[#allocation2 + $0x58] sm:$0x3]  ;;  %v14897_v21 = vld [vmem:[#allocation196_spill] sm:$0xff]  ;;  %v14898_v37 = vld [vmem:[#allocation198_spill] sm:$0xff]  ;;  %6893 = vmatpush3.bf16.msra.mxu0 %v6890_v33  ;;  %v3087_v32 = vpop.permute.xlu1 %3086 }
 0x4e2   :  { %v2873_v54 = vsel %vm419_vm7, %v14898_v37, %v14897_v21  ;;  %v14899_v61 = vld [vmem:[#allocation181_spill] sm:$0xff]  ;;  %v14900_v31 = vld [vmem:[#allocation183_spill] sm:$0xff]  ;;  %6895 = vmatprep.subr.bf16.mxu0 %v6894_v12  ;;  %v4603_v39 = vld [vmem:[#allocation2] sm:$0xf0]  ;;  %v11145_v33 = vmul.f32 %v14881_v24, %v2646_v50  ;;  %v4529_v29 = vrot.slane %v4498_v51, 2  ;;  %v4620_v51 = vrot.slane %v11082_v57, 4 }
 0x4e3   :  { %v2722_v59 = vsel %vm2350_vm11, %v14900_v31, %v14899_v61  ;;  %v14901_v48 = vld [vmem:[#allocation201_spill] sm:$0xff]  ;;  %v14902_v18 = vld [vmem:[#allocation200_spill] sm:$0xff]  ;;  %v14903_v40 = vld [vmem:[#allocation199_spill] sm:$0xff]  ;;  %v2916_v21 = vadd.f32 %v2912_v49, %v2808_v23  ;;  %v2881_v31 = vmul.f32 %v14857_v11, %v2873_v54  ;;  %v11168_v23 = vsel %vm2212_vm8, %v4512_v10, %v4517_v42  ;;  %4771 = vrot.lane.b32.xlu1 %v10977_v35, %s7792_s22 }
 0x4e4   :  { %v3065_v13 = vmul.f32 %v14901_v48, %v3057_v17  ;;  %v3014_v44 = vsel %vm381_vm5, %v14903_v40, %v14902_v18  ;;  %v14904_v7 = vld [vmem:[#allocation94_spill] sm:$0xff]  ;;  %v14905_v56 = vld [vmem:[#allocation95_spill] sm:$0xff]  ;;  %v14906_v0 = vld [vmem:[#allocation48_spill] sm:$0xff]  ;;  %v2730_v18 = vmul.f32 %v14883_v30, %v2722_v59  ;;  %14910 = vst [vmem:[#allocation70_spill] sm:$0xff] %v11168_v23  ;;  %v4619_v49 = vrot.slane %v4603_v39, 4 }
 0x4e5   :  { %v3090_v17 = vsel %vm2350_vm11, %v14905_v56, %v14904_v7  ;;  %v14907_v26 = vld [vmem:[#allocation191_spill] sm:$0xff]  ;;  %v14908_v61 = vld [vmem:[#allocation194_spill] sm:$0xff]  ;;  %v14909_v24 = vld [vmem:[#allocation192_spill] sm:$0xff]  ;;  %4539 = vrot.lane.b32.xlu0 %v11135_v41, %s7792_s22  ;;  %6897 = vmatpush3.bf16.msra.mxu0 %v6894_v12  ;;  %v3022_v40 = vmul.f32 %v14858_v43, %v3014_v44  ;;  %v3091_v12 = vsel %vm2350_vm11, %v3079_v6, %v3087_v32 }
 0x4e6   :  { %v2983_v37 = vsel %vm2257_vm10, %v14907_v26, %v14906_v0  ;;  %v2797_v50 = vsel %vm2257_vm10, %v14909_v24, %v14908_v61  ;;  %v3098_v7 = vmul.f32 %v11019_v22, %v3090_v17  ;;  %v3069_v56 = vadd.f32 %v3065_v13, %v2916_v21  ;;  %v2900_v0 = vpop.permute.xlu1 %2899  ;;  %v2892_v26 = vpop.permute.xlu0 %2891  ;;  %6899 = vmatprep.subr.bf16.mxu0 %v6898_v28  ;;  %v4719_v54 = vld [vmem:[#allocation2] sm:$0xc0]  ;;  %v14914_v32 = vld [vmem:[#allocation89_spill] sm:$0xff] }
 0x4e7   :  { %v2991_v30 = vmul.f32 %v14885_v34, %v2983_v37  ;;  %v2805_v10 = vmul.f32 %v14879_v8, %v2797_v50  ;;  %v11182_v42 = vsel %vm2212_vm8, %v4525_v20, %v4529_v29  ;;  %v2885_v59 = vadd.f32 %v2881_v31, %v2733_v52  ;;  %v14911_v39 = vld [vmem:[#allocation116_spill] sm:$0xff] }
 0x4e8   :  { %v2874_v13 = vsel %vm419_vm7, %v11047_v47, %v11045_v5  ;;  %v14912_v44 = vld [vmem:[#allocation188_spill] sm:$0xff]  ;;  %v4736_v34 = vrot.slane %v11082_v57, 6  ;;  %v3015_v20 = vsel %vm381_vm5, %v11078_v27, %v11080_v19  ;;  %v2905_v52 = vsel %vm2350_vm11, %v2892_v26, %v2900_v0  ;;  %4553 = vrot.lane.b32.xlu1 %v11182_v42, %s7792_s22  ;;  %v14917_v26 = vld [vmem:[#allocation139_spill] sm:$0xff] }
 0x4e9   :  { %v2850_v17 = vmul.f32 %v14912_v44, %v14911_v39  ;;  %4541 = vrot.lane.b32.xlu0 %v11168_v23, %s7792_s22  ;;  %6901 = vmatpush3.bf16.msra.mxu0 %v6898_v28  ;;  %v11202_v5 = vsel %vm457_vm1, %v4619_v49, %v4620_v51  ;;  %v4735_v47 = vrot.slane %v4719_v54, 6  ;;  %v3026_v6 = vadd.f32 %v3022_v40, %v14914_v32  ;;  %v4605_v50 = vld [vmem:[#allocation2 + $0x20] sm:$0xf]  ;;  %v14918_v54 = vld [vmem:[#allocation195_spill] sm:$0xff] }
 0x4ea   :  { %14913 = vst [vmem:[#allocation87_spill] sm:$0xff] %v11202_v5  ;;  %v3102_v29 = vadd.f32 %v3098_v7, %v2994_v38  ;;  %v3113_v21 = vadd.f32 %v3109_v4, %v3069_v56  ;;  %v3099_v37 = vmul.f32 %v11019_v22, %v3091_v12  ;;  %v2902_v61 = vpop.permute.xlu1 %2901  ;;  %v2894_v24 = vpop.permute.xlu0 %2893  ;;  %v2734_v27 = vadd.f32 %v2730_v18, %v11105_v45  ;;  %v14915_v45 = vld [vmem:[#allocation132_spill] sm:$0xff]  ;;  %v4608_v39 = vld [vmem:[#allocation2 + $0x38] sm:$0xf0] }
 0x4eb   :  { %v2995_v19 = vadd.f32 %v2991_v30, %v11114_v62  ;;  %v2798_v28 = vsel %vm2257_vm10, %v11003_v3, %v11005_v15  ;;  %v2882_v38 = vmul.f32 %v14857_v11, %v2874_v13  ;;  %v2809_v4 = vadd.f32 %v2805_v10, %v11117_v16  ;;  %v4721_v56 = vld [vmem:[#allocation2 + $0x20] sm:$0x3f] }
 0x4ec   :  { %v3023_v22 = vmul.f32 %v14858_v43, %v3015_v20  ;;  %v2913_v31 = vmul.f32 %v14896_v58, %v2905_v52  ;;  %6451 = vmatmul.mubr.f32.vlgmr.msra.gmra.mrb[10].mxu0 %v3113_v21  ;;  %v3038_v18 = vadd.f32 %v14915_v45, %v2885_v59  ;;  %v2906_v62 = vsel %vm2350_vm11, %v2894_v24, %v2902_v61 }
 0x4ed   :  { %4687 = vrot.lane.b32.xlu0 %v11202_v5, %s7804_s10  ;;  %v11226_v3 = vsel %vm2935_vm9, %v4735_v47, %v4736_v34  ;;  %v4625_v15 = vrot.slane %v4605_v50, 4  ;;  %v3106_v11 = vadd.f32 %v3102_v29, %v3026_v6  ;;  %v2806_v43 = vmul.f32 %v14879_v8, %v2798_v28  ;;  %4585 = vrot.lane.b32.xlu1 %v10911_v63, %s7804_s10  ;;  %v4493_v6 = vld [vmem:[#allocation2 + $0x30] sm:$0xfc] }
 0x4ee   :  { %14916 = vst [vmem:[#allocation86_spill] sm:$0xff] %v11226_v3  ;;  %v2854_v16 = vadd.f32 %v2850_v17, %v11108_v1  ;;  %v3103_v49 = vadd.f32 %v3099_v37, %v2995_v19  ;;  %v3053_v40 = vpop.permute.xlu1 %3052  ;;  %v3045_v7 = vpop.permute.xlu0 %3044  ;;  %v2658_v0 = vadd.f32 %v11145_v33, %v11065_v53  ;;  %v3035_v30 = vmul.f32 %v14918_v54, %v14917_v26 }
 0x4ef   :  { %v2886_v10 = vadd.f32 %v2882_v38, %v2734_v27  ;;  %v3058_v12 = vsel %vm419_vm7, %v3045_v7, %v3053_v40  ;;  %v2917_v59 = vadd.f32 %v2913_v31, %v2809_v4  ;;  %v2914_v1 = vmul.f32 %v14896_v58, %v2906_v62  ;;  %v11247_v58 = vld [vmem:[#allocation2 + $0x40] sm:$0xff]  ;;  %v4724_v27 = vld [vmem:[#allocation2 + $0x38] sm:$0xc0] }
 0x4f0   :  { %v3027_v8 = vadd.f32 %v3023_v22, %v2854_v16  ;;  %v3066_v13 = vmul.f32 %v14901_v48, %v3058_v12  ;;  %v11245_v53 = vsel %vm457_vm1, %v4620_v51, %v4625_v15  ;;  %v4741_v33 = vrot.slane %v4721_v56, 6  ;;  %v4610_v15 = vld [vmem:[#allocation2 + $0x58] sm:$0xf] }
 0x4f1   :  { %4807 = vrot.lane.b32.xlu0 %v11226_v3, %s7804_s10  ;;  %14919 = vst [vmem:[#allocation91_spill] sm:$0xff] %v11245_v53  ;;  %v2810_v44 = vadd.f32 %v2806_v43, %v2658_v0  ;;  %v3110_v32 = vadd.f32 %v3106_v11, %v3038_v18  ;;  %4773 = vrot.lane.b32.xlu1 %v11053_v36, %s7792_s22  ;;  %v4632_v21 = vrot.slane %v4608_v39, 4  ;;  %v4633_v51 = vrot.slane %v11024_v46, 4  ;;  %v4497_v43 = vld [vmem:[#allocation2 + $0x50] sm:$0x3] }
 0x4f2   :  { %v3107_v17 = vadd.f32 %v3103_v49, %v3027_v8  ;;  %v3070_v20 = vadd.f32 %v3066_v13, %v2917_v59  ;;  %v3055_v52 = vpop.permute.xlu1 %3054  ;;  %v3047_v47 = vpop.permute.xlu0 %3046  ;;  %v3039_v37 = vadd.f32 %v3035_v30, %v2886_v10  ;;  %v11260_v19 = vsel %vm2935_vm9, %v4736_v34, %v4741_v33  ;;  %v4726_v49 = vld [vmem:[#allocation2 + $0x58] sm:$0x3f]  ;;  %v4607_v10 = vld [vmem:[#allocation2 + $0x30] sm:$0xf0] }
 0x4f3   :  { %v3059_v29 = vsel %vm419_vm7, %v3047_v47, %v3055_v52  ;;  %v2918_v61 = vadd.f32 %v2914_v1, %v2810_v44  ;;  %14920 = vst [vmem:[#allocation90_spill] sm:$0xff] %v11260_v19  ;;  %v4521_v28 = vrot.slane %v4493_v6, 2  ;;  %v4522_v38 = vrot.slane %v11247_v58, 2  ;;  %v4723_v13 = vld [vmem:[#allocation2 + $0x30] sm:$0xc0] }
 0x4f4   :  { %v3067_v24 = vmul.f32 %v14901_v48, %v3059_v29  ;;  %v3114_v50 = vadd.f32 %v3110_v32, %v3070_v20  ;;  %v3111_v22 = vadd.f32 %v3107_v17, %v3039_v37  ;;  %v11266_v48 = vsel %vm457_vm1, %v4632_v21, %v4633_v51  ;;  %v4609_v47 = vld [vmem:[#allocation2 + $0x50] sm:$0xf] }
 0x4f5   :  { %4689 = vrot.lane.b32.xlu0 %v11245_v53, %s7804_s10  ;;  %4655 = vrot.lane.b32.xlu1 %v10942_v55, %s7792_s22  ;;  %v4748_v31 = vrot.slane %v4724_v27, 6  ;;  %v4749_v45 = vrot.slane %v11024_v46, 6  ;;  %v11272_v34 = vsel %vm2212_vm8, %v4521_v28, %v4522_v38  ;;  %v4637_v16 = vrot.slane %v4610_v15, 4  ;;  %v4725_v21 = vld [vmem:[#allocation2 + $0x50] sm:$0x3f]  ;;  %v2058_v27 = vld [vmem:[#allocation12] sm:$0xff] }
 0x4f6   :  { %v3071_v4 = vadd.f32 %v3067_v24, %v2918_v61  ;;  %6453 = vmatprep.mubr.f32.mxu0 %v3114_v50  ;;  %14921 = vst [vmem:[#allocation92_spill] sm:$0xff] %v11272_v34  ;;  %v11281_v11 = vpop.permute.xlu0 %7182  ;;  %v4527_v40 = vrot.slane %v4497_v43, 2  ;;  %v4753_v56 = vrot.slane %v4726_v49, 6  ;;  %v11314_v12 = vpop.permute.xlu1 %7187  ;;  %v4629_v59 = vrot.slane %v4607_v10, 4  ;;  %v11361_v50 = vld [vmem:[#allocation2 + $0x8] sm:$0xff]  ;;  %v2062_v43 = vld [vmem:[#allocation12 + $0x20] sm:$0xff] }
 0x4f7   :  { %v11277_v62 = vsel %vm2935_vm9, %v4748_v31, %v4749_v45  ;;  %v11290_v7 = vsel %vm457_vm1, %v4633_v51, %v4637_v16  ;;  %v4630_v1 = vrot.slane %v11247_v58, 4  ;;  %v4745_v44 = vrot.slane %v4723_v13, 6  ;;  %v2059_v28 = vld [vmem:[#allocation12 + $0x8] sm:$0xff] }
 0x4f8   :  { %v3115_v18 = vadd.f32 %v3111_v22, %v3071_v4  ;;  %14922 = vst [vmem:[#allocation93_spill] sm:$0xff] %v11277_v62  ;;  %v11297_v26 = vsel %vm2212_vm8, %v4522_v38, %v4527_v40  ;;  %v11302_v54 = vsel %vm2935_vm9, %v4749_v45, %v4753_v56  ;;  %v4746_v17 = vrot.slane %v11247_v58, 6  ;;  %v2060_v38 = vld [vmem:[#allocation12 + $0x10] sm:$0xff]  ;;  %v2061_v22 = vld [vmem:[#allocation12 + $0x18] sm:$0xff]  ;;  %v2063_v16 = vld [vmem:[#allocation12 + $0x28] sm:$0xff] }
 0x4f9   :  { %4809 = vrot.lane.b32.xlu0 %v11260_v19, %s7804_s10  ;;  %4699 = vrot.lane.b32.xlu1 %v11266_v48, %s7804_s10  ;;  %14923 = vst [vmem:[#allocation98_spill] sm:$0xff] %v11297_v26  ;;  %14924 = vst [vmem:[#allocation96_spill] sm:$0xff] %v11302_v54  ;;  %v11326_v39 = vsel %vm457_vm1, %v4629_v59, %v4630_v1  ;;  %v4635_v29 = vrot.slane %v4609_v47, 4  ;;  %v4751_v61 = vrot.slane %v4725_v21, 6  ;;  %v14929_v15 = vmov 0.0|0.0   ;;  %v2064_v59 = vld [vmem:[#allocation12 + $0x30] sm:$0xff] }
 0x4fa   :  { %6454 = vmatmul.mubr.f32.gmra.mrb[12].mxu0 %v3115_v18  ;;  %v11292_v0 = vpop.permute.xlu0 %7197  ;;  %14925 = vst [vmem:[#allocation99_spill] sm:$0xff] %v11326_v39  ;;  %v11328_v33 = vpop.permute.xlu1 %7192  ;;  %v11338_v52 = vsel %vm2935_vm9, %v4745_v44, %v4746_v17  ;;  %v11365_v4 = vpack.c.bf16 %v2059_v28, %v2058_v27  ;;  %v11373_v45 = vpack.c.bf16 %v2061_v22, %v2060_v38  ;;  %v2067_v47 = vld [vmem:[#allocation12 + $0x48] sm:$0xff]  ;;  %v2069_v27 = vld [vmem:[#allocation12 + $0x58] sm:$0xff]  ;;  %v2070_v28 = vld [vmem:[#allocation12 + $0x60] sm:$0xff] }
 0x4fb   :  { %14926 = vst [vmem:[#allocation100_spill] sm:$0xff] %v11338_v52  ;;  %v11355_v37 = vsel %vm457_vm1, %v4630_v1, %v4635_v29  ;;  %v11368_v31 = vsel %vm2935_vm9, %v4746_v17, %v4751_v61  ;;  %v11385_v40 = vpack.c.bf16 %v2063_v16, %v2062_v43  ;;  %v2065_v1 = vld [vmem:[#allocation12 + $0x38] sm:$0xff]  ;;  %v2066_v17 = vld [vmem:[#allocation12 + $0x40] sm:$0xff]  ;;  %v2068_v61 = vld [vmem:[#allocation12 + $0x50] sm:$0xff] }
 0x4fc   :  { %14927 = vst [vmem:[#allocation102_spill] sm:$0xff] %v11355_v37  ;;  %14928 = vst [vmem:[#allocation101_spill] sm:$0xff] %v11368_v31  ;;  %6848 = vmatpush3.bf16.msra.mxu1 %v11365_v4  ;;  %v11400_v13 = vpack.c.bf16 %v2065_v1, %v2064_v59  ;;  %v11412_v21 = vpack.c.bf16 %v2067_v47, %v2066_v17  ;;  %v11420_v38 = vpack.c.bf16 %v2069_v27, %v2068_v61  ;;  %v2071_v22 = vld [vmem:[#allocation12 + $0x68] sm:$0xff]  ;;  %v2072_v1 = vld [vmem:[#allocation12 + $0x70] sm:$0xff] }
 0x4fd   :  { %4543 = vrot.lane.b32.xlu0 %v11272_v34, %s7792_s22  ;;  %4819 = vrot.lane.b32.xlu1 %v11277_v62, %s7804_s10  ;;  %v11429_v59 = vpack.c.bf16 %v2071_v22, %v2070_v28  ;;  %v2073_v17 = vld [vmem:[#allocation12 + $0x78] sm:$0xff]  ;;  %v5085_v28 = vld [vmem:[#allocation2] sm:$0xff] }
 0x4fe   :  { %v11306_v30 = vpop.permute.xlu0 %7207  ;;  %v11342_v32 = vpop.permute.xlu1 %7202  ;;  %6849 = vmatprep.subr.bf16.mxu1 %v14929_v15  ;;  %v11437_v47 = vpack.c.bf16 %v2073_v17, %v2072_v1 }
 0x500   :  { %6851 = vmatpush3.bf16.msra.mxu1 %v11373_v45 }
 0x501   :  { %4575 = vrot.lane.b32.xlu0 %v11135_v41, %s7804_s10  ;;  %4657 = vrot.lane.b32.xlu1 %v11010_v14, %s7792_s22 }
 0x502   :  { %v11316_v8 = vpop.permute.xlu0 %7222  ;;  %v11352_v51 = vpop.permute.xlu1 %7212  ;;  %6852 = vmatprep.subr.bf16.mxu1 %v14929_v15 }
 0x504   :  { %6854 = vmatpush3.bf16.msra.mxu1 %v11385_v40 }
 0x505   :  { %4763 = vrot.lane.b32.xlu0 %v11226_v3, %s7792_s22  ;;  %4701 = vrot.lane.b32.xlu1 %v11290_v7, %s7804_s10 }
 0x506   :  { %v11331_v20 = vpop.permute.xlu0 %7227  ;;  %v11375_v18 = vpop.permute.xlu1 %7217  ;;  %6855 = vmatprep.subr.bf16.mxu1 %v14929_v15 }
 0x508   :  { %6857 = vmatpush3.bf16.msra.mxu1 %v11400_v13 }
 0x509   :  { %4545 = vrot.lane.b32.xlu0 %v11297_v26, %s7792_s22  ;;  %4821 = vrot.lane.b32.xlu1 %v11302_v54, %s7804_s10 }
 0x50a   :  { %v11344_v6 = vpop.permute.xlu0 %7232  ;;  %v11390_v56 = vpop.permute.xlu1 %7247  ;;  %6858 = vmatprep.subr.bf16.mxu1 %v14929_v15 }
 0x50b   :  { %14931 = vst [vmem:[#allocation106_spill] sm:$0xff] %v11390_v56 }
 0x50c   :  { %6860 = vmatpush3.bf16.msra.mxu1 %v11412_v21 }
 0x50d   :  { %4577 = vrot.lane.b32.xlu0 %v11168_v23, %s7804_s10  ;;  %4587 = vrot.lane.b32.xlu1 %v11092_v9, %s7804_s10 }
 0x50e   :  { %v11357_v24 = vpop.permute.xlu0 %7237  ;;  %v11405_v44 = vpop.permute.xlu1 %7262  ;;  %6861 = vmatprep.subr.bf16.mxu1 %v14929_v15 }
 0x50f   :  { %14933 = vst [vmem:[#allocation111_spill] sm:$0xff] %v11405_v44 }
 0x510   :  { %6863 = vmatpush3.bf16.msra.mxu1 %v11420_v38 }
 0x511   :  { %4765 = vrot.lane.b32.xlu0 %v11260_v19, %s7792_s22  ;;  %4775 = vrot.lane.b32.xlu1 %v11277_v62, %s7792_s22 }
 0x512   :  { %v11378_v49 = vpop.permute.xlu0 %7242  ;;  %v11422_v43 = vpop.permute.xlu1 %7267  ;;  %6864 = vmatprep.subr.bf16.mxu1 %v14929_v15 }
 0x513   :  { %14930 = vst [vmem:[#allocation104_spill] sm:$0xff] %v11378_v49  ;;  %14935 = vst [vmem:[#allocation45_spill] sm:$0xff] %v11422_v43 }
 0x514   :  { %6866 = vmatpush3.bf16.msra.mxu1 %v11429_v59 }
 0x515   :  { %4647 = vrot.lane.b32.xlu0 %v11202_v5, %s7792_s22  ;;  %4589 = vrot.lane.b32.xlu1 %v11182_v42, %s7804_s10 }
 0x516   :  { %v11392_v10 = vpop.permute.xlu0 %7252  ;;  %v11439_v61 = vpop.permute.xlu1 %7272  ;;  %6867 = vmatprep.subr.bf16.mxu1 %v14929_v15 }
 0x517   :  { %14932 = vst [vmem:[#allocation60_spill] sm:$0xff] %v11392_v10  ;;  %14937 = vst [vmem:[#allocation107_spill] sm:$0xff] %v11439_v61  ;;  %v7185_v10 = vunpack.i.h.bf16 %v11281_v11 }
 0x518   :  { %6869 = vmatpush3.bf16.msra.mxu1 %v11437_v47 }
 0x519   :  { %4691 = vrot.lane.b32.xlu0 %v11326_v39, %s7804_s10  ;;  %4777 = vrot.lane.b32.xlu1 %v11302_v54, %s7792_s22 }
 0x51a   :  { %v11408_v29 = vpop.permute.xlu0 %7257  ;;  %6902 = vmatprep.subr.bf16.mxu1 %v14929_v15  ;;  %v11453_v22 = vpop.permute.xlu1 %7277 }
 0x51b   :  { %14934 = vst [vmem:[#allocation112_spill] sm:$0xff] %v11408_v29  ;;  %14939 = vst [vmem:[#allocation84_spill] sm:$0xff] %v11453_v22 }
 0x51d   :  { %4811 = vrot.lane.b32.xlu0 %v11338_v52, %s7804_s10  ;;  %4659 = vrot.lane.b32.xlu1 %v11266_v48, %s7792_s22 }
 0x51e   :  { %v11424_v16 = vpop.permute.xlu0 %7287  ;;  %v11462_v17 = vpop.permute.xlu1 %7282 }
 0x51f   :  { %14936 = vst [vmem:[#allocation108_spill] sm:$0xff] %v11424_v16  ;;  %14941 = vst [vmem:[#allocation109_spill] sm:$0xff] %v11462_v17 }
 0x521   :  { %4649 = vrot.lane.b32.xlu0 %v11245_v53, %s7792_s22  ;;  %4661 = vrot.lane.b32.xlu1 %v11290_v7, %s7792_s22 }
 0x522   :  { %v11442_v27 = vpop.permute.xlu0 %7292 }
 0x523   :  { %14938 = vst [vmem:[#allocation81_spill] sm:$0xff] %v11442_v27 }
 0x525   :  { %4693 = vrot.lane.b32.xlu0 %v11355_v37, %s7804_s10  ;;  %5101 = vrot.lane.b32.xlu1 %v11361_v50, %s7805_s9 }
 0x526   :  { %v11455_v1 = vpop.permute.xlu0 %7297 }
 0x527   :  { %14940 = vst [vmem:[#allocation110_spill] sm:$0xff] %v11455_v1  ;;  %v11472_v1 = vpop.permute.xlu1 %7307 }
 0x528   :  { %14943 = vst [vmem:[#allocation123_spill] sm:$0xff] %v11472_v1 }
 0x529   :  { %4813 = vrot.lane.b32.xlu0 %v11368_v31, %s7804_s10  ;;  %5194 = vrot.lane.b32.xlu1 %v11361_v50, %s7806_s0 }
 0x52a   :  { %v11464_v54 = vpop.permute.xlu0 %7302 }
 0x52b   :  { %14942 = vst [vmem:[#allocation122_spill] sm:$0xff] %v11464_v54  ;;  %v11481_v54 = vpop.permute.xlu1 %7322 }
 0x52c   :  { %14945 = vst [vmem:[#allocation127_spill] sm:$0xff] %v11481_v54 }
 0x52d   :  { %4579 = vrot.lane.b32.xlu0 %v11272_v34, %s7804_s10  ;;  %5103 = vrot.lane.b32.xlu1 %v10820_v25, %s7805_s9 }
 0x52e   :  { %v11474_v62 = vpop.permute.xlu0 %7312 }
 0x52f   :  { %14944 = vst [vmem:[#allocation126_spill] sm:$0xff] %v11474_v62 }
 0x531   :  { %4767 = vrot.lane.b32.xlu0 %v11338_v52, %s7792_s22  ;;  %5196 = vrot.lane.b32.xlu1 %v10820_v25, %s7806_s0 }
 0x532   :  { %v11483_v27 = vpop.permute.xlu0 %7317 }
 0x533   :  { %14946 = vst [vmem:[#allocation97_spill] sm:$0xff] %v11483_v27  ;;  %v11499_v27 = vld [vmem:[#allocation2 + $0x30] sm:$0xff] }
 0x535   :  { %4581 = vrot.lane.b32.xlu0 %v11297_v26, %s7804_s10  ;;  %5130 = vrot.lane.b32.xlu1 %v11361_v50, %s7792_s22 }
 0x536   :  { %v11493_v62 = vpop.permute.xlu0 %7327 }
 0x537   :  { %14948 = vst [vmem:[#allocation119_spill] sm:$0xff] %v11493_v62 }
 0x539   :  { %4769 = vrot.lane.b32.xlu0 %v11368_v31, %s7792_s22  ;;  %5227 = vrot.lane.b32.xlu1 %v10882_v2, %s7805_s9 }
 0x53d   :  { %4651 = vrot.lane.b32.xlu0 %v11326_v39, %s7792_s22  ;;  %5132 = vrot.lane.b32.xlu1 %v10820_v25, %s7792_s22  ;;  %v11449_v25 = vld [vmem:[#allocation2 + $0x38] sm:$0xff] }
 0x541   :  { %4653 = vrot.lane.b32.xlu0 %v11355_v37, %s7792_s22  ;;  %5229 = vrot.lane.b32.xlu1 %v10911_v63, %s7805_s9 }
 0x545   :  { %5093 = vrot.lane.b32.xlu0 %v5085_v28, %s7805_s9  ;;  %5105 = vrot.lane.b32.xlu1 %v11449_v25, %s7805_s9 }
 0x549   :  { %5186 = vrot.lane.b32.xlu0 %v5085_v28, %s7806_s0  ;;  %5198 = vrot.lane.b32.xlu1 %v11449_v25, %s7806_s0 }
 0x54d   :  { %5095 = vrot.lane.b32.xlu0 %v11082_v57, %s7805_s9  ;;  %5295 = vrot.lane.b32.xlu1 %v10882_v2, %s7806_s0  ;;  %v11491_v2 = vpop.permute.xlu1 %7337 }
 0x54e   :  { %14947 = vst [vmem:[#allocation118_spill] sm:$0xff] %v11491_v2 }
 0x551   :  { %5188 = vrot.lane.b32.xlu0 %v11082_v57, %s7806_s0  ;;  %5107 = vrot.lane.b32.xlu1 %v11024_v46, %s7805_s9  ;;  %v11503_v54 = vpop.permute.xlu1 %7362 }
 0x552   :  { %14949 = vst [vmem:[#allocation117_spill] sm:$0xff] %v11503_v54  ;;  %v7403_v54 = vld [vmem:[#allocation2 + $0x18] sm:$0xff] }
 0x555   :  { %5122 = vrot.lane.b32.xlu0 %v5085_v28, %s7792_s22  ;;  %5200 = vrot.lane.b32.xlu1 %v11024_v46, %s7806_s0  ;;  %v11513_v62 = vpop.permute.xlu1 %7372 }
 0x556   :  { %14951 = vst [vmem:[#allocation121_spill] sm:$0xff] %v11513_v62 }
 0x559   :  { %5219 = vrot.lane.b32.xlu0 %v11135_v41, %s7805_s9  ;;  %5297 = vrot.lane.b32.xlu1 %v10911_v63, %s7806_s0  ;;  %v11505_v63 = vpop.permute.xlu0 %7332 }
 0x55a   :  { %14950 = vst [vmem:[#allocation115_spill] sm:$0xff] %v11505_v63 }
 0x55d   :  { %5124 = vrot.lane.b32.xlu0 %v11082_v57, %s7792_s22  ;;  %5134 = vrot.lane.b32.xlu1 %v11449_v25, %s7792_s22  ;;  %v11515_v2 = vpop.permute.xlu0 %7342 }
 0x55e   :  { %14952 = vst [vmem:[#allocation120_spill] sm:$0xff] %v11515_v2 }
 0x561   :  { %5221 = vrot.lane.b32.xlu0 %v11168_v23, %s7805_s9  ;;  %5166 = vrot.lane.b32.xlu1 %v11361_v50, %s7804_s10  ;;  %v11523_v50 = vpop.permute.xlu1 %4547  ;;  %v11525_v63 = vpop.permute.xlu0 %7347 }
 0x562   :  { %14953 = vst [vmem:[#allocation125_spill] sm:$0xff] %v11523_v50  ;;  %14954 = vst [vmem:[#allocation124_spill] sm:$0xff] %v11525_v63 }
 0x565   :  { %5097 = vrot.lane.b32.xlu0 %v11499_v27, %s7805_s9  ;;  %5231 = vrot.lane.b32.xlu1 %v11092_v9, %s7805_s9  ;;  %v11532_v2 = vpop.permute.xlu1 %4549  ;;  %v11534_v62 = vpop.permute.xlu0 %7352 }
 0x566   :  { %14955 = vst [vmem:[#allocation129_spill] sm:$0xff] %v11532_v2  ;;  %14956 = vst [vmem:[#allocation128_spill] sm:$0xff] %v11534_v62 }
 0x569   :  { %5190 = vrot.lane.b32.xlu0 %v11499_v27, %s7806_s0  ;;  %5327 = vrot.lane.b32.xlu1 %v10942_v55, %s7805_s9  ;;  %v11542_v63 = vpop.permute.xlu1 %4695  ;;  %v11544_v50 = vpop.permute.xlu0 %7357 }
 0x56a   :  { %14957 = vst [vmem:[#allocation113_spill] sm:$0xff] %v11542_v63  ;;  %14958 = vst [vmem:[#allocation61_spill] sm:$0xff] %v11544_v50 }
 0x56d   :  { %5287 = vrot.lane.b32.xlu0 %v11135_v41, %s7806_s0  ;;  %5136 = vrot.lane.b32.xlu1 %v11024_v46, %s7792_s22  ;;  %v11551_v62 = vpop.permute.xlu1 %4815  ;;  %v11553_v2 = vpop.permute.xlu0 %7367 }
 0x56e   :  { %14959 = vst [vmem:[#allocation133_spill] sm:$0xff] %v11551_v62  ;;  %14960 = vst [vmem:[#allocation131_spill] sm:$0xff] %v11553_v2 }
 0x571   :  { %5099 = vrot.lane.b32.xlu0 %v11247_v58, %s7805_s9  ;;  %5168 = vrot.lane.b32.xlu1 %v7403_v54, %s7804_s10  ;;  %v11560_v50 = vpop.permute.xlu1 %4697  ;;  %v11562_v63 = vpop.permute.xlu0 %7377 }
 0x572   :  { %14961 = vst [vmem:[#allocation134_spill] sm:$0xff] %v11560_v50  ;;  %14962 = vst [vmem:[#allocation135_spill] sm:$0xff] %v11562_v63 }
 0x575   :  { %5192 = vrot.lane.b32.xlu0 %v11247_v58, %s7806_s0  ;;  %5233 = vrot.lane.b32.xlu1 %v11182_v42, %s7805_s9 }
 0x579   :  { %5289 = vrot.lane.b32.xlu0 %v11168_v23, %s7806_s0  ;;  %5329 = vrot.lane.b32.xlu1 %v11010_v14, %s7805_s9 }
 0x57d   :  { %5126 = vrot.lane.b32.xlu0 %v11499_v27, %s7792_s22  ;;  %5299 = vrot.lane.b32.xlu1 %v11092_v9, %s7806_s0  ;;  %v11570_v9 = vpop.permute.xlu1 %4817 }
 0x57e   :  { %14963 = vst [vmem:[#allocation83_spill] sm:$0xff] %v11570_v9 }
 0x581   :  { %5158 = vrot.lane.b32.xlu0 %v5085_v28, %s7804_s10  ;;  %5395 = vrot.lane.b32.xlu1 %v10942_v55, %s7806_s0  ;;  %v11572_v55 = vpop.permute.xlu0 %4539  ;;  %v5520_v28 = vld [vmem:[#allocation2 + $0x28] sm:$0xff]  ;;  %v11579_v63 = vpop.permute.xlu1 %4551 }
 0x582   :  { %14964 = vst [vmem:[#allocation54_spill] sm:$0xff] %v11572_v55  ;;  %14965 = vst [vmem:[#allocation52_spill] sm:$0xff] %v11579_v63 }
 0x585   :  { %5223 = vrot.lane.b32.xlu0 %v11272_v34, %s7805_s9  ;;  %5531 = vrot.lane.b32.xlu1 %v7403_v54, %s7805_s9  ;;  %v11581_v2 = vpop.permute.xlu0 %4541 }
 0x586   :  { %14966 = vst [vmem:[#allocation67_spill] sm:$0xff] %v11581_v2 }
 0x589   :  { %5319 = vrot.lane.b32.xlu0 %v11202_v5, %s7805_s9  ;;  %5301 = vrot.lane.b32.xlu1 %v11182_v42, %s7806_s0  ;;  %v11591_v42 = vpop.permute.xlu0 %4687 }
 0x58a   :  { %14968 = vst [vmem:[#allocation140_spill] sm:$0xff] %v11591_v42 }
 0x58d   :  { %5128 = vrot.lane.b32.xlu0 %v11247_v58, %s7792_s22  ;;  %5397 = vrot.lane.b32.xlu1 %v11010_v14, %s7806_s0  ;;  %v11589_v14 = vpop.permute.xlu1 %4583 }
 0x58e   :  { %14967 = vst [vmem:[#allocation72_spill] sm:$0xff] %v11589_v14 }
 0x591   :  { %5160 = vrot.lane.b32.xlu0 %v11082_v57, %s7804_s10  ;;  %5533 = vrot.lane.b32.xlu1 %v5520_v28, %s7805_s9  ;;  %v11599_v63 = vpop.permute.xlu1 %4771 }
 0x592   :  { %14969 = vst [vmem:[#allocation141_spill] sm:$0xff] %v11599_v63 }
 0x595   :  { %5225 = vrot.lane.b32.xlu0 %v11297_v26, %s7805_s9  ;;  %5170 = vrot.lane.b32.xlu1 %v11449_v25, %s7804_s10  ;;  %v11603_v25 = vpop.permute.xlu0 %4807 }
 0x596   :  { %14970 = vst [vmem:[#allocation143_spill] sm:$0xff] %v11603_v25  ;;  %v11618_v25 = vpop.permute.xlu1 %4553 }
 0x597   :  { %14971 = vst [vmem:[#allocation142_spill] sm:$0xff] %v11618_v25 }
 0x599   :  { %5321 = vrot.lane.b32.xlu0 %v11245_v53, %s7805_s9  ;;  %5331 = vrot.lane.b32.xlu1 %v11266_v48, %s7805_s9  ;;  %v11620_v2 = vpop.permute.xlu0 %4689 }
 0x59a   :  { %14972 = vst [vmem:[#allocation144_spill] sm:$0xff] %v11620_v2  ;;  %v11627_v55 = vpop.permute.xlu1 %4585  ;;  %v11640_v2 = vld [vmem:[#allocation2 + $0x20] sm:$0xff] }
 0x59b   :  { %14973 = vst [vmem:[#allocation145_spill] sm:$0xff] %v11627_v55 }
 0x59d   :  { %5291 = vrot.lane.b32.xlu0 %v11272_v34, %s7806_s0  ;;  %5427 = vrot.lane.b32.xlu1 %v10977_v35, %s7805_s9 }
 0x59e   :  { %v11651_v16 = vpop.permute.xlu1 %4773 }
 0x59f   :  { %v11601_v9 = vpop.f32.mrb[6].mxu0  ;;  %14976 = vst [vmem:[#allocation147_spill] sm:$0xff] %v11651_v16 }
 0x5a0   :  { %v2045_v14 = vmul.f32 %v11601_v9, %v11601_v9  ;;  %v11607_v50 = vpop.f32.mrb[7].mxu0 }
 0x5a1   :  { %5387 = vrot.lane.b32.xlu0 %v11202_v5, %s7806_s0  ;;  %v2035_v62 = vadd.f32 %v11601_v9, %v11607_v50  ;;  %v2044_v42 = vmul.f32 %v11607_v50, %v11607_v50  ;;  %5563 = vrot.lane.b32.xlu1 %v7403_v54, %s7792_s22 }
 0x5a3   :  { %v2048_v63 = vadd.f32 %v2045_v14, %v2044_v42  ;;  %v11631_v14 = vpop.permute.xlu0 %4809 }
 0x5a4   :  { %14974 = vst [vmem:[#allocation152_spill] sm:$0xff] %v11631_v14 }
 0x5a5   :  { %5523 = vrot.lane.b32.xlu0 %v11082_v57, %s7805_s9  ;;  %5639 = vrot.lane.b32.xlu1 %v7403_v54, %s7806_s0 }
 0x5a9   :  { %5293 = vrot.lane.b32.xlu0 %v11297_v26, %s7806_s0  ;;  %5172 = vrot.lane.b32.xlu1 %v11024_v46, %s7804_s10 }
 0x5ad   :  { %v11629_v1 = vpop.f32.mrb[8].mxu0  ;;  %5389 = vrot.lane.b32.xlu0 %v11245_v53, %s7806_s0  ;;  %5333 = vrot.lane.b32.xlu1 %v11290_v7, %s7805_s9 }
 0x5ae   :  { %v11633_v42 = vpop.f32.mrb[9].mxu0  ;;  %v2047_v46 = vmul.f32 %v11629_v1, %v11629_v1 }
 0x5af   :  { %v2036_v25 = vadd.f32 %v2035_v62, %v11633_v42  ;;  %v2046_v54 = vmul.f32 %v11633_v42, %v11633_v42  ;;  %v11649_v62 = vpop.permute.xlu0 %4543 }
 0x5b0   :  { %14975 = vst [vmem:[#allocation153_spill] sm:$0xff] %v11649_v62 }
 0x5b1   :  { %v2037_v55 = vadd.f32 %v11629_v1, %v2036_v25  ;;  %v2049_v14 = vadd.f32 %v2048_v63, %v2046_v54  ;;  %5525 = vrot.lane.b32.xlu0 %v11640_v2, %s7805_s9  ;;  %5429 = vrot.lane.b32.xlu1 %v11053_v36, %s7805_s9 }
 0x5b3   :  { %v2038_v26 = vrot.slane %v2037_v55, 4  ;;  %v2050_v17 = vadd.f32 %v2049_v14, %v2047_v46  ;;  %v11658_v43 = vpop.permute.xlu0 %4575  ;;  %v11660_v14 = vpop.permute.xlu1 %4655 }
 0x5b4   :  { %14977 = vst [vmem:[#allocation146_spill] sm:$0xff] %v11658_v43  ;;  %14978 = vst [vmem:[#allocation148_spill] sm:$0xff] %v11660_v14 }
 0x5b5   :  { %v2039_v22 = vadd.f32 %v2038_v26, %v2037_v55  ;;  %v2051_v61 = vrot.slane %v2050_v17, 4  ;;  %5162 = vrot.lane.b32.xlu0 %v11499_v27, %s7804_s10  ;;  %5565 = vrot.lane.b32.xlu1 %v5520_v28, %s7792_s22 }
 0x5b7   :  { %v2040_v29 = vrot.slane %v2039_v22, 2  ;;  %v2052_v25 = vadd.f32 %v2051_v61, %v2050_v17  ;;  %v11667_v17 = vpop.permute.xlu0 %4763 }
 0x5b8   :  { %14979 = vst [vmem:[#allocation149_spill] sm:$0xff] %v11667_v17 }
 0x5b9   :  { %v2041_v63 = vadd.f32 %v2040_v29, %v2039_v22  ;;  %v2053_v54 = vrot.slane %v2052_v25, 2  ;;  %5323 = vrot.lane.b32.xlu0 %v11326_v39, %s7805_s9  ;;  %5641 = vrot.lane.b32.xlu1 %v5520_v28, %s7806_s0  ;;  %v11669_v29 = vpop.permute.xlu1 %4699 }
 0x5ba   :  { %14980 = vst [vmem:[#allocation151_spill] sm:$0xff] %v11669_v29 }
 0x5bb   :  { %v2042_v46 = vrot.slane %v2041_v63, 1  ;;  %v2054_v16 = vadd.f32 %v2053_v54, %v2052_v25 }
 0x5bd   :  { %v2055_v26 = vrot.slane %v2054_v16, 1  ;;  %5419 = vrot.lane.b32.xlu0 %v11226_v3, %s7805_s9  ;;  %v2043_v61 = vadd.f32 %v2042_v46, %v2041_v63  ;;  %5399 = vrot.lane.b32.xlu1 %v11266_v48, %s7806_s0  ;;  %v7404_v48 = vld [vmem:[#allocation3 + $0x8] sm:$0xff]  ;;  %v11689_v46 = vpop.permute.xlu0 %4545 }
 0x5be   :  { %14981 = vst [vmem:[#allocation150_spill] sm:$0xff] %v11689_v46 }
 0x5bf   :  { %v2056_v27 = vadd.f32 %v2055_v26, %v2054_v16  ;;  %v11673_v22 = vpop.f32.mrb[10].mxu0 }
 0x5c0   :  { %v3227_v28 = vmul.f32 %v11673_v22, %v11673_v22  ;;  %v11678_v25 = vpop.f32.mrb[11].mxu0 }
 0x5c1   :  { %v2057_v55 = vsel %vm743_vm4, %v2043_v61, %v2056_v27  ;;  %5555 = vrot.lane.b32.xlu0 %v11082_v57, %s7792_s22  ;;  %v3217_v16 = vadd.f32 %v11673_v22, %v11678_v25  ;;  %v3226_v63 = vmul.f32 %v11678_v25, %v11678_v25 }
 0x5c2   :  { %6416 = vmatmul.mubr.f32.vlgmr.msra.gmra.mrb[4].mxu1 %v2057_v55 }
 0x5c3   :  { %6904 = vmatpush3.bf16.msra.mxu1 %v11365_v4  ;;  %6488 = vmatprep.mubr.msk.f32.mxu1 %vm7803_vm3, %v7404_v48  ;;  %v3230_v54 = vadd.f32 %v3227_v28, %v3226_v63  ;;  %v11698_v4 = vpop.permute.xlu0 %4577 }
 0x5c4   :  { %6905 = vmatprep.subr.bf16.mxu1 %v14929_v15  ;;  %14982 = vst [vmem:[#allocation58_spill] sm:$0xff] %v11698_v4 }
 0x5c5   :  { %5631 = vrot.lane.b32.xlu0 %v11082_v57, %s7806_s0 }
 0x5c7   :  { %6907 = vmatpush3.bf16.msra.mxu1 %v11373_v45 }
 0x5c8   :  { %6908 = vmatprep.subr.bf16.mxu1 %v14929_v15 }
 0x5c9   :  { %5164 = vrot.lane.b32.xlu0 %v11247_v58, %s7804_s10 }
 0x5cb   :  { %6910 = vmatpush3.bf16.msra.mxu1 %v11385_v40  ;;  %v11712_v40 = vpop.permute.xlu0 %4765 }
 0x5cc   :  { %6911 = vmatprep.subr.bf16.mxu1 %v14929_v15  ;;  %14983 = vst [vmem:[#allocation155_spill] sm:$0xff] %v11712_v40 }
 0x5cd   :  { %5325 = vrot.lane.b32.xlu0 %v11355_v37, %s7805_s9  ;;  %v11703_v26 = vpop.f32.mrb[12].mxu0 }
 0x5ce   :  { %v11706_v57 = vpop.f32.mrb[13].mxu0  ;;  %v3229_v61 = vmul.f32 %v11703_v26, %v11703_v26 }
 0x5cf   :  { %6913 = vmatpush3.bf16.msra.mxu1 %v11400_v13  ;;  %v3218_v45 = vadd.f32 %v3217_v16, %v11706_v57  ;;  %v3228_v58 = vmul.f32 %v11706_v57, %v11706_v57  ;;  %v11724_v29 = vpop.permute.xlu0 %4647 }
 0x5d0   :  { %6914 = vmatprep.subr.bf16.mxu1 %v14929_v15  ;;  %14984 = vst [vmem:[#allocation154_spill] sm:$0xff] %v11724_v29 }
 0x5d1   :  { %5421 = vrot.lane.b32.xlu0 %v11260_v19, %s7805_s9  ;;  %v3219_v27 = vadd.f32 %v11703_v26, %v3218_v45  ;;  %v3231_v13 = vadd.f32 %v3230_v54, %v3228_v58 }
 0x5d3   :  { %6916 = vmatpush3.bf16.msra.mxu1 %v11412_v21  ;;  %v3220_v55 = vrot.slane %v3219_v27, 4  ;;  %v3232_v28 = vadd.f32 %v3231_v13, %v3229_v61 }
 0x5d4   :  { %6917 = vmatprep.subr.bf16.mxu1 %v14929_v15 }
 0x5d5   :  { %5557 = vrot.lane.b32.xlu0 %v11640_v2, %s7792_s22  ;;  %v3221_v16 = vadd.f32 %v3220_v55, %v3219_v27  ;;  %v3233_v63 = vrot.slane %v3232_v28, 4  ;;  %v11731_v27 = vpop.permute.xlu0 %4691 }
 0x5d6   :  { %14985 = vst [vmem:[#allocation156_spill] sm:$0xff] %v11731_v27 }
 0x5d7   :  { %6919 = vmatpush3.bf16.msra.mxu1 %v11420_v38  ;;  %v3222_v14 = vrot.slane %v3221_v16, 2  ;;  %v3234_v45 = vadd.f32 %v3233_v63, %v3232_v28 }
 0x5d8   :  { %6920 = vmatprep.subr.bf16.mxu1 %v14929_v15 }
 0x5d9   :  { %5633 = vrot.lane.b32.xlu0 %v11640_v2, %s7806_s0  ;;  %v3223_v21 = vadd.f32 %v3222_v14, %v3221_v16  ;;  %v3235_v54 = vrot.slane %v3234_v45, 2  ;;  %v11741_v55 = vpop.permute.xlu0 %4811 }
 0x5da   :  { %14987 = vst [vmem:[#allocation114_spill] sm:$0xff] %v11741_v55  ;;  %v15034_v55 = vld [vmem:[#allocation41_spill] sm:$0xff] }
 0x5db   :  { %6922 = vmatpush3.bf16.msra.mxu1 %v11429_v59  ;;  %v3224_v58 = vrot.slane %v3223_v21, 1  ;;  %v3236_v61 = vadd.f32 %v3235_v54, %v3234_v45  ;;  %v11739_v59 = vpop.permute.xlu1 %4819 }
 0x5dc   :  { %6923 = vmatprep.subr.bf16.mxu1 %v14929_v15  ;;  %14986 = vst [vmem:[#allocation62_spill] sm:$0xff] %v11739_v59  ;;  %v15035_v59 = vld [vmem:[#allocation42_spill] sm:$0xff] }
 0x5dd   :  { %5391 = vrot.lane.b32.xlu0 %v11326_v39, %s7806_s0  ;;  %v3237_v38 = vrot.slane %v3236_v61, 1  ;;  %v3225_v13 = vadd.f32 %v3224_v58, %v3223_v21  ;;  %v11745_v16 = vpop.permute.xlu0 %4649 }
 0x5de   :  { %14989 = vst [vmem:[#allocation167_spill] sm:$0xff] %v11745_v16 }
 0x5df   :  { %6925 = vmatpush3.bf16.msra.mxu1 %v11437_v47  ;;  %v3238_v2 = vadd.f32 %v3237_v38, %v3236_v61  ;;  %v11743_v28 = vpop.permute.xlu1 %4657 }
 0x5e0   :  { %6958 = vmatprep.subr.bf16.mxu1 %v14929_v15  ;;  %14988 = vst [vmem:[#allocation59_spill] sm:$0xff] %v11743_v28 }
 0x5e1   :  { %v3239_v14 = vsel %vm743_vm4, %v3225_v13, %v3238_v2  ;;  %v11749_v47 = vpop.permute.xlu0 %4693 }
 0x5e2   :  { %6489 = vmatmul.mubr.f32.vlgmr.msra.gmra.mrb[6].mxu1 %v3239_v14  ;;  %14991 = vst [vmem:[#allocation170_spill] sm:$0xff] %v11749_v47 }
 0x5e3   :  { %6561 = vmatprep.mubr.msk.f32.mxu1 %vm7803_vm3, %v7404_v48  ;;  %v11747_v63 = vpop.permute.xlu1 %4701 }
 0x5e4   :  { %14990 = vst [vmem:[#allocation168_spill] sm:$0xff] %v11747_v63 }
 0x5e5   :  { %v11753_v21 = vpop.permute.xlu0 %4813 }
 0x5e6   :  { %14993 = vst [vmem:[#allocation207_spill] sm:$0xff] %v11753_v21 }
 0x5e7   :  { %v11751_v45 = vpop.permute.xlu1 %4821 }
 0x5e8   :  { %14992 = vst [vmem:[#allocation169_spill] sm:$0xff] %v11751_v45 }
 0x5e9   :  { %v11757_v58 = vpop.permute.xlu0 %4579 }
 0x5ea   :  { %14995 = vst [vmem:[#allocation138_spill] sm:$0xff] %v11757_v58 }
 0x5eb   :  { %v11755_v54 = vpop.permute.xlu1 %4587 }
 0x5ec   :  { %14994 = vst [vmem:[#allocation47_spill] sm:$0xff] %v11755_v54 }
 0x5ed   :  { %v11761_v61 = vpop.permute.xlu0 %4767 }
 0x5ee   :  { %14997 = vst [vmem:[#allocation208_spill] sm:$0xff] %v11761_v61 }
 0x5ef   :  { %v11759_v48 = vpop.permute.xlu1 %4775 }
 0x5f0   :  { %14996 = vst [vmem:[#allocation56_spill] sm:$0xff] %v11759_v48 }
 0x5f1   :  { %v11765_v13 = vpop.permute.xlu0 %4581 }
 0x5f2   :  { %14999 = vst [vmem:[#allocation204_spill] sm:$0xff] %v11765_v13 }
 0x5f3   :  { %v11763_v38 = vpop.permute.xlu1 %4589 }
 0x5f4   :  { %14998 = vst [vmem:[#allocation210_spill] sm:$0xff] %v11763_v38 }
 0x5f5   :  { %v11769_v14 = vpop.permute.xlu0 %4769 }
 0x5f6   :  { %15001 = vst [vmem:[#allocation205_spill] sm:$0xff] %v11769_v14 }
 0x5f7   :  { %v11767_v2 = vpop.permute.xlu1 %4777 }
 0x5f8   :  { %15000 = vst [vmem:[#allocation203_spill] sm:$0xff] %v11767_v2 }
 0x5f9   :  { %v11773_v45 = vpop.permute.xlu0 %4651 }
 0x5fa   :  { %15003 = vst [vmem:[#allocation53_spill] sm:$0xff] %v11773_v45 }
 0x5fb   :  { %v11771_v15 = vpop.permute.xlu1 %4659 }
 0x5fc   :  { %15002 = vst [vmem:[#allocation209_spill] sm:$0xff] %v11771_v15 }
 0x5fd   :  { %v11777_v54 = vpop.permute.xlu0 %4653 }
 0x5fe   :  { %15005 = vst [vmem:[#allocation51_spill] sm:$0xff] %v11777_v54 }
 0x5ff   :  { %v11775_v21 = vpop.permute.xlu1 %4661 }
 0x600   :  { %15004 = vst [vmem:[#allocation206_spill] sm:$0xff] %v11775_v21 }
 0x601   :  { %v11781_v48 = vpop.permute.xlu0 %5093 }
 0x602   :  { %15007 = vst [vmem:[#allocation50_spill] sm:$0xff] %v11781_v48 }
 0x603   :  { %v11779_v58 = vpop.permute.xlu1 %5101 }
 0x604   :  { %15006 = vst [vmem:[#allocation211_spill] sm:$0xff] %v11779_v58 }
 0x605   :  { %v11785_v38 = vpop.permute.xlu0 %5186 }
 0x606   :  { %15009 = vst [vmem:[#allocation57_spill] sm:$0xff] %v11785_v38 }
 0x607   :  { %v11783_v61 = vpop.permute.xlu1 %5194 }
 0x608   :  { %15008 = vst [vmem:[#allocation55_spill] sm:$0xff] %v11783_v61 }
 0x609   :  { %v11789_v2 = vpop.permute.xlu0 %5095 }
 0x60a   :  { %15011 = vst [vmem:[#allocation172_spill] sm:$0xff] %v11789_v2 }
 0x60b   :  { %v11787_v13 = vpop.permute.xlu1 %5103 }
 0x60c   :  { %15010 = vst [vmem:[#allocation171_spill] sm:$0xff] %v11787_v13 }
 0x60d   :  { %v11793_v15 = vpop.permute.xlu0 %5188 }
 0x60e   :  { %15013 = vst [vmem:[#allocation212_spill] sm:$0xff] %v11793_v15 }
 0x60f   :  { %v11791_v14 = vpop.permute.xlu1 %5196 }
 0x610   :  { %15012 = vst [vmem:[#allocation213_spill] sm:$0xff] %v11791_v14 }
 0x611   :  { %v11797_v21 = vpop.permute.xlu0 %5122 }
 0x612   :  { %15015 = vst [vmem:[#allocation158_spill] sm:$0xff] %v11797_v21 }
 0x613   :  { %v11795_v45 = vpop.permute.xlu1 %5130 }
 0x614   :  { %15014 = vst [vmem:[#allocation157_spill] sm:$0xff] %v11795_v45 }
 0x615   :  { %v11801_v58 = vpop.permute.xlu0 %5219 }
 0x616   :  { %15017 = vst [vmem:[#allocation137_spill] sm:$0xff] %v11801_v58 }
 0x617   :  { %v11799_v54 = vpop.permute.xlu1 %5227 }
 0x618   :  { %15016 = vst [vmem:[#allocation214_spill] sm:$0xff] %v11799_v54 }
 0x619   :  { %v11805_v61 = vpop.permute.xlu0 %5124 }
 0x61a   :  { %15019 = vst [vmem:[#allocation160_spill] sm:$0xff] %v11805_v61 }
 0x61b   :  { %v11803_v48 = vpop.permute.xlu1 %5132 }
 0x61c   :  { %15018 = vst [vmem:[#allocation136_spill] sm:$0xff] %v11803_v48 }
 0x61d   :  { %v11809_v13 = vpop.permute.xlu0 %5221 }
 0x61e   :  { %15021 = vst [vmem:[#allocation161_spill] sm:$0xff] %v11809_v13 }
 0x61f   :  { %v11807_v38 = vpop.permute.xlu1 %5229 }
 0x620   :  { %15020 = vst [vmem:[#allocation159_spill] sm:$0xff] %v11807_v38 }
 0x621   :  { %v11813_v15 = vpop.permute.xlu0 %5097 }
 0x622   :  { %15023 = vst [vmem:[#allocation164_spill] sm:$0xff] %v11813_v15  ;;  %v992_v15 = vstv %s5935_s11 }
 0x623   :  { %v11811_v2 = vpop.permute.xlu1 %5105  ;;  %v995_v27 = vmul.f32 %v992_v15, %v15035_v59  ;;  %v15041_v59 = vld [vmem:[#allocation71_spill] sm:$0xff] }
 0x624   :  { %15022 = vst [vmem:[#allocation162_spill] sm:$0xff] %v11811_v2 }
 0x625   :  { %v11817_v58 = vpop.permute.xlu0 %5190 }
 0x626   :  { %15025 = vst [vmem:[#allocation166_spill] sm:$0xff] %v11817_v58 }
 0x627   :  { %v11815_v54 = vpop.permute.xlu1 %5198 }
 0x628   :  { %15024 = vst [vmem:[#allocation163_spill] sm:$0xff] %v11815_v54 }
 0x629   :  { %v11821_v38 = vpop.permute.xlu0 %5287 }
 0x62a   :  { %15027 = vst [vmem:[#allocation63_spill] sm:$0xff] %v11821_v38 }
 0x62b   :  { %v11819_v16 = vpop.permute.xlu1 %5295 }
 0x62c   :  { %15026 = vst [vmem:[#allocation165_spill] sm:$0xff] %v11819_v16  ;;  %v15033_v16 = vld [vmem:[#allocation40_spill] sm:$0xff] }
 0x62d   :  { %v994_v38 = vmul.f32 %v992_v15, %v15033_v16 }
 0x62f   :  { %v11823_v2 = vpop.permute.xlu1 %5107  ;;  %v998_v17 = vadd.f32 %v994_v38, %v15041_v59 }
 0x630   :  { %15028 = vst [vmem:[#allocation174_spill] sm:$0xff] %v11823_v2  ;;  %v15036_v2 = vld [vmem:[#allocation44_spill] sm:$0xff] }
 0x631   :  { %v996_v29 = vmul.f32 %v992_v15, %v15036_v2 }
 0x633   :  { %v11827_v13 = vpop.permute.xlu1 %5200 }
 0x634   :  { %15030 = vst [vmem:[#allocation85_spill] sm:$0xff] %v11827_v13  ;;  %v15037_v13 = vld [vmem:[#allocation76_spill] sm:$0xff] }
 0x695   :  { %v2140_v14 = vpop.f32.mrb[4].mxu1 }
 0x696   :  { %v2144_v45 = vmul.f32 0.001953125, %v2140_v14  ;;  %v6417_v47 = vpop.f32.mrb[5].mxu1  ;;  %v11825_v14 = vpop.permute.xlu0 %5099 }
 0x697   :  { %15029 = vst [vmem:[#allocation173_spill] sm:$0xff] %v11825_v14  ;;  %v2153_v47 = vstv %s5936_s24 }
 0x698   :  { %v2145_v21 = vmul.f32 %v2144_v45, %v2144_v45 }
 0x69a   :  { %v2147_v63 = vrot.slane %v2145_v21, 7 }
 0x69c   :  { %v2149_v48 = vsub.f32 %v2144_v45, %v2147_v63  ;;  %v11829_v63 = vpop.permute.xlu0 %5192 }
 0x69d   :  { %15031 = vst [vmem:[#allocation103_spill] sm:$0xff] %v11829_v63 }
 0x69e   :  { %v2150_v28 = vmax.f32 %v2149_v48, 0.0 }
 0x6a0   :  { %v2151_v61 = vadd.f32 1e-05, %v2150_v28  ;;  %v15032_v28 = vld [vmem:[#allocation77_spill] sm:$0xff]  ;;  %v11843_v16 = vpop.permute.xlu0 %5289 }
 0x6a1   :  { %15039 = vst [vmem:[#allocation175_spill] sm:$0xff] %v11843_v16 }
 0x6a2   :  { %7387 = vrsqrt.f32 %v2151_v61  ;;  %v993_v61 = vmul.f32 %v992_v15, %v15034_v55  ;;  %v15040_v55 = vld [vmem:[#allocation69_spill] sm:$0xff]  ;;  %v15042_v15 = vld [vmem:[#allocation74_spill] sm:$0xff] }
 0x6a4   :  { %v997_v46 = vadd.f32 %v993_v61, %v15040_v55 }
 0x6ac   :  { %v7388_v21 = vpop.eup %7387 }
 0x6ad   :  { %v2154_v54 = vmul.f32 %v7388_v21, %v2153_v47 }
 0x6af   :  { %v2158_v48 = vrot.slane %v2154_v54, %v15032_v28  ;;  %v2164_v58 = vrot.slane %v2154_v54, 1  ;;  %v11841_v54 = vpop.permute.xlu1 %5297 }
 0x6b0   :  { %15038 = vst [vmem:[#allocation182_spill] sm:$0xff] %v11841_v54 }
 0x6b1   :  { %v2166_v14 = vmul.f32 %v2164_v58, %v2144_v45  ;;  %v2159_v40 = vmul.f32 %v2158_v48, %v11607_v50  ;;  %v2160_v47 = vmul.f32 %v11601_v9, %v2158_v48  ;;  %v2161_v21 = vmul.f32 %v2158_v48, %v11633_v42  ;;  %v15043_v58 = vld [vmem:[#allocation66_spill] sm:$0xff] }
 0x6b2   :  { %v2162_v63 = vmul.f32 %v11629_v1, %v2158_v48  ;;  %v999_v45 = vadd.f32 %v995_v27, %v15042_v15  ;;  %v1000_v50 = vadd.f32 %v996_v29, %v15043_v58  ;;  %v11859_v27 = vpop.permute.xlu0 %5126 }
 0x6b3   :  { %v2170_v4 = vrot.slane %v2166_v14, %v15037_v13  ;;  %v11857_v38 = vpop.permute.xlu1 %5134  ;;  %15049 = vst [vmem:[#allocation193_spill] sm:$0xff] %v11859_v27 }
 0x6b4   :  { %15048 = vst [vmem:[#allocation177_spill] sm:$0xff] %v11857_v38 }
 0x6b5   :  { %v2171_v2 = vsub.f32 %v2159_v40, %v2170_v4  ;;  %v2172_v9 = vsub.f32 %v2160_v47, %v2170_v4  ;;  %v2173_v43 = vsub.f32 %v2161_v21, %v2170_v4  ;;  %v2174_v42 = vsub.f32 %v2162_v63, %v2170_v4  ;;  %v3306_v62 = vpop.f32.mrb[6].mxu1 }
 0x6b6   :  { %v3310_v61 = vmul.f32 0.001953125, %v3306_v62  ;;  %v6490_v55 = vpop.f32.mrb[7].mxu1  ;;  %v11863_v4 = vpop.permute.xlu0 %5158 }
 0x6b7   :  { %v11849_v1 = vadd.f32 %v2171_v2, %v997_v46  ;;  %v11851_v14 = vadd.f32 %v2172_v9, %v998_v17  ;;  %v11853_v48 = vadd.f32 %v2173_v43, %v999_v45  ;;  %v11855_v16 = vadd.f32 %v2174_v42, %v1000_v50  ;;  %v11861_v21 = vpop.permute.xlu1 %5166  ;;  %15051 = vst [vmem:[#allocation75_spill] sm:$0xff] %v11863_v4 }
 0x6b8   :  { %v3311_v29 = vmul.f32 %v3310_v61, %v3310_v61  ;;  %15050 = vst [vmem:[#allocation185_spill] sm:$0xff] %v11861_v21  ;;  %v4240_v21 = vld [vmem:[#allocation23 + $0x8] sm:$0xff] }
 0x6b9   :  { %15044 = vst [vmem:[#allocation176_spill] sm:$0xff] %v11849_v1  ;;  %15045 = vst [vmem:[#allocation202_spill] sm:$0xff] %v11851_v14 }
 0x6ba   :  { %15046 = vst [vmem:[#allocation184_spill] sm:$0xff] %v11853_v48  ;;  %15047 = vst [vmem:[#allocation178_spill] sm:$0xff] %v11855_v16  ;;  %v3313_v40 = vrot.slane %v3311_v29, 7  ;;  %v11867_v63 = vpop.permute.xlu0 %5223 }
 0x6bb   :  { %v11865_v43 = vpop.permute.xlu1 %5231  ;;  %15053 = vst [vmem:[#allocation187_spill] sm:$0xff] %v11867_v63 }
 0x6bc   :  { %v3315_v47 = vsub.f32 %v3310_v61, %v3313_v40  ;;  %15052 = vst [vmem:[#allocation105_spill] sm:$0xff] %v11865_v43 }
 0x6be   :  { %v3316_v46 = vmax.f32 %v3315_v47, 0.0  ;;  %v11871_v59 = vpop.permute.xlu0 %5319 }
 0x6bf   :  { %v11869_v62 = vpop.permute.xlu1 %5327  ;;  %15055 = vst [vmem:[#allocation190_spill] sm:$0xff] %v11871_v59 }
 0x6c0   :  { %v3317_v17 = vadd.f32 1e-05, %v3316_v46  ;;  %15054 = vst [vmem:[#allocation73_spill] sm:$0xff] %v11869_v62 }
 0x6c2   :  { %7389 = vrsqrt.f32 %v3317_v17  ;;  %v11880_v29 = vpop.permute.xlu0 %5128 }
 0x6c3   :  { %v11878_v55 = vpop.permute.xlu1 %5136  ;;  %15057 = vst [vmem:[#allocation189_spill] sm:$0xff] %v11880_v29 }
 0x6c4   :  { %15056 = vst [vmem:[#allocation186_spill] sm:$0xff] %v11878_v55 }
 0x6cc   :  { %v7390_v15 = vpop.eup %7389 }
 0x6cd   :  { %v3322_v45 = vrot.slane %v7390_v15, %v15032_v28  ;;  %v3328_v58 = vrot.slane %v7390_v15, 1  ;;  %v11883_v15 = vpop.permute.xlu1 %5168 }
 0x6ce   :  { %15058 = vst [vmem:[#allocation68_spill] sm:$0xff] %v11883_v15 }
 0x6cf   :  { %v3323_v50 = vmul.f32 %v3322_v45, %v11678_v25  ;;  %v3324_v2 = vmul.f32 %v11673_v22, %v3322_v45  ;;  %v3325_v9 = vmul.f32 %v3322_v45, %v11706_v57  ;;  %v3326_v42 = vmul.f32 %v11703_v26, %v3322_v45  ;;  %v11885_v25 = vpop.permute.xlu0 %5160 }
 0x6d0   :  { %v3330_v40 = vmul.f32 %v3328_v58, %v3310_v61  ;;  %15059 = vst [vmem:[#allocation64_spill] sm:$0xff] %v11885_v25 }
 0x6d1   :  { %v11903_v61 = vpop.permute.xlu1 %5233 }
 0x6d2   :  { %v3334_v47 = vrot.slane %v3330_v40, %v15037_v13  ;;  %15061 = vst [vmem:[#allocation130_spill] sm:$0xff] %v11903_v61 }
 0x6d4   :  { %v3335_v46 = vsub.f32 %v3323_v50, %v3334_v47  ;;  %v3336_v17 = vsub.f32 %v3324_v2, %v3334_v47  ;;  %v3337_v16 = vsub.f32 %v3325_v9, %v3334_v47  ;;  %v3338_v48 = vsub.f32 %v3326_v42, %v3334_v47  ;;  %v3347_v50 = vld [vmem:[#allocation3] sm:$0xc0] }
 0x6d5   :  { %v3371_v2 = vrot.slane %v3347_v50, 6  ;;  %v3353_v47 = vld [vmem:[#allocation3 + $0x40] sm:$0xc0] }
 0x6d6   :  { %v11887_v22 = vmax.f32 %v3335_v46, 0.0  ;;  %v11889_v57 = vmax.f32 %v3336_v17, 0.0  ;;  %v11891_v26 = vmax.f32 %v3337_v16, 0.0  ;;  %v11893_v45 = vmax.f32 %v3338_v48, 0.0  ;;  %v11905_v16 = vpop.permute.xlu0 %5225  ;;  %v11915_v48 = vpop.permute.xlu1 %5329 }
 0x6d7   :  { %15062 = vst [vmem:[#allocation46_spill] sm:$0xff] %v11905_v16  ;;  %15063 = vst [vmem:[#allocation88_spill] sm:$0xff] %v11915_v48  ;;  %v3381_v17 = vrot.slane %v3353_v47, 6 }
 0x6d8   :  { %15060 = vst [vmem:[#allocation65_spill] sm:$0xff] %v11891_v26  ;;  %3343 = vst [vmem:[#allocation3 + $0x10] sm:$0xff] %v11887_v22  ;;  %3787 = vrot.lane.b32.xlu1 %v11887_v22, %s7800_s16  ;;  %3711 = vrot.lane.b32.xlu0 %v11887_v22, %s7792_s22  ;;  %v3372_v9 = vrot.slane %v11887_v22, 6  ;;  %v3382_v14 = vrot.slane %v11891_v26, 6 }
 0x6d9   :  { %3344 = vst [vmem:[#allocation3 + $0x20] sm:$0xff] %v11889_v57  ;;  %3345 = vst [vmem:[#allocation3 + $0x50] sm:$0xff] %v11891_v26 }
 0x6da   :  { %3346 = vst [vmem:[#allocation3 + $0x60] sm:$0xff] %v11893_v45  ;;  %v11917_v58 = vpop.permute.xlu0 %5321  ;;  %v11924_v42 = vpop.permute.xlu1 %5299  ;;  %v11933_v46 = vsel %vm2935_vm9, %v3371_v2, %v3372_v9  ;;  %v11945_v61 = vsel %vm2935_vm9, %v3381_v17, %v3382_v14  ;;  %v3523_v17 = vld [vmem:[#allocation3] sm:$0x80] }
 0x6db   :  { %15064 = vst [vmem:[#allocation180_spill] sm:$0xff] %v11917_v58  ;;  %15065 = vst [vmem:[#allocation179_spill] sm:$0xff] %v11924_v42  ;;  %v3540_v42 = vrot.slane %v11887_v22, 7  ;;  %v4060_v58 = vrot.slane %v11889_v57, 2 }
 0x6dc   :  { %3713 = vrot.lane.b32.xlu1 %v11889_v57, %s7792_s22  ;;  %3789 = vrot.lane.b32.xlu0 %v11889_v57, %s7800_s16  ;;  %15067 = vst [vmem:[#allocation196_spill] sm:$0xff] %v11933_v46  ;;  %15070 = vst [vmem:[#allocation183_spill] sm:$0xff] %v11945_v61 }
 0x6de   :  { %v11926_v40 = vpop.permute.xlu0 %5291  ;;  %v11940_v50 = vpop.permute.xlu1 %5395 }
 0x6df   :  { %15066 = vst [vmem:[#allocation197_spill] sm:$0xff] %v11926_v40  ;;  %15068 = vst [vmem:[#allocation198_spill] sm:$0xff] %v11940_v50  ;;  %v3539_v40 = vrot.slane %v3523_v17, 7 }
 0x6e0   :  { %3819 = vrot.lane.b32.xlu1 %v11887_v22, %s7804_s10  ;;  %3743 = vrot.lane.b32.xlu0 %v11887_v22, %s7783_s20  ;;  %v3351_v2 = vld [vmem:[#allocation3 + $0x20] sm:$0x3f] }
 0x6e1   :  { %v3377_v47 = vrot.slane %v3351_v2, 6  ;;  %v11972_v15 = vsel %vm743_vm4, %v3539_v40, %v3540_v42  ;;  %v3357_v17 = vld [vmem:[#allocation3 + $0x60] sm:$0x3f] }
 0x6e2   :  { %v11942_v1 = vpop.permute.xlu0 %5387  ;;  %v11951_v16 = vpop.permute.xlu1 %5531  ;;  %15075 = vst [vmem:[#allocation95_spill] sm:$0xff] %v11972_v15 }
 0x6e3   :  { %15069 = vst [vmem:[#allocation181_spill] sm:$0xff] %v11942_v1  ;;  %15071 = vst [vmem:[#allocation201_spill] sm:$0xff] %v11951_v16  ;;  %v11960_v29 = vsel %vm2935_vm9, %v3372_v9, %v3377_v47 }
 0x6e4   :  { %3821 = vrot.lane.b32.xlu1 %v11889_v57, %s7804_s10  ;;  %3745 = vrot.lane.b32.xlu0 %v11889_v57, %s7783_s20 }
 0x6e6   :  { %v11953_v55 = vpop.permute.xlu0 %5523  ;;  %v11967_v2 = vpop.permute.xlu1 %5301 }
 0x6e7   :  { %15072 = vst [vmem:[#allocation200_spill] sm:$0xff] %v11953_v55  ;;  %15073 = vst [vmem:[#allocation199_spill] sm:$0xff] %v11967_v2 }
 0x6e8   :  { %3715 = vrot.lane.b32.xlu1 %v11891_v26, %s7792_s22  ;;  %3749 = vrot.lane.b32.xlu0 %v11893_v45, %s7783_s20 }
 0x6ea   :  { %v11969_v25 = vpop.permute.xlu0 %5293  ;;  %v11978_v9 = vpop.permute.xlu1 %5397 }
 0x6eb   :  { %15074 = vst [vmem:[#allocation94_spill] sm:$0xff] %v11969_v25  ;;  %15076 = vst [vmem:[#allocation48_spill] sm:$0xff] %v11978_v9  ;;  %v3387_v25 = vrot.slane %v3357_v17, 6  ;;  %v3525_v17 = vld [vmem:[#allocation3 + $0x20] sm:$0x7f] }
 0x6ec   :  { %3791 = vrot.lane.b32.xlu1 %v11891_v26, %s7800_s16  ;;  %3399 = vrot.lane.b32.xlu0 %v11933_v46, %s7792_s22  ;;  %v3545_v9 = vrot.slane %v3525_v17, 7 }
 0x6ee   :  { %v11980_v47 = vpop.permute.xlu0 %5389  ;;  %v11990_v40 = vpop.permute.xlu1 %5533 }
 0x6ef   :  { %15077 = vst [vmem:[#allocation191_spill] sm:$0xff] %v11980_v47  ;;  %15078 = vst [vmem:[#allocation194_spill] sm:$0xff] %v11990_v40  ;;  %v11995_v47 = vsel %vm2935_vm9, %v3382_v14, %v3387_v25  ;;  %v12010_v14 = vsel %vm743_vm4, %v3540_v42, %v3545_v9  ;;  %v3550_v42 = vrot.slane %v11891_v26, 7 }
 0x6f0   :  { %3717 = vrot.lane.b32.xlu1 %v11893_v45, %s7792_s22  ;;  %3403 = vrot.lane.b32.xlu0 %v11945_v61, %s7792_s22  ;;  %15080 = vst [vmem:[#allocation116_spill] sm:$0xff] %v11995_v47  ;;  %15083 = vst [vmem:[#allocation132_spill] sm:$0xff] %v12010_v14 }
 0x6f2   :  { %v11992_v2 = vpop.permute.xlu0 %5525  ;;  %v12001_v43 = vpop.permute.xlu1 %5170 }
 0x6f3   :  { %15079 = vst [vmem:[#allocation192_spill] sm:$0xff] %v11992_v2  ;;  %15081 = vst [vmem:[#allocation188_spill] sm:$0xff] %v12001_v43 }
 0x6f4   :  { %3793 = vrot.lane.b32.xlu1 %v11893_v45, %s7800_s16  ;;  %3491 = vrot.lane.b32.xlu0 %v11933_v46, %s7804_s10 }
 0x6f6   :  { %v12003_v63 = vpop.permute.xlu0 %5162  ;;  %v12016_v25 = vpop.permute.xlu1 %5331 }
 0x6f7   :  { %15082 = vst [vmem:[#allocation89_spill] sm:$0xff] %v12003_v63  ;;  %15084 = vst [vmem:[#allocation139_spill] sm:$0xff] %v12016_v25  ;;  %v3527_v63 = vld [vmem:[#allocation3 + $0x40] sm:$0x80] }
 0x6f8   :  { %3747 = vrot.lane.b32.xlu1 %v11891_v26, %s7783_s20  ;;  %3493 = vrot.lane.b32.xlu0 %v11960_v29, %s7804_s10  ;;  %v3549_v43 = vrot.slane %v3527_v63, 7  ;;  %v4043_v63 = vld [vmem:[#allocation3 + $0x10] sm:$0xfc] }
 0x6f9   :  { %v4059_v48 = vrot.slane %v4043_v63, 2 }
 0x6fa   :  { %v12018_v17 = vpop.permute.xlu0 %5323  ;;  %v12025_v9 = vpop.permute.xlu1 %5427  ;;  %v12034_v25 = vsel %vm743_vm4, %v3549_v43, %v3550_v42  ;;  %v3529_v43 = vld [vmem:[#allocation3 + $0x60] sm:$0x7f] }
 0x6fb   :  { %15085 = vst [vmem:[#allocation195_spill] sm:$0xff] %v12018_v17  ;;  %15086 = vst [vmem:[#allocation40_spill] sm:$0xff] %v12025_v9  ;;  %v12050_v38 = vsel %vm2212_vm8, %v4059_v48, %v4060_v58  ;;  %v3555_v27 = vrot.slane %v3529_v43, 7  ;;  %v4045_v48 = vld [vmem:[#allocation3 + $0x30] sm:$0x3] }
 0x6fc   :  { %3823 = vrot.lane.b32.xlu1 %v11891_v26, %s7804_s10  ;;  %3643 = vrot.lane.b32.xlu0 %v11972_v15, %s7800_s16  ;;  %15088 = vst [vmem:[#allocation42_spill] sm:$0xff] %v12034_v25  ;;  %15091 = vst [vmem:[#allocation71_spill] sm:$0xff] %v12050_v38 }
 0x6fd   :  { %v12061_v63 = vsel %vm743_vm4, %v3550_v42, %v3555_v27  ;;  %v3851_v27 = vld [vmem:[#allocation3 + $0x10] sm:$0xfe] }
 0x6fe   :  { %v12027_v40 = vpop.permute.xlu0 %5419  ;;  %v12040_v17 = vpop.permute.xlu1 %5563  ;;  %15094 = vst [vmem:[#allocation215_spill] sm:$0xff] %v12061_v63 }
 0x6ff   :  { %15087 = vst [vmem:[#allocation41_spill] sm:$0xff] %v12027_v40  ;;  %15089 = vst [vmem:[#allocation44_spill] sm:$0xff] %v12040_v17 }
 0x700   :  { %3825 = vrot.lane.b32.xlu1 %v11893_v45, %s7804_s10  ;;  %3429 = vrot.lane.b32.xlu0 %v11960_v29, %s7783_s20 }
 0x702   :  { %v12042_v2 = vpop.permute.xlu0 %5555  ;;  %v12052_v9 = vpop.permute.xlu1 %5639 }
 0x703   :  { %15090 = vst [vmem:[#allocation69_spill] sm:$0xff] %v12042_v2  ;;  %15092 = vst [vmem:[#allocation74_spill] sm:$0xff] %v12052_v9  ;;  %v3875_v9 = vrot.slane %v3851_v27, 1  ;;  %v3855_v27 = vld [vmem:[#allocation3 + $0x30] sm:$0x1] }
 0x704   :  { %3401 = vrot.lane.b32.xlu1 %v11960_v29, %s7792_s22  ;;  %3495 = vrot.lane.b32.xlu0 %v11945_v61, %s7804_s10 }
 0x706   :  { %v12054_v40 = vpop.permute.xlu0 %5631  ;;  %v12067_v43 = vpop.permute.xlu1 %5172 }
 0x707   :  { %15093 = vst [vmem:[#allocation66_spill] sm:$0xff] %v12054_v40  ;;  %15095 = vst [vmem:[#allocation216_spill] sm:$0xff] %v12067_v43  ;;  %v4065_v40 = vrot.slane %v4045_v48, 2  ;;  %v3876_v48 = vrot.slane %v11889_v57, 1 }
 0x708   :  { %3405 = vrot.lane.b32.xlu1 %v11995_v47, %s7792_s22  ;;  %3599 = vrot.lane.b32.xlu0 %v11972_v15, %s7783_s20 }
 0x709   :  { %v12076_v42 = vsel %vm2212_vm8, %v4060_v58, %v4065_v40 }
 0x70a   :  { %v12069_v54 = vpop.permute.xlu0 %5164  ;;  %15097 = vst [vmem:[#allocation218_spill] sm:$0xff] %v12076_v42  ;;  %v12078_v17 = vpop.permute.xlu1 %5333 }
 0x70b   :  { %15096 = vst [vmem:[#allocation217_spill] sm:$0xff] %v12069_v54  ;;  %15098 = vst [vmem:[#allocation219_spill] sm:$0xff] %v12078_v17  ;;  %v12088_v54 = vsel %vm1817_vm6, %v3875_v9, %v3876_v48  ;;  %v3861_v17 = vld [vmem:[#allocation3 + $0x70] sm:$0x1]  ;;  %v3881_v9 = vrot.slane %v3855_v27, 1 }
 0x70c   :  { %3427 = vrot.lane.b32.xlu1 %v11933_v46, %s7783_s20  ;;  %3675 = vrot.lane.b32.xlu0 %v11972_v15, %s7804_s10  ;;  %15100 = vst [vmem:[#allocation221_spill] sm:$0xff] %v12088_v54  ;;  %v3891_v43 = vrot.slane %v3861_v17, 1  ;;  %v3857_v17 = vld [vmem:[#allocation3 + $0x50] sm:$0xfe] }
 0x70e   :  { %v12080_v2 = vpop.permute.xlu0 %5325  ;;  %v12094_v58 = vpop.permute.xlu1 %5429 }
 0x70f   :  { %15099 = vst [vmem:[#allocation220_spill] sm:$0xff] %v12080_v2  ;;  %15101 = vst [vmem:[#allocation222_spill] sm:$0xff] %v12094_v58  ;;  %v3886_v2 = vrot.slane %v11893_v45, 1  ;;  %v12112_v58 = vsel %vm1817_vm6, %v3876_v48, %v3881_v9 }
 0x710   :  { %3567 = vrot.lane.b32.xlu1 %v11972_v15, %s7792_s22  ;;  %3677 = vrot.lane.b32.xlu0 %v12010_v14, %s7804_s10  ;;  %15105 = vst [vmem:[#allocation226_spill] sm:$0xff] %v12112_v58 }
 0x712   :  { %v12096_v40 = vpop.permute.xlu0 %5421  ;;  %v12103_v16 = vpop.permute.xlu1 %5565 }
 0x713   :  { %15102 = vst [vmem:[#allocation223_spill] sm:$0xff] %v12096_v40  ;;  %15103 = vst [vmem:[#allocation224_spill] sm:$0xff] %v12103_v16  ;;  %v12115_v40 = vsel %vm1817_vm6, %v3886_v2, %v3891_v43  ;;  %v4047_v43 = vld [vmem:[#allocation3 + $0x50] sm:$0xfc] }
 0x714   :  { %3569 = vrot.lane.b32.xlu1 %v12010_v14, %s7792_s22  ;;  %3433 = vrot.lane.b32.xlu0 %v11995_v47, %s7783_s20  ;;  %15106 = vst [vmem:[#allocation227_spill] sm:$0xff] %v12115_v40  ;;  %v4069_v50 = vrot.slane %v4047_v43, 2 }
 0x716   :  { %v12105_v55 = vpop.permute.xlu0 %5557  ;;  %v12121_v27 = vpop.permute.xlu1 %5641 }
 0x717   :  { %15104 = vst [vmem:[#allocation225_spill] sm:$0xff] %v12105_v55  ;;  %15107 = vst [vmem:[#allocation228_spill] sm:$0xff] %v12121_v27  ;;  %v3885_v55 = vrot.slane %v3857_v17, 1  ;;  %v4049_v17 = vld [vmem:[#allocation3 + $0x70] sm:$0x3] }
 0x718   :  { %3645 = vrot.lane.b32.xlu1 %v12010_v14, %s7800_s16  ;;  %3465 = vrot.lane.b32.xlu0 %v11960_v29, %s7800_s16 }
 0x719   :  { %v12134_v1 = vsel %vm1817_vm6, %v3885_v55, %v3886_v2  ;;  %v4075_v55 = vrot.slane %v4049_v17, 2 }
 0x71a   :  { %v12123_v16 = vpop.permute.xlu0 %5633  ;;  %v12129_v48 = vpop.permute.xlu1 %5399  ;;  %15111 = vst [vmem:[#allocation232_spill] sm:$0xff] %v12134_v1 }
 0x71b   :  { %15108 = vst [vmem:[#allocation229_spill] sm:$0xff] %v12123_v16  ;;  %15109 = vst [vmem:[#allocation230_spill] sm:$0xff] %v12129_v48  ;;  %v4070_v16 = vrot.slane %v11893_v45, 2  ;;  %v4239_v48 = vld [vmem:[#allocation23] sm:$0xff] }
 0x71c   :  { %3497 = vrot.lane.b32.xlu1 %v11995_v47, %s7804_s10  ;;  %3603 = vrot.lane.b32.xlu0 %v12034_v25, %s7783_s20  ;;  %v6926_v2 = vpack.c.bf16 %v4240_v21, %v4239_v48  ;;  %v4241_v21 = vld [vmem:[#allocation23 + $0x10] sm:$0xff] }
 0x71d   :  { %v12157_v62 = vsel %vm2212_vm8, %v4070_v16, %v4075_v55 }
 0x71e   :  { %v12131_v9 = vpop.permute.xlu0 %5391  ;;  %6927 = vmatprep.subr.bf16.mxu0 %v6926_v2  ;;  %15117 = vst [vmem:[#allocation238_spill] sm:$0xff] %v12157_v62 }
 0x71f   :  { %15110 = vst [vmem:[#allocation231_spill] sm:$0xff] %v12131_v9  ;;  %v12146_v9 = vsel %vm2212_vm8, %v4069_v50, %v4070_v16  ;;  %6929 = vmatpush3.bf16.msra.mxu0 %v6926_v2  ;;  %v4242_v50 = vld [vmem:[#allocation23 + $0x18] sm:$0xff] }
 0x720   :  { %3601 = vrot.lane.b32.xlu1 %v12010_v14, %s7783_s20  ;;  %3679 = vrot.lane.b32.xlu0 %v12034_v25, %s7804_s10  ;;  %15114 = vst [vmem:[#allocation235_spill] sm:$0xff] %v12146_v9  ;;  %v6930_v59 = vpack.c.bf16 %v4242_v50, %v4241_v21 }
 0x722   :  { %6931 = vmatprep.subr.bf16.mxu0 %v6930_v59 }
 0x723   :  { %6933 = vmatpush3.bf16.msra.mxu0 %v6930_v59 }
 0x724   :  { %3431 = vrot.lane.b32.xlu1 %v11945_v61, %s7783_s20  ;;  %4087 = vrot.lane.b32.xlu0 %v12050_v38, %s7792_s22 }
 0x728   :  { %3463 = vrot.lane.b32.xlu1 %v11933_v46, %s7800_s16  ;;  %3605 = vrot.lane.b32.xlu0 %v12061_v63, %s7783_s20 }
 0x72c   :  { %3571 = vrot.lane.b32.xlu1 %v12034_v25, %s7792_s22  ;;  %3681 = vrot.lane.b32.xlu0 %v12061_v63, %s7804_s10 }
 0x730   :  { %3647 = vrot.lane.b32.xlu1 %v12034_v25, %s7800_s16  ;;  %4089 = vrot.lane.b32.xlu0 %v12076_v42, %s7792_s22  ;;  %v4244_v25 = vld [vmem:[#allocation23 + $0x28] sm:$0xff] }
 0x734   :  { %3935 = vrot.lane.b32.xlu1 %v12088_v54, %s7783_s20  ;;  %3903 = vrot.lane.b32.xlu0 %v12088_v54, %s7792_s22 }
 0x738   :  { %3573 = vrot.lane.b32.xlu1 %v12061_v63, %s7792_s22  ;;  %4195 = vrot.lane.b32.xlu0 %v12050_v38, %s7804_s10 }
 0x73c   :  { %3649 = vrot.lane.b32.xlu1 %v12061_v63, %s7800_s16  ;;  %3469 = vrot.lane.b32.xlu0 %v11995_v47, %s7800_s16  ;;  %v4243_v63 = vld [vmem:[#allocation23 + $0x20] sm:$0xff] }
 0x73d   :  { %v6934_v47 = vpack.c.bf16 %v4244_v25, %v4243_v63  ;;  %v4245_v25 = vld [vmem:[#allocation23 + $0x30] sm:$0xff]  ;;  %v4246_v63 = vld [vmem:[#allocation23 + $0x38] sm:$0xff] }
 0x73e   :  { %v6938_v50 = vpack.c.bf16 %v4246_v63, %v4245_v25 }
 0x73f   :  { %6935 = vmatprep.subr.bf16.mxu0 %v6934_v47 }
 0x740   :  { %3937 = vrot.lane.b32.xlu1 %v12112_v58, %s7783_s20  ;;  %3941 = vrot.lane.b32.xlu0 %v12115_v40, %s7783_s20 }
 0x741   :  { %6937 = vmatpush3.bf16.msra.mxu0 %v6934_v47  ;;  %v4249_v47 = vld [vmem:[#allocation23 + $0x50] sm:$0xff] }
 0x742   :  { %6939 = vmatprep.subr.bf16.mxu0 %v6938_v50 }
 0x744   :  { %3467 = vrot.lane.b32.xlu1 %v11945_v61, %s7800_s16  ;;  %3981 = vrot.lane.b32.xlu0 %v12112_v58, %s7800_s16  ;;  %v4248_v61 = vld [vmem:[#allocation23 + $0x48] sm:$0xff] }
 0x745   :  { %6941 = vmatpush3.bf16.msra.mxu0 %v6938_v50 }
 0x748   :  { %3939 = vrot.lane.b32.xlu1 %v12134_v1, %s7783_s20  ;;  %4197 = vrot.lane.b32.xlu0 %v12076_v42, %s7804_s10 }
 0x74a   :  { %v12141_v27 = vpop.permute.xlu1 %3787  ;;  %v12143_v4 = vpop.permute.xlu0 %3711 }
 0x74b   :  { %15112 = vst [vmem:[#allocation233_spill] sm:$0xff] %v12141_v27  ;;  %15113 = vst [vmem:[#allocation234_spill] sm:$0xff] %v12143_v4 }
 0x74c   :  { %3979 = vrot.lane.b32.xlu1 %v12088_v54, %s7800_s16  ;;  %4091 = vrot.lane.b32.xlu0 %v12146_v9, %s7792_s22 }
 0x74e   :  { %v12152_v43 = vpop.permute.xlu1 %3713  ;;  %v12154_v45 = vpop.permute.xlu0 %3789 }
 0x74f   :  { %15115 = vst [vmem:[#allocation236_spill] sm:$0xff] %v12152_v43  ;;  %15116 = vst [vmem:[#allocation237_spill] sm:$0xff] %v12154_v45  ;;  %v4254_v43 = vld [vmem:[#allocation23 + $0x78] sm:$0xff] }
 0x750   :  { %4119 = vrot.lane.b32.xlu1 %v12050_v38, %s7783_s20  ;;  %4093 = vrot.lane.b32.xlu0 %v12157_v62, %s7792_s22 }
 0x752   :  { %v12163_v48 = vpop.permute.xlu1 %3819  ;;  %v12165_v17 = vpop.permute.xlu0 %3743 }
 0x753   :  { %15118 = vst [vmem:[#allocation239_spill] sm:$0xff] %v12163_v48  ;;  %15119 = vst [vmem:[#allocation240_spill] sm:$0xff] %v12165_v17  ;;  %v4247_v17 = vld [vmem:[#allocation23 + $0x40] sm:$0xff] }
 0x754   :  { %3905 = vrot.lane.b32.xlu1 %v12112_v58, %s7792_s22  ;;  %4199 = vrot.lane.b32.xlu0 %v12146_v9, %s7804_s10  ;;  %v6942_v14 = vpack.c.bf16 %v4248_v61, %v4247_v17  ;;  %v4250_v61 = vld [vmem:[#allocation23 + $0x58] sm:$0xff] }
 0x755   :  { %v6946_v17 = vpack.c.bf16 %v4250_v61, %v4249_v47  ;;  %v15126_v47 = vld [vmem:[#allocation43_spill] sm:$0xff] }
 0x756   :  { %v12171_v16 = vpop.permute.xlu1 %3821  ;;  %v12173_v55 = vpop.permute.xlu0 %3745  ;;  %6943 = vmatprep.subr.bf16.mxu0 %v6942_v14 }
 0x757   :  { %15120 = vst [vmem:[#allocation241_spill] sm:$0xff] %v12171_v16  ;;  %15121 = vst [vmem:[#allocation242_spill] sm:$0xff] %v12173_v55  ;;  %6945 = vmatpush3.bf16.msra.mxu0 %v6942_v14  ;;  %v4251_v14 = vld [vmem:[#allocation23 + $0x60] sm:$0xff] }
 0x758   :  { %4121 = vrot.lane.b32.xlu1 %v12076_v42, %s7783_s20  ;;  %3909 = vrot.lane.b32.xlu0 %v12115_v40, %s7792_s22 }
 0x759   :  { %6947 = vmatprep.subr.bf16.mxu0 %v6946_v17 }
 0x75a   :  { %v12179_v2 = vpop.permute.xlu1 %3715  ;;  %v12181_v21 = vpop.permute.xlu0 %3749 }
 0x75b   :  { %15122 = vst [vmem:[#allocation243_spill] sm:$0xff] %v12179_v2  ;;  %15123 = vst [vmem:[#allocation244_spill] sm:$0xff] %v12181_v21  ;;  %v7184_v21 = vunpack.i.l.bf16 %v11281_v11  ;;  %v12196_v2 = vld [vmem:[#allocation21] sm:$0xff]  ;;  %6949 = vmatpush3.bf16.msra.mxu0 %v6946_v17  ;;  %v7406_v11 = vld [vmem:[#allocation2 + $0x10] sm:$0xff] }
 0x75c   :  { %4011 = vrot.lane.b32.xlu1 %v12088_v54, %s7804_s10  ;;  %4165 = vrot.lane.b32.xlu0 %v12076_v42, %s7800_s16  ;;  %v12200_v50 = vrot.slane %v12196_v2, %v15037_v13  ;;  %v12208_v61 = vrot.slane %v12196_v2, %v15126_v47  ;;  %v4253_v54 = vld [vmem:[#allocation23 + $0x70] sm:$0xff] }
 0x75d   :  { %v6954_v27 = vpack.c.bf16 %v4254_v43, %v4253_v54  ;;  %v7204_v43 = vunpack.i.l.bf16 %v11342_v32 }
 0x75e   :  { %v12187_v59 = vpop.permute.xlu1 %3791  ;;  %v3400_v55 = vpop.permute.xlu0 %3399 }
 0x75f   :  { %15124 = vst [vmem:[#allocation245_spill] sm:$0xff] %v12187_v59  ;;  %v7194_v59 = vunpack.i.l.bf16 %v11328_v33  ;;  %v3415_v42 = vsel %vm2257_vm10, %v7184_v21, %v3400_v55 }
 0x760   :  { %4013 = vrot.lane.b32.xlu1 %v12112_v58, %s7804_s10  ;;  %4015 = vrot.lane.b32.xlu0 %v12134_v1, %s7804_s10  ;;  %v3423_v4 = vmul.f32 %v12200_v50, %v3415_v42  ;;  %v12235_v42 = vld [vmem:[#allocation2 + $0x40] sm:$0xff] }
 0x762   :  { %v12193_v25 = vpop.permute.xlu1 %3717  ;;  %v3404_v63 = vpop.permute.xlu0 %3403 }
 0x763   :  { %15125 = vst [vmem:[#allocation246_spill] sm:$0xff] %v12193_v25  ;;  %v4252_v25 = vld [vmem:[#allocation23 + $0x68] sm:$0xff] }
 0x764   :  { %3907 = vrot.lane.b32.xlu1 %v12134_v1, %s7792_s22  ;;  %4017 = vrot.lane.b32.xlu0 %v12115_v40, %s7804_s10  ;;  %v6950_v58 = vpack.c.bf16 %v4252_v25, %v4251_v14  ;;  %v12227_v25 = vld [vmem:[#allocation21 + $0x8] sm:$0xff] }
 0x765   :  { %15129 = vst [vmem:[#allocation249_spill] sm:$0xff] %v12227_v25  ;;  %v12233_v54 = vrot.slane %v12227_v25, %v15037_v13 }
 0x766   :  { %v12213_v16 = vpop.permute.xlu1 %3793  ;;  %v3492_v45 = vpop.permute.xlu0 %3491  ;;  %6951 = vmatprep.subr.bf16.mxu0 %v6950_v58 }
 0x767   :  { %15127 = vst [vmem:[#allocation247_spill] sm:$0xff] %v12213_v16  ;;  %v3507_v48 = vsel %vm2350_vm11, %v3492_v45, %v7194_v59  ;;  %6953 = vmatpush3.bf16.msra.mxu0 %v6950_v58  ;;  %v12246_v59 = vrot.slane %v12227_v25, %v15126_v47 }
 0x768   :  { %v3515_v46 = vmul.f32 %v12208_v61, %v3507_v48  ;;  %3983 = vrot.lane.b32.xlu1 %v12134_v1, %s7800_s16  ;;  %5487 = vrot.lane.b32.xlu0 %v11226_v3, %s7806_s0  ;;  %v7189_v1 = vunpack.i.l.bf16 %v11314_v12 }
 0x769   :  { %6955 = vmatprep.subr.bf16.mxu0 %v6954_v27 }
 0x76a   :  { %v3519_v55 = vadd.f32 %v3515_v46, %v3423_v4  ;;  %v12223_v21 = vpop.permute.xlu1 %3747  ;;  %v12225_v17 = vpop.permute.xlu0 %3493  ;;  %v4851_v4 = vld [vmem:[#allocation24] sm:$0xff]  ;;  %v4852_v46 = vld [vmem:[#allocation24 + $0x8] sm:$0xff] }
 0x76b   :  { %15128 = vst [vmem:[#allocation248_spill] sm:$0xff] %v12223_v21  ;;  %v12240_v58 = vpack.c.bf16 %v4852_v46, %v4851_v4  ;;  %6957 = vmatpush3.bf16.msra.mxu0 %v6954_v27  ;;  %v3779_v27 = vmul.f32 %v12246_v59, %v11887_v22 }
 0x76c   :  { %4123 = vrot.lane.b32.xlu1 %v12146_v9, %s7783_s20  ;;  %5527 = vrot.lane.b32.xlu0 %v12235_v42, %s7805_s9 }
 0x76d   :  { %15130 = vst [vmem:[#allocation250_spill] sm:$0xff] %v12240_v58  ;;  %6983 = vmatprep.subr.bf16.mxu0 %v12240_v58 }
 0x76e   :  { %v12242_v45 = vpop.permute.xlu1 %3823  ;;  %v3644_v48 = vpop.permute.xlu0 %3643 }
 0x76f   :  { %15131 = vst [vmem:[#allocation251_spill] sm:$0xff] %v12242_v45  ;;  %v3659_v14 = vsel %vm419_vm7, %v3644_v48, %v7204_v43  ;;  %v7214_v48 = vunpack.i.l.bf16 %v11352_v51  ;;  %v15138_v45 = vld [vmem:[#allocation80_spill] sm:$0xff] }
 0x770   :  { %v3667_v21 = vmul.f32 %v12233_v54, %v3659_v14  ;;  %4163 = vrot.lane.b32.xlu1 %v12050_v38, %s7800_s16  ;;  %5393 = vrot.lane.b32.xlu0 %v11355_v37, %s7806_s0  ;;  %v12310_v38 = vrot.slane %v12196_v2, %v15138_v45 }
 0x772   :  { %v3671_v4 = vadd.f32 %v3667_v21, %v3519_v55  ;;  %v12256_v46 = vpop.permute.xlu1 %3825  ;;  %v3430_v16 = vpop.permute.xlu0 %3429  ;;  %v3417_v55 = vsel %vm2257_vm10, %v7189_v1, %v3404_v63  ;;  %v12270_v21 = vld [vmem:[#allocation2 + $0x50] sm:$0xff] }
 0x773   :  { %15132 = vst [vmem:[#allocation252_spill] sm:$0xff] %v12256_v46  ;;  %v3425_v46 = vmul.f32 %v12200_v50, %v3417_v55 }
 0x774   :  { %3985 = vrot.lane.b32.xlu1 %v12115_v40, %s7800_s16  ;;  %5489 = vrot.lane.b32.xlu0 %v11260_v19, %s7806_s0  ;;  %v12265_v43 = vadd.f32 %v3779_v27, %v3671_v4 }
 0x776   :  { %15133 = vst [vmem:[#allocation253_spill] sm:$0xff] %v12265_v43  ;;  %v3402_v14 = vpop.permute.xlu1 %3401  ;;  %v3496_v58 = vpop.permute.xlu0 %3495  ;;  %v7190_v43 = vunpack.i.h.bf16 %v11314_v12  ;;  %v12333_v12 = vrot.slane %v12227_v25, %v15032_v28 }
 0x777   :  { %v3509_v22 = vsel %vm2350_vm11, %v3496_v58, %v7214_v48  ;;  %v12289_v58 = vld [vmem:[%s14074_s13] sm:$0xff] }
 0x778   :  { %v3517_v40 = vmul.f32 %v12208_v61, %v3509_v22  ;;  %4125 = vrot.lane.b32.xlu1 %v12157_v62, %s7783_s20  ;;  %5529 = vrot.lane.b32.xlu0 %v12270_v21, %s7805_s9  ;;  %v12302_v55 = vrot.slane %v12289_v58, %v15037_v13  ;;  %v12304_v22 = vld [vmem:[#allocation26] sm:$0xff]  ;;  %15142 = vst [vmem:[#allocation258_spill] sm:$0xff] %v12333_v12 }
 0x779   :  { %15137 = vst [vmem:[#allocation257_spill] sm:$0xff] %v12304_v22 }
 0x77a   :  { %v12280_v4 = vadd.f32 %v3517_v40, %v3425_v46  ;;  %v12282_v1 = vpop.permute.xlu1 %3405  ;;  %v12284_v63 = vpop.permute.xlu0 %3599  ;;  %v7199_v40 = vunpack.i.l.bf16 %v11292_v0  ;;  %v12298_v46 = vrot.slane %v12289_v58, %v15126_v47  ;;  %15136 = vst [vmem:[#allocation256_spill] sm:$0xff] %v12302_v55  ;;  %v15139_v47 = vld [vmem:[#allocation79_spill] sm:$0xff]  ;;  %v15140_v55 = vld [vmem:[#allocation78_spill] sm:$0xff] }
 0x77b   :  { %15135 = vst [vmem:[#allocation255_spill] sm:$0xff] %v12284_v63  ;;  %v7215_v63 = vunpack.i.h.bf16 %v11352_v51  ;;  %v12318_v26 = vrot.slane %v12304_v22, %v15139_v47  ;;  %v12325_v19 = vrot.slane %v12304_v22, %v15140_v55 }
 0x77c   :  { %15134 = vst [vmem:[#allocation254_spill] sm:$0xff] %v12280_v4  ;;  %4201 = vrot.lane.b32.xlu1 %v12157_v62, %s7804_s10  ;;  %5423 = vrot.lane.b32.xlu0 %v11338_v52, %s7805_s9  ;;  %v12329_v52 = vrot.slane %v12196_v2, %v15032_v28 }
 0x77d   :  { %15141 = vst [vmem:[#allocation79_spill] sm:$0xff] %v12325_v19 }
 0x77e   :  { %v3428_v27 = vpop.permute.xlu1 %3427  ;;  %v3676_v48 = vpop.permute.xlu0 %3675 }
 0x77f   :  { %v3443_v4 = vsel %vm381_vm5, %v7199_v40, %v3428_v27  ;;  %v12338_v27 = vmul.f32 %v12298_v46, %v11202_v5  ;;  %v7209_v5 = vunpack.i.l.bf16 %v11306_v30 }
 0x780   :  { %5495 = vrot.lane.b32.xlu1 %v10977_v35, %s7806_s0  ;;  %5559 = vrot.lane.b32.xlu0 %v12235_v42, %s7792_s22  ;;  %v7200_v35 = vunpack.i.h.bf16 %v11292_v0  ;;  %v3691_v0 = vsel %vm2350_vm11, %v3676_v48, %v7215_v63  ;;  %v3451_v25 = vmul.f32 %v12329_v52, %v3443_v4  ;;  %v7225_v63 = vunpack.i.h.bf16 %v11316_v8 }
 0x781   :  { %15143 = vst [vmem:[#allocation259_spill] sm:$0xff] %v12338_v27  ;;  %v7195_v48 = vunpack.i.h.bf16 %v11328_v33 }
 0x782   :  { %v3568_v51 = vpop.permute.xlu1 %3567  ;;  %v3678_v15 = vpop.permute.xlu0 %3677  ;;  %v3444_v19 = vsel %vm381_vm5, %v7200_v35, %v3430_v16  ;;  %v7407_v16 = vld [vmem:[#allocation2] sm:$0xff]  ;;  %v12361_v35 = vrot.slane %v12289_v58, %v15032_v28 }
 0x783   :  { %v3583_v40 = vsel %vm2257_vm10, %v7190_v43, %v3568_v51  ;;  %v3416_v43 = vsel %vm2257_vm10, %v7185_v10, %v3402_v14  ;;  %v12357_v4 = vmul.f32 %v7407_v16, %v12318_v26  ;;  %v3699_v51 = vmul.f32 %v12333_v12, %v3691_v0  ;;  %v5082_v0 = vld [vmem:[#allocation26 + $0x10] sm:$0xff] }
 0x784   :  { %v3591_v22 = vmul.f32 %v12310_v38, %v3583_v40  ;;  %4167 = vrot.lane.b32.xlu1 %v12146_v9, %s7800_s16  ;;  %5599 = vrot.lane.b32.xlu0 %v7406_v11, %s7804_s10  ;;  %v3508_v33 = vsel %vm2350_vm11, %v12225_v17, %v7195_v48  ;;  %v3452_v10 = vmul.f32 %v12329_v52, %v3444_v19  ;;  %v7205_v19 = vunpack.i.h.bf16 %v11342_v32  ;;  %v12394_v17 = vld [vmem:[#allocation26 + $0x8] sm:$0xff] }
 0x785   :  { %15144 = vst [vmem:[#allocation260_spill] sm:$0xff] %v12357_v4  ;;  %v3692_v14 = vsel %vm2350_vm11, %v3678_v15, %v7225_v63  ;;  %v3424_v28 = vmul.f32 %v12200_v50, %v3416_v43  ;;  %v12385_v15 = vmul.f32 %v12298_v46, %v11245_v53  ;;  %15146 = vst [vmem:[#allocation262_spill] sm:$0xff] %v12394_v17 }
 0x786   :  { %v3595_v40 = vadd.f32 %v3591_v22, %v3451_v25  ;;  %v3570_v9 = vpop.permute.xlu1 %3569  ;;  %v12364_v27 = vpop.permute.xlu0 %3433  ;;  %v12398_v22 = vrot.slane %v12394_v17, %v15138_v45  ;;  %v3516_v32 = vmul.f32 %v12208_v61, %v3508_v33  ;;  %v3700_v63 = vmul.f32 %v12333_v12, %v3692_v14  ;;  %v12417_v14 = vld [vmem:[#allocation2 + $0x48] sm:$0xff] }
 0x787   :  { %v3584_v16 = vsel %vm2257_vm10, %v7209_v5, %v3570_v9  ;;  %v12388_v5 = vmul.f32 %v7406_v11, %v12318_v26  ;;  %v12392_v9 = vrot.slane %v12289_v58, %v15138_v45  ;;  %v7210_v11 = vunpack.i.h.bf16 %v11306_v30  ;;  %15150 = vst [vmem:[#allocation266_spill] sm:$0xff] %v12417_v14 }
 0x788   :  { %v12375_v4 = vadd.f32 %v3699_v51, %v3595_v40  ;;  %v3592_v25 = vmul.f32 %v12310_v38, %v3584_v16  ;;  %4169 = vrot.lane.b32.xlu1 %v12157_v62, %s7800_s16  ;;  %5635 = vrot.lane.b32.xlu0 %v12235_v42, %s7806_s0  ;;  %v12407_v40 = vmul.f32 %v12361_v35, %v11135_v41  ;;  %v7224_v30 = vunpack.i.l.bf16 %v11316_v8 }
 0x789   :  { %v12410_v16 = vrot.slane %v5082_v0, %v15139_v47  ;;  %v3520_v62 = vadd.f32 %v3516_v32, %v3424_v28  ;;  %v12430_v28 = vmul.f32 %v12298_v46, %v11326_v39  ;;  %v3780_v39 = vmul.f32 %v12246_v59, %v11889_v57 }
 0x78a   :  { %15145 = vst [vmem:[#allocation261_spill] sm:$0xff] %v12375_v4  ;;  %v3596_v48 = vadd.f32 %v3592_v25, %v3452_v10  ;;  %v3646_v43 = vpop.permute.xlu1 %3645  ;;  %v12402_v51 = vpop.permute.xlu0 %3465  ;;  %v12426_v25 = vmul.f32 %v12361_v35, %v11168_v23  ;;  %v12448_v23 = vrot.slane %v12394_v17, %v15037_v13 }
 0x78b   :  { %15147 = vst [vmem:[#allocation263_spill] sm:$0xff] %v12402_v51  ;;  %15148 = vst [vmem:[#allocation264_spill] sm:$0xff] %v12410_v16  ;;  %v3660_v53 = vsel %vm419_vm7, %v3646_v43, %v7205_v19  ;;  %v7409_v19 = vld [vmem:[#allocation2 + $0x30] sm:$0xff]  ;;  %v12470_v51 = vrot.slane %v5082_v0, %v15037_v13 }
 0x78c   :  { %v12414_v33 = vadd.f32 %v3700_v63, %v3596_v48  ;;  %v3668_v10 = vmul.f32 %v12233_v54, %v3660_v53  ;;  %5535 = vrot.lane.b32.xlu1 %v12417_v14, %s7805_s9  ;;  %5425 = vrot.lane.b32.xlu0 %v11368_v31, %s7805_s9  ;;  %v3418_v53 = vsel %vm2257_vm10, %v7210_v11, %v12282_v1  ;;  %v15155_v11 = vld [vmem:[#allocation49_spill] sm:$0xff] }
 0x78d   :  { %v12436_v32 = vmul.f32 %v7409_v19, %v12318_v26  ;;  %v12440_v63 = vrot.slane %v12289_v58, %v15139_v47  ;;  %15153 = vst [vmem:[#allocation269_spill] sm:$0xff] %v12448_v23  ;;  %v12452_v1 = vrot.slane %v12289_v58, %v15140_v55  ;;  %v12456_v19 = vrot.slane %v12289_v58, %v15155_v11  ;;  %v15214_v23 = vld [vmem:[#allocation133_spill] sm:$0xff] }
 0x78e   :  { %15149 = vst [vmem:[#allocation265_spill] sm:$0xff] %v12414_v33  ;;  %v3672_v8 = vadd.f32 %v3668_v10, %v3520_v62  ;;  %v3498_v48 = vpop.permute.xlu1 %3497  ;;  %v12442_v43 = vpop.permute.xlu0 %3603  ;;  %v3426_v10 = vmul.f32 %v12200_v50, %v3418_v53  ;;  %v7220_v33 = vunpack.i.h.bf16 %v11375_v18  ;;  %15157 = vst [vmem:[#allocation272_spill] sm:$0xff] %v12470_v51  ;;  %v12478_v50 = vmul.f32 %v12235_v42, %v12318_v26  ;;  %v15180_v51 = vld [vmem:[#allocation100_spill] sm:$0xff] }
 0x78f   :  { %15151 = vst [vmem:[#allocation267_spill] sm:$0xff] %v12440_v63  ;;  %15152 = vst [vmem:[#allocation268_spill] sm:$0xff] %v12442_v43  ;;  %v3510_v62 = vsel %vm2350_vm11, %v3498_v48, %v7224_v30  ;;  %v12474_v30 = vmul.f32 %v12298_v46, %v11355_v37  ;;  %v7229_v46 = vunpack.i.l.bf16 %v11331_v20  ;;  %v15160_v48 = vld [vmem:[#allocation82_spill] sm:$0xff]  ;;  %v12520_v37 = vmul.f32 %v12361_v35, %v11272_v34  ;;  %v15170_v34 = vld [vmem:[#allocation112_spill] sm:$0xff] }
 0x790   :  { %15154 = vst [vmem:[#allocation270_spill] sm:$0xff] %v12452_v1  ;;  %v3518_v43 = vmul.f32 %v12208_v61, %v3510_v62  ;;  %5401 = vrot.lane.b32.xlu1 %v11290_v7, %s7806_s0  ;;  %5561 = vrot.lane.b32.xlu0 %v12270_v21, %s7792_s22  ;;  %v12466_v57 = vadd.f32 %v3780_v39, %v3672_v8  ;;  %15159 = vst [vmem:[#allocation274_spill] sm:$0xff] %v12478_v50 }
 0x791   :  { %15158 = vst [vmem:[#allocation273_spill] sm:$0xff] %v12474_v30  ;;  %v12483_v61 = vrot.slane %v12196_v2, %v15139_v47  ;;  %v12487_v39 = vrot.slane %v12196_v2, %v15140_v55  ;;  %v12496_v26 = vrot.slane %v12289_v58, %v15160_v48  ;;  %v12500_v62 = vrot.slane %v12394_v17, %v15160_v48  ;;  %v7410_v58 = vld [vmem:[#allocation2 + $0x20] sm:$0xff] }
 0x792   :  { %15156 = vst [vmem:[#allocation271_spill] sm:$0xff] %v12466_v57  ;;  %v12489_v0 = vadd.f32 %v3518_v43, %v3426_v10  ;;  %v3602_v53 = vpop.permute.xlu1 %3601  ;;  %v12491_v8 = vpop.permute.xlu0 %3679  ;;  %v12507_v43 = vmul.f32 %v12456_v19, %v11226_v3  ;;  %15164 = vst [vmem:[#allocation278_spill] sm:$0xff] %v12520_v37  ;;  %v12522_v3 = vld [vmem:[#allocation2 + $0x58] sm:$0xff]  ;;  %v15167_v57 = vld [vmem:[#allocation60_spill] sm:$0xff] }
 0x793   :  { %15161 = vst [vmem:[#allocation275_spill] sm:$0xff] %v12496_v26  ;;  %15162 = vst [vmem:[#allocation276_spill] sm:$0xff] %v12500_v62  ;;  %v3616_v7 = vsel %vm381_vm5, %v7220_v33, %v3602_v53  ;;  %v3460_v10 = vmul.f32 %v12483_v61, %v11960_v29  ;;  %v7234_v33 = vunpack.i.l.bf16 %v11344_v6  ;;  %v15168_v29 = vld [vmem:[#allocation45_spill] sm:$0xff] }
 0x794   :  { %15163 = vst [vmem:[#allocation277_spill] sm:$0xff] %v12507_v43  ;;  %v3624_v50 = vmul.f32 %v12487_v39, %v3616_v7  ;;  %5497 = vrot.lane.b32.xlu1 %v11053_v36, %s7806_s0  ;;  %5601 = vrot.lane.b32.xlu0 %v7410_v58, %s7804_s10  ;;  %v7239_v7 = vunpack.i.l.bf16 %v11357_v24  ;;  %v7269_v55 = vunpack.i.l.bf16 %v15168_v29  ;;  %v15178_v36 = vld [vmem:[#allocation95_spill] sm:$0xff] }
 0x796   :  { %v12527_v43 = vadd.f32 %v3624_v50, %v3460_v10  ;;  %v3432_v58 = vpop.permute.xlu1 %3431  ;;  %v12529_v62 = vpop.permute.xlu0 %4087  ;;  %v12540_v50 = vrot.slane %v12196_v2, %v15155_v11  ;;  %v15231_v10 = vld [vmem:[#allocation96_spill] sm:$0xff] }
 0x797   :  { %15166 = vst [vmem:[#allocation280_spill] sm:$0xff] %v12529_v62  ;;  %v12555_v62 = vrot.slane %v12196_v2, %v15160_v48 }
 0x798   :  { %15165 = vst [vmem:[#allocation279_spill] sm:$0xff] %v12527_v43  ;;  %15169 = vst [vmem:[#allocation60_spill] sm:$0xff] %v12540_v50  ;;  %5537 = vrot.lane.b32.xlu1 %v12522_v3, %s7805_s9  ;;  %5637 = vrot.lane.b32.xlu0 %v12270_v21, %s7806_s0  ;;  %v3635_v2 = vmul.f32 %v12540_v50, %v15178_v36  ;;  %v15183_v36 = vld [vmem:[#allocation90_spill] sm:$0xff]  ;;  %v15237_v43 = vunpack.i.l.bf16 %v15170_v34 }
 0x799   :  { %15173 = vst [vmem:[#allocation112_spill] sm:$0xff] %v12555_v62  ;;  %v15185_v50 = vld [vmem:[#allocation98_spill] sm:$0xff] }
 0x79a   :  { %v3464_v29 = vpop.permute.xlu1 %3463  ;;  %v12557_v49 = vpop.permute.xlu0 %3605 }
 0x79b   :  { %15174 = vst [vmem:[#allocation281_spill] sm:$0xff] %v12557_v49  ;;  %v3479_v4 = vsel %vm419_vm7, %v3464_v29, %v7234_v33  ;;  %v15179_v49 = vld [vmem:[#allocation93_spill] sm:$0xff]  ;;  %v3445_v29 = vsel %vm381_vm5, %v7229_v46, %v3432_v58  ;;  %v3693_v46 = vsel %vm2350_vm11, %v12491_v8, %v7269_v55  ;;  %v15196_v55 = vld [vmem:[#allocation54_spill] sm:$0xff] }
 0x79c   :  { %v3487_v26 = vmul.f32 %v12555_v62, %v3479_v4  ;;  %5431 = vrot.lane.b32.xlu1 %v15179_v49, %s7805_s9  ;;  %5491 = vrot.lane.b32.xlu0 %v15180_v51, %s7806_s0  ;;  %v12581_v4 = vmul.f32 %v12456_v19, %v15183_v36  ;;  %v12585_v62 = vmul.f32 %v12361_v35, %v15185_v50 }
 0x79e   :  { %15184 = vst [vmem:[#allocation95_spill] sm:$0xff] %v12581_v4  ;;  %15186 = vst [vmem:[#allocation93_spill] sm:$0xff] %v12585_v62  ;;  %v12587_v30 = vadd.f32 %v3635_v2, %v3487_v26  ;;  %v3572_v37 = vpop.permute.xlu1 %3571  ;;  %v12589_v53 = vpop.permute.xlu0 %3681  ;;  %v3453_v26 = vmul.f32 %v12329_v52, %v3445_v29  ;;  %v15198_v62 = vunpack.i.h.bf16 %v11344_v6  ;;  %v15215_v6 = vld [vmem:[#allocation143_spill] sm:$0xff] }
 0x79f   :  { %15188 = vst [vmem:[#allocation283_spill] sm:$0xff] %v12589_v53  ;;  %v3585_v58 = vsel %vm2257_vm10, %v7239_v7, %v3572_v37  ;;  %v15206_v7 = vld [vmem:[#allocation65_spill] sm:$0xff]  ;;  %v4823_v50 = vsel %vm2350_vm11, %v15215_v6, %v15214_v23  ;;  %v15221_v23 = vunpack.i.l.bf16 %v11390_v56  ;;  %v15233_v56 = vld [vmem:[#allocation79_spill] sm:$0xff] }
 0x7a0   :  { %15187 = vst [vmem:[#allocation282_spill] sm:$0xff] %v12587_v30  ;;  %v3593_v2 = vmul.f32 %v12310_v38, %v3585_v58  ;;  %5567 = vrot.lane.b32.xlu1 %v12417_v14, %s7792_s22  ;;  %5493 = vrot.lane.b32.xlu0 %v11368_v31, %s7806_s0  ;;  %v3701_v58 = vmul.f32 %v12333_v12, %v3693_v46  ;;  %v15197_v30 = vld [vmem:[#allocation125_spill] sm:$0xff]  ;;  %v7411_v12 = vld [vmem:[#allocation2 + $0x18] sm:$0xff] }
 0x7a1   :  { %v4555_v8 = vsel %vm2257_vm10, %v15197_v30, %v15196_v55  ;;  %v3781_v30 = vmul.f32 %v12246_v59, %v15206_v7  ;;  %v15212_v55 = vld [vmem:[#allocation140_spill] sm:$0xff]  ;;  %v12661_v7 = vld [vmem:[%s14074_s13 + $0x8] ss:$0 sm:$0xff]  ;;  %v3446_v6 = vsel %vm381_vm5, %v15221_v23, %v12364_v27  ;;  %v15226_v23 = vunpack.i.l.bf16 %v15167_v57  ;;  %s5939_s13 = sld [smem:[#allocation4 + $0x5]] }
 0x7a2   :  { %v3597_v36 = vadd.f32 %v3593_v2, %v3453_v26  ;;  %v3648_v35 = vpop.permute.xlu1 %3647  ;;  %v12613_v53 = vpop.permute.xlu0 %4089  ;;  %v4831_v27 = vmul.f32 %v12661_v7, %v4823_v50  ;;  %v3454_v33 = vmul.f32 %v12329_v52, %v3446_v6 }
 0x7a3   :  { %15194 = vst [vmem:[#allocation284_spill] sm:$0xff] %v12613_v53  ;;  %v3661_v29 = vsel %vm419_vm7, %v3648_v35, %v15198_v62  ;;  %v15209_v62 = vld [vmem:[#allocation67_spill] sm:$0xff] }
 0x7a4   :  { %v12627_v37 = vadd.f32 %v3701_v58, %v3597_v36  ;;  %v3669_v4 = vmul.f32 %v12233_v54, %v3661_v29  ;;  %5607 = vrot.lane.b32.xlu1 %v7411_v12, %s7804_s10  ;;  %5603 = vrot.lane.b32.xlu0 %v12235_v42, %s7804_s10  ;;  %v15203_v36 = vld [vmem:[#allocation256_spill] sm:$0xff]  ;;  %v15204_v58 = vld [vmem:[#allocation254_spill] sm:$0xff] }
 0x7a5   :  { %v4563_v35 = vmul.f32 %v15203_v36, %v4555_v8  ;;  %15213 = vst [vmem:[#allocation256_spill] sm:$0xff] %v12661_v7 }
 0x7a6   :  { %15200 = vst [vmem:[#allocation54_spill] sm:$0xff] %v12627_v37  ;;  %v3673_v29 = vadd.f32 %v3669_v4, %v15204_v58  ;;  %v12640_v2 = vpop.permute.xlu1 %3935  ;;  %v12642_v12 = vpop.permute.xlu0 %3903  ;;  %v15210_v37 = vld [vmem:[#allocation129_spill] sm:$0xff] }
 0x7a7   :  { %15205 = vst [vmem:[#allocation125_spill] sm:$0xff] %v12642_v12  ;;  %v4556_v4 = vsel %vm2257_vm10, %v15210_v37, %v15209_v62  ;;  %v15211_v58 = vld [vmem:[#allocation113_spill] sm:$0xff]  ;;  %v12673_v37 = vmul.f32 %v12456_v19, %v15180_v51  ;;  %v15228_v51 = vld [vmem:[#allocation144_spill] sm:$0xff] }
 0x7a8   :  { %v4703_v12 = vsel %vm2350_vm11, %v15212_v55, %v15211_v58  ;;  %5643 = vrot.lane.b32.xlu1 %v12417_v14, %s7806_s0  ;;  %v12669_v42 = vadd.f32 %v3781_v30, %v3673_v29  ;;  %v12677_v55 = vmul.f32 %v12456_v19, %v11368_v31  ;;  %v15219_v62 = vld [vmem:[#allocation257_spill] sm:$0xff]  ;;  %5605 = vrot.lane.b32.xlu0 %v12270_v21, %s7804_s10  ;;  %v15224_v31 = vld [vmem:[#allocation259_spill] sm:$0xff]  ;;  %v15227_v29 = vld [vmem:[#allocation134_spill] sm:$0xff] }
 0x7a9   :  { %15217 = vst [vmem:[#allocation65_spill] sm:$0xff] %v12673_v37  ;;  %v12681_v58 = vrot.slane %v15219_v62, %v15037_v13  ;;  %v4711_v46 = vmul.f32 %v12392_v9, %v4703_v12  ;;  %v4704_v19 = vsel %vm2350_vm11, %v15228_v51, %v15227_v29  ;;  %v5255_v51 = vmul.f32 %v15233_v56, %v4555_v8  ;;  %v15243_v29 = vld [vmem:[#allocation52_spill] sm:$0xff] }
 0x7aa   :  { %15216 = vst [vmem:[#allocation254_spill] sm:$0xff] %v12669_v42  ;;  %15218 = vst [vmem:[#allocation67_spill] sm:$0xff] %v12677_v55  ;;  %v4683_v55 = vadd.f32 %v15224_v31, %v4563_v35  ;;  %v3574_v26 = vpop.permute.xlu1 %3573  ;;  %v12694_v42 = vpop.permute.xlu0 %4195  ;;  %v15229_v31 = vld [vmem:[#allocation83_spill] sm:$0xff]  ;;  %v15230_v35 = vld [vmem:[#allocation152_spill] sm:$0xff] }
 0x7ab   :  { %15220 = vst [vmem:[#allocation129_spill] sm:$0xff] %v12681_v58  ;;  %15225 = vst [vmem:[#allocation113_spill] sm:$0xff] %v12694_v42  ;;  %v4564_v58 = vmul.f32 %v15203_v36, %v4556_v4  ;;  %v3586_v21 = vsel %vm2257_vm10, %v15226_v23, %v3574_v26  ;;  %v4824_v30 = vsel %vm2350_vm11, %v15230_v35, %v15229_v31  ;;  %v15232_v26 = vld [vmem:[#allocation131_spill] sm:$0xff]  ;;  %v15242_v23 = vld [vmem:[#allocation153_spill] sm:$0xff] }
 0x7ac   :  { %v3594_v53 = vmul.f32 %v12310_v38, %v3586_v21  ;;  %5433 = vrot.lane.b32.xlu1 %v15231_v10, %s7805_s9  ;;  %v5256_v31 = vmul.f32 %v15233_v56, %v4556_v4  ;;  %v4712_v35 = vmul.f32 %v12392_v9, %v4704_v19  ;;  %v4832_v14 = vmul.f32 %v12661_v7, %v4824_v30  ;;  %v15238_v4 = vld [vmem:[#allocation43_spill] sm:$0xff] }
 0x7ad   :  { %v4684_v21 = vadd.f32 %v12385_v15, %v4564_v58  ;;  %v4715_v44 = vadd.f32 %v4711_v46, %v12407_v40  ;;  %v4835_v42 = vadd.f32 %v4831_v27, %v4683_v55  ;;  %v15240_v15 = vld [vmem:[#allocation260_spill] sm:$0xff]  ;;  %v12754_v46 = vrot.slane %v15219_v62, %v15138_v45 }
 0x7ae   :  { %v12722_v52 = vadd.f32 %v3594_v53, %v3454_v33  ;;  %v3650_v38 = vpop.permute.xlu1 %3649  ;;  %v12724_v6 = vpop.permute.xlu0 %3469  ;;  %v12736_v53 = vrot.slane %v15219_v62, %v15238_v4  ;;  %v12742_v58 = vadd.f32 %v5255_v51, %v15240_v15  ;;  %v12760_v55 = vmul.f32 %v12398_v22, %v4703_v12 }
 0x7af   :  { %15236 = vst [vmem:[#allocation133_spill] sm:$0xff] %v12724_v6  ;;  %v3662_v8 = vsel %vm419_vm7, %v3650_v38, %v15237_v43  ;;  %v4557_v43 = vsel %vm2257_vm10, %v15243_v29, %v15242_v23  ;;  %v15244_v38 = vld [vmem:[#allocation77_spill] sm:$0xff]  ;;  %15246 = vst [vmem:[#allocation134_spill] sm:$0xff] %v12754_v46  ;;  %v4716_v15 = vadd.f32 %v4712_v35, %v12426_v25  ;;  %v15252_v12 = vunpack.i.l.bf16 %v11375_v18  ;;  %v15260_v35 = vld [vmem:[#allocation146_spill] sm:$0xff] }
 0x7b0   :  { %15235 = vst [vmem:[#allocation140_spill] sm:$0xff] %v12722_v52  ;;  %15239 = vst [vmem:[#allocation143_spill] sm:$0xff] %v12736_v53  ;;  %v3670_v33 = vmul.f32 %v12233_v54, %v3662_v8  ;;  %5569 = vrot.lane.b32.xlu1 %v12522_v3, %s7792_s22  ;;  %v12750_v40 = vrot.slane %v15219_v62, %v15244_v38  ;;  %v12757_v54 = vadd.f32 %v5256_v31, %v12388_v5  ;;  %v7412_v8 = vld [vmem:[#allocation3 + $0x60] sm:$0xff]  ;;  %v15251_v5 = vld [vmem:[#allocation255_spill] sm:$0xff]  ;;  %s5942_s22 = sld [smem:[#allocation4 + $0x6]] }
 0x7b1   :  { %15241 = vst [vmem:[#allocation257_spill] sm:$0xff] %v12742_v58  ;;  %15248 = vst [vmem:[#allocation83_spill] sm:$0xff] %v12760_v55  ;;  %v3782_v23 = vmul.f32 %v7412_v8, %v12246_v59  ;;  %v4836_v58 = vadd.f32 %v4832_v14, %v4684_v21  ;;  %v12771_v46 = vrot.slane %v12394_v17, %v15244_v38  ;;  %v7413_v14 = vld [vmem:[#allocation2 + $0x28] sm:$0xff]  ;;  %v15293_v6 = vunpack.i.h.bf16 %v15167_v57 }
 0x7b2   :  { %15245 = vst [vmem:[#allocation259_spill] sm:$0xff] %v12750_v40  ;;  %15247 = vst [vmem:[#allocation144_spill] sm:$0xff] %v12757_v54  ;;  %v3674_v27 = vadd.f32 %v3670_v33, %v12489_v0  ;;  %v12763_v51 = vpop.permute.xlu1 %3937  ;;  %v12766_v29 = vpop.permute.xlu0 %3941  ;;  %v3615_v0 = vsel %vm381_vm5, %v15252_v12, %v15251_v5  ;;  %v12778_v31 = vadd.f32 %v4835_v42, %v4715_v44  ;;  %v15259_v42 = vld [vmem:[#allocation72_spill] sm:$0xff]  ;;  %v15262_v5 = vld [vmem:[#allocation141_spill] sm:$0xff] }
 0x7b3   :  { %15249 = vst [vmem:[#allocation152_spill] sm:$0xff] %v12766_v29  ;;  %15250 = vst [vmem:[#allocation96_spill] sm:$0xff] %v12771_v46  ;;  %v12781_v33 = vmul.f32 %v12410_v16, %v4823_v50  ;;  %v4565_v59 = vmul.f32 %v15203_v36, %v4557_v43  ;;  %v12788_v25 = vmul.f32 %v12398_v22, %v4704_v19  ;;  %v12798_v50 = vld [vmem:[#allocation21 + $0x10] sm:$0xff]  ;;  %v15283_v46 = vld [vmem:[#allocation233_spill] sm:$0xff] }
 0x7b4   :  { %15253 = vst [vmem:[#allocation131_spill] sm:$0xff] %v12778_v31  ;;  %v12784_v8 = vadd.f32 %v3782_v23, %v3674_v27  ;;  %5609 = vrot.lane.b32.xlu1 %v7413_v14, %s7804_s10  ;;  %v12791_v18 = vmul.f32 %v12410_v16, %v4824_v30  ;;  %v5257_v21 = vmul.f32 %v15233_v56, %v4557_v43  ;;  %v15261_v23 = vld [vmem:[#allocation149_spill] sm:$0xff] }
 0x7b5   :  { %15254 = vst [vmem:[#allocation79_spill] sm:$0xff] %v12781_v33  ;;  %15256 = vst [vmem:[#allocation153_spill] sm:$0xff] %v12788_v25  ;;  %v12796_v44 = vrot.slane %v15219_v62, %v15155_v11  ;;  %v4591_v27 = vsel %vm2350_vm11, %v15260_v35, %v15259_v42  ;;  %v4779_v19 = vsel %vm2257_vm10, %v15262_v5, %v15261_v23  ;;  %v15265_v35 = vunpack.i.h.bf16 %v11331_v20  ;;  %v15299_v29 = vld [vmem:[#allocation261_spill] sm:$0xff] }
 0x7b6   :  { %15255 = vst [vmem:[#allocation260_spill] sm:$0xff] %v12784_v8  ;;  %15257 = vst [vmem:[#allocation52_spill] sm:$0xff] %v12791_v18  ;;  %v3623_v30 = vmul.f32 %v12487_v39, %v3615_v0  ;;  %v12811_v43 = vrot.slane %v12798_v50, %v15037_v13  ;;  %v12813_v12 = vpop.permute.xlu1 %3467  ;;  %v12815_v14 = vpop.permute.xlu0 %3981  ;;  %v12817_v18 = vadd.f32 %v4836_v58, %v4716_v15  ;;  %v15267_v58 = vld [vmem:[#allocation249_spill] sm:$0xff]  ;;  %v15268_v13 = vld [vmem:[#allocation196_spill] sm:$0xff]  ;;  %v15274_v33 = vunpack.i.h.bf16 %v11357_v24 }
 0x7b7   :  { %15258 = vst [vmem:[#allocation255_spill] sm:$0xff] %v12796_v44  ;;  %15264 = vst [vmem:[#allocation146_spill] sm:$0xff] %v12813_v12  ;;  %v4599_v54 = vmul.f32 %v12440_v63, %v4591_v27  ;;  %v4787_v42 = vmul.f32 %v12452_v1, %v4779_v19  ;;  %v3951_v0 = vsel %vm381_vm5, %v15265_v35, %v12640_v2  ;;  %v15270_v2 = vld [vmem:[#allocation150_spill] sm:$0xff]  ;;  %v15292_v8 = vld [vmem:[#allocation236_spill] sm:$0xff] }
 0x7b8   :  { %15263 = vst [vmem:[#allocation72_spill] sm:$0xff] %v12811_v43  ;;  %v12827_v23 = vadd.f32 %v12430_v28, %v4565_v59  ;;  %v12831_v5 = vrot.slane %v15219_v62, %v15160_v48  ;;  %v12835_v15 = vrot.slane %v15267_v58, %v15139_v47  ;;  %v3459_v25 = vmul.f32 %v12483_v61, %v15268_v13  ;;  %v15271_v28 = vld [vmem:[#allocation142_spill] sm:$0xff]  ;;  %v15302_v52 = vld [vmem:[#allocation145_spill] sm:$0xff] }
 0x7b9   :  { %5645 = vrot.lane.b32.xlu1 %v12522_v3, %s7806_s0  ;;  %v12842_v20 = vadd.f32 %v5257_v21, %v12436_v32  ;;  %v4558_v59 = vsel %vm2257_vm10, %v15271_v28, %v15270_v2  ;;  %v12850_v62 = vmul.f32 %v12796_v44, %v11135_v41  ;;  %v15273_v35 = vld [vmem:[#allocation234_spill] sm:$0xff]  ;;  %v12862_v32 = vrot.slane %v15267_v58, %v15138_v45 }
 0x7ba   :  { %15266 = vst [vmem:[#allocation149_spill] sm:$0xff] %v12831_v5  ;;  %v3727_v13 = vsel %vm2257_vm10, %v15274_v33, %v15273_v35  ;;  %v15275_v5 = vld [vmem:[#allocation269_spill] sm:$0xff]  ;;  %v3627_v21 = vadd.f32 %v3623_v30, %v3459_v25  ;;  %v3959_v2 = vmul.f32 %v12811_v43, %v3951_v0  ;;  %v12865_v28 = vpop.permute.xlu1 %3939  ;;  %v4198_v41 = vpop.permute.xlu0 %4197  ;;  %v12874_v33 = vrot.slane %v12394_v17, %v15139_v47 }
 0x7bb   :  { %15269 = vst [vmem:[#allocation141_spill] sm:$0xff] %v12842_v20  ;;  %15272 = vst [vmem:[#allocation249_spill] sm:$0xff] %v12850_v62  ;;  %v12858_v55 = vmul.f32 %v15275_v5, %v4591_v27  ;;  %v12867_v20 = vadd.f32 %v4787_v42, %v4599_v54  ;;  %v15278_v62 = vld [vmem:[#allocation272_spill] sm:$0xff]  ;;  %v4566_v30 = vmul.f32 %v15203_v36, %v4558_v59  ;;  %v15310_v17 = vld [vmem:[#allocation109_spill] sm:$0xff] }
 0x7bc   :  { %v12870_v24 = vmul.f32 %v15278_v62, %v4779_v19  ;;  %15280 = vst [vmem:[#allocation234_spill] sm:$0xff] %v12874_v33  ;;  %v15281_v27 = vld [vmem:[#allocation104_spill] sm:$0xff]  ;;  %v3735_v0 = vmul.f32 %v12835_v15, %v3727_v13  ;;  %v12889_v19 = vrot.slane %v12798_v50, %v15238_v4  ;;  %v12894_v42 = vmul.f32 %v15233_v56, %v4558_v59  ;;  %v15289_v33 = vld [vmem:[#allocation107_spill] sm:$0xff]  ;;  %v15291_v59 = vld [vmem:[#allocation253_spill] sm:$0xff] }
 0x7bd   :  { %15276 = vst [vmem:[#allocation196_spill] sm:$0xff] %v12858_v55  ;;  %15277 = vst [vmem:[#allocation150_spill] sm:$0xff] %v12867_v20  ;;  %v15282_v35 = vunpack.i.l.bf16 %v15281_v27  ;;  %v15284_v55 = vld [vmem:[#allocation78_spill] sm:$0xff]  ;;  %5499 = vrot.lane.b32.xlu1 %v15179_v49, %s7806_s0  ;;  %v15288_v13 = vld [vmem:[#allocation280_spill] sm:$0xff]  ;;  %v15290_v31 = vunpack.i.l.bf16 %v15289_v33  ;;  %v12908_v40 = vrot.slane %v12798_v50, %v15244_v38  ;;  %v3963_v53 = vadd.f32 %v3959_v2, %v15291_v59 }
 0x7be   :  { %15279 = vst [vmem:[#allocation142_spill] sm:$0xff] %v12870_v24  ;;  %v12885_v54 = vrot.slane %v15267_v58, %v15284_v55  ;;  %v15285_v24 = vld [vmem:[#allocation45_spill] sm:$0xff]  ;;  %v3739_v56 = vadd.f32 %v3735_v0, %v3627_v21  ;;  %v15294_v38 = vld [vmem:[#allocation123_spill] sm:$0xff]  ;;  %v15297_v0 = vld [vmem:[#allocation122_spill] sm:$0xff]  ;;  %v12936_v12 = vrot.slane %v12798_v50, %v15138_v45 }
 0x7bf   :  { %v3803_v25 = vsel %vm419_vm7, %v15283_v46, %v15282_v35  ;;  %v15286_v46 = vunpack.i.h.bf16 %v15285_v24  ;;  %v15287_v35 = vld [vmem:[#allocation239_spill] sm:$0xff]  ;;  %v4103_v20 = vsel %vm2257_vm10, %v15290_v31, %v15288_v13  ;;  %v12914_v24 = vrot.slane %v12798_v50, %v15139_v47  ;;  %v15296_v21 = vld [vmem:[#allocation113_spill] sm:$0xff] }
 0x7c0   :  { %v3811_v49 = vmul.f32 %v12862_v32, %v3803_v25  ;;  %v3728_v31 = vsel %vm2257_vm10, %v15293_v6, %v15292_v8  ;;  %v12923_v13 = vld [vmem:[#allocation21 + $0x18] ss:$0 sm:$0xff]  ;;  %v15295_v25 = vunpack.i.l.bf16 %v15294_v38  ;;  %v15298_v47 = vunpack.i.l.bf16 %v15297_v0 }
 0x7c1   :  { %v3835_v36 = vsel %vm2350_vm11, %v15287_v35, %v15286_v46  ;;  %v3980_v46 = vpop.permute.xlu1 %3979  ;;  %v12916_v35 = vpop.permute.xlu0 %4091  ;;  %v4111_v6 = vmul.f32 %v12889_v19, %v4103_v20  ;;  %5501 = vrot.lane.b32.xlu1 %v15231_v10, %s7806_s0 }
 0x7c2   :  { %v4211_v2 = vsel %vm2350_vm11, %v15296_v21, %v15295_v25  ;;  %v3995_v59 = vsel %vm419_vm7, %v3980_v46, %v15298_v47  ;;  %v3843_v57 = vmul.f32 %v12885_v54, %v3835_v36  ;;  %v3815_v25 = vadd.f32 %v3811_v49, %v15299_v29  ;;  %v15300_v21 = vld [vmem:[#allocation273_spill] sm:$0xff]  ;;  %v15303_v46 = vld [vmem:[#allocation58_spill] sm:$0xff] }
 0x7c3   :  { %v4003_v8 = vmul.f32 %v12914_v24, %v3995_v59  ;;  %v12945_v0 = vadd.f32 %v15300_v21, %v4566_v30  ;;  %v12951_v47 = vsel %vm2350_vm11, %v15303_v46, %v15302_v52  ;;  %v15304_v36 = vld [vmem:[#allocation106_spill] sm:$0xff]  ;;  %v15306_v59 = vld [vmem:[#allocation221_spill] sm:$0xff]  ;;  %v15307_v29 = vunpack.i.h.bf16 %v15170_v34 }
 0x7c4   :  { %v15305_v45 = vunpack.i.h.bf16 %v15304_v36  ;;  %v3971_v10 = vmul.f32 %v12908_v40, %v15306_v59  ;;  %v15308_v49 = vld [vmem:[#allocation237_spill] sm:$0xff]  ;;  %v4115_v21 = vadd.f32 %v4111_v6, %v3963_v53  ;;  %v3847_v52 = vadd.f32 %v3843_v57, %v3739_v56 }
 0x7c5   :  { %15301 = vst [vmem:[#allocation104_spill] sm:$0xff] %v12945_v0  ;;  %v3804_v30 = vsel %vm419_vm7, %v15308_v49, %v15307_v29  ;;  %v4219_v0 = vmul.f32 %v12923_v13, %v4211_v2  ;;  %v4120_v46 = vpop.permute.xlu1 %4119  ;;  %v12966_v4 = vpop.permute.xlu0 %4093  ;;  %v3736_v36 = vmul.f32 %v12835_v15, %v3728_v31  ;;  %v12976_v34 = vrot.slane %v12798_v50, %v15284_v55  ;;  %v15313_v29 = vld [vmem:[#allocation110_spill] sm:$0xff] }
 0x7c6   :  { %v3952_v20 = vsel %vm381_vm5, %v15305_v45, %v12763_v51  ;;  %15309 = vst [vmem:[#allocation233_spill] sm:$0xff] %v12966_v4  ;;  %v15311_v45 = vunpack.i.h.bf16 %v15310_v17  ;;  %v15312_v51 = vld [vmem:[#allocation241_spill] sm:$0xff]  ;;  %v15314_v53 = vunpack.i.h.bf16 %v15313_v29  ;;  %v4007_v57 = vadd.f32 %v4003_v8, %v3847_v52  ;;  %v15315_v49 = vld [vmem:[#allocation266_spill] sm:$0xff]  ;;  %v15316_v4 = vld [vmem:[#allocation155_spill] sm:$0xff] }
 0x7c7   :  { %v3960_v2 = vmul.f32 %v12811_v43, %v3952_v20  ;;  %v3975_v6 = vadd.f32 %v3971_v10, %v3815_v25  ;;  %5611 = vrot.lane.b32.xlu1 %v15315_v49, %s7804_s10  ;;  %v3812_v55 = vmul.f32 %v12862_v32, %v3804_v30  ;;  %v15318_v17 = vld [vmem:[#allocation97_spill] sm:$0xff]  ;;  %v15320_v25 = vld [vmem:[#allocation71_spill] sm:$0xff]  ;;  %v15321_v10 = vunpack.i.h.bf16 %v15281_v27  ;;  %v15324_v43 = vld [vmem:[#allocation284_spill] sm:$0xff] }
 0x7c8   :  { %v3836_v59 = vsel %vm2350_vm11, %v15312_v51, %v15311_v45  ;;  %v4135_v56 = vsel %vm381_vm5, %v15314_v53, %v4120_v46  ;;  %v15317_v45 = vld [vmem:[#allocation147_spill] sm:$0xff]  ;;  %v15319_v37 = vunpack.i.h.bf16 %v15318_v17  ;;  %v4155_v20 = vmul.f32 %v12976_v34, %v15320_v25 }
 0x7c9   :  { %v4143_v31 = vmul.f32 %v12936_v12, %v4135_v56  ;;  %v12990_v51 = vsel %vm2257_vm10, %v15317_v45, %v15316_v4  ;;  %v15322_v52 = vld [vmem:[#allocation263_spill] sm:$0xff]  ;;  %v4223_v56 = vadd.f32 %v4219_v0, %v4115_v21  ;;  %v3906_v30 = vpop.permute.xlu1 %3905  ;;  %v13006_v45 = vpop.permute.xlu0 %4199  ;;  %v3844_v17 = vmul.f32 %v12885_v54, %v3836_v59 }
 0x7ca   :  { %v3996_v8 = vsel %vm419_vm7, %v12815_v14, %v15319_v37  ;;  %v3480_v46 = vsel %vm419_vm7, %v15322_v52, %v15321_v10  ;;  %v15323_v53 = vld [vmem:[#allocation279_spill] sm:$0xff]  ;;  %v15325_v37 = vunpack.i.h.bf16 %v15289_v33  ;;  %v15326_v27 = vunpack.i.h.bf16 %v15294_v38  ;;  %v15327_v10 = vld [vmem:[#allocation265_spill] sm:$0xff] }
 0x7cb   :  { %v3740_v4 = vadd.f32 %v3736_v36, %v15323_v53  ;;  %v4147_v49 = vadd.f32 %v4143_v31, %v3975_v6  ;;  %v3816_v36 = vadd.f32 %v3812_v55, %v15327_v10  ;;  %v15328_v0 = vld [vmem:[#allocation271_spill] sm:$0xff]  ;;  %v4004_v6 = vmul.f32 %v12914_v24, %v3996_v8  ;;  %5613 = vrot.lane.b32.xlu1 %v12522_v3, %s7804_s10  ;;  %v15336_v10 = vld [vmem:[#allocation60_spill] sm:$0xff] }
 0x7cc   :  { %v4104_v14 = vsel %vm2257_vm10, %v15325_v37, %v15324_v43  ;;  %v4212_v25 = vsel %vm2350_vm11, %v4198_v41, %v15326_v27  ;;  %v3964_v21 = vadd.f32 %v3960_v2, %v15328_v0  ;;  %v4159_v31 = vadd.f32 %v4155_v20, %v4007_v57  ;;  %v15329_v43 = vld [vmem:[#allocation112_spill] sm:$0xff]  ;;  %v15330_v41 = vld [vmem:[#allocation226_spill] sm:$0xff] }
 0x7cd   :  { %v4227_v52 = vadd.f32 %v4223_v56, %v4147_v49  ;;  %v4600_v33 = vmul.f32 %v12440_v63, %v12951_v47  ;;  %v4788_v38 = vmul.f32 %v12452_v1, %v12990_v51  ;;  %v3488_v59 = vmul.f32 %v15329_v43, %v3480_v46  ;;  %v4122_v8 = vpop.permute.xlu1 %4121  ;;  %v13032_v20 = vpop.permute.xlu0 %3909  ;;  %v15333_v56 = vld [vmem:[#allocation154_spill] sm:$0xff]  ;;  %v15334_v49 = vld [vmem:[#allocation148_spill] sm:$0xff] }
 0x7ce   :  { %v3972_v55 = vmul.f32 %v12908_v40, %v15330_v41  ;;  %v4112_v2 = vmul.f32 %v12889_v19, %v4104_v14  ;;  %v3848_v53 = vadd.f32 %v3844_v17, %v3740_v4  ;;  %v4220_v57 = vmul.f32 %v12923_v13, %v4212_v25  ;;  %15331 = vst [vmem:[#allocation45_spill] sm:$0xff] %v13032_v20  ;;  %v15335_v27 = vld [vmem:[#allocation132_spill] sm:$0xff]  ;;  %v15337_v17 = vld [vmem:[#allocation127_spill] sm:$0xff]  ;;  %v15339_v1 = vld [vmem:[#allocation242_spill] sm:$0xff] }
 0x7cf   :  { %v13034_v3 = vadd.f32 %v4227_v52, %v4159_v31  ;;  %v4663_v37 = vsel %vm2257_vm10, %v15334_v49, %v15333_v56  ;;  %v13042_v46 = vrot.slane %v15267_v58, %v15160_v48  ;;  %v3636_v14 = vmul.f32 %v15336_v10, %v15335_v27  ;;  %v15340_v63 = vld [vmem:[#allocation84_spill] sm:$0xff]  ;;  %v15342_v27 = vld [vmem:[#allocation218_spill] sm:$0xff] }
 0x7d0   :  { %v15338_v4 = vunpack.i.h.bf16 %v15337_v17  ;;  %v4008_v0 = vadd.f32 %v4004_v6, %v3848_v53  ;;  %v4116_v31 = vadd.f32 %v4112_v2, %v3964_v21  ;;  %v3976_v52 = vadd.f32 %v3972_v55, %v3816_v36  ;;  %v15343_v43 = vld [vmem:[#allocation126_spill] sm:$0xff]  ;;  %v15345_v6 = vld [vmem:[#allocation268_spill] sm:$0xff]  ;;  %v15346_v55 = vld [vmem:[#allocation111_spill] sm:$0xff] }
 0x7d1   :  { %15332 = vst [vmem:[#allocation239_spill] sm:$0xff] %v13034_v3  ;;  %v15341_v56 = vunpack.i.h.bf16 %v15340_v63  ;;  %v13058_v20 = vrot.slane %v15267_v58, %v15155_v11  ;;  %v4156_v10 = vmul.f32 %v12976_v34, %v15342_v27  ;;  %v3640_v21 = vadd.f32 %v3636_v14, %v3488_v59  ;;  %v4166_v58 = vpop.permute.xlu0 %4165  ;;  %v15352_v59 = vld [vmem:[#allocation156_spill] sm:$0xff] }
 0x7d2   :  { %v4136_v25 = vsel %vm381_vm5, %v15338_v4, %v4122_v8  ;;  %v15344_v8 = vunpack.i.h.bf16 %v15343_v43  ;;  %v15347_v2 = vunpack.i.l.bf16 %v15346_v55  ;;  %v13079_v3 = vmul.f32 %v15275_v5, %v12951_v47  ;;  %v15356_v47 = vld [vmem:[#allocation62_spill] sm:$0xff] }
 0x7d3   :  { %v4144_v41 = vmul.f32 %v12936_v12, %v4136_v25  ;;  %v3760_v49 = vsel %vm381_vm5, %v15341_v56, %v15339_v1  ;;  %v4224_v1 = vadd.f32 %v4220_v57, %v4116_v31  ;;  %v13071_v25 = vpop.permute.xlu1 %4011  ;;  %v15348_v56 = vld [vmem:[#allocation274_spill] sm:$0xff] }
 0x7d4   :  { %v3920_v36 = vsel %vm2257_vm10, %v15344_v8, %v3906_v30  ;;  %v3617_v53 = vsel %vm381_vm5, %v15347_v2, %v15345_v6  ;;  %v13075_v27 = vadd.f32 %v12894_v42, %v15348_v56  ;;  %15350 = vst [vmem:[#allocation107_spill] sm:$0xff] %v13079_v3  ;;  %v15351_v30 = vld [vmem:[#allocation151_spill] sm:$0xff]  ;;  %v15353_v8 = vld [vmem:[#allocation70_spill] sm:$0xff]  ;;  %v3768_v31 = vmul.f32 %v13042_v46, %v3760_v49 }
 0x7d5   :  { %v4148_v4 = vadd.f32 %v4144_v41, %v3976_v52  ;;  %v4705_v14 = vsel %vm2350_vm11, %v15352_v59, %v15351_v30  ;;  %v13087_v57 = vmul.f32 %v12796_v44, %v15353_v8  ;;  %v4160_v52 = vadd.f32 %v4156_v10, %v4008_v0  ;;  %v15355_v2 = vld [vmem:[#allocation275_spill] sm:$0xff] }
 0x7d6   :  { %15349 = vst [vmem:[#allocation280_spill] sm:$0xff] %v13075_v27  ;;  %v3928_v41 = vmul.f32 %v13058_v20, %v3920_v36  ;;  %v4792_v6 = vadd.f32 %v4788_v38, %v4600_v33  ;;  %v4671_v56 = vmul.f32 %v15355_v2, %v4663_v37  ;;  %v15357_v27 = vld [vmem:[#allocation114_spill] sm:$0xff]  ;;  %v3625_v30 = vmul.f32 %v12487_v39, %v3617_v53  ;;  %v13105_v38 = vpop.permute.xlu0 %4015  ;;  %v15359_v49 = vld [vmem:[#allocation183_spill] sm:$0xff] }
 0x7d7   :  { %15354 = vst [vmem:[#allocation253_spill] sm:$0xff] %v13087_v57  ;;  %v4228_v42 = vadd.f32 %v4224_v1, %v4148_v4  ;;  %v4825_v3 = vsel %vm2350_vm11, %v15357_v27, %v15356_v47  ;;  %v3772_v59 = vadd.f32 %v3768_v31, %v3640_v21  ;;  %v13099_v8 = vrot.slane %v12798_v50, %v15160_v48  ;;  %v4014_v33 = vpop.permute.xlu1 %4013  ;;  %v15361_v1 = vld [vmem:[#allocation120_spill] sm:$0xff]  ;;  %v15363_v31 = vld [vmem:[#allocation243_spill] sm:$0xff] }
 0x7d8   :  { %v13103_v10 = vrot.slane %v12798_v50, %v15155_v11  ;;  %15358 = vst [vmem:[#allocation236_spill] sm:$0xff] %v13105_v38  ;;  %v4713_v0 = vmul.f32 %v12392_v9, %v4705_v14  ;;  %v3461_v36 = vmul.f32 %v12483_v61, %v15359_v49  ;;  %v15360_v53 = vunpack.i.h.bf16 %v15232_v26  ;;  %v15369_v11 = vld [vmem:[#allocation277_spill] sm:$0xff]  ;;  %v15370_v38 = vld [vmem:[#allocation108_spill] sm:$0xff] }
 0x7d9   :  { %v4232_v5 = vadd.f32 %v4228_v42, %v4160_v52  ;;  %v15362_v4 = vunpack.i.h.bf16 %v15361_v1  ;;  %v4833_v50 = vmul.f32 %v12661_v7, %v4825_v3  ;;  %v15364_v52 = vld [vmem:[#allocation81_spill] sm:$0xff]  ;;  %v3932_v57 = vadd.f32 %v3928_v41, %v3772_v59 }
 0x7da   :  { %v4180_v21 = vsel %vm419_vm7, %v4166_v58, %v15360_v53  ;;  %v15365_v42 = vunpack.i.l.bf16 %v15364_v52  ;;  %v13126_v48 = vadd.f32 %v12817_v18, %v4792_v6  ;;  %v13130_v58 = vmul.f32 %v15278_v62, %v12990_v51  ;;  %v15367_v53 = vld [vmem:[#allocation276_spill] sm:$0xff]  ;;  %v13146_v51 = vpop.permute.xlu0 %4017 }
 0x7db   :  { %v4028_v27 = vsel %vm2350_vm11, %v4014_v33, %v15362_v4  ;;  %v13133_v33 = vmul.f32 %v15367_v53, %v4663_v37  ;;  %v3629_v4 = vadd.f32 %v3625_v30, %v3461_v36  ;;  %v13136_v44 = vadd.f32 %v15369_v11, %v4671_v56  ;;  %v13144_v59 = vpop.permute.xlu1 %3907  ;;  %v15374_v11 = vld [vmem:[#allocation115_spill] sm:$0xff] }
 0x7dc   :  { %v3729_v47 = vsel %vm2257_vm10, %v15365_v42, %v15363_v31  ;;  %v4036_v49 = vmul.f32 %v13099_v8, %v4028_v27  ;;  %15366 = vst [vmem:[#allocation123_spill] sm:$0xff] %v13130_v58  ;;  %v15371_v7 = vunpack.i.h.bf16 %v15370_v38  ;;  %v15372_v31 = vld [vmem:[#allocation245_spill] sm:$0xff]  ;;  %v4188_v18 = vmul.f32 %v13103_v10, %v4180_v21  ;;  %v15376_v36 = vld [vmem:[#allocation251_spill] sm:$0xff]  ;;  %v15378_v21 = vld [vmem:[#allocation278_spill] sm:$0xff] }
 0x7dd   :  { %15368 = vst [vmem:[#allocation113_spill] sm:$0xff] %v13133_v33  ;;  %v13149_v37 = vmul.f32 %v12398_v22, %v4705_v14  ;;  %v3737_v30 = vmul.f32 %v12835_v15, %v3729_v47  ;;  %v15375_v56 = vunpack.i.l.bf16 %v15374_v11  ;;  %v4717_v42 = vadd.f32 %v4713_v0, %v15378_v21  ;;  %v15384_v0 = vld [vmem:[#allocation240_spill] sm:$0xff] }
 0x7de   :  { %v3805_v41 = vsel %vm419_vm7, %v15372_v31, %v15371_v7  ;;  %v4040_v6 = vadd.f32 %v4036_v49, %v3932_v57  ;;  %v15377_v7 = vunpack.i.l.bf16 %v15313_v29  ;;  %v4837_v49 = vadd.f32 %v4833_v50, %v12827_v23  ;;  %v15380_v31 = vld [vmem:[#allocation167_spill] sm:$0xff]  ;;  %v15382_v29 = vld [vmem:[#allocation118_spill] sm:$0xff] }
 0x7df   :  { %15373 = vst [vmem:[#allocation261_spill] sm:$0xff] %v13149_v37  ;;  %v3837_v27 = vsel %vm2350_vm11, %v15376_v36, %v15375_v56  ;;  %v13165_v14 = vmul.f32 %v12410_v16, %v4825_v3  ;;  %v15381_v37 = vld [vmem:[#allocation59_spill] sm:$0xff]  ;;  %v3813_v56 = vmul.f32 %v12862_v32, %v3805_v41  ;;  %v3741_v36 = vadd.f32 %v3737_v30, %v3629_v4  ;;  %v3984_v41 = vpop.permute.xlu1 %3983  ;;  %v13186_v4 = vpop.permute.xlu0 %5487  ;;  %v15388_v30 = vld [vmem:[#allocation125_spill] sm:$0xff] }
 0x7e0   :  { %v3953_v57 = vsel %vm381_vm5, %v15377_v7, %v12865_v28  ;;  %v4192_v47 = vadd.f32 %v4188_v18, %v4040_v6  ;;  %v4664_v58 = vsel %vm2257_vm10, %v15381_v37, %v15380_v31  ;;  %v15383_v33 = vunpack.i.l.bf16 %v15382_v29  ;;  %v15386_v18 = vld [vmem:[#allocation72_spill] sm:$0xff]  ;;  %15387 = vst [vmem:[#allocation145_spill] sm:$0xff] %v13186_v4  ;;  %v15405_v4 = vld [vmem:[#allocation61_spill] sm:$0xff] }
 0x7e1   :  { %15379 = vst [vmem:[#allocation273_spill] sm:$0xff] %v13165_v14  ;;  %v15385_v23 = vunpack.i.h.bf16 %v15346_v55  ;;  %v3845_v50 = vmul.f32 %v12885_v54, %v3837_v27  ;;  %v3961_v6 = vmul.f32 %v15386_v18, %v3953_v57  ;;  %v15389_v7 = vunpack.i.h.bf16 %v15364_v52  ;;  %v15392_v27 = vld [vmem:[#allocation128_spill] sm:$0xff]  ;;  %v15394_v57 = vld [vmem:[#allocation54_spill] sm:$0xff] }
 0x7e2   :  { %v4105_v28 = vsel %vm2257_vm10, %v15383_v33, %v12916_v35  ;;  %v13184_v37 = vadd.f32 %v4232_v5, %v4192_v47  ;;  %v15390_v33 = vld [vmem:[#allocation117_spill] sm:$0xff]  ;;  %v15393_v31 = vunpack.i.l.bf16 %v15392_v27  ;;  %v3817_v47 = vadd.f32 %v3813_v56, %v15394_v57 }
 0x7e3   :  { %v3759_v3 = vsel %vm381_vm5, %v15385_v23, %v15384_v0  ;;  %v3919_v35 = vsel %vm2257_vm10, %v15389_v7, %v15388_v30  ;;  %v15391_v55 = vunpack.i.l.bf16 %v15390_v33  ;;  %v13203_v0 = vadd.f32 %v4837_v49, %v4717_v42  ;;  %v15398_v42 = vld [vmem:[#allocation281_spill] sm:$0xff]  ;;  %v4124_v57 = vpop.permute.xlu1 %4123  ;;  %v13224_v14 = vpop.permute.xlu0 %5527 }
 0x7e4   :  { %v3997_v5 = vsel %vm419_vm7, %v3984_v41, %v15393_v31  ;;  %v4672_v52 = vmul.f32 %v15355_v2, %v4664_v58  ;;  %v4113_v23 = vmul.f32 %v12889_v19, %v4105_v28  ;;  %v3767_v7 = vmul.f32 %v13042_v46, %v3759_v3  ;;  %v15397_v41 = vld [vmem:[#allocation232_spill] sm:$0xff]  ;;  %15401 = vst [vmem:[#allocation106_spill] sm:$0xff] %v13224_v14 }
 0x7e5   :  { %v4213_v21 = vsel %vm2350_vm11, %v13006_v45, %v15391_v55  ;;  %15395 = vst [vmem:[#allocation58_spill] sm:$0xff] %v13203_v0  ;;  %v4005_v30 = vmul.f32 %v12914_v24, %v3997_v5  ;;  %v15396_v16 = vunpack.i.h.bf16 %v15374_v11  ;;  %v3849_v55 = vadd.f32 %v3845_v50, %v3741_v36  ;;  %v15400_v5 = vld [vmem:[#allocation254_spill] sm:$0xff] }
 0x7e6   :  { %v3973_v56 = vmul.f32 %v12908_v40, %v15397_v41  ;;  %v15399_v49 = vunpack.i.l.bf16 %v15340_v63  ;;  %v3927_v31 = vmul.f32 %v13058_v20, %v3919_v35  ;;  %v3965_v3 = vadd.f32 %v3961_v6, %v15400_v5  ;;  %v15404_v50 = vld [vmem:[#allocation282_spill] sm:$0xff]  ;;  %v15407_v5 = vld [vmem:[#allocation95_spill] sm:$0xff] }
 0x7e7   :  { %v4027_v45 = vsel %vm2350_vm11, %v13071_v25, %v15396_v16  ;;  %v4221_v11 = vmul.f32 %v12923_v13, %v4213_v21  ;;  %v15402_v16 = vld [vmem:[#allocation168_spill] sm:$0xff]  ;;  %v15403_v25 = vld [vmem:[#allocation170_spill] sm:$0xff]  ;;  %v3771_v41 = vadd.f32 %v3767_v7, %v15404_v50  ;;  %v15406_v0 = vunpack.i.l.bf16 %v15405_v4  ;;  %v15408_v7 = vld [vmem:[#allocation235_spill] sm:$0xff] }
 0x7e8   :  { %v3618_v28 = vsel %vm381_vm5, %v15399_v49, %v15398_v42  ;;  %v4706_v36 = vsel %vm2350_vm11, %v15403_v25, %v15402_v16  ;;  %v3977_v63 = vadd.f32 %v3973_v56, %v3817_v47  ;;  %v4117_v42 = vadd.f32 %v4113_v23, %v3965_v3  ;;  %v15409_v56 = vld [vmem:[#allocation109_spill] sm:$0xff]  ;;  %v15411_v50 = vld [vmem:[#allocation283_spill] sm:$0xff]  ;;  %v15412_v3 = vld [vmem:[#allocation78_spill] sm:$0xff] }
 0x7e9   :  { %v4137_v35 = vsel %vm381_vm5, %v15406_v0, %v4124_v57  ;;  %v4035_v6 = vmul.f32 %v13099_v8, %v4027_v45  ;;  %v4009_v21 = vadd.f32 %v4005_v30, %v3849_v55  ;;  %v4804_v14 = vadd.f32 %v15407_v5, %v4672_v52  ;;  %v4164_v55 = vpop.permute.xlu1 %4163 }
 0x7ea   :  { %v4145_v49 = vmul.f32 %v12936_v12, %v4137_v35  ;;  %v13239_v62 = vmul.f32 %v15367_v53, %v4664_v58  ;;  %v3626_v16 = vmul.f32 %v12487_v39, %v3618_v28  ;;  %v4157_v47 = vmul.f32 %v12976_v34, %v15408_v7  ;;  %v15413_v58 = vld [vmem:[#allocation262_spill] sm:$0xff]  ;;  %v15414_v39 = vld [vmem:[#allocation116_spill] sm:$0xff] }
 0x7eb   :  { %v15410_v25 = vunpack.i.l.bf16 %v15409_v56  ;;  %v3931_v23 = vadd.f32 %v3927_v31, %v3771_v41  ;;  %v4225_v30 = vadd.f32 %v4221_v11, %v4117_v42  ;;  %v4714_v52 = vmul.f32 %v12392_v9, %v4706_v36  ;;  %v13261_v41 = vpop.permute.xlu0 %5393 }
 0x7ec   :  { %v4149_v45 = vadd.f32 %v4145_v49, %v3977_v63  ;;  %v13252_v57 = vrot.slane %v15413_v58, %v15412_v3  ;;  %v3462_v28 = vmul.f32 %v12483_v61, %v15414_v39  ;;  %v15415_v35 = vunpack.i.h.bf16 %v15392_v27  ;;  %15416 = vst [vmem:[#allocation221_spill] sm:$0xff] %v13261_v41  ;;  %v15417_v63 = vld [vmem:[#allocation246_spill] sm:$0xff]  ;;  %v15419_v27 = vld [vmem:[#allocation97_spill] sm:$0xff] }
 0x7ed   :  { %v3694_v0 = vsel %vm2350_vm11, %v15411_v50, %v15410_v25  ;;  %v4039_v7 = vadd.f32 %v4035_v6, %v3931_v23  ;;  %v4161_v56 = vadd.f32 %v4157_v47, %v4009_v21  ;;  %v13264_v9 = vadd.f32 %v13126_v48, %v4804_v14  ;;  %v15421_v25 = vld [vmem:[#allocation247_spill] sm:$0xff]  ;;  %v15422_v21 = vld [vmem:[#allocation258_spill] sm:$0xff] }
 0x7ee   :  { %v4179_v5 = vsel %vm419_vm7, %v4164_v55, %v15415_v35  ;;  %v4229_v31 = vadd.f32 %v4225_v30, %v4149_v45  ;;  %v15418_v42 = vunpack.i.l.bf16 %v15343_v43  ;;  %v15420_v49 = vunpack.i.l.bf16 %v15419_v27  ;;  %v15423_v50 = vld [vmem:[#allocation43_spill] sm:$0xff]  ;;  %v3986_v43 = vpop.permute.xlu1 %3985  ;;  %v4853_v30 = vld [vmem:[#allocation24 + $0x10] sm:$0xff]  ;;  %v15426_v35 = vld [vmem:[#allocation140_spill] sm:$0xff] }
 0x7ef   :  { %v4187_v11 = vmul.f32 %v13103_v10, %v4179_v5  ;;  %v3702_v47 = vmul.f32 %v15422_v21, %v3694_v0  ;;  %v13280_v48 = vrot.slane %v15413_v58, %v15423_v50  ;;  %v3630_v14 = vadd.f32 %v3626_v16, %v3462_v28  ;;  %v4854_v45 = vld [vmem:[#allocation24 + $0x18] sm:$0xff]  ;;  %v15430_v16 = vld [vmem:[#allocation146_spill] sm:$0xff]  ;;  %v15434_v27 = vld [vmem:[#allocation252_spill] sm:$0xff] }
 0x7f0   :  { %v3730_v61 = vsel %vm2257_vm10, %v15418_v42, %v15417_v63  ;;  %v3806_v6 = vsel %vm419_vm7, %v15421_v25, %v15420_v49  ;;  %v13282_v55 = vadd.f32 %v4229_v31, %v4161_v56  ;;  %v13285_v39 = vmul.f32 %v12398_v22, %v4706_v36  ;;  %v15427_v63 = vld [vmem:[#allocation152_spill] sm:$0xff]  ;;  %v15432_v31 = vld [vmem:[#allocation239_spill] sm:$0xff]  ;;  %v15435_v49 = vld [vmem:[#allocation233_spill] sm:$0xff] }
 0x7f1   :  { %15424 = vst [vmem:[#allocation237_spill] sm:$0xff] %v13280_v48  ;;  %v4191_v23 = vadd.f32 %v4187_v11, %v4039_v7  ;;  %v3706_v5 = vadd.f32 %v3702_v47, %v15426_v35  ;;  %v15428_v0 = vunpack.i.l.bf16 %v15337_v17  ;;  %v15429_v58 = vunpack.i.l.bf16 %v15370_v38  ;;  %v15431_v7 = vld [vmem:[#allocation93_spill] sm:$0xff] }
 0x7f2   :  { %15425 = vst [vmem:[#allocation241_spill] sm:$0xff] %v13285_v39  ;;  %v13299_v56 = vadd.f32 %v4714_v52, %v15431_v7  ;;  %v3738_v22 = vmul.f32 %v12835_v15, %v3730_v61  ;;  %v3814_v36 = vmul.f32 %v12862_v32, %v3806_v6  ;;  %v15433_v11 = vunpack.i.l.bf16 %v15361_v1  ;;  %v15438_v61 = vld [vmem:[#allocation87_spill] sm:$0xff]  ;;  %v15534_v39 = vld [vmem:[#allocation160_spill] sm:$0xff] }
 0x7f3   :  { %v3954_v42 = vsel %vm381_vm5, %v15428_v0, %v15427_v63  ;;  %v3481_v28 = vsel %vm419_vm7, %v15430_v16, %v15429_v58  ;;  %v4235_v17 = vadd.f32 %v15432_v31, %v4191_v23  ;;  %v15436_v25 = vunpack.i.h.bf16 %v15382_v29  ;;  %v15439_v23 = vld [vmem:[#allocation112_spill] sm:$0xff]  ;;  %v4126_v63 = vpop.permute.xlu1 %4125  ;;  %v4856_v0 = vld [vmem:[#allocation24 + $0x28] sm:$0xff]  ;;  %v13325_v58 = vpop.permute.xlu0 %5489  ;;  %v15441_v16 = vld [vmem:[#allocation119_spill] sm:$0xff] }
 0x7f4   :  { %v3838_v38 = vsel %vm2350_vm11, %v15434_v27, %v15433_v11  ;;  %v15437_v21 = vunpack.i.l.bf16 %v15232_v26  ;;  %v6986_v32 = vpack.c.bf16 %v4854_v45, %v4853_v30  ;;  %v13321_v6 = vmul.f32 %v13280_v48, %v15438_v61  ;;  %v4855_v29 = vld [vmem:[#allocation24 + $0x20] sm:$0xff]  ;;  %v15443_v30 = vld [vmem:[#allocation42_spill] sm:$0xff]  ;;  %v15448_v11 = vld [vmem:[#allocation133_spill] sm:$0xff] }
 0x7f5   :  { %v4106_v52 = vsel %vm2257_vm10, %v15436_v25, %v15435_v49  ;;  %v3742_v1 = vadd.f32 %v3738_v22, %v3630_v14  ;;  %v3962_v47 = vmul.f32 %v15386_v18, %v3954_v42  ;;  %v3489_v35 = vmul.f32 %v15439_v23, %v3481_v28  ;;  %6523 = vmatprep.mubr.f32.mxu0 %v4235_v17  ;;  %v15440_v26 = vld [vmem:[#allocation248_spill] sm:$0xff]  ;;  %v15446_v22 = vld [vmem:[#allocation122_spill] sm:$0xff]  ;;  %v15455_v61 = vld [vmem:[#allocation227_spill] sm:$0xff] }
 0x7f6   :  { %v3998_v15 = vsel %vm419_vm7, %v3986_v43, %v15437_v21  ;;  %v15442_v7 = vunpack.i.l.bf16 %v15441_v16  ;;  %v15444_v45 = vld [vmem:[#allocation60_spill] sm:$0xff]  ;;  %v3818_v14 = vadd.f32 %v3814_v36, %v3706_v5  ;;  %v15445_v18 = vunpack.i.h.bf16 %v15405_v4  ;;  %6524 = vmatmul.mubr.f32.vlgmr.msra.gmra.mrb[14].mxu0 %v13184_v37  ;;  %v15449_v5 = vld [vmem:[#allocation250_spill] sm:$0xff]  ;;  %v15450_v4 = vld [vmem:[#allocation169_spill] sm:$0xff] }
 0x7f7   :  { %v3637_v31 = vmul.f32 %v15444_v45, %v15443_v30  ;;  %v3846_v28 = vmul.f32 %v12885_v54, %v3838_v38  ;;  %v15447_v17 = vunpack.i.h.bf16 %v15446_v22  ;;  %v4114_v49 = vmul.f32 %v12889_v19, %v4106_v52  ;;  %6985 = vmatpush3.bf16.msra.mxu0 %v15449_v5  ;;  %v15451_v36 = vld [vmem:[#allocation207_spill] sm:$0xff]  ;;  %v15453_v54 = vld [vmem:[#allocation124_spill] sm:$0xff]  ;;  %v4202_v30 = vpop.permute.xlu1 %4201 }
 0x7f8   :  { %v3761_v43 = vsel %vm381_vm5, %v15442_v7, %v15440_v26  ;;  %v4138_v42 = vsel %vm381_vm5, %v15445_v18, %v4126_v63  ;;  %v4006_v25 = vmul.f32 %v12914_v24, %v3998_v15  ;;  %v13352_v21 = vsel %vm2350_vm11, %v15451_v36, %v15450_v4  ;;  %6987 = vmatprep.subr.bf16.mxu0 %v6986_v32  ;;  %v15456_v24 = vld [vmem:[#allocation260_spill] sm:$0xff]  ;;  %v4857_v18 = vld [vmem:[#allocation24 + $0x30] sm:$0xff]  ;;  %v4858_v22 = vld [vmem:[#allocation24 + $0x38] sm:$0xff] }
 0x7f9   :  { %v3482_v27 = vsel %vm419_vm7, %v15448_v11, %v15447_v17  ;;  %15452 = vst [vmem:[#allocation110_spill] sm:$0xff] %v13352_v21  ;;  %v15454_v37 = vunpack.i.l.bf16 %v15453_v54  ;;  %v3974_v63 = vmul.f32 %v12908_v40, %v15455_v61  ;;  %v6990_v19 = vpack.c.bf16 %v4856_v0, %v4855_v29  ;;  %v15459_v0 = vld [vmem:[#allocation256_spill] sm:$0xff]  ;;  %v15465_v61 = vld [vmem:[#allocation57_spill] sm:$0xff] }
 0x7fa   :  { %v3966_v52 = vadd.f32 %v3962_v47, %v15456_v24  ;;  %v3641_v15 = vadd.f32 %v3637_v31, %v3489_v35  ;;  %v3850_v26 = vadd.f32 %v3846_v28, %v3742_v1  ;;  %v4146_v7 = vmul.f32 %v12936_v12, %v4138_v42  ;;  %v13371_v12 = vpop.permute.xlu0 %5529  ;;  %v15460_v31 = vld [vmem:[#allocation50_spill] sm:$0xff]  ;;  %v4859_v36 = vld [vmem:[#allocation24 + $0x40] sm:$0xff] }
 0x7fb   :  { %v3921_v38 = vsel %vm2257_vm10, %v15454_v37, %v13144_v59  ;;  %v3769_v17 = vmul.f32 %v13042_v46, %v3761_v43  ;;  %v3490_v11 = vmul.f32 %v15439_v23, %v3482_v27  ;;  %v3978_v5 = vadd.f32 %v3974_v63, %v3818_v14  ;;  %6989 = vmatpush3.bf16.msra.mxu0 %v6986_v32  ;;  %v15461_v23 = vld [vmem:[#allocation211_spill] sm:$0xff]  ;;  %v15462_v14 = vld [vmem:[#allocation238_spill] sm:$0xff]  ;;  %v13383_v4 = vpop.permute.xlu1 %5495  ;;  %v4860_v37 = vld [vmem:[#allocation24 + $0x48] sm:$0xff] }
 0x7fc   :  { %v15457_v59 = vunpack.i.h.bf16 %v15390_v33  ;;  %v4118_v29 = vadd.f32 %v4114_v49, %v3966_v52  ;;  %v3929_v47 = vmul.f32 %v13058_v20, %v3921_v38  ;;  %v4010_v35 = vadd.f32 %v4006_v25, %v3850_v26  ;;  %15458 = vst [vmem:[#allocation266_spill] sm:$0xff] %v13371_v12  ;;  %6991 = vmatprep.subr.bf16.mxu0 %v6990_v19  ;;  %v15463_v27 = vld [vmem:[#allocation215_spill] sm:$0xff]  ;;  %v15466_v24 = vld [vmem:[#allocation244_spill] sm:$0xff]  ;;  %v15468_v26 = vld [vmem:[#allocation45_spill] sm:$0xff] }
 0x7fd   :  { %v4834_v43 = vmul.f32 %v15459_v0, %v13352_v21  ;;  %v5110_v33 = vsel %vm5109_vm12, %v15461_v23, %v15460_v31  ;;  %v4158_v42 = vmul.f32 %v12976_v34, %v15462_v14  ;;  %v6994_v28 = vpack.c.bf16 %v4858_v22, %v4857_v18  ;;  %v15464_v38 = vld [vmem:[#allocation55_spill] sm:$0xff]  ;;  %v15472_v18 = vld [vmem:[#allocation236_spill] sm:$0xff]  ;;  %v15475_v0 = vld [vmem:[#allocation138_spill] sm:$0xff] }
 0x7fe   :  { %v4214_v40 = vsel %vm2350_vm11, %v4202_v30, %v15457_v59  ;;  %v3638_v49 = vmul.f32 %v15444_v45, %v15463_v27  ;;  %v4150_v32 = vadd.f32 %v4146_v7, %v3978_v5  ;;  %v5203_v63 = vsel %vm5202_vm13, %v15465_v61, %v15464_v38  ;;  %v15470_v7 = vld [vmem:[#allocation121_spill] sm:$0xff]  ;;  %v4861_v14 = vld [vmem:[#allocation24 + $0x50] sm:$0xff] }
 0x7ff   :  { %v4222_v1 = vmul.f32 %v12923_v13, %v4214_v40  ;;  %v3773_v13 = vadd.f32 %v3769_v17, %v3641_v15  ;;  %v15467_v34 = vunpack.i.h.bf16 %v15441_v16  ;;  %v15469_v45 = vunpack.i.h.bf16 %v15453_v54  ;;  %6993 = vmatpush3.bf16.msra.mxu0 %v6990_v19  ;;  %v15473_v16 = vld [vmem:[#allocation104_spill] sm:$0xff]  ;;  %v15480_v61 = vld [vmem:[#allocation158_spill] sm:$0xff] }
 0x800   :  { %v15471_v30 = vunpack.i.l.bf16 %v15470_v7  ;;  %v3642_v17 = vadd.f32 %v3638_v49, %v3490_v11  ;;  %v4162_v59 = vadd.f32 %v4158_v42, %v4010_v35  ;;  %v15476_v31 = vunpack.i.h.bf16 %v15470_v7  ;;  %6995 = vmatprep.subr.bf16.mxu0 %v6994_v28  ;;  %v4862_v42 = vld [vmem:[#allocation24 + $0x58] sm:$0xff]  ;;  %v13421_v49 = vpop.permute.xlu0 %5423  ;;  %v15525_v21 = vld [vmem:[#allocation234_spill] sm:$0xff] }
 0x801   :  { %v4226_v25 = vadd.f32 %v4222_v1, %v4118_v29  ;;  %v3762_v52 = vsel %vm381_vm5, %v15467_v34, %v15466_v24  ;;  %v3922_v15 = vsel %vm2257_vm10, %v15469_v45, %v15468_v26  ;;  %v3933_v5 = vadd.f32 %v3929_v47, %v3773_v13  ;;  %v15474_v1 = vld [vmem:[#allocation47_spill] sm:$0xff]  ;;  %15477 = vst [vmem:[#allocation155_spill] sm:$0xff] %v13421_v49  ;;  %v15478_v13 = vld [vmem:[#allocation129_spill] sm:$0xff]  ;;  %v15485_v45 = vld [vmem:[#allocation208_spill] sm:$0xff] }
 0x802   :  { %v4029_v22 = vsel %vm2350_vm11, %v15472_v18, %v15471_v30  ;;  %v13405_v29 = vadd.f32 %v4834_v43, %v15473_v16  ;;  %v13411_v54 = vsel %vm2350_vm11, %v15475_v0, %v15474_v1  ;;  %v4030_v23 = vsel %vm2350_vm11, %v13146_v51, %v15476_v31  ;;  %v4168_v43 = vpop.permute.xlu1 %4167  ;;  %v15481_v51 = vld [vmem:[#allocation157_spill] sm:$0xff]  ;;  %v15488_v18 = vld [vmem:[#allocation214_spill] sm:$0xff]  ;;  %v15535_v49 = vld [vmem:[#allocation136_spill] sm:$0xff] }
 0x803   :  { %v4230_v40 = vadd.f32 %v4226_v25, %v4150_v32  ;;  %v6998_v11 = vpack.c.bf16 %v4860_v37, %v4859_v36  ;;  %v3770_v47 = vmul.f32 %v13042_v46, %v3762_v52  ;;  %v3930_v19 = vmul.f32 %v13058_v20, %v3922_v15  ;;  %v15479_v25 = vld [vmem:[#allocation143_spill] sm:$0xff]  ;;  %6997 = vmatpush3.bf16.msra.mxu0 %v6994_v28  ;;  %v15486_v15 = vld [vmem:[#allocation56_spill] sm:$0xff]  ;;  %v15487_v30 = vld [vmem:[#allocation137_spill] sm:$0xff] }
 0x804   :  { %v4037_v35 = vmul.f32 %v13099_v8, %v4029_v22  ;;  %v5118_v32 = vmul.f32 %v15478_v13, %v5110_v33  ;;  %v5211_v38 = vmul.f32 %v15479_v25, %v5203_v63  ;;  %v5138_v36 = vsel %vm2257_vm10, %v15481_v51, %v15480_v61  ;;  %v15482_v46 = vld [vmem:[#allocation135_spill] sm:$0xff] }
 0x805   :  { %v4234_v27 = vadd.f32 %v4230_v40, %v4162_v59  ;;  %v15483_v37 = vunpack.i.l.bf16 %v15482_v46  ;;  %v3774_v24 = vadd.f32 %v3770_v47, %v3642_v17  ;;  %v4038_v34 = vmul.f32 %v13099_v8, %v4030_v23  ;;  %v15484_v33 = vld [vmem:[#allocation267_spill] sm:$0xff]  ;;  %6999 = vmatprep.subr.bf16.mxu0 %v6998_v11  ;;  %v15489_v17 = vld [vmem:[#allocation210_spill] sm:$0xff]  ;;  %v15491_v59 = vld [vmem:[#allocation205_spill] sm:$0xff] }
 0x806   :  { %v4041_v52 = vadd.f32 %v4037_v35, %v3933_v5  ;;  %v4601_v63 = vmul.f32 %v15484_v33, %v13411_v54  ;;  %v13441_v7 = vsel %vm2257_vm10, %v15486_v15, %v15485_v45  ;;  %v5235_v22 = vsel %vm5109_vm12, %v15488_v18, %v15487_v30  ;;  %v15490_v5 = vld [vmem:[#allocation204_spill] sm:$0xff]  ;;  %v15492_v40 = vld [vmem:[#allocation203_spill] sm:$0xff]  ;;  %v4170_v31 = vpop.permute.xlu1 %4169  ;;  %v4864_v47 = vld [vmem:[#allocation24 + $0x68] sm:$0xff]  ;;  %v13473_v15 = vpop.permute.xlu0 %5559 }
 0x807   :  { %v4181_v20 = vsel %vm419_vm7, %v4168_v43, %v15483_v37  ;;  %v7002_v8 = vpack.c.bf16 %v4862_v42, %v4861_v14  ;;  %v13451_v28 = vsel %vm2350_vm11, %v15490_v5, %v15489_v17  ;;  %v13457_v16 = vsel %vm2257_vm10, %v15492_v40, %v15491_v59  ;;  %v4863_v23 = vld [vmem:[#allocation24 + $0x60] sm:$0xff]  ;;  %v15493_v35 = vld [vmem:[#allocation53_spill] sm:$0xff]  ;;  %v15495_v61 = vld [vmem:[#allocation259_spill] sm:$0xff]  ;;  %7001 = vmatpush3.bf16.msra.mxu0 %v6998_v11 }
 0x808   :  { %v4189_v26 = vmul.f32 %v13103_v10, %v4181_v20  ;;  %v3934_v1 = vadd.f32 %v3930_v19, %v3774_v24  ;;  %v15494_v43 = vld [vmem:[#allocation209_spill] sm:$0xff]  ;;  %v5215_v42 = vadd.f32 %v5211_v38, %v5118_v32  ;;  %v5146_v51 = vmul.f32 %v15495_v61, %v5138_v36  ;;  %v15497_v45 = vld [vmem:[#allocation134_spill] sm:$0xff]  ;;  %15498 = vst [vmem:[#allocation147_spill] sm:$0xff] %v13473_v15  ;;  %v15500_v18 = vld [vmem:[#allocation63_spill] sm:$0xff] }
 0x809   :  { %v13463_v14 = vsel %vm2257_vm10, %v15494_v43, %v15493_v35  ;;  %v15496_v37 = vunpack.i.h.bf16 %v15482_v46  ;;  %v5243_v19 = vmul.f32 %v15497_v45, %v5235_v22  ;;  %v15499_v30 = vld [vmem:[#allocation165_spill] sm:$0xff]  ;;  %v13479_v38 = vld [vmem:[#allocation26 + $0x10] sm:$0xff]  ;;  %7003 = vmatprep.subr.bf16.mxu0 %v7002_v8  ;;  %v7006_v46 = vpack.c.bf16 %v4864_v47, %v4863_v23  ;;  %v15504_v17 = vld [vmem:[#allocation172_spill] sm:$0xff] }
 0x80a   :  { %v4193_v0 = vadd.f32 %v4189_v26, %v4041_v52  ;;  %v4042_v24 = vadd.f32 %v4038_v34, %v3934_v1  ;;  %v5303_v32 = vsel %vm5202_vm13, %v15500_v18, %v15499_v30  ;;  %v13483_v36 = vrot.slane %v13479_v38, %v15412_v3  ;;  %v15501_v34 = vld [vmem:[#allocation150_spill] sm:$0xff]  ;;  %v15505_v5 = vld [vmem:[#allocation171_spill] sm:$0xff]  ;;  %v15506_v40 = vld [vmem:[#allocation213_spill] sm:$0xff] }
 0x80b   :  { %v4182_v20 = vsel %vm419_vm7, %v4170_v31, %v15496_v37  ;;  %v5111_v59 = vsel %vm5109_vm12, %v15505_v5, %v15504_v17  ;;  %v15507_v1 = vld [vmem:[#allocation212_spill] sm:$0xff]  ;;  %v13497_v31 = vpop.permute.xlu1 %5535  ;;  %v4865_v23 = vld [vmem:[#allocation24 + $0x70] sm:$0xff]  ;;  %v4866_v47 = vld [vmem:[#allocation24 + $0x78] sm:$0xff]  ;;  %v4602_v35 = vmul.f32 %v15484_v33, %v13451_v28  ;;  %v4673_v37 = vmul.f32 %v15355_v2, %v13463_v14  ;;  %7005 = vmatpush3.bf16.msra.mxu0 %v7002_v8 }
 0x80c   :  { %v4190_v52 = vmul.f32 %v13103_v10, %v4182_v20  ;;  %v4237_v26 = vadd.f32 %v13282_v55, %v4193_v0  ;;  %v15502_v10 = vld [vmem:[#allocation131_spill] sm:$0xff]  ;;  %v15503_v55 = vld [vmem:[#allocation270_spill] sm:$0xff]  ;;  %v5204_v0 = vsel %vm5202_vm13, %v15507_v1, %v15506_v40  ;;  %15508 = vst [vmem:[#allocation71_spill] sm:$0xff] %v13497_v31  ;;  %v5119_v33 = vmul.f32 %v15478_v13, %v5111_v59  ;;  %v15519_v59 = vld [vmem:[#allocation272_spill] sm:$0xff] }
 0x80d   :  { %v4843_v11 = vadd.f32 %v15502_v10, %v15501_v34  ;;  %v4789_v22 = vmul.f32 %v15503_v55, %v13441_v7  ;;  %v4790_v43 = vmul.f32 %v15503_v55, %v13457_v16  ;;  %v15509_v20 = vld [vmem:[#allocation51_spill] sm:$0xff]  ;;  %v15510_v30 = vld [vmem:[#allocation206_spill] sm:$0xff]  ;;  %v15512_v34 = vld [vmem:[#allocation96_spill] sm:$0xff]  ;;  %v5212_v55 = vmul.f32 %v15479_v25, %v5204_v0  ;;  %7007 = vmatprep.subr.bf16.mxu0 %v7006_v46 }
 0x80e   :  { %v4194_v3 = vadd.f32 %v4190_v52, %v4042_v24  ;;  %6526 = vmatprep.mubr.f32.mxu0 %v4237_v26  ;;  %v13509_v18 = vsel %vm2257_vm10, %v15510_v30, %v15509_v20  ;;  %v15511_v24 = vld [vmem:[#allocation196_spill] sm:$0xff]  ;;  %v5247_v26 = vadd.f32 %v5243_v19, %v5146_v51  ;;  %v5311_v10 = vmul.f32 %v15512_v34, %v5303_v32  ;;  %v15513_v20 = vld [vmem:[#allocation269_spill] sm:$0xff]  ;;  %v13528_v32 = vpop.permute.xlu0 %5599 }
 0x80f   :  { %v5283_v52 = vadd.f32 %v15511_v24, %v5215_v42  ;;  %v4847_v5 = vadd.f32 %v4843_v11, %v13136_v44  ;;  %v7010_v40 = vpack.c.bf16 %v4866_v47, %v4865_v23  ;;  %v4842_v1 = vadd.f32 %v13405_v29, %v13299_v56  ;;  %v5675_v51 = vld [vmem:[#allocation27] sm:$0xff]  ;;  %v5676_v19 = vld [vmem:[#allocation27 + $0x8] sm:$0xff]  ;;  %v15515_v56 = vld [vmem:[#allocation190_spill] sm:$0xff]  ;;  %7009 = vmatpush3.bf16.msra.mxu0 %v7006_v46 }
 0x810   :  { %v4238_v17 = vadd.f32 %v4234_v27, %v4194_v3  ;;  %v13520_v30 = vmul.f32 %v15513_v20, %v13411_v54  ;;  %v4793_v42 = vadd.f32 %v4789_v22, %v4601_v63  ;;  %v13524_v8 = vrot.slane %v13479_v38, %v15423_v50  ;;  %v13526_v27 = vpop.permute.xlu1 %5401  ;;  %v15516_v29 = vld [vmem:[#allocation73_spill] sm:$0xff]  ;;  %v7415_v63 = vld [vmem:[#allocation2 + $0x20] sm:$0xff]  ;;  %v15521_v23 = vld [vmem:[#allocation91_spill] sm:$0xff] }
 0x811   :  { %15514 = vst [vmem:[#allocation263_spill] sm:$0xff] %v13526_v27  ;;  %v4674_v44 = vmul.f32 %v15355_v2, %v13509_v18  ;;  %v5335_v54 = vsel %vm5109_vm12, %v15516_v29, %v15515_v56  ;;  %v13537_v11 = vmul.f32 %v7415_v63, %v13483_v36  ;;  %v15518_v50 = vld [vmem:[#allocation77_spill] sm:$0xff]  ;;  %v13545_v0 = vmul.f32 %v15519_v59, %v13441_v7  ;;  %v15527_v46 = vld [vmem:[#allocation58_spill] sm:$0xff] }
 0x812   :  { %6527 = vmatmul.mubr.f32.gmra.mrb[16].mxu0 %v4238_v17  ;;  %v13541_v22 = vrot.slane %v13479_v38, %v15518_v50  ;;  %v5315_v3 = vadd.f32 %v5311_v10, %v5247_v26  ;;  %v5371_v2 = vadd.f32 %v13321_v6, %v5283_v52  ;;  %v13550_v47 = vmul.f32 %v13280_v48, %v15521_v23  ;;  %v15522_v17 = vld [vmem:[#allocation65_spill] sm:$0xff]  ;;  %v15526_v10 = vld [vmem:[#allocation80_spill] sm:$0xff]  ;;  %v13586_v12 = vpop.permute.xlu0 %5635 }
 0x813   :  { %15517 = vst [vmem:[#allocation279_spill] sm:$0xff] %v13537_v11  ;;  %6596 = vmatprep.mubr.f32.mxu0 %v4847_v5  ;;  %15520 = vst [vmem:[#allocation284_spill] sm:$0xff] %v13545_v0  ;;  %v4794_v24 = vadd.f32 %v4790_v43, %v4602_v35  ;;  %v4805_v56 = vadd.f32 %v15522_v17, %v4673_v37  ;;  %v5216_v29 = vadd.f32 %v5212_v55, %v5119_v33  ;;  %v15523_v50 = vld [vmem:[#allocation185_spill] sm:$0xff]  ;;  %v15524_v5 = vld [vmem:[#allocation75_spill] sm:$0xff] }
 0x814   :  { %7011 = vmatprep.subr.bf16.mxu0 %v7010_v40  ;;  %v7038_v63 = vpack.c.bf16 %v5676_v19, %v5675_v51  ;;  %v5174_v7 = vsel %vm2350_vm11, %v15524_v5, %v15523_v50  ;;  %v5343_v26 = vmul.f32 %v15525_v21, %v5335_v54  ;;  %v13560_v6 = vrot.slane %v13479_v38, %v15526_v10  ;;  %v13562_v52 = vpop.permute.xlu1 %5497  ;;  %v5677_v43 = vld [vmem:[#allocation27 + $0x10] sm:$0xff]  ;;  %v5678_v37 = vld [vmem:[#allocation27 + $0x18] sm:$0xff]  ;;  %v15530_v19 = vld [vmem:[#allocation181_spill] sm:$0xff] }
 0x815   :  { %v4845_v35 = vadd.f32 %v15527_v46, %v4793_v42  ;;  %v15528_v33 = vld [vmem:[#allocation67_spill] sm:$0xff]  ;;  %v15529_v51 = vld [vmem:[#allocation198_spill] sm:$0xff]  ;;  %v15531_v50 = vld [vmem:[#allocation200_spill] sm:$0xff]  ;;  %v5139_v42 = vsel %vm2257_vm10, %v15535_v49, %v15534_v39  ;;  %7013 = vmatpush3.bf16.msra.mxu0 %v7010_v40  ;;  %15540 = vst [vmem:[#allocation265_spill] sm:$0xff] %v13586_v12  ;;  %v4846_v27 = vadd.f32 %v4842_v1, %v4794_v24 }
 0x816   :  { %v4806_v55 = vadd.f32 %v15528_v33, %v4674_v44  ;;  %v5403_v23 = vsel %vm5202_vm13, %v15530_v19, %v15529_v51  ;;  %v15532_v17 = vld [vmem:[#allocation201_spill] sm:$0xff]  ;;  %v15533_v5 = vld [vmem:[#allocation86_spill] sm:$0xff]  ;;  %v15537_v44 = vld [vmem:[#allocation159_spill] sm:$0xff]  ;;  %7039 = vmatprep.subr.bf16.mxu0 %v7038_v63  ;;  %v7042_v31 = vpack.c.bf16 %v5678_v37, %v5677_v43 }
 0x817   :  { %v5539_v54 = vsel %vm5109_vm12, %v15532_v17, %v15531_v50  ;;  %v5467_v10 = vmul.f32 %v13541_v22, %v15533_v5  ;;  %v15536_v46 = vld [vmem:[#allocation161_spill] sm:$0xff]  ;;  %v15538_v0 = vld [vmem:[#allocation83_spill] sm:$0xff]  ;;  %v15539_v19 = vld [vmem:[#allocation142_spill] sm:$0xff]  ;;  %v5411_v11 = vmul.f32 %v13252_v57, %v5403_v23 }
 0x818   :  { %v5236_v33 = vsel %vm5109_vm12, %v15537_v44, %v15536_v46  ;;  %v5383_v51 = vadd.f32 %v15538_v0, %v5315_v3  ;;  %v5459_v15 = vadd.f32 %v15539_v19, %v5371_v2  ;;  %v15541_v50 = vld [vmem:[#allocation107_spill] sm:$0xff]  ;;  %v15542_v5 = vld [vmem:[#allocation149_spill] sm:$0xff]  ;;  %v5547_v46 = vmul.f32 %v13524_v8, %v5539_v54  ;;  %v13593_v44 = vpop.permute.xlu1 %5537  ;;  %v5679_v3 = vld [vmem:[#allocation27 + $0x20] sm:$0xff]  ;;  %6597 = vmatmul.mubr.f32.vlgmr.msra.gmra.mrb[18].mxu0 %v13264_v9 }
 0x819   :  { %v5284_v17 = vadd.f32 %v15541_v50, %v5216_v29  ;;  %v5182_v41 = vmul.f32 %v15542_v5, %v5174_v7  ;;  %v15543_v39 = vld [vmem:[#allocation257_spill] sm:$0xff]  ;;  %15544 = vst [vmem:[#allocation271_spill] sm:$0xff] %v13593_v44  ;;  %v4849_v0 = vadd.f32 %v4845_v35, %v4805_v56  ;;  %v5147_v2 = vmul.f32 %v15495_v61, %v5139_v42  ;;  %v15546_v7 = vld [vmem:[#allocation44_spill] sm:$0xff]  ;;  %v13601_v24 = vld [vmem:[#allocation26 + $0x18] ss:$0 sm:$0xff] }
 0x81a   :  { %v5347_v49 = vadd.f32 %v5343_v26, %v15543_v39  ;;  %v5680_v40 = vld [vmem:[#allocation27 + $0x28] sm:$0xff]  ;;  %v5244_v29 = vmul.f32 %v15497_v45, %v5236_v33  ;;  %v15547_v26 = vld [vmem:[#allocation74_spill] sm:$0xff]  ;;  %v15549_v56 = vld [vmem:[#allocation92_spill] sm:$0xff]  ;;  %v5471_v50 = vadd.f32 %v5467_v10, %v5383_v51  ;;  %7041 = vmatpush3.bf16.msra.mxu0 %v7038_v63  ;;  %v13624_v51 = vpop.permute.xlu0 %5425 }
 0x81b   :  { %v15545_v19 = vld [vmem:[#allocation69_spill] sm:$0xff]  ;;  %v15548_v43 = vld [vmem:[#allocation66_spill] sm:$0xff]  ;;  %v15550_v35 = vld [vmem:[#allocation255_spill] sm:$0xff]  ;;  %6599 = vmatprep.mubr.f32.mxu0 %v4849_v0  ;;  %7043 = vmatprep.subr.bf16.mxu0 %v7042_v31  ;;  %v7046_v9 = vpack.c.bf16 %v5680_v40, %v5679_v3  ;;  %15557 = vst [vmem:[#allocation148_spill] sm:$0xff] %v13624_v51  ;;  %v13628_v0 = vmul.f32 %v15513_v20, %v13451_v28 }
 0x81c   :  { %v5571_v1 = vsel %vm2257_vm10, %v15546_v7, %v15545_v19  ;;  %v5647_v37 = vsel %vm5202_vm13, %v15548_v43, %v15547_v26  ;;  %v13610_v23 = vmul.f32 %v15550_v35, %v15549_v56  ;;  %v7416_v54 = vld [vmem:[#allocation26 + $0x8] sm:$0xff]  ;;  %v15553_v39 = vld [vmem:[#allocation182_spill] sm:$0xff]  ;;  %v15554_v19 = vld [vmem:[#allocation175_spill] sm:$0xff]  ;;  %v4850_v43 = vadd.f32 %v4846_v27, %v4806_v55  ;;  %v13622_v48 = vpop.permute.xlu1 %5431 }
 0x81d   :  { %v15552_v42 = vld [vmem:[#allocation49_spill] sm:$0xff]  ;;  %v5304_v7 = vsel %vm5202_vm13, %v15554_v19, %v15553_v39  ;;  %v5415_v12 = vadd.f32 %v5411_v11, %v5347_v49  ;;  %v5551_v56 = vadd.f32 %v5547_v46, %v5459_v15  ;;  %15556 = vst [vmem:[#allocation154_spill] sm:$0xff] %v13622_v48  ;;  %v5681_v10 = vld [vmem:[#allocation27 + $0x30] sm:$0xff]  ;;  %v5682_v63 = vld [vmem:[#allocation27 + $0x38] sm:$0xff]  ;;  %v5372_v27 = vadd.f32 %v13550_v47, %v5284_v17 }
 0x81e   :  { %15551 = vst [vmem:[#allocation226_spill] sm:$0xff] %v13610_v23  ;;  %v13613_v33 = vrot.slane %v7416_v54, %v15552_v42  ;;  %v15555_v44 = vld [vmem:[#allocation249_spill] sm:$0xff]  ;;  %v5579_v23 = vmul.f32 %v13560_v6, %v5571_v1  ;;  %v5655_v54 = vmul.f32 %v13601_v24, %v5647_v37  ;;  %v15559_v11 = vld [vmem:[#allocation40_spill] sm:$0xff]  ;;  %6600 = vmatmul.mubr.f32.gmra.mrb[20].mxu0 %v4850_v43  ;;  %v15562_v40 = vld [vmem:[#allocation82_spill] sm:$0xff] }
 0x81f   :  { %v5271_v26 = vadd.f32 %v15555_v44, %v5182_v41  ;;  %v5248_v41 = vadd.f32 %v5244_v29, %v5147_v2  ;;  %v15558_v55 = vld [vmem:[#allocation41_spill] sm:$0xff]  ;;  %v5312_v49 = vmul.f32 %v15512_v34, %v5304_v7  ;;  %v13642_v28 = vrot.slane %v13479_v38, %v15562_v40  ;;  %7045 = vmatpush3.bf16.msra.mxu0 %v7042_v31  ;;  %v7417_v20 = vld [vmem:[#allocation2 + $0x10] sm:$0xff]  ;;  %v15563_v17 = vld [vmem:[#allocation180_spill] sm:$0xff] }
 0x820   :  { %v5435_v15 = vsel %vm5109_vm12, %v15559_v11, %v15558_v55  ;;  %v15560_v46 = vld [vmem:[#allocation193_spill] sm:$0xff]  ;;  %v5591_v47 = vmul.f32 %v7417_v20, %v13483_v36  ;;  %v15564_v2 = vld [vmem:[#allocation88_spill] sm:$0xff]  ;;  %7047 = vmatprep.subr.bf16.mxu0 %v7046_v9  ;;  %v7050_v7 = vpack.c.bf16 %v5682_v63, %v5681_v10  ;;  %v15567_v43 = vld [vmem:[#allocation79_spill] sm:$0xff]  ;;  %v5583_v11 = vadd.f32 %v5579_v23, %v5471_v50 }
 0x821   :  { %v15561_v44 = vld [vmem:[#allocation177_spill] sm:$0xff]  ;;  %v5336_v29 = vsel %vm5109_vm12, %v15564_v2, %v15563_v17  ;;  %v5483_v55 = vadd.f32 %v15567_v43, %v5415_v12  ;;  %v5443_v31 = vmul.f32 %v13613_v33, %v5435_v15  ;;  %v5683_v40 = vld [vmem:[#allocation27 + $0x40] sm:$0xff]  ;;  %v15570_v2 = vld [vmem:[#allocation162_spill] sm:$0xff] }
 0x822   :  { %v5140_v3 = vsel %vm2257_vm10, %v15561_v44, %v15560_v46  ;;  %v15565_v1 = vld [vmem:[#allocation113_spill] sm:$0xff]  ;;  %v5659_v46 = vadd.f32 %v5655_v54, %v5551_v56  ;;  %v13656_v44 = vpop.permute.xlu1 %5567  ;;  %v15569_v17 = vld [vmem:[#allocation164_spill] sm:$0xff]  ;;  %v15572_v51 = vld [vmem:[#allocation166_spill] sm:$0xff] }
 0x823   :  { %v5359_v37 = vadd.f32 %v15565_v1, %v5271_v26  ;;  %v15566_v39 = vld [vmem:[#allocation145_spill] sm:$0xff]  ;;  %15568 = vst [vmem:[#allocation132_spill] sm:$0xff] %v13656_v44  ;;  %v5112_v26 = vsel %vm5109_vm12, %v15570_v2, %v15569_v17  ;;  %v15571_v1 = vld [vmem:[#allocation163_spill] sm:$0xff]  ;;  %v15574_v63 = vld [vmem:[#allocation90_spill] sm:$0xff]  ;;  %7049 = vmatpush3.bf16.msra.mxu0 %v7046_v9  ;;  %v5316_v2 = vadd.f32 %v5312_v49, %v5248_v41 }
 0x824   :  { %v5503_v19 = vsel %vm5202_vm13, %v15566_v39, %v13383_v4  ;;  %v5684_v20 = vld [vmem:[#allocation27 + $0x48] sm:$0xff]  ;;  %v5205_v4 = vsel %vm5202_vm13, %v15572_v51, %v15571_v1  ;;  %v15573_v10 = vld [vmem:[#allocation123_spill] sm:$0xff]  ;;  %v5468_v23 = vmul.f32 %v13541_v22, %v15574_v63  ;;  %v15576_v56 = vld [vmem:[#allocation174_spill] sm:$0xff]  ;;  %v13680_v51 = vrot.slane %v13479_v38, %v15552_v42  ;;  %7051 = vmatprep.subr.bf16.mxu0 %v7050_v7 }
 0x825   :  { %v5460_v12 = vadd.f32 %v15573_v10, %v5372_v27  ;;  %v15575_v50 = vld [vmem:[#allocation173_spill] sm:$0xff]  ;;  %v15577_v15 = vld [vmem:[#allocation187_spill] sm:$0xff]  ;;  %v5511_v17 = vmul.f32 %v13642_v28, %v5503_v19  ;;  %v13682_v27 = vpop.permute.xlu0 %5561  ;;  %v5148_v1 = vmul.f32 %v15495_v61, %v5140_v3  ;;  %v5344_v10 = vmul.f32 %v15525_v21, %v5336_v29  ;;  %v5685_v42 = vld [vmem:[#allocation27 + $0x50] sm:$0xff] }
 0x826   :  { %v5113_v54 = vsel %vm5109_vm12, %v15576_v56, %v15575_v50  ;;  %v15578_v39 = vld [vmem:[#allocation105_spill] sm:$0xff]  ;;  %15579 = vst [vmem:[#allocation127_spill] sm:$0xff] %v13682_v27  ;;  %v7054_v63 = vpack.c.bf16 %v5684_v20, %v5683_v40  ;;  %v15580_v50 = vld [vmem:[#allocation68_spill] sm:$0xff]  ;;  %v5447_v19 = vadd.f32 %v5443_v31, %v5359_v37  ;;  %v5608_v48 = vpop.permute.xlu1 %5607  ;;  %v5595_v38 = vadd.f32 %v5591_v47, %v5483_v55  ;;  %v5686_v9 = vld [vmem:[#allocation27 + $0x58] sm:$0xff] }
 0x827   :  { %v5237_v43 = vsel %vm5109_vm12, %v15578_v39, %v15577_v15  ;;  %v15581_v56 = vld [vmem:[#allocation64_spill] sm:$0xff]  ;;  %v5663_v39 = vadd.f32 %v5659_v46, %v5583_v11  ;;  %v15583_v49 = vld [vmem:[#allocation191_spill] sm:$0xff]  ;;  %v15585_v40 = vld [vmem:[#allocation194_spill] sm:$0xff]  ;;  %v5615_v37 = vsel %vm2350_vm11, %v13528_v32, %v5608_v48  ;;  %7053 = vmatpush3.bf16.msra.mxu0 %v7050_v7  ;;  %v7058_v32 = vpack.c.bf16 %v5686_v9, %v5685_v42 }
 0x828   :  { %v5175_v15 = vsel %vm2350_vm11, %v15581_v56, %v15580_v50  ;;  %v5245_v27 = vmul.f32 %v15497_v45, %v5237_v43  ;;  %v15582_v41 = vld [vmem:[#allocation48_spill] sm:$0xff]  ;;  %v15586_v31 = vld [vmem:[#allocation85_spill] sm:$0xff]  ;;  %v15587_v47 = vld [vmem:[#allocation103_spill] sm:$0xff]  ;;  %v5515_v50 = vadd.f32 %v5511_v17, %v5447_v19  ;;  %v5623_v56 = vmul.f32 %v13680_v51, %v5615_v37  ;;  %7055 = vmatprep.subr.bf16.mxu0 %v7054_v63 }
 0x829   :  { %v5404_v3 = vsel %vm5202_vm13, %v15583_v49, %v15582_v41  ;;  %v15584_v29 = vld [vmem:[#allocation192_spill] sm:$0xff]  ;;  %v5206_v55 = vsel %vm5202_vm13, %v15587_v47, %v15586_v31  ;;  %v15588_v11 = vld [vmem:[#allocation179_spill] sm:$0xff]  ;;  %v15589_v46 = vld [vmem:[#allocation197_spill] sm:$0xff]  ;;  %v13718_v17 = vpop.permute.xlu0 %5601 }
 0x82a   :  { %v5540_v20 = vsel %vm5109_vm12, %v15585_v40, %v15584_v29  ;;  %v5305_v43 = vsel %vm5202_vm13, %v15589_v46, %v15588_v11  ;;  %v15590_v41 = vld [vmem:[#allocation153_spill] sm:$0xff]  ;;  %v5183_v29 = vmul.f32 %v15542_v5, %v5175_v15  ;;  %v15591_v40 = vld [vmem:[#allocation144_spill] sm:$0xff]  ;;  %v5412_v44 = vmul.f32 %v13252_v57, %v5404_v3  ;;  %v13716_v21 = vpop.permute.xlu1 %5643 }
 0x82b   :  { %v5384_v49 = vadd.f32 %v15590_v41, %v5316_v2  ;;  %v5348_v48 = vadd.f32 %v5344_v10, %v15591_v40  ;;  %v5548_v31 = vmul.f32 %v13524_v8, %v5540_v20  ;;  %v5627_v47 = vadd.f32 %v5623_v56, %v5515_v50  ;;  %v5687_v19 = vld [vmem:[#allocation27 + $0x60] sm:$0xff]  ;;  %v5688_v7 = vld [vmem:[#allocation27 + $0x68] sm:$0xff]  ;;  %7057 = vmatpush3.bf16.msra.mxu0 %v7054_v63 }
 0x82c   :  { %v5667_v11 = vadd.f32 %v5663_v39, %v5595_v38  ;;  %v5249_v37 = vadd.f32 %v5245_v27, %v5148_v1  ;;  %v5313_v2 = vmul.f32 %v15512_v34, %v5305_v43  ;;  %v15592_v15 = vld [vmem:[#allocation225_spill] sm:$0xff]  ;;  %v15593_v46 = vld [vmem:[#allocation224_spill] sm:$0xff]  ;;  %v5120_v20 = vmul.f32 %v15478_v13, %v5112_v26  ;;  %7059 = vmatprep.subr.bf16.mxu0 %v7058_v32 }
 0x82d   :  { %v5572_v10 = vsel %vm2257_vm10, %v15593_v46, %v15592_v15  ;;  %v15594_v42 = vld [vmem:[#allocation228_spill] sm:$0xff]  ;;  %v15595_v9 = vld [vmem:[#allocation229_spill] sm:$0xff]  ;;  %v5213_v39 = vmul.f32 %v15479_v25, %v5205_v4  ;;  %v5121_v38 = vmul.f32 %v15478_v13, %v5113_v54  ;;  %v5214_v27 = vmul.f32 %v15479_v25, %v5206_v55  ;;  %v5689_v4 = vld [vmem:[#allocation27 + $0x70] sm:$0xff] }
 0x82e   :  { %v5648_v3 = vsel %vm5202_vm13, %v15595_v9, %v15594_v42  ;;  %v5671_v50 = vadd.f32 %v5667_v11, %v5627_v47  ;;  %v15596_v1 = vld [vmem:[#allocation253_spill] sm:$0xff]  ;;  %v5472_v56 = vadd.f32 %v5468_v23, %v5384_v49  ;;  %v7062_v41 = vpack.c.bf16 %v5688_v7, %v5687_v19  ;;  %v13736_v26 = vpop.permute.xlu1 %5433  ;;  %v5690_v13 = vld [vmem:[#allocation27 + $0x78] sm:$0xff]  ;;  %v13762_v47 = vpop.permute.xlu0 %5637  ;;  %v15603_v7 = vld [vmem:[#allocation52_spill] sm:$0xff] }
 0x82f   :  { %v5272_v43 = vadd.f32 %v15596_v1, %v5183_v29  ;;  %v5416_v40 = vadd.f32 %v5412_v44, %v5348_v48  ;;  %v5552_v15 = vadd.f32 %v5548_v31, %v5460_v12  ;;  %v5580_v46 = vmul.f32 %v13560_v6, %v5572_v10  ;;  %v15597_v44 = vld [vmem:[#allocation223_spill] sm:$0xff]  ;;  %v15598_v12 = vld [vmem:[#allocation222_spill] sm:$0xff]  ;;  %v15599_v29 = vld [vmem:[#allocation189_spill] sm:$0xff]  ;;  %7061 = vmatpush3.bf16.msra.mxu0 %v7058_v32 }
 0x830   :  { %v5656_v42 = vmul.f32 %v13601_v24, %v5648_v3  ;;  %6669 = vmatprep.mubr.f32.mxu0 %v5671_v50  ;;  %v13740_v54 = vmul.f32 %v15519_v59, %v13457_v16  ;;  %v13744_v25 = vmul.f32 %v15367_v53, %v13463_v14  ;;  %v5317_v23 = vadd.f32 %v5313_v2, %v5249_v37  ;;  %v15600_v48 = vld [vmem:[#allocation186_spill] sm:$0xff] }
 0x831   :  { %v5436_v63 = vsel %vm5109_vm12, %v15598_v12, %v15597_v44  ;;  %v13752_v55 = vmul.f32 %v15367_v53, %v13509_v18  ;;  %v5217_v49 = vadd.f32 %v5213_v39, %v5120_v20  ;;  %v5141_v16 = vsel %vm2257_vm10, %v15600_v48, %v15599_v29  ;;  %v15601_v59 = vld [vmem:[#allocation46_spill] sm:$0xff]  ;;  %7063 = vmatprep.subr.bf16.mxu0 %v7062_v41  ;;  %v15613_v44 = vld [vmem:[#allocation279_spill] sm:$0xff]  ;;  %v15614_v12 = vld [vmem:[#allocation188_spill] sm:$0xff] }
 0x832   :  { %v15602_v31 = vld [vmem:[#allocation130_spill] sm:$0xff]  ;;  %v5218_v11 = vadd.f32 %v5214_v27, %v5121_v38  ;;  %v5360_v19 = vadd.f32 %v13239_v62, %v5272_v43  ;;  %v5504_v53 = vsel %vm5202_vm13, %v13325_v58, %v13562_v52  ;;  %v7066_v18 = vpack.c.bf16 %v5690_v13, %v5689_v4  ;;  %v13771_v3 = vpop.permute.xlu1 %5569  ;;  %v15604_v62 = vld [vmem:[#allocation261_spill] sm:$0xff]  ;;  %v15605_v38 = vld [vmem:[#allocation100_spill] sm:$0xff]  ;;  %v5492_v48 = vpop.permute.xlu0 %5491 }
 0x833   :  { %v5238_v14 = vsel %vm5109_vm12, %v15602_v31, %v15601_v59  ;;  %v5484_v37 = vadd.f32 %v15603_v7, %v5416_v40  ;;  %v5444_v2 = vmul.f32 %v13613_v33, %v5436_v63  ;;  %v5584_v10 = vadd.f32 %v5580_v46, %v5472_v56  ;;  %v15606_v52 = vld [vmem:[#allocation195_spill] sm:$0xff]  ;;  %v15608_v43 = vld [vmem:[#allocation98_spill] sm:$0xff]  ;;  %7065 = vmatpush3.bf16.msra.mxu0 %v7062_v41  ;;  %v7418_v13 = vld [vmem:[#allocation2 + $0x40] sm:$0xff] }
 0x834   :  { %v5660_v9 = vadd.f32 %v5656_v42, %v5552_v15  ;;  %v5149_v32 = vmul.f32 %v15495_v61, %v5141_v16  ;;  %v5246_v20 = vmul.f32 %v15497_v45, %v5238_v14  ;;  %v5385_v39 = vadd.f32 %v15604_v62, %v5317_v23  ;;  %v15607_v27 = vld [vmem:[#allocation139_spill] sm:$0xff]  ;;  %v15610_v15 = vld [vmem:[#allocation94_spill] sm:$0xff]  ;;  %7067 = vmatprep.subr.bf16.mxu0 %v7066_v18  ;;  %v15615_v63 = vld [vmem:[#allocation89_spill] sm:$0xff] }
 0x835   :  { %v5469_v50 = vmul.f32 %v13541_v22, %v15605_v38  ;;  %v5285_v58 = vadd.f32 %v13520_v30, %v5217_v49  ;;  %v5337_v1 = vsel %vm5109_vm12, %v15607_v27, %v15606_v52  ;;  %v5270_v56 = vmul.f32 %v15550_v35, %v15608_v43  ;;  %v15609_v45 = vld [vmem:[#allocation199_spill] sm:$0xff]  ;;  %v15612_v30 = vld [vmem:[#allocation237_spill] sm:$0xff]  ;;  %v15616_v59 = vld [vmem:[#allocation234_spill] sm:$0xff] }
 0x836   :  { %v5512_v40 = vmul.f32 %v13642_v28, %v5504_v53  ;;  %v5286_v61 = vadd.f32 %v13628_v0, %v5218_v11  ;;  %v5306_v46 = vsel %vm5202_vm13, %v15610_v15, %v15609_v45  ;;  %v15611_v42 = vld [vmem:[#allocation99_spill] sm:$0xff]  ;;  %v13794_v23 = vmul.f32 %v7418_v13, %v13483_v36  ;;  %v5610_v29 = vpop.permute.xlu1 %5609  ;;  %v15617_v7 = vld [vmem:[#allocation230_spill] sm:$0xff]  ;;  %v15624_v27 = vld [vmem:[#allocation220_spill] sm:$0xff] }
 0x837   :  { %v5369_v4 = vmul.f32 %v15612_v30, %v15611_v42  ;;  %v5596_v35 = vadd.f32 %v15613_v44, %v5484_v37  ;;  %v5176_v0 = vsel %vm2350_vm11, %v15615_v63, %v15614_v12  ;;  %v5448_v41 = vadd.f32 %v5444_v2, %v5360_v19  ;;  %v15618_v37 = vld [vmem:[#allocation231_spill] sm:$0xff]  ;;  %7069 = vmatpush3.bf16.msra.mxu0 %v7066_v18  ;;  %v15626_v45 = vld [vmem:[#allocation141_spill] sm:$0xff] }
 0x838   :  { %v5664_v49 = vadd.f32 %v5660_v9, %v5584_v10  ;;  %v5250_v16 = vadd.f32 %v5246_v20, %v5149_v32  ;;  %v5345_v31 = vmul.f32 %v15616_v59, %v5337_v1  ;;  %v5473_v14 = vadd.f32 %v5469_v50, %v5385_v39  ;;  %v15619_v9 = vld [vmem:[#allocation106_spill] sm:$0xff]  ;;  %v15620_v32 = vld [vmem:[#allocation71_spill] sm:$0xff]  ;;  %v15622_v39 = vld [vmem:[#allocation216_spill] sm:$0xff] }
 0x839   :  { %v5616_v11 = vsel %vm2350_vm11, %v13718_v17, %v5610_v29  ;;  %v5314_v53 = vmul.f32 %v15512_v34, %v5306_v46  ;;  %v5405_v62 = vsel %vm5202_vm13, %v15618_v37, %v15617_v7  ;;  %v5516_v38 = vadd.f32 %v5512_v40, %v5448_v41  ;;  %v15621_v17 = vld [vmem:[#allocation102_spill] sm:$0xff]  ;;  %v15623_v50 = vld [vmem:[#allocation217_spill] sm:$0xff]  ;;  %v15625_v1 = vld [vmem:[#allocation219_spill] sm:$0xff] }
 0x83a   :  { %v5624_v19 = vmul.f32 %v13680_v51, %v5616_v11  ;;  %v5184_v2 = vmul.f32 %v15542_v5, %v5176_v0  ;;  %v5373_v10 = vadd.f32 %v5369_v4, %v5285_v58  ;;  %v5541_v20 = vsel %vm5109_vm12, %v15620_v32, %v15619_v9  ;;  %v5646_v40 = vpop.permute.xlu1 %5645  ;;  %v15627_v42 = vld [vmem:[#allocation265_spill] sm:$0xff]  ;;  %v15629_v63 = vld [vmem:[#allocation263_spill] sm:$0xff]  ;;  %v15631_v11 = vld [vmem:[#allocation266_spill] sm:$0xff] }
 0x83b   :  { %v5370_v34 = vmul.f32 %v15612_v30, %v15621_v17  ;;  %v5177_v52 = vsel %vm2350_vm11, %v15623_v50, %v15622_v39  ;;  %v5338_v18 = vsel %vm5109_vm12, %v15625_v1, %v15624_v27  ;;  %v5668_v43 = vadd.f32 %v5664_v49, %v5596_v35  ;;  %v15628_v4 = vld [vmem:[#allocation101_spill] sm:$0xff]  ;;  %v5494_v49 = vpop.permute.xlu0 %5493  ;;  %v15632_v7 = vld [vmem:[#allocation271_spill] sm:$0xff]  ;;  %v15635_v37 = vld [vmem:[#allocation226_spill] sm:$0xff] }
 0x83c   :  { %v5628_v58 = vadd.f32 %v5624_v19, %v5516_v38  ;;  %v5349_v15 = vadd.f32 %v5345_v31, %v15626_v45  ;;  %v5413_v46 = vmul.f32 %v13252_v57, %v5405_v62  ;;  %v5649_v30 = vsel %vm5202_vm13, %v15627_v42, %v13716_v21  ;;  %v15630_v0 = vld [vmem:[#allocation221_spill] sm:$0xff]  ;;  %v15636_v38 = vld [vmem:[#allocation284_spill] sm:$0xff]  ;;  %v15637_v17 = vld [vmem:[#allocation155_spill] sm:$0xff] }
 0x83d   :  { %v5470_v13 = vmul.f32 %v13541_v22, %v15628_v4  ;;  %v5318_v44 = vadd.f32 %v5314_v53, %v5250_v16  ;;  %v5549_v12 = vmul.f32 %v13524_v8, %v5541_v20  ;;  %v5406_v35 = vsel %vm5202_vm13, %v15630_v0, %v15629_v63  ;;  %v15633_v22 = vld [vmem:[#allocation147_spill] sm:$0xff]  ;;  %v15634_v16 = vld [vmem:[#allocation132_spill] sm:$0xff]  ;;  %v15638_v39 = vld [vmem:[#allocation154_spill] sm:$0xff] }
 0x83e   :  { %v5672_v41 = vadd.f32 %v5668_v43, %v5628_v58  ;;  %v5185_v29 = vmul.f32 %v15542_v5, %v5177_v52  ;;  %v5346_v31 = vmul.f32 %v15616_v59, %v5338_v18  ;;  %v5542_v21 = vsel %vm5109_vm12, %v15632_v7, %v15631_v11  ;;  %v5500_v5 = vpop.permute.xlu1 %5499  ;;  %v15640_v18 = vld [vmem:[#allocation280_spill] sm:$0xff] }
 0x83f   :  { %v5573_v53 = vsel %vm2257_vm10, %v15634_v16, %v15633_v22  ;;  %v5273_v62 = vadd.f32 %v15635_v37, %v5184_v2  ;;  %v5461_v19 = vadd.f32 %v15636_v38, %v5373_v10  ;;  %v5374_v9 = vadd.f32 %v5370_v34, %v5286_v61  ;;  %v15639_v2 = vld [vmem:[#allocation241_spill] sm:$0xff]  ;;  %v5604_v42 = vpop.permute.xlu0 %5603 }
 0x840   :  { %v5657_v32 = vmul.f32 %v13601_v24, %v5649_v30  ;;  %6670 = vmatmul.mubr.f32.vlgmr.msra.gmra.mrb[22].mxu0 %v5672_v41  ;;  %v5417_v59 = vadd.f32 %v5413_v46, %v5349_v15  ;;  %v5414_v20 = vmul.f32 %v13252_v57, %v5406_v35  ;;  %v5437_v50 = vsel %vm5109_vm12, %v15638_v39, %v15637_v17  ;;  %v15641_v57 = vld [vmem:[#allocation127_spill] sm:$0xff]  ;;  %v15644_v35 = vld [vmem:[#allocation110_spill] sm:$0xff] }
 0x841   :  { %v5650_v52 = vsel %vm5202_vm13, %v13762_v47, %v5646_v40  ;;  %v5386_v27 = vadd.f32 %v15639_v2, %v5318_v44  ;;  %v5553_v10 = vadd.f32 %v5549_v12, %v5461_v19  ;;  %v5550_v61 = vmul.f32 %v13524_v8, %v5542_v21  ;;  %v15643_v12 = vld [vmem:[#allocation148_spill] sm:$0xff]  ;;  %v4364_v2 = vld [vmem:[#allocation12 + $0x8] sm:$0xff] }
 0x842   :  { %v5581_v34 = vmul.f32 %v13560_v6, %v5573_v53  ;;  %v5274_v1 = vadd.f32 %v5270_v56, %v5185_v29  ;;  %v5350_v43 = vadd.f32 %v5346_v31, %v15640_v18  ;;  %v5574_v58 = vsel %vm2257_vm10, %v13771_v3, %v15641_v57  ;;  %v5502_v46 = vpop.permute.xlu1 %5501  ;;  %v15642_v56 = vld [vmem:[#allocation273_spill] sm:$0xff]  ;;  %v7419_v53 = vld [vmem:[#allocation2 + $0x50] sm:$0xff]  ;;  %v4370_v57 = vld [vmem:[#allocation12 + $0x38] sm:$0xff] }
 0x843   :  { %v5505_v45 = vsel %vm5202_vm13, %v5492_v48, %v5500_v5  ;;  %v5462_v47 = vadd.f32 %v13740_v54, %v5374_v9  ;;  %v5445_v40 = vmul.f32 %v13613_v33, %v5437_v50  ;;  %v5661_v15 = vadd.f32 %v5657_v32, %v5553_v10  ;;  %v5606_v38 = vpop.permute.xlu0 %5605 }
 0x844   :  { %v5658_v8 = vmul.f32 %v13601_v24, %v5650_v52  ;;  %v5485_v30 = vadd.f32 %v15642_v56, %v5417_v59  ;;  %v5418_v4 = vadd.f32 %v5414_v20, %v5350_v43  ;;  %v5361_v44 = vadd.f32 %v13744_v25, %v5273_v62  ;;  %v15645_v24 = vld [vmem:[#allocation264_spill] sm:$0xff]  ;;  %v4369_v43 = vld [vmem:[#allocation12 + $0x30] sm:$0xff]  ;;  %v4376_v56 = vld [vmem:[#allocation12 + $0x68] sm:$0xff] }
 0x845   :  { %v5438_v3 = vsel %vm5109_vm12, %v13736_v26, %v15643_v12  ;;  %v5554_v48 = vadd.f32 %v5550_v61, %v5462_v47  ;;  %v5585_v63 = vadd.f32 %v5581_v34, %v5473_v14  ;;  %v5582_v54 = vmul.f32 %v13560_v6, %v5574_v58  ;;  %v4363_v52 = vld [vmem:[#allocation12] sm:$0xff]  ;;  %v4366_v61 = vld [vmem:[#allocation12 + $0x18] sm:$0xff]  ;;  %v4372_v47 = vld [vmem:[#allocation12 + $0x48] sm:$0xff] }
 0x846   :  { %v5513_v0 = vmul.f32 %v13642_v28, %v5505_v45  ;;  %v5482_v41 = vmul.f32 %v15645_v24, %v15644_v35  ;;  %v5362_v29 = vadd.f32 %v13752_v55, %v5274_v1  ;;  %v5474_v31 = vadd.f32 %v5470_v13, %v5386_v27  ;;  %v5612_v22 = vpop.permute.xlu1 %5611  ;;  %v4365_v27 = vld [vmem:[#allocation12 + $0x10] sm:$0xff]  ;;  %v4368_v1 = vld [vmem:[#allocation12 + $0x28] sm:$0xff]  ;;  %v4371_v45 = vld [vmem:[#allocation12 + $0x40] sm:$0xff] }
 0x847   :  { %v5506_v25 = vsel %vm5202_vm13, %v5494_v49, %v5502_v46  ;;  %v5449_v11 = vadd.f32 %v5445_v40, %v5361_v44  ;;  %v5665_v7 = vadd.f32 %v5661_v15, %v5585_v63  ;;  %v5446_v21 = vmul.f32 %v13613_v33, %v5438_v3  ;;  %v4373_v15 = vld [vmem:[#allocation12 + $0x50] sm:$0xff]  ;;  %v4378_v44 = vld [vmem:[#allocation12 + $0x78] sm:$0xff] }
 0x848   :  { %v5662_v26 = vadd.f32 %v5658_v8, %v5554_v48  ;;  %v5486_v14 = vadd.f32 %v5482_v41, %v5418_v4  ;;  %v5617_v6 = vsel %vm2350_vm11, %v5604_v42, %v5612_v22  ;;  %v5597_v16 = vadd.f32 %v13794_v23, %v5485_v30  ;;  %v4374_v8 = vld [vmem:[#allocation12 + $0x58] sm:$0xff]  ;;  %v4375_v42 = vld [vmem:[#allocation12 + $0x60] sm:$0xff]  ;;  %v4377_v4 = vld [vmem:[#allocation12 + $0x70] sm:$0xff] }
 0x849   :  { %v5594_v37 = vmul.f32 %v7419_v53, %v13483_v36  ;;  %v5586_v55 = vadd.f32 %v5582_v54, %v5474_v31  ;;  %v5517_v13 = vadd.f32 %v5513_v0, %v5449_v11  ;;  %v5514_v62 = vmul.f32 %v13642_v28, %v5506_v25 }
 0x84a   :  { %v5625_v49 = vmul.f32 %v13680_v51, %v5617_v6  ;;  %v5450_v19 = vadd.f32 %v5446_v21, %v5362_v29  ;;  %v5614_v32 = vpop.permute.xlu1 %5613  ;;  %v5669_v5 = vadd.f32 %v5665_v7, %v5597_v16  ;;  %v13896_v10 = vpack.c.bf16 %v4364_v2, %v4363_v52 }
 0x84b   :  { %v5666_v33 = vadd.f32 %v5662_v26, %v5586_v55  ;;  %v5618_v59 = vsel %vm2350_vm11, %v5606_v38, %v5614_v32  ;;  %v5598_v36 = vadd.f32 %v5594_v37, %v5486_v14  ;;  %v13899_v60 = vpack.c.bf16 %v4366_v61, %v4365_v27 }
 0x84c   :  { %v5629_v9 = vadd.f32 %v5625_v49, %v5517_v13  ;;  %v5518_v20 = vadd.f32 %v5514_v62, %v5450_v19  ;;  %v5626_v23 = vmul.f32 %v13680_v51, %v5618_v59  ;;  %6960 = vmatpush3.bf16.msra.mxu1 %v13896_v10  ;;  %v15646_v34 = vmov 0.0|0.0   ;;  %v4367_v51 = vld [vmem:[#allocation12 + $0x20] sm:$0xff] }
 0x84d   :  { %v5670_v50 = vadd.f32 %v5666_v33, %v5598_v36  ;;  %6961 = vmatprep.subr.bf16.mxu1 %v15646_v34  ;;  %v13903_v18 = vpack.c.bf16 %v4368_v1, %v4367_v51  ;;  %v13908_v58 = vpack.c.bf16 %v4370_v57, %v4369_v43  ;;  %v13912_v40 = vpack.c.bf16 %v4372_v47, %v4371_v45  ;;  %v7420_v1 = vld [vmem:[#allocation3 + $0x8] sm:$0xff] }
 0x84e   :  { %v5673_v17 = vadd.f32 %v5669_v5, %v5629_v9  ;;  %v5630_v39 = vadd.f32 %v5626_v23, %v5518_v20  ;;  %v13916_v46 = vpack.c.bf16 %v4374_v8, %v4373_v15  ;;  %v13919_v30 = vpack.c.bf16 %v4376_v56, %v4375_v42 }
 0x84f   :  { %v13924_v12 = vpack.c.bf16 %v4378_v44, %v4377_v4 }
 0x850   :  { %6672 = vmatprep.mubr.f32.mxu0 %v5673_v17  ;;  %v5674_v28 = vadd.f32 %v5670_v50, %v5630_v39  ;;  %6963 = vmatpush3.bf16.msra.mxu1 %v13899_v60 }
 0x851   :  { %6964 = vmatprep.subr.bf16.mxu1 %v15646_v34 }
 0x852   :  { %6673 = vmatmul.mubr.f32.gmra.mrb[24].mxu0 %v5674_v28 }
 0x854   :  { %6966 = vmatpush3.bf16.msra.mxu1 %v13903_v18 }
 0x855   :  { %6967 = vmatprep.subr.bf16.mxu1 %v15646_v34 }
 0x858   :  { %6969 = vmatpush3.bf16.msra.mxu1 %v13908_v58 }
 0x859   :  { %6970 = vmatprep.subr.bf16.mxu1 %v15646_v34 }
 0x85c   :  { %6972 = vmatpush3.bf16.msra.mxu1 %v13912_v40 }
 0x85d   :  { %6973 = vmatprep.subr.bf16.mxu1 %v15646_v34 }
 0x860   :  { %6975 = vmatpush3.bf16.msra.mxu1 %v13916_v46 }
 0x861   :  { %6976 = vmatprep.subr.bf16.mxu1 %v15646_v34 }
 0x864   :  { %6978 = vmatpush3.bf16.msra.mxu1 %v13919_v30 }
 0x865   :  { %6979 = vmatprep.subr.bf16.mxu1 %v15646_v34 }
 0x868   :  { %6981 = vmatpush3.bf16.msra.mxu1 %v13924_v12 }
 0x869   :  { %7014 = vmatprep.subr.bf16.mxu1 %v15646_v34 }
 0x8c9   :  { %v13928_v3 = vpop.f32.mrb[14].mxu0 }
 0x8ca   :  { %v4350_v48 = vmul.f32 %v13928_v3, %v13928_v3  ;;  %v13932_v63 = vpop.f32.mrb[15].mxu0 }
 0x8cb   :  { %v4340_v54 = vadd.f32 %v13928_v3, %v13932_v63  ;;  %v4349_v0 = vmul.f32 %v13932_v63, %v13932_v63 }
 0x8cd   :  { %v4353_v35 = vadd.f32 %v4350_v48, %v4349_v0 }
 0x8e5   :  { %v13938_v24 = vpop.f32.mrb[16].mxu0 }
 0x8e6   :  { %v13940_v41 = vpop.f32.mrb[17].mxu0  ;;  %v4352_v25 = vmul.f32 %v13938_v24, %v13938_v24 }
 0x8e7   :  { %v4341_v29 = vadd.f32 %v4340_v54, %v13940_v41  ;;  %v4351_v31 = vmul.f32 %v13940_v41, %v13940_v41 }
 0x8e9   :  { %v4342_v11 = vadd.f32 %v13938_v24, %v4341_v29  ;;  %v4354_v7 = vadd.f32 %v4353_v35, %v4351_v31 }
 0x8eb   :  { %v4343_v21 = vrot.slane %v4342_v11, 4  ;;  %v4355_v26 = vadd.f32 %v4354_v7, %v4352_v25  ;;  %v13948_v6 = vpop.f32.mrb[18].mxu0 }
 0x8ec   :  { %v4962_v37 = vmul.f32 %v13948_v6, %v13948_v6  ;;  %v13952_v55 = vpop.f32.mrb[19].mxu0 }
 0x8ed   :  { %v4344_v22 = vadd.f32 %v4343_v21, %v4342_v11  ;;  %v4356_v14 = vrot.slane %v4355_v26, 4  ;;  %v4952_v13 = vadd.f32 %v13948_v6, %v13952_v55  ;;  %v4961_v62 = vmul.f32 %v13952_v55, %v13952_v55 }
 0x8ef   :  { %v4345_v16 = vrot.slane %v4344_v22, 2  ;;  %v4357_v53 = vadd.f32 %v4356_v14, %v4355_v26  ;;  %v4965_v19 = vadd.f32 %v4962_v37, %v4961_v62 }
 0x8f1   :  { %v4346_v49 = vadd.f32 %v4345_v16, %v4344_v22  ;;  %v4358_v38 = vrot.slane %v4357_v53, 2  ;;  %v13958_v33 = vpop.f32.mrb[20].mxu0 }
 0x8f2   :  { %v13960_v9 = vpop.f32.mrb[21].mxu0  ;;  %v4964_v17 = vmul.f32 %v13958_v33, %v13958_v33 }
 0x8f3   :  { %v4347_v32 = vrot.slane %v4346_v49, 1  ;;  %v4359_v5 = vadd.f32 %v4358_v38, %v4357_v53  ;;  %v4953_v59 = vadd.f32 %v4952_v13, %v13960_v9  ;;  %v4963_v20 = vmul.f32 %v13960_v9, %v13960_v9 }
 0x8f5   :  { %v4360_v23 = vrot.slane %v4359_v5, 1  ;;  %v4954_v36 = vadd.f32 %v13958_v33, %v4953_v59  ;;  %v4966_v39 = vadd.f32 %v4965_v19, %v4963_v20  ;;  %v4348_v50 = vadd.f32 %v4347_v32, %v4346_v49 }
 0x8f7   :  { %v4361_v28 = vadd.f32 %v4360_v23, %v4359_v5  ;;  %v4955_v52 = vrot.slane %v4954_v36, 4  ;;  %v4967_v2 = vadd.f32 %v4966_v39, %v4964_v17 }
 0x8f9   :  { %v4362_v27 = vsel %vm743_vm4, %v4348_v50, %v4361_v28  ;;  %v4956_v61 = vadd.f32 %v4955_v52, %v4954_v36  ;;  %v4968_v51 = vrot.slane %v4967_v2, 4  ;;  %v15647_v28 = vld [vmem:[#allocation77_spill] sm:$0xff] }
 0x8fa   :  { %6562 = vmatmul.mubr.f32.vlgmr.msra.gmra.mrb[8].mxu1 %v4362_v27 }
 0x8fb   :  { %7016 = vmatpush3.bf16.msra.mxu1 %v13896_v10  ;;  %6634 = vmatprep.mubr.msk.f32.mxu1 %vm7803_vm3, %v7420_v1  ;;  %v4957_v43 = vrot.slane %v4956_v61, 2  ;;  %v4969_v57 = vadd.f32 %v4968_v51, %v4967_v2 }
 0x8fc   :  { %7017 = vmatprep.subr.bf16.mxu1 %v15646_v34 }
 0x8fd   :  { %v4958_v45 = vadd.f32 %v4957_v43, %v4956_v61  ;;  %v4970_v47 = vrot.slane %v4969_v57, 2  ;;  %v15648_v43 = vld [vmem:[#allocation76_spill] sm:$0xff] }
 0x8ff   :  { %7019 = vmatpush3.bf16.msra.mxu1 %v13899_v60  ;;  %v4959_v15 = vrot.slane %v4958_v45, 1  ;;  %v4971_v8 = vadd.f32 %v4970_v47, %v4969_v57 }
 0x900   :  { %7020 = vmatprep.subr.bf16.mxu1 %v15646_v34 }
 0x901   :  { %v4972_v42 = vrot.slane %v4971_v8, 1  ;;  %v4960_v56 = vadd.f32 %v4959_v15, %v4958_v45 }
 0x903   :  { %7022 = vmatpush3.bf16.msra.mxu1 %v13903_v18  ;;  %v4973_v4 = vadd.f32 %v4972_v42, %v4971_v8 }
 0x904   :  { %7023 = vmatprep.subr.bf16.mxu1 %v15646_v34 }
 0x905   :  { %v4974_v44 = vsel %vm743_vm4, %v4960_v56, %v4973_v4 }
 0x907   :  { %7025 = vmatpush3.bf16.msra.mxu1 %v13908_v58 }
 0x908   :  { %7026 = vmatprep.subr.bf16.mxu1 %v15646_v34 }
 0x90b   :  { %7028 = vmatpush3.bf16.msra.mxu1 %v13912_v40 }
 0x90c   :  { %7029 = vmatprep.subr.bf16.mxu1 %v15646_v34 }
 0x90f   :  { %7031 = vmatpush3.bf16.msra.mxu1 %v13916_v46 }
 0x910   :  { %7032 = vmatprep.subr.bf16.mxu1 %v15646_v34 }
 0x913   :  { %v13983_v48 = vpop.f32.mrb[22].mxu0  ;;  %7034 = vmatpush3.bf16.msra.mxu1 %v13919_v30 }
 0x914   :  { %v5786_v54 = vmul.f32 %v13983_v48, %v13983_v48  ;;  %v13987_v0 = vpop.f32.mrb[23].mxu0  ;;  %7035 = vmatprep.subr.bf16.mxu1 %v15646_v34 }
 0x915   :  { %v5776_v35 = vadd.f32 %v13983_v48, %v13987_v0  ;;  %v5785_v29 = vmul.f32 %v13987_v0, %v13987_v0 }
 0x917   :  { %v5789_v31 = vadd.f32 %v5786_v54, %v5785_v29  ;;  %7037 = vmatpush3.bf16.msra.mxu1 %v13924_v12 }
 0x918   :  { %7070 = vmatprep.subr.bf16.mxu1 %v15646_v34 }
 0x91a   :  { %6635 = vmatmul.mubr.f32.vlgmr.msra.gmra.mrb[10].mxu1 %v4974_v44  ;;  %v15649_v44 = vld [vmem:[#allocation176_spill] sm:$0xff] }
 0x91b   :  { %7072 = vmatpush3.bf16.msra.mxu1 %v13896_v10  ;;  %6707 = vmatprep.mubr.msk.f32.mxu1 %vm7803_vm3, %v7420_v1 }
 0x91c   :  { %7073 = vmatprep.subr.bf16.mxu1 %v15646_v34 }
 0x91f   :  { %7075 = vmatpush3.bf16.msra.mxu1 %v13899_v60 }
 0x920   :  { %7076 = vmatprep.subr.bf16.mxu1 %v15646_v34 }
 0x923   :  { %7078 = vmatpush3.bf16.msra.mxu1 %v13903_v18 }
 0x924   :  { %7079 = vmatprep.subr.bf16.mxu1 %v15646_v34 }
 0x925   :  { %v14004_v25 = vpop.f32.mrb[24].mxu0 }
 0x926   :  { %v14006_v11 = vpop.f32.mrb[25].mxu0  ;;  %v5788_v60 = vmul.f32 %v14004_v25, %v14004_v25 }
 0x927   :  { %v5777_v7 = vadd.f32 %v5776_v35, %v14006_v11  ;;  %v5787_v10 = vmul.f32 %v14006_v11, %v14006_v11  ;;  %7081 = vmatpush3.bf16.msra.mxu1 %v13908_v58  ;;  %v15650_v35 = vld [vmem:[#allocation202_spill] sm:$0xff] }
 0x928   :  { %7082 = vmatprep.subr.bf16.mxu1 %v15646_v34 }
 0x929   :  { %v5778_v18 = vadd.f32 %v14004_v25, %v5777_v7  ;;  %v5790_v21 = vadd.f32 %v5789_v31, %v5787_v10 }
 0x92b   :  { %v5779_v26 = vrot.slane %v5778_v18, 4  ;;  %v5791_v22 = vadd.f32 %v5790_v21, %v5788_v60  ;;  %7084 = vmatpush3.bf16.msra.mxu1 %v13912_v40  ;;  %v5054_v21 = vstv %s5942_s22 }
 0x92c   :  { %7085 = vmatprep.subr.bf16.mxu1 %v15646_v34 }
 0x92d   :  { %v5780_v14 = vadd.f32 %v5779_v26, %v5778_v18  ;;  %v5792_v16 = vrot.slane %v5791_v22, 4 }
 0x92f   :  { %v5781_v53 = vrot.slane %v5780_v14, 2  ;;  %v5793_v37 = vadd.f32 %v5792_v16, %v5791_v22  ;;  %7087 = vmatpush3.bf16.msra.mxu1 %v13916_v46 }
 0x930   :  { %7088 = vmatprep.subr.bf16.mxu1 %v15646_v34 }
 0x931   :  { %v5782_v58 = vadd.f32 %v5781_v53, %v5780_v14  ;;  %v5794_v13 = vrot.slane %v5793_v37, 2 }
 0x933   :  { %v5783_v62 = vrot.slane %v5782_v58, 1  ;;  %v5795_v49 = vadd.f32 %v5794_v13, %v5793_v37  ;;  %7090 = vmatpush3.bf16.msra.mxu1 %v13919_v30  ;;  %v4458_v30 = vstv %s5939_s13 }
 0x934   :  { %7091 = vmatprep.subr.bf16.mxu1 %v15646_v34 }
 0x935   :  { %v5796_v38 = vrot.slane %v5795_v49, 1  ;;  %v5784_v40 = vadd.f32 %v5783_v62, %v5782_v58 }
 0x937   :  { %7093 = vmatpush3.bf16.msra.mxu1 %v13924_v12  ;;  %v5797_v19 = vadd.f32 %v5796_v38, %v5795_v49 }
 0x939   :  { %v5798_v32 = vsel %vm743_vm4, %v5784_v40, %v5797_v19 }
 0x93a   :  { %6708 = vmatmul.mubr.f32.vlgmr.msra.gmra.mrb[12].mxu1 %v5798_v32 }
 0x9cd   :  { %v4445_v5 = vpop.f32.mrb[8].mxu1 }
 0x9ce   :  { %v4449_v46 = vmul.f32 0.001953125, %v4445_v5  ;;  %v6563_v59 = vpop.f32.mrb[9].mxu1 }
 0x9d0   :  { %v4450_v20 = vmul.f32 %v4449_v46, %v4449_v46 }
 0x9d2   :  { %v4452_v23 = vrot.slane %v4450_v20, 7 }
 0x9d4   :  { %v4454_v17 = vsub.f32 %v4449_v46, %v4452_v23 }
 0x9d6   :  { %v4455_v36 = vmax.f32 %v4454_v17, 0.0 }
 0x9d8   :  { %v4456_v39 = vadd.f32 1e-05, %v4455_v36 }
 0x9da   :  { %7391 = vrsqrt.f32 %v4456_v39 }
 0x9e4   :  { %v7392_v34 = vpop.eup %7391 }
 0x9e5   :  { %v4459_v50 = vmul.f32 %v7392_v34, %v4458_v30 }
 0x9e7   :  { %v4463_v12 = vrot.slane %v4459_v50, %v15647_v28  ;;  %v4469_v52 = vrot.slane %v4459_v50, 1 }
 0x9e9   :  { %v4471_v2 = vmul.f32 %v4469_v52, %v4449_v46  ;;  %v4464_v27 = vmul.f32 %v4463_v12, %v13932_v63  ;;  %v4465_v61 = vmul.f32 %v13928_v3, %v4463_v12  ;;  %v4466_v51 = vmul.f32 %v4463_v12, %v13940_v41  ;;  %v15651_v63 = vld [vmem:[#allocation184_spill] sm:$0xff]  ;;  %v15652_v3 = vld [vmem:[#allocation178_spill] sm:$0xff] }
 0x9ea   :  { %v4467_v1 = vmul.f32 %v13938_v24, %v4463_v12 }
 0x9eb   :  { %v4475_v57 = vrot.slane %v4471_v2, %v15648_v43 }
 0x9ed   :  { %v5041_v45 = vpop.f32.mrb[10].mxu1  ;;  %v4476_v47 = vsub.f32 %v4464_v27, %v4475_v57  ;;  %v4477_v15 = vsub.f32 %v4465_v61, %v4475_v57  ;;  %v4478_v8 = vsub.f32 %v4466_v51, %v4475_v57  ;;  %v4479_v42 = vsub.f32 %v4467_v1, %v4475_v57 }
 0x9ee   :  { %v5045_v56 = vmul.f32 0.001953125, %v5041_v45  ;;  %v6636_v4 = vpop.f32.mrb[11].mxu1 }
 0x9ef   :  { %v4480_v54 = vadd.f32 %v4476_v47, %v15649_v44  ;;  %v4481_v29 = vadd.f32 %v4477_v15, %v15650_v35  ;;  %v4482_v31 = vadd.f32 %v4478_v8, %v15651_v63  ;;  %v4483_v7 = vadd.f32 %v4479_v42, %v15652_v3 }
 0x9f0   :  { %v5046_v41 = vmul.f32 %v5045_v56, %v5045_v56 }
 0x9f2   :  { %v5048_v10 = vrot.slane %v5046_v41, 7 }
 0x9f4   :  { %v5050_v24 = vsub.f32 %v5045_v56, %v5048_v10 }
 0x9f6   :  { %v5051_v60 = vmax.f32 %v5050_v24, 0.0 }
 0x9f8   :  { %v5052_v18 = vadd.f32 1e-05, %v5051_v60 }
 0x9fa   :  { %7393 = vrsqrt.f32 %v5052_v18 }
 0xa04   :  { %v7394_v26 = vpop.eup %7393 }
 0xa05   :  { %v5055_v22 = vmul.f32 %v7394_v26, %v5054_v21 }
 0xa07   :  { %v5059_v14 = vrot.slane %v5055_v22, %v15647_v28  ;;  %v5065_v16 = vrot.slane %v5055_v22, 1 }
 0xa09   :  { %v5067_v53 = vmul.f32 %v5065_v16, %v5045_v56  ;;  %v5060_v37 = vmul.f32 %v5059_v14, %v13952_v55  ;;  %v5061_v58 = vmul.f32 %v13948_v6, %v5059_v14  ;;  %v5062_v13 = vmul.f32 %v5059_v14, %v13960_v9 }
 0xa0a   :  { %v5063_v62 = vmul.f32 %v13958_v33, %v5059_v14  ;;  %v5878_v33 = vstv %s5944_s5 }
 0xa0b   :  { %v5071_v49 = vrot.slane %v5067_v53, %v15648_v43 }
 0xa0d   :  { %v5865_v38 = vpop.f32.mrb[12].mxu1  ;;  %v5072_v40 = vsub.f32 %v5060_v37, %v5071_v49  ;;  %v5073_v19 = vsub.f32 %v5061_v58, %v5071_v49  ;;  %v5074_v32 = vsub.f32 %v5062_v13, %v5071_v49  ;;  %v5075_v5 = vsub.f32 %v5063_v62, %v5071_v49 }
 0xa0e   :  { %v5869_v46 = vmul.f32 0.001953125, %v5865_v38  ;;  %v6709_v59 = vpop.f32.mrb[13].mxu1 }
 0xa0f   :  { %v5076_v20 = vadd.f32 %v5072_v40, %v4480_v54  ;;  %v5077_v23 = vadd.f32 %v5073_v19, %v4481_v29  ;;  %v5078_v17 = vadd.f32 %v5074_v32, %v4482_v31  ;;  %v5079_v36 = vadd.f32 %v5075_v5, %v4483_v7 }
 0xa10   :  { %v5870_v55 = vmul.f32 %v5869_v46, %v5869_v46 }
 0xa12   :  { %v5872_v39 = vrot.slane %v5870_v55, 7 }
 0xa14   :  { %v5874_v6 = vsub.f32 %v5869_v46, %v5872_v39 }
 0xa16   :  { %v5875_v30 = vmax.f32 %v5874_v6, 0.0 }
 0xa18   :  { %v5876_v9 = vadd.f32 1e-05, %v5875_v30 }
 0xa1a   :  { %7395 = vrsqrt.f32 %v5876_v9 }
 0xa24   :  { %v7396_v34 = vpop.eup %7395 }
 0xa25   :  { %v5879_v50 = vmul.f32 %v7396_v34, %v5878_v33 }
 0xa27   :  { %v5883_v12 = vrot.slane %v5879_v50, %v15647_v28  ;;  %v5889_v52 = vrot.slane %v5879_v50, 1 }
 0xa29   :  { %v5891_v2 = vmul.f32 %v5889_v52, %v5869_v46  ;;  %v5884_v27 = vmul.f32 %v5883_v12, %v13987_v0  ;;  %v5885_v61 = vmul.f32 %v13983_v48, %v5883_v12  ;;  %v5886_v51 = vmul.f32 %v5883_v12, %v14006_v11 }
 0xa2a   :  { %v5887_v1 = vmul.f32 %v14004_v25, %v5883_v12 }
 0xa2b   :  { %v5895_v57 = vrot.slane %v5891_v2, %v15648_v43 }
 0xa2d   :  { %v5896_v45 = vsub.f32 %v5884_v27, %v5895_v57  ;;  %v5897_v47 = vsub.f32 %v5885_v61, %v5895_v57  ;;  %v5898_v15 = vsub.f32 %v5886_v51, %v5895_v57  ;;  %v5899_v8 = vsub.f32 %v5887_v1, %v5895_v57 }
 0xa2f   :  { %v5900_v42 = vadd.f32 %v5896_v45, %v5076_v20  ;;  %v5901_v28 = vadd.f32 %v5897_v47, %v5077_v23  ;;  %v5902_v56 = vadd.f32 %v5898_v15, %v5078_v17  ;;  %v5903_v4 = vadd.f32 %v5899_v8, %v5079_v36 }
 0xa31   :  { %5904 = vst [vmem:[#allocation29] sm:$0xff] %v5900_v42  ;;  %5905 = vst [vmem:[#allocation29 + $0x8] sm:$0xff] %v5901_v28 }
 0xa32   :  { %5906 = vst [vmem:[#allocation29 + $0x10] sm:$0xff] %v5902_v56  ;;  %5907 = vst [vmem:[#allocation29 + $0x18] sm:$0xff] %v5903_v4 }
 0xa33   :  { %7750 = shalt.err (!%p7747_p7)
}
 0xa34   :  { %s15653_s10 = sld [smem:[#allocation287_spill]] }
 0xa3a   :  { %s7751_s4 = scalar_lea.hbm %s15653_s10, 512 }
 0xa3b   :  { %p7752_p8 = scmp.ne.s32.totalorder %s15653_s10, %s7751_s4  ;;  %p7755_p9 = scmp.lt.u32.totalorder %s7751_s4, %s15653_s10 }
 0xa3d   :  { %p7757_p10 = pnand %p7755_p9, %p7752_p8 }
 0xa3f   :  { %7760 = shalt.err (!%p7757_p10)
}
 0xa40   :  { %5919 = dma.vmem_to_hbm [thread:$0]  %s5914_s21, 512, %s15653_s10, [#allocation6], %s7782_s1, %s7782_s1, %s7783_s20  }
 0xa41   :  { %7779 = dma.done.wait [#allocation6], 512  }
 0xa42   :  { %7780 = vsyncadd [#allocation6], 4294966784 }
 0xa43   :  { %5923 = vsyncpa [#allocation5], 1 }
 0xa44   :  { %5924 = vsyncpa [#allocation10], 1 }
 0xa45   :  { %5925 = vsyncpa [#allocation13], 1 }
 0xa46   :  { %5926 = vsyncpa [#allocation16], 1 }
 0xa47   :  { %5927 = vsyncpa [#allocation19], 1 }
 0xa48   :  { %5928 = vsyncpa [#allocation22], 1 }
 0xa49   :  { %5929 = vsyncpa [#allocation25], 1 }
 0xa4a   :  { %5930 = vsyncpa [#allocation28], 1 }
 0xa4b   :  { %5931 = vsyncpa [#allocation6], 1 }
 0xa4c   :  { %5932 = vsyncpa [#allocation7], 1 }

</bundles_post_ra>
